<compile_context>
chip_gen: v6e
topology: v6e:2x2x1
jax: 0.10.0
libtpu: 0.0.40
codegen_flags: <defaults>
</compile_context>

<pallas_src>
import functools

import jax
import jax.numpy as jnp
from jax.experimental import pallas as pl
from jax.experimental.pallas import tpu as pltpu


# ----------------------------- Pallas kernels ------------------------------

def _matmul_bias_act_kernel(a_ref, w_ref, b_ref, o_ref, acc_ref, *, relu):
    """Tiled  acc += A_tile @ W_tile ; epilogue: +bias (BN folded), optional ReLU."""
    @pl.when(pl.program_id(2) == 0)
    def _():
        acc_ref[...] = jnp.zeros_like(acc_ref)

    acc_ref[...] += jnp.dot(a_ref[...], w_ref[...],
                            preferred_element_type=jnp.float32)

    @pl.when(pl.program_id(2) == pl.num_programs(2) - 1)
    def _():
        y = acc_ref[...] + b_ref[...]
        if relu:
            y = jnp.maximum(y, 0.0)
        o_ref[...] = y.astype(o_ref.dtype)


def _matmul_bias_add_relu_kernel(a_ref, w_ref, b_ref, id_ref, o_ref, acc_ref):
    """Same, with the residual identity fused into the epilogue: relu(acc+b+id)."""
    @pl.when(pl.program_id(2) == 0)
    def _():
        acc_ref[...] = jnp.zeros_like(acc_ref)

    acc_ref[...] += jnp.dot(a_ref[...], w_ref[...],
                            preferred_element_type=jnp.float32)

    @pl.when(pl.program_id(2) == pl.num_programs(2) - 1)
    def _():
        y = acc_ref[...] + b_ref[...] + id_ref[...].astype(jnp.float32)
        o_ref[...] = jnp.maximum(y, 0.0).astype(o_ref.dtype)


# --------------------------- tiled matmul wrapper ---------------------------

def _round_up(x, m):
    return (x + m - 1) // m * m


def _pad2d(x, mp, np_):
    m, n = x.shape
    if m == mp and n == np_:
        return x
    return jnp.pad(x, ((0, mp - m), (0, np_ - n)))


def fused_matmul_bn_act(a, w, bias, *, identity=None, relu=True,
                        out_dtype=jnp.bfloat16):
    """out = act((a @ w) + bias [+ identity]); bf16 MXU inputs, f32 accumulation."""
    m, k = a.shape
    _, n = w.shape

    # Tile selection (per-layer): keep every block (8,128)-legal via padding / full
    # extents, and small enough that 2x double-buffered tiles fit the scoped VMEM
    # default on every generation (v5e/v6e/v7x).
    tm = 256 if m >= 256 else _round_up(m, 8)
    mp = _round_up(m, tm)
    kp = _round_up(k, 128)
    tk = 256 if (kp >= 256 and kp % 256 == 0) else 128
    if n >= 256:
        tn = 256
    elif n >= 128:
        tn = 128
    else:
        tn = n                      # sub-128 Cout only ever as the full extent
    np_ = _round_up(n, tn)

    a_p = _pad2d(a.astype(jnp.bfloat16), mp, kp)
    w_p = _pad2d(w.astype(jnp.bfloat16), kp, np_)
    b_p = _pad2d(bias.astype(jnp.float32), 1, np_)

    grid = (mp // tm, np_ // tn, kp // tk)

    in_specs = [
        pl.BlockSpec((tm, tk), lambda i, j, kk: (i, kk)),
        pl.BlockSpec((tk, tn), lambda i, j, kk: (kk, j)),
        pl.BlockSpec((1, tn), lambda i, j, kk: (0, j)),
    ]
    operands = [a_p, w_p, b_p]
    bytes_accessed = (mp * kp + kp * np_ + mp * np_) * 2 + np_ * 4

    if identity is not None:
        id_p = _pad2d(identity.astype(jnp.bfloat16), mp, np_)
        in_specs.append(pl.BlockSpec((tm, tn), lambda i, j, kk: (i, j)))
        operands.append(id_p)
        bytes_accessed += mp * np_ * 2
        kern = _matmul_bias_add_relu_kernel
    else:
        kern = functools.partial(_matmul_bias_act_kernel, relu=relu)

    out = pl.pallas_call(
        kern,
        out_shape=jax.ShapeDtypeStruct((mp, np_), out_dtype),
        grid_spec=pltpu.PrefetchScalarGridSpec(
            num_scalar_prefetch=0,
            grid=grid,
            in_specs=in_specs,
            out_specs=pl.BlockSpec((tm, tn), lambda i, j, kk: (i, j)),
            scratch_shapes=[pltpu.VMEM((tm, tn), jnp.float32)],
        ),
        compiler_params=pltpu.CompilerParams(
            dimension_semantics=("parallel", "parallel", "arbitrary")),
        cost_estimate=pl.CostEstimate(
            flops=2 * mp * np_ * kp,
            transcendentals=0,
            bytes_accessed=bytes_accessed),
    )(*operands)
    return out[:m, :n]


# ------------------------------ glue (JAX) ---------------------------------

def im2col(x, k, stride, pad):
    """x: NHWC -> (N*Ho*Wo, k*k*C) patches, patch element order (ki, kj, c)."""
    n, h, w, c = x.shape
    xp = jnp.pad(x, ((0, 0), (pad, pad), (pad, pad), (0, 0)))
    ho = (h + 2 * pad - k) // stride + 1
    wo = (w + 2 * pad - k) // stride + 1
    cols = []
    for i in range(k):
        for j in range(k):
            cols.append(xp[:, i:i + stride * ho:stride, j:j + stride * wo:stride, :])
    patches = jnp.stack(cols, axis=3)                      # (N, Ho, Wo, k*k, C)
    return patches.reshape(n * ho * wo, k * k * c), n, ho, wo


def max_pool_3x3_s2(x):
    # TODO(synk): pooling kept as XLA reduce_window glue (no dedicated Pallas kernel).
    return jax.lax.reduce_window(
        x, jnp.array(-jnp.inf, x.dtype), jax.lax.max,
        (1, 3, 3, 1), (1, 2, 2, 1), ((0, 0), (1, 1), (1, 1), (0, 0)))


def basic_block(x, p, stride):
    n, h, w_, cin = x.shape
    cout = p['w1'].shape[1]

    # conv1 (3x3, stride s) + folded-BN + ReLU
    patches, _, ho, wo = im2col(x, 3, stride, 1)
    out = fused_matmul_bn_act(patches, p['w1'], p['b1'], relu=True)
    out = out.reshape(n, ho, wo, cout)

    # identity path (optionally 1x1 downsample conv + folded-BN)
    if 'wd' in p:
        xs = x[:, ::stride, ::stride, :] if stride > 1 else x
        idm = fused_matmul_bn_act(xs.reshape(n * ho * wo, cin),
                                  p['wd'], p['bd'], relu=False)
    else:
        idm = x.reshape(n * h * w_, cin)

    # conv2 (3x3, stride 1) + folded-BN + fused residual-add + ReLU
    patches2, _, _, _ = im2col(out, 3, 1, 1)
    y = fused_matmul_bn_act(patches2, p['w2'], p['b2'], identity=idm, relu=True)
    return y.reshape(n, ho, wo, cout)


def block_configs():
    cfgs = []
    in_c = 64
    for out_c, n_blocks, stride in [(64, 3, 1), (128, 4, 2), (256, 6, 2), (512, 3, 2)]:
        for b in range(n_blocks):
            cfgs.append((in_c, out_c, stride if b == 0 else 1))
            in_c = out_c
    return cfgs


def resnet34_forward(params, x_nchw):
    # Eval branch of PipelineModel.forward: self.detector(x); self.training is False.
    x = jnp.transpose(x_nchw, (0, 2, 3, 1)).astype(jnp.bfloat16)   # NCHW -> NHWC bf16

    patches, n, ho, wo = im2col(x, 7, 2, 3)
    x = fused_matmul_bn_act(patches, params['conv1_w'], params['conv1_b'], relu=True)
    x = x.reshape(n, ho, wo, 64)
    x = max_pool_3x3_s2(x)

    for p, (_, _, stride) in zip(params['blocks'], block_configs()):
        x = basic_block(x, p, stride)

    pooled = jnp.mean(x.astype(jnp.float32), axis=(1, 2))           # global avg pool
    logits = fused_matmul_bn_act(pooled, params['fc_w'], params['fc_b'],
                                 relu=False, out_dtype=jnp.float32)
    return logits                                                    # (N, num_classes)


# --------------------------- deterministic init ----------------------------

def _conv_bn_params(key, cin, cout, k):
    """Random conv weight + eval-mode BN, with BN scale folded into the weight."""
    kw, kg, kb, km, kv = jax.random.split(key, 5)
    fan_in = k * k * cin
    w = jax.random.normal(kw, (fan_in, cout), jnp.float32) * jnp.sqrt(2.0 / fan_in)
    gamma = 1.0 + 0.1 * jax.random.normal(kg, (cout,), jnp.float32)
    beta = 0.1 * jax.random.normal(kb, (cout,), jnp.float32)
    mean = 0.1 * jax.random.normal(km, (cout,), jnp.float32)
    var = jax.random.uniform(kv, (cout,), jnp.float32, minval=0.5, maxval=1.5)
    scale = gamma / jnp.sqrt(var + 1e-5)
    w_folded = (w * scale[None, :]).astype(jnp.bfloat16)     # BN scale folded into W
    bias = (beta - mean * scale).reshape(1, cout).astype(jnp.float32)
    return w_folded, bias


def init_params(key, num_classes):
    params = {}
    key, k1 = jax.random.split(key)
    params['conv1_w'], params['conv1_b'] = _conv_bn_params(k1, 3, 64, 7)

    blocks = []
    for in_c, out_c, stride in block_configs():
        key, k1, k2 = jax.random.split(key, 3)
        p = {}
        p['w1'], p['b1'] = _conv_bn_params(k1, in_c, out_c, 3)
        p['w2'], p['b2'] = _conv_bn_params(k2, out_c, out_c, 3)
        if stride != 1 or in_c != out_c:
            key, k3 = jax.random.split(key)
            p['wd'], p['bd'] = _conv_bn_params(k3, in_c, out_c, 1)
        blocks.append(p)
    params['blocks'] = blocks

    key, k1, k2 = jax.random.split(key, 3)
    params['fc_w'] = (jax.random.normal(k1, (512, num_classes), jnp.float32)
                      * jnp.sqrt(1.0 / 512)).astype(jnp.bfloat16)
    params['fc_b'] = 0.01 * jax.random.normal(k2, (1, num_classes), jnp.float32)
    return params


# --------------------------------- main ------------------------------------

if __name__ == "__main__":
    num_classes = 10
    key = jax.random.PRNGKey(0)
    kp, kx = jax.random.split(key)
    params = init_params(kp, num_classes)
    x_nchw = jax.random.normal(kx, (2, 3, 32, 32), jnp.float32)   # PyTorch NCHW input

    fwd = jax.jit(resnet34_forward)
    logits = fwd(params, x_nchw)
    jax.block_until_ready(logits)

    assert logits.shape == (2, num_classes)
    assert bool(jnp.all(jnp.isfinite(logits)))
    print("KERNEL_OK")
</pallas_src>

<mosaic_0001>
module attributes {stable_mosaic.version = 11 : i64} {
  func.func @_matmul_bias_act_kernel(%arg0: i32, %arg1: i32, %arg2: i32, %arg3: memref<256x256xbf16, #tpu.memory_space<vmem>>, %arg4: memref<256x64xbf16, #tpu.memory_space<vmem>>, %arg5: memref<1x64xf32, #tpu.memory_space<vmem>>, %arg6: memref<256x64xbf16, #tpu.memory_space<vmem>>, %arg7: memref<256x64xf32, #tpu.memory_space<vmem>>) attributes {dimension_semantics = [#tpu.dimension_semantics<parallel>, #tpu.dimension_semantics<parallel>, #tpu.dimension_semantics<arbitrary>], iteration_bounds = array<i64: 2, 1, 1>, scalar_prefetch = 0 : i64, scratch_operands = 1 : i64, tpu.core_type = #tpu.core_type<tc>, window_params = [{transform_indices = @transform_0, window_bounds = array<i64: 256, 256>}, {transform_indices = @transform_1, window_bounds = array<i64: 256, 64>}, {transform_indices = @transform_2, window_bounds = array<i64: 1, 64>}, {transform_indices = @transform_3, window_bounds = array<i64: 256, 64>}]} {
    %c0_i32 = arith.constant 0 : i32
    %0 = arith.cmpi eq, %arg2, %c0_i32 : i32
    %1 = arith.extui %0 : i1 to i32
    %c0_i32_0 = arith.constant 0 : i32
    %2 = arith.cmpi ne, %1, %c0_i32_0 : i32
    scf.if %2 {
      %cst_10 = arith.constant 0.000000e+00 : f32
      %12 = vector.broadcast %cst_10 : f32 to vector<256x64xf32>
      %c0_11 = arith.constant 0 : index
      %c0_12 = arith.constant 0 : index
      %13 = vector.load %arg7[%c0_11, %c0_12] : memref<256x64xf32, #tpu.memory_space<vmem>>, vector<256x64xf32>
      tpu.vector_store %arg7[%c0_11, %c0_12], %12 {strides = array<i32>} : memref<256x64xf32, #tpu.memory_space<vmem>>, vector<256x64xf32>,
    } else {
    }
    %c0 = arith.constant 0 : index
    %c0_1 = arith.constant 0 : index
    %3 = vector.load %arg7[%c0, %c0_1] : memref<256x64xf32, #tpu.memory_space<vmem>>, vector<256x64xf32>
    %c0_2 = arith.constant 0 : index
    %c0_3 = arith.constant 0 : index
    %4 = vector.load %arg3[%c0_2, %c0_3] : memref<256x256xbf16, #tpu.memory_space<vmem>>, vector<256x256xbf16>
    %c0_4 = arith.constant 0 : index
    %c0_5 = arith.constant 0 : index
    %5 = vector.load %arg4[%c0_4, %c0_5] : memref<256x64xbf16, #tpu.memory_space<vmem>>, vector<256x64xbf16>
    %cst = arith.constant dense<0.000000e+00> : vector<256x64xf32>
    %6 = tpu.matmul %4, %5, %cst {dimension_numbers = #tpu.dot_dimension_numbers<[1], [0], [0], [1], [0, 0, 1, 1], [], []>} : vector<256x256xbf16>, vector<256x64xbf16>, vector<256x64xf32> -> vector<256x64xf32>
    %7 = arith.addf %3, %6 : vector<256x64xf32>
    %c0_6 = arith.constant 0 : index
    %c0_7 = arith.constant 0 : index
    %8 = vector.load %arg7[%c0_6, %c0_7] : memref<256x64xf32, #tpu.memory_space<vmem>>, vector<256x64xf32>
    tpu.vector_store %arg7[%c0_6, %c0_7], %7 {strides = array<i32>} : memref<256x64xf32, #tpu.memory_space<vmem>>, vector<256x64xf32>,
    %c0_i32_8 = arith.constant 0 : i32
    %9 = arith.cmpi eq, %arg2, %c0_i32_8 : i32
    %10 = arith.extui %9 : i1 to i32
    %c0_i32_9 = arith.constant 0 : i32
    %11 = arith.cmpi ne, %10, %c0_i32_9 : i32
    scf.if %11 {
      %c0_10 = arith.constant 0 : index
      %c0_11 = arith.constant 0 : index
      %12 = vector.load %arg7[%c0_10, %c0_11] : memref<256x64xf32, #tpu.memory_space<vmem>>, vector<256x64xf32>
      %c0_12 = arith.constant 0 : index
      %c0_13 = arith.constant 0 : index
      %13 = vector.load %arg5[%c0_12, %c0_13] : memref<1x64xf32, #tpu.memory_space<vmem>>, vector<1x64xf32>
      %14 = vector.broadcast %13 : vector<1x64xf32> to vector<256x64xf32>
      %15 = arith.addf %12, %14 : vector<256x64xf32>
      %cst_14 = arith.constant 0.000000e+00 : f32
      %16 = vector.broadcast %cst_14 : f32 to vector<256x64xf32>
      %17 = arith.maximumf %15, %16 : vector<256x64xf32>
      %18 = arith.truncf %17 : vector<256x64xf32> to vector<256x64xbf16>
      %c0_15 = arith.constant 0 : index
      %c0_16 = arith.constant 0 : index
      %19 = vector.load %arg6[%c0_15, %c0_16] : memref<256x64xbf16, #tpu.memory_space<vmem>>, vector<256x64xbf16>
      tpu.vector_store %arg6[%c0_15, %c0_16], %18 {strides = array<i32>} : memref<256x64xbf16, #tpu.memory_space<vmem>>, vector<256x64xbf16>,
    } else {
    }
    return
  }
  func.func @transform_0(%arg0: i32, %arg1: i32, %arg2: i32) -> (i32, i32) {
    %c0_i32 = arith.constant 0 : i32
    return %arg0, %arg2 : i32, i32
  }
  func.func @transform_1(%arg0: i32, %arg1: i32, %arg2: i32) -> (i32, i32) {
    %c0_i32 = arith.constant 0 : i32
    return %arg2, %arg1 : i32, i32
  }
  func.func @transform_2(%arg0: i32, %arg1: i32, %arg2: i32) -> (i32, i32) {
    %c0_i32 = arith.constant 0 : i32
    %c0_i32_0 = arith.constant 0 : i32
    return %c0_i32, %arg1 : i32, i32
  }
  func.func @transform_3(%arg0: i32, %arg1: i32, %arg2: i32) -> (i32, i32) {
    %c0_i32 = arith.constant 0 : i32
    return %arg0, %arg1 : i32, i32
  }
}

module attributes {stable_mosaic.version = 11 : i64} {
  func.func @_matmul_bias_act_kernel(%arg0: i32, %arg1: i32, %arg2: i32, %arg3: memref<128x128xbf16, #tpu.memory_space<vmem>>, %arg4: memref<128x64xbf16, #tpu.memory_space<vmem>>, %arg5: memref<1x64xf32, #tpu.memory_space<vmem>>, %arg6: memref<128x64xbf16, #tpu.memory_space<vmem>>, %arg7: memref<128x64xf32, #tpu.memory_space<vmem>>) attributes {dimension_semantics = [#tpu.dimension_semantics<parallel>, #tpu.dimension_semantics<parallel>, #tpu.dimension_semantics<arbitrary>], iteration_bounds = array<i64: 1, 1, 5>, scalar_prefetch = 0 : i64, scratch_operands = 1 : i64, tpu.core_type = #tpu.core_type<tc>, window_params = [{transform_indices = @transform_0, window_bounds = array<i64: 128, 128>}, {transform_indices = @transform_1, window_bounds = array<i64: 128, 64>}, {transform_indices = @transform_2, window_bounds = array<i64: 1, 64>}, {transform_indices = @transform_3, window_bounds = array<i64: 128, 64>}]} {
    %c0_i32 = arith.constant 0 : i32
    %0 = arith.cmpi eq, %arg2, %c0_i32 : i32
    %1 = arith.extui %0 : i1 to i32
    %c0_i32_0 = arith.constant 0 : i32
    %2 = arith.cmpi ne, %1, %c0_i32_0 : i32
    scf.if %2 {
      %cst_9 = arith.constant 0.000000e+00 : f32
      %12 = vector.broadcast %cst_9 : f32 to vector<128x64xf32>
      %c0_10 = arith.constant 0 : index
      %c0_11 = arith.constant 0 : index
      %13 = vector.load %arg7[%c0_10, %c0_11] : memref<128x64xf32, #tpu.memory_space<vmem>>, vector<128x64xf32>
      tpu.vector_store %arg7[%c0_10, %c0_11], %12 {strides = array<i32>} : memref<128x64xf32, #tpu.memory_space<vmem>>, vector<128x64xf32>,
    } else {
    }
    %c0 = arith.constant 0 : index
    %c0_1 = arith.constant 0 : index
    %3 = vector.load %arg7[%c0, %c0_1] : memref<128x64xf32, #tpu.memory_space<vmem>>, vector<128x64xf32>
    %c0_2 = arith.constant 0 : index
    %c0_3 = arith.constant 0 : index
    %4 = vector.load %arg3[%c0_2, %c0_3] : memref<128x128xbf16, #tpu.memory_space<vmem>>, vector<128x128xbf16>
    %c0_4 = arith.constant 0 : index
    %c0_5 = arith.constant 0 : index
    %5 = vector.load %arg4[%c0_4, %c0_5] : memref<128x64xbf16, #tpu.memory_space<vmem>>, vector<128x64xbf16>
    %cst = arith.constant dense<0.000000e+00> : vector<128x64xf32>
    %6 = tpu.matmul %4, %5, %cst {dimension_numbers = #tpu.dot_dimension_numbers<[1], [0], [0], [1], [0, 0, 1, 1], [], []>} : vector<128x128xbf16>, vector<128x64xbf16>, vector<128x64xf32> -> vector<128x64xf32>
    %7 = arith.addf %3, %6 : vector<128x64xf32>
    %c0_6 = arith.constant 0 : index
    %c0_7 = arith.constant 0 : index
    %8 = vector.load %arg7[%c0_6, %c0_7] : memref<128x64xf32, #tpu.memory_space<vmem>>, vector<128x64xf32>
    tpu.vector_store %arg7[%c0_6, %c0_7], %7 {strides = array<i32>} : memref<128x64xf32, #tpu.memory_space<vmem>>, vector<128x64xf32>,
    %c4_i32 = arith.constant 4 : i32
    %9 = arith.cmpi eq, %arg2, %c4_i32 : i32
    %10 = arith.extui %9 : i1 to i32
    %c0_i32_8 = arith.constant 0 : i32
    %11 = arith.cmpi ne, %10, %c0_i32_8 : i32
    scf.if %11 {
      %c0_9 = arith.constant 0 : index
      %c0_10 = arith.constant 0 : index
      %12 = vector.load %arg7[%c0_9, %c0_10] : memref<128x64xf32, #tpu.memory_space<vmem>>, vector<128x64xf32>
      %c0_11 = arith.constant 0 : index
      %c0_12 = arith.constant 0 : index
      %13 = vector.load %arg5[%c0_11, %c0_12] : memref<1x64xf32, #tpu.memory_space<vmem>>, vector<1x64xf32>
      %14 = vector.broadcast %13 : vector<1x64xf32> to vector<128x64xf32>
      %15 = arith.addf %12, %14 : vector<128x64xf32>
      %cst_13 = arith.constant 0.000000e+00 : f32
      %16 = vector.broadcast %cst_13 : f32 to vector<128x64xf32>
      %17 = arith.maximumf %15, %16 : vector<128x64xf32>
      %18 = arith.truncf %17 : vector<128x64xf32> to vector<128x64xbf16>
      %c0_14 = arith.constant 0 : index
      %c0_15 = arith.constant 0 : index
      %19 = vector.load %arg6[%c0_14, %c0_15] : memref<128x64xbf16, #tpu.memory_space<vmem>>, vector<128x64xbf16>
      tpu.vector_store %arg6[%c0_14, %c0_15], %18 {strides = array<i32>} : memref<128x64xbf16, #tpu.memory_space<vmem>>, vector<128x64xbf16>,
    } else {
    }
    return
  }
  func.func @transform_0(%arg0: i32, %arg1: i32, %arg2: i32) -> (i32, i32) {
    %c0_i32 = arith.constant 0 : i32
    return %arg0, %arg2 : i32, i32
  }
  func.func @transform_1(%arg0: i32, %arg1: i32, %arg2: i32) -> (i32, i32) {
    %c0_i32 = arith.constant 0 : i32
    return %arg2, %arg1 : i32, i32
  }
  func.func @transform_2(%arg0: i32, %arg1: i32, %arg2: i32) -> (i32, i32) {
    %c0_i32 = arith.constant 0 : i32
    %c0_i32_0 = arith.constant 0 : i32
    return %c0_i32, %arg1 : i32, i32
  }
  func.func @transform_3(%arg0: i32, %arg1: i32, %arg2: i32) -> (i32, i32) {
    %c0_i32 = arith.constant 0 : i32
    return %arg0, %arg1 : i32, i32
  }
}

module attributes {stable_mosaic.version = 11 : i64} {
  func.func @_matmul_bias_add_relu_kernel(%arg0: i32, %arg1: i32, %arg2: i32, %arg3: memref<128x128xbf16, #tpu.memory_space<vmem>>, %arg4: memref<128x64xbf16, #tpu.memory_space<vmem>>, %arg5: memref<1x64xf32, #tpu.memory_space<vmem>>, %arg6: memref<128x64xbf16, #tpu.memory_space<vmem>>, %arg7: memref<128x64xbf16, #tpu.memory_space<vmem>>, %arg8: memref<128x64xf32, #tpu.memory_space<vmem>>) attributes {dimension_semantics = [#tpu.dimension_semantics<parallel>, #tpu.dimension_semantics<parallel>, #tpu.dimension_semantics<arbitrary>], iteration_bounds = array<i64: 1, 1, 5>, scalar_prefetch = 0 : i64, scratch_operands = 1 : i64, tpu.core_type = #tpu.core_type<tc>, window_params = [{transform_indices = @transform_0, window_bounds = array<i64: 128, 128>}, {transform_indices = @transform_1, window_bounds = array<i64: 128, 64>}, {transform_indices = @transform_2, window_bounds = array<i64: 1, 64>}, {transform_indices = @transform_3, window_bounds = array<i64: 128, 64>}, {transform_indices = @transform_4, window_bounds = array<i64: 128, 64>}]} {
    %c0_i32 = arith.constant 0 : i32
    %0 = arith.cmpi eq, %arg2, %c0_i32 : i32
    %1 = arith.extui %0 : i1 to i32
    %c0_i32_0 = arith.constant 0 : i32
    %2 = arith.cmpi ne, %1, %c0_i32_0 : i32
    scf.if %2 {
      %cst_9 = arith.constant 0.000000e+00 : f32
      %12 = vector.broadcast %cst_9 : f32 to vector<128x64xf32>
      %c0_10 = arith.constant 0 : index
      %c0_11 = arith.constant 0 : index
      %13 = vector.load %arg8[%c0_10, %c0_11] : memref<128x64xf32, #tpu.memory_space<vmem>>, vector<128x64xf32>
      tpu.vector_store %arg8[%c0_10, %c0_11], %12 {strides = array<i32>} : memref<128x64xf32, #tpu.memory_space<vmem>>, vector<128x64xf32>,
    } else {
    }
    %c0 = arith.constant 0 : index
    %c0_1 = arith.constant 0 : index
    %3 = vector.load %arg8[%c0, %c0_1] : memref<128x64xf32, #tpu.memory_space<vmem>>, vector<128x64xf32>
    %c0_2 = arith.constant 0 : index
    %c0_3 = arith.constant 0 : index
    %4 = vector.load %arg3[%c0_2, %c0_3] : memref<128x128xbf16, #tpu.memory_space<vmem>>, vector<128x128xbf16>
    %c0_4 = arith.constant 0 : index
    %c0_5 = arith.constant 0 : index
    %5 = vector.load %arg4[%c0_4, %c0_5] : memref<128x64xbf16, #tpu.memory_space<vmem>>, vector<128x64xbf16>
    %cst = arith.constant dense<0.000000e+00> : vector<128x64xf32>
    %6 = tpu.matmul %4, %5, %cst {dimension_numbers = #tpu.dot_dimension_numbers<[1], [0], [0], [1], [0, 0, 1, 1], [], []>} : vector<128x128xbf16>, vector<128x64xbf16>, vector<128x64xf32> -> vector<128x64xf32>
    %7 = arith.addf %3, %6 : vector<128x64xf32>
    %c0_6 = arith.constant 0 : index
    %c0_7 = arith.constant 0 : index
    %8 = vector.load %arg8[%c0_6, %c0_7] : memref<128x64xf32, #tpu.memory_space<vmem>>, vector<128x64xf32>
    tpu.vector_store %arg8[%c0_6, %c0_7], %7 {strides = array<i32>} : memref<128x64xf32, #tpu.memory_space<vmem>>, vector<128x64xf32>,
    %c4_i32 = arith.constant 4 : i32
    %9 = arith.cmpi eq, %arg2, %c4_i32 : i32
    %10 = arith.extui %9 : i1 to i32
    %c0_i32_8 = arith.constant 0 : i32
    %11 = arith.cmpi ne, %10, %c0_i32_8 : i32
    scf.if %11 {
      %c0_9 = arith.constant 0 : index
      %c0_10 = arith.constant 0 : index
      %12 = vector.load %arg8[%c0_9, %c0_10] : memref<128x64xf32, #tpu.memory_space<vmem>>, vector<128x64xf32>
      %c0_11 = arith.constant 0 : index
      %c0_12 = arith.constant 0 : index
      %13 = vector.load %arg5[%c0_11, %c0_12] : memref<1x64xf32, #tpu.memory_space<vmem>>, vector<1x64xf32>
      %14 = vector.broadcast %13 : vector<1x64xf32> to vector<128x64xf32>
      %15 = arith.addf %12, %14 : vector<128x64xf32>
      %c0_13 = arith.constant 0 : index
      %c0_14 = arith.constant 0 : index
      %16 = vector.load %arg6[%c0_13, %c0_14] : memref<128x64xbf16, #tpu.memory_space<vmem>>, vector<128x64xbf16>
      %17 = arith.extf %16 : vector<128x64xbf16> to vector<128x64xf32>
      %18 = arith.addf %15, %17 : vector<128x64xf32>
      %cst_15 = arith.constant 0.000000e+00 : f32
      %19 = vector.broadcast %cst_15 : f32 to vector<128x64xf32>
      %20 = arith.maximumf %18, %19 : vector<128x64xf32>
      %21 = arith.truncf %20 : vector<128x64xf32> to vector<128x64xbf16>
      %c0_16 = arith.constant 0 : index
      %c0_17 = arith.constant 0 : index
      %22 = vector.load %arg7[%c0_16, %c0_17] : memref<128x64xbf16, #tpu.memory_space<vmem>>, vector<128x64xbf16>
      tpu.vector_store %arg7[%c0_16, %c0_17], %21 {strides = array<i32>} : memref<128x64xbf16, #tpu.memory_space<vmem>>, vector<128x64xbf16>,
    } else {
    }
    return
  }
  func.func @transform_0(%arg0: i32, %arg1: i32, %arg2: i32) -> (i32, i32) {
    %c0_i32 = arith.constant 0 : i32
    return %arg0, %arg2 : i32, i32
  }
  func.func @transform_1(%arg0: i32, %arg1: i32, %arg2: i32) -> (i32, i32) {
    %c0_i32 = arith.constant 0 : i32
    return %arg2, %arg1 : i32, i32
  }
  func.func @transform_2(%arg0: i32, %arg1: i32, %arg2: i32) -> (i32, i32) {
    %c0_i32 = arith.constant 0 : i32
    %c0_i32_0 = arith.constant 0 : i32
    return %c0_i32, %arg1 : i32, i32
  }
  func.func @transform_3(%arg0: i32, %arg1: i32, %arg2: i32) -> (i32, i32) {
    %c0_i32 = arith.constant 0 : i32
    return %arg0, %arg1 : i32, i32
  }
  func.func @transform_4(%arg0: i32, %arg1: i32, %arg2: i32) -> (i32, i32) {
    %c0_i32 = arith.constant 0 : i32
    return %arg0, %arg1 : i32, i32
  }
}

module attributes {stable_mosaic.version = 11 : i64} {
  func.func @_matmul_bias_act_kernel(%arg0: i32, %arg1: i32, %arg2: i32, %arg3: memref<32x128xbf16, #tpu.memory_space<vmem>>, %arg4: memref<128x128xbf16, #tpu.memory_space<vmem>>, %arg5: memref<1x128xf32, #tpu.memory_space<vmem>>, %arg6: memref<32x128xbf16, #tpu.memory_space<vmem>>, %arg7: memref<32x128xf32, #tpu.memory_space<vmem>>) attributes {dimension_semantics = [#tpu.dimension_semantics<parallel>, #tpu.dimension_semantics<parallel>, #tpu.dimension_semantics<arbitrary>], iteration_bounds = array<i64: 1, 1, 5>, scalar_prefetch = 0 : i64, scratch_operands = 1 : i64, tpu.core_type = #tpu.core_type<tc>, window_params = [{transform_indices = @transform_0, window_bounds = array<i64: 32, 128>}, {transform_indices = @transform_1, window_bounds = array<i64: 128, 128>}, {transform_indices = @transform_2, window_bounds = array<i64: 1, 128>}, {transform_indices = @transform_3, window_bounds = array<i64: 32, 128>}]} {
    %c0_i32 = arith.constant 0 : i32
    %0 = arith.cmpi eq, %arg2, %c0_i32 : i32
    %1 = arith.extui %0 : i1 to i32
    %c0_i32_0 = arith.constant 0 : i32
    %2 = arith.cmpi ne, %1, %c0_i32_0 : i32
    scf.if %2 {
      %cst_9 = arith.constant 0.000000e+00 : f32
      %12 = vector.broadcast %cst_9 : f32 to vector<32x128xf32>
      %c0_10 = arith.constant 0 : index
      %c0_11 = arith.constant 0 : index
      %13 = vector.load %arg7[%c0_10, %c0_11] : memref<32x128xf32, #tpu.memory_space<vmem>>, vector<32x128xf32>
      tpu.vector_store %arg7[%c0_10, %c0_11], %12 {strides = array<i32>} : memref<32x128xf32, #tpu.memory_space<vmem>>, vector<32x128xf32>,
    } else {
    }
    %c0 = arith.constant 0 : index
    %c0_1 = arith.constant 0 : index
    %3 = vector.load %arg7[%c0, %c0_1] : memref<32x128xf32, #tpu.memory_space<vmem>>, vector<32x128xf32>
    %c0_2 = arith.constant 0 : index
    %c0_3 = arith.constant 0 : index
    %4 = vector.load %arg3[%c0_2, %c0_3] : memref<32x128xbf16, #tpu.memory_space<vmem>>, vector<32x128xbf16>
    %c0_4 = arith.constant 0 : index
    %c0_5 = arith.constant 0 : index
    %5 = vector.load %arg4[%c0_4, %c0_5] : memref<128x128xbf16, #tpu.memory_space<vmem>>, vector<128x128xbf16>
    %cst = arith.constant dense<0.000000e+00> : vector<32x128xf32>
    %6 = tpu.matmul %4, %5, %cst {dimension_numbers = #tpu.dot_dimension_numbers<[1], [0], [0], [1], [0, 0, 1, 1], [], []>} : vector<32x128xbf16>, vector<128x128xbf16>, vector<32x128xf32> -> vector<32x128xf32>
    %7 = arith.addf %3, %6 : vector<32x128xf32>
    %c0_6 = arith.constant 0 : index
    %c0_7 = arith.constant 0 : index
    %8 = vector.load %arg7[%c0_6, %c0_7] : memref<32x128xf32, #tpu.memory_space<vmem>>, vector<32x128xf32>
    tpu.vector_store %arg7[%c0_6, %c0_7], %7 {strides = array<i32>} : memref<32x128xf32, #tpu.memory_space<vmem>>, vector<32x128xf32>,
    %c4_i32 = arith.constant 4 : i32
    %9 = arith.cmpi eq, %arg2, %c4_i32 : i32
    %10 = arith.extui %9 : i1 to i32
    %c0_i32_8 = arith.constant 0 : i32
    %11 = arith.cmpi ne, %10, %c0_i32_8 : i32
    scf.if %11 {
      %c0_9 = arith.constant 0 : index
      %c0_10 = arith.constant 0 : index
      %12 = vector.load %arg7[%c0_9, %c0_10] : memref<32x128xf32, #tpu.memory_space<vmem>>, vector<32x128xf32>
      %c0_11 = arith.constant 0 : index
      %c0_12 = arith.constant 0 : index
      %13 = vector.load %arg5[%c0_11, %c0_12] : memref<1x128xf32, #tpu.memory_space<vmem>>, vector<1x128xf32>
      %14 = vector.broadcast %13 : vector<1x128xf32> to vector<32x128xf32>
      %15 = arith.addf %12, %14 : vector<32x128xf32>
      %cst_13 = arith.constant 0.000000e+00 : f32
      %16 = vector.broadcast %cst_13 : f32 to vector<32x128xf32>
      %17 = arith.maximumf %15, %16 : vector<32x128xf32>
      %18 = arith.truncf %17 : vector<32x128xf32> to vector<32x128xbf16>
      %c0_14 = arith.constant 0 : index
      %c0_15 = arith.constant 0 : index
      %19 = vector.load %arg6[%c0_14, %c0_15] : memref<32x128xbf16, #tpu.memory_space<vmem>>, vector<32x128xbf16>
      tpu.vector_store %arg6[%c0_14, %c0_15], %18 {strides = array<i32>} : memref<32x128xbf16, #tpu.memory_space<vmem>>, vector<32x128xbf16>,
    } else {
    }
    return
  }
  func.func @transform_0(%arg0: i32, %arg1: i32, %arg2: i32) -> (i32, i32) {
    %c0_i32 = arith.constant 0 : i32
    return %arg0, %arg2 : i32, i32
  }
  func.func @transform_1(%arg0: i32, %arg1: i32, %arg2: i32) -> (i32, i32) {
    %c0_i32 = arith.constant 0 : i32
    return %arg2, %arg1 : i32, i32
  }
  func.func @transform_2(%arg0: i32, %arg1: i32, %arg2: i32) -> (i32, i32) {
    %c0_i32 = arith.constant 0 : i32
    %c0_i32_0 = arith.constant 0 : i32
    return %c0_i32, %arg1 : i32, i32
  }
  func.func @transform_3(%arg0: i32, %arg1: i32, %arg2: i32) -> (i32, i32) {
    %c0_i32 = arith.constant 0 : i32
    return %arg0, %arg1 : i32, i32
  }
}

module attributes {stable_mosaic.version = 11 : i64} {
  func.func @_matmul_bias_act_kernel(%arg0: i32, %arg1: i32, %arg2: i32, %arg3: memref<32x128xbf16, #tpu.memory_space<vmem>>, %arg4: memref<128x128xbf16, #tpu.memory_space<vmem>>, %arg5: memref<1x128xf32, #tpu.memory_space<vmem>>, %arg6: memref<32x128xbf16, #tpu.memory_space<vmem>>, %arg7: memref<32x128xf32, #tpu.memory_space<vmem>>) attributes {dimension_semantics = [#tpu.dimension_semantics<parallel>, #tpu.dimension_semantics<parallel>, #tpu.dimension_semantics<arbitrary>], iteration_bounds = array<i64: 1, 1, 1>, scalar_prefetch = 0 : i64, scratch_operands = 1 : i64, tpu.core_type = #tpu.core_type<tc>, window_params = [{transform_indices = @transform_0, window_bounds = array<i64: 32, 128>}, {transform_indices = @transform_1, window_bounds = array<i64: 128, 128>}, {transform_indices = @transform_2, window_bounds = array<i64: 1, 128>}, {transform_indices = @transform_3, window_bounds = array<i64: 32, 128>}]} {
    %c0_i32 = arith.constant 0 : i32
    %0 = arith.cmpi eq, %arg2, %c0_i32 : i32
    %1 = arith.extui %0 : i1 to i32
    %c0_i32_0 = arith.constant 0 : i32
    %2 = arith.cmpi ne, %1, %c0_i32_0 : i32
    scf.if %2 {
      %cst_10 = arith.constant 0.000000e+00 : f32
      %12 = vector.broadcast %cst_10 : f32 to vector<32x128xf32>
      %c0_11 = arith.constant 0 : index
      %c0_12 = arith.constant 0 : index
      %13 = vector.load %arg7[%c0_11, %c0_12] : memref<32x128xf32, #tpu.memory_space<vmem>>, vector<32x128xf32>
      tpu.vector_store %arg7[%c0_11, %c0_12], %12 {strides = array<i32>} : memref<32x128xf32, #tpu.memory_space<vmem>>, vector<32x128xf32>,
    } else {
    }
    %c0 = arith.constant 0 : index
    %c0_1 = arith.constant 0 : index
    %3 = vector.load %arg7[%c0, %c0_1] : memref<32x128xf32, #tpu.memory_space<vmem>>, vector<32x128xf32>
    %c0_2 = arith.constant 0 : index
    %c0_3 = arith.constant 0 : index
    %4 = vector.load %arg3[%c0_2, %c0_3] : memref<32x128xbf16, #tpu.memory_space<vmem>>, vector<32x128xbf16>
    %c0_4 = arith.constant 0 : index
    %c0_5 = arith.constant 0 : index
    %5 = vector.load %arg4[%c0_4, %c0_5] : memref<128x128xbf16, #tpu.memory_space<vmem>>, vector<128x128xbf16>
    %cst = arith.constant dense<0.000000e+00> : vector<32x128xf32>
    %6 = tpu.matmul %4, %5, %cst {dimension_numbers = #tpu.dot_dimension_numbers<[1], [0], [0], [1], [0, 0, 1, 1], [], []>} : vector<32x128xbf16>, vector<128x128xbf16>, vector<32x128xf32> -> vector<32x128xf32>
    %7 = arith.addf %3, %6 : vector<32x128xf32>
    %c0_6 = arith.constant 0 : index
    %c0_7 = arith.constant 0 : index
    %8 = vector.load %arg7[%c0_6, %c0_7] : memref<32x128xf32, #tpu.memory_space<vmem>>, vector<32x128xf32>
    tpu.vector_store %arg7[%c0_6, %c0_7], %7 {strides = array<i32>} : memref<32x128xf32, #tpu.memory_space<vmem>>, vector<32x128xf32>,
    %c0_i32_8 = arith.constant 0 : i32
    %9 = arith.cmpi eq, %arg2, %c0_i32_8 : i32
    %10 = arith.extui %9 : i1 to i32
    %c0_i32_9 = arith.constant 0 : i32
    %11 = arith.cmpi ne, %10, %c0_i32_9 : i32
    scf.if %11 {
      %c0_10 = arith.constant 0 : index
      %c0_11 = arith.constant 0 : index
      %12 = vector.load %arg7[%c0_10, %c0_11] : memref<32x128xf32, #tpu.memory_space<vmem>>, vector<32x128xf32>
      %c0_12 = arith.constant 0 : index
      %c0_13 = arith.constant 0 : index
      %13 = vector.load %arg5[%c0_12, %c0_13] : memref<1x128xf32, #tpu.memory_space<vmem>>, vector<1x128xf32>
      %14 = vector.broadcast %13 : vector<1x128xf32> to vector<32x128xf32>
      %15 = arith.addf %12, %14 : vector<32x128xf32>
      %16 = arith.truncf %15 : vector<32x128xf32> to vector<32x128xbf16>
      %c0_14 = arith.constant 0 : index
      %c0_15 = arith.constant 0 : index
      %17 = vector.load %arg6[%c0_14, %c0_15] : memref<32x128xbf16, #tpu.memory_space<vmem>>, vector<32x128xbf16>
      tpu.vector_store %arg6[%c0_14, %c0_15], %16 {strides = array<i32>} : memref<32x128xbf16, #tpu.memory_space<vmem>>, vector<32x128xbf16>,
    } else {
    }
    return
  }
  func.func @transform_0(%arg0: i32, %arg1: i32, %arg2: i32) -> (i32, i32) {
    %c0_i32 = arith.constant 0 : i32
    return %arg0, %arg2 : i32, i32
  }
  func.func @transform_1(%arg0: i32, %arg1: i32, %arg2: i32) -> (i32, i32) {
    %c0_i32 = arith.constant 0 : i32
    return %arg2, %arg1 : i32, i32
  }
  func.func @transform_2(%arg0: i32, %arg1: i32, %arg2: i32) -> (i32, i32) {
    %c0_i32 = arith.constant 0 : i32
    %c0_i32_0 = arith.constant 0 : i32
    return %c0_i32, %arg1 : i32, i32
  }
  func.func @transform_3(%arg0: i32, %arg1: i32, %arg2: i32) -> (i32, i32) {
    %c0_i32 = arith.constant 0 : i32
    return %arg0, %arg1 : i32, i32
  }
}

module attributes {stable_mosaic.version = 11 : i64} {
  func.func @_matmul_bias_add_relu_kernel(%arg0: i32, %arg1: i32, %arg2: i32, %arg3: memref<32x128xbf16, #tpu.memory_space<vmem>>, %arg4: memref<128x128xbf16, #tpu.memory_space<vmem>>, %arg5: memref<1x128xf32, #tpu.memory_space<vmem>>, %arg6: memref<32x128xbf16, #tpu.memory_space<vmem>>, %arg7: memref<32x128xbf16, #tpu.memory_space<vmem>>, %arg8: memref<32x128xf32, #tpu.memory_space<vmem>>) attributes {dimension_semantics = [#tpu.dimension_semantics<parallel>, #tpu.dimension_semantics<parallel>, #tpu.dimension_semantics<arbitrary>], iteration_bounds = array<i64: 1, 1, 9>, scalar_prefetch = 0 : i64, scratch_operands = 1 : i64, tpu.core_type = #tpu.core_type<tc>, window_params = [{transform_indices = @transform_0, window_bounds = array<i64: 32, 128>}, {transform_indices = @transform_1, window_bounds = array<i64: 128, 128>}, {transform_indices = @transform_2, window_bounds = array<i64: 1, 128>}, {transform_indices = @transform_3, window_bounds = array<i64: 32, 128>}, {transform_indices = @transform_4, window_bounds = array<i64: 32, 128>}]} {
    %c0_i32 = arith.constant 0 : i32
    %0 = arith.cmpi eq, %arg2, %c0_i32 : i32
    %1 = arith.extui %0 : i1 to i32
    %c0_i32_0 = arith.constant 0 : i32
    %2 = arith.cmpi ne, %1, %c0_i32_0 : i32
    scf.if %2 {
      %cst_9 = arith.constant 0.000000e+00 : f32
      %12 = vector.broadcast %cst_9 : f32 to vector<32x128xf32>
      %c0_10 = arith.constant 0 : index
      %c0_11 = arith.constant 0 : index
      %13 = vector.load %arg8[%c0_10, %c0_11] : memref<32x128xf32, #tpu.memory_space<vmem>>, vector<32x128xf32>
      tpu.vector_store %arg8[%c0_10, %c0_11], %12 {strides = array<i32>} : memref<32x128xf32, #tpu.memory_space<vmem>>, vector<32x128xf32>,
    } else {
    }
    %c0 = arith.constant 0 : index
    %c0_1 = arith.constant 0 : index
    %3 = vector.load %arg8[%c0, %c0_1] : memref<32x128xf32, #tpu.memory_space<vmem>>, vector<32x128xf32>
    %c0_2 = arith.constant 0 : index
    %c0_3 = arith.constant 0 : index
    %4 = vector.load %arg3[%c0_2, %c0_3] : memref<32x128xbf16, #tpu.memory_space<vmem>>, vector<32x128xbf16>
    %c0_4 = arith.constant 0 : index
    %c0_5 = arith.constant 0 : index
    %5 = vector.load %arg4[%c0_4, %c0_5] : memref<128x128xbf16, #tpu.memory_space<vmem>>, vector<128x128xbf16>
    %cst = arith.constant dense<0.000000e+00> : vector<32x128xf32>
    %6 = tpu.matmul %4, %5, %cst {dimension_numbers = #tpu.dot_dimension_numbers<[1], [0], [0], [1], [0, 0, 1, 1], [], []>} : vector<32x128xbf16>, vector<128x128xbf16>, vector<32x128xf32> -> vector<32x128xf32>
    %7 = arith.addf %3, %6 : vector<32x128xf32>
    %c0_6 = arith.constant 0 : index
    %c0_7 = arith.constant 0 : index
    %8 = vector.load %arg8[%c0_6, %c0_7] : memref<32x128xf32, #tpu.memory_space<vmem>>, vector<32x128xf32>
    tpu.vector_store %arg8[%c0_6, %c0_7], %7 {strides = array<i32>} : memref<32x128xf32, #tpu.memory_space<vmem>>, vector<32x128xf32>,
    %c8_i32 = arith.constant 8 : i32
    %9 = arith.cmpi eq, %arg2, %c8_i32 : i32
    %10 = arith.extui %9 : i1 to i32
    %c0_i32_8 = arith.constant 0 : i32
    %11 = arith.cmpi ne, %10, %c0_i32_8 : i32
    scf.if %11 {
      %c0_9 = arith.constant 0 : index
      %c0_10 = arith.constant 0 : index
      %12 = vector.load %arg8[%c0_9, %c0_10] : memref<32x128xf32, #tpu.memory_space<vmem>>, vector<32x128xf32>
      %c0_11 = arith.constant 0 : index
      %c0_12 = arith.constant 0 : index
      %13 = vector.load %arg5[%c0_11, %c0_12] : memref<1x128xf32, #tpu.memory_space<vmem>>, vector<1x128xf32>
      %14 = vector.broadcast %13 : vector<1x128xf32> to vector<32x128xf32>
      %15 = arith.addf %12, %14 : vector<32x128xf32>
      %c0_13 = arith.constant 0 : index
      %c0_14 = arith.constant 0 : index
      %16 = vector.load %arg6[%c0_13, %c0_14] : memref<32x128xbf16, #tpu.memory_space<vmem>>, vector<32x128xbf16>
      %17 = arith.extf %16 : vector<32x128xbf16> to vector<32x128xf32>
      %18 = arith.addf %15, %17 : vector<32x128xf32>
      %cst_15 = arith.constant 0.000000e+00 : f32
      %19 = vector.broadcast %cst_15 : f32 to vector<32x128xf32>
      %20 = arith.maximumf %18, %19 : vector<32x128xf32>
      %21 = arith.truncf %20 : vector<32x128xf32> to vector<32x128xbf16>
      %c0_16 = arith.constant 0 : index
      %c0_17 = arith.constant 0 : index
      %22 = vector.load %arg7[%c0_16, %c0_17] : memref<32x128xbf16, #tpu.memory_space<vmem>>, vector<32x128xbf16>
      tpu.vector_store %arg7[%c0_16, %c0_17], %21 {strides = array<i32>} : memref<32x128xbf16, #tpu.memory_space<vmem>>, vector<32x128xbf16>,
    } else {
    }
    return
  }
  func.func @transform_0(%arg0: i32, %arg1: i32, %arg2: i32) -> (i32, i32) {
    %c0_i32 = arith.constant 0 : i32
    return %arg0, %arg2 : i32, i32
  }
  func.func @transform_1(%arg0: i32, %arg1: i32, %arg2: i32) -> (i32, i32) {
    %c0_i32 = arith.constant 0 : i32
    return %arg2, %arg1 : i32, i32
  }
  func.func @transform_2(%arg0: i32, %arg1: i32, %arg2: i32) -> (i32, i32) {
    %c0_i32 = arith.constant 0 : i32
    %c0_i32_0 = arith.constant 0 : i32
    return %c0_i32, %arg1 : i32, i32
  }
  func.func @transform_3(%arg0: i32, %arg1: i32, %arg2: i32) -> (i32, i32) {
    %c0_i32 = arith.constant 0 : i32
    return %arg0, %arg1 : i32, i32
  }
  func.func @transform_4(%arg0: i32, %arg1: i32, %arg2: i32) -> (i32, i32) {
    %c0_i32 = arith.constant 0 : i32
    return %arg0, %arg1 : i32, i32
  }
}

module attributes {stable_mosaic.version = 11 : i64} {
  func.func @_matmul_bias_act_kernel(%arg0: i32, %arg1: i32, %arg2: i32, %arg3: memref<32x128xbf16, #tpu.memory_space<vmem>>, %arg4: memref<128x128xbf16, #tpu.memory_space<vmem>>, %arg5: memref<1x128xf32, #tpu.memory_space<vmem>>, %arg6: memref<32x128xbf16, #tpu.memory_space<vmem>>, %arg7: memref<32x128xf32, #tpu.memory_space<vmem>>) attributes {dimension_semantics = [#tpu.dimension_semantics<parallel>, #tpu.dimension_semantics<parallel>, #tpu.dimension_semantics<arbitrary>], iteration_bounds = array<i64: 1, 1, 9>, scalar_prefetch = 0 : i64, scratch_operands = 1 : i64, tpu.core_type = #tpu.core_type<tc>, window_params = [{transform_indices = @transform_0, window_bounds = array<i64: 32, 128>}, {transform_indices = @transform_1, window_bounds = array<i64: 128, 128>}, {transform_indices = @transform_2, window_bounds = array<i64: 1, 128>}, {transform_indices = @transform_3, window_bounds = array<i64: 32, 128>}]} {
    %c0_i32 = arith.constant 0 : i32
    %0 = arith.cmpi eq, %arg2, %c0_i32 : i32
    %1 = arith.extui %0 : i1 to i32
    %c0_i32_0 = arith.constant 0 : i32
    %2 = arith.cmpi ne, %1, %c0_i32_0 : i32
    scf.if %2 {
      %cst_9 = arith.constant 0.000000e+00 : f32
      %12 = vector.broadcast %cst_9 : f32 to vector<32x128xf32>
      %c0_10 = arith.constant 0 : index
      %c0_11 = arith.constant 0 : index
      %13 = vector.load %arg7[%c0_10, %c0_11] : memref<32x128xf32, #tpu.memory_space<vmem>>, vector<32x128xf32>
      tpu.vector_store %arg7[%c0_10, %c0_11], %12 {strides = array<i32>} : memref<32x128xf32, #tpu.memory_space<vmem>>, vector<32x128xf32>,
    } else {
    }
    %c0 = arith.constant 0 : index
    %c0_1 = arith.constant 0 : index
    %3 = vector.load %arg7[%c0, %c0_1] : memref<32x128xf32, #tpu.memory_space<vmem>>, vector<32x128xf32>
    %c0_2 = arith.constant 0 : index
    %c0_3 = arith.constant 0 : index
    %4 = vector.load %arg3[%c0_2, %c0_3] : memref<32x128xbf16, #tpu.memory_space<vmem>>, vector<32x128xbf16>
    %c0_4 = arith.constant 0 : index
    %c0_5 = arith.constant 0 : index
    %5 = vector.load %arg4[%c0_4, %c0_5] : memref<128x128xbf16, #tpu.memory_space<vmem>>, vector<128x128xbf16>
    %cst = arith.constant dense<0.000000e+00> : vector<32x128xf32>
    %6 = tpu.matmul %4, %5, %cst {dimension_numbers = #tpu.dot_dimension_numbers<[1], [0], [0], [1], [0, 0, 1, 1], [], []>} : vector<32x128xbf16>, vector<128x128xbf16>, vector<32x128xf32> -> vector<32x128xf32>
    %7 = arith.addf %3, %6 : vector<32x128xf32>
    %c0_6 = arith.constant 0 : index
    %c0_7 = arith.constant 0 : index
    %8 = vector.load %arg7[%c0_6, %c0_7] : memref<32x128xf32, #tpu.memory_space<vmem>>, vector<32x128xf32>
    tpu.vector_store %arg7[%c0_6, %c0_7], %7 {strides = array<i32>} : memref<32x128xf32, #tpu.memory_space<vmem>>, vector<32x128xf32>,
    %c8_i32 = arith.constant 8 : i32
    %9 = arith.cmpi eq, %arg2, %c8_i32 : i32
    %10 = arith.extui %9 : i1 to i32
    %c0_i32_8 = arith.constant 0 : i32
    %11 = arith.cmpi ne, %10, %c0_i32_8 : i32
    scf.if %11 {
      %c0_9 = arith.constant 0 : index
      %c0_10 = arith.constant 0 : index
      %12 = vector.load %arg7[%c0_9, %c0_10] : memref<32x128xf32, #tpu.memory_space<vmem>>, vector<32x128xf32>
      %c0_11 = arith.constant 0 : index
      %c0_12 = arith.constant 0 : index
      %13 = vector.load %arg5[%c0_11, %c0_12] : memref<1x128xf32, #tpu.memory_space<vmem>>, vector<1x128xf32>
      %14 = vector.broadcast %13 : vector<1x128xf32> to vector<32x128xf32>
      %15 = arith.addf %12, %14 : vector<32x128xf32>
      %cst_13 = arith.constant 0.000000e+00 : f32
      %16 = vector.broadcast %cst_13 : f32 to vector<32x128xf32>
      %17 = arith.maximumf %15, %16 : vector<32x128xf32>
      %18 = arith.truncf %17 : vector<32x128xf32> to vector<32x128xbf16>
      %c0_14 = arith.constant 0 : index
      %c0_15 = arith.constant 0 : index
      %19 = vector.load %arg6[%c0_14, %c0_15] : memref<32x128xbf16, #tpu.memory_space<vmem>>, vector<32x128xbf16>
      tpu.vector_store %arg6[%c0_14, %c0_15], %18 {strides = array<i32>} : memref<32x128xbf16, #tpu.memory_space<vmem>>, vector<32x128xbf16>,
    } else {
    }
    return
  }
  func.func @transform_0(%arg0: i32, %arg1: i32, %arg2: i32) -> (i32, i32) {
    %c0_i32 = arith.constant 0 : i32
    return %arg0, %arg2 : i32, i32
  }
  func.func @transform_1(%arg0: i32, %arg1: i32, %arg2: i32) -> (i32, i32) {
    %c0_i32 = arith.constant 0 : i32
    return %arg2, %arg1 : i32, i32
  }
  func.func @transform_2(%arg0: i32, %arg1: i32, %arg2: i32) -> (i32, i32) {
    %c0_i32 = arith.constant 0 : i32
    %c0_i32_0 = arith.constant 0 : i32
    return %c0_i32, %arg1 : i32, i32
  }
  func.func @transform_3(%arg0: i32, %arg1: i32, %arg2: i32) -> (i32, i32) {
    %c0_i32 = arith.constant 0 : i32
    return %arg0, %arg1 : i32, i32
  }
}

module attributes {stable_mosaic.version = 11 : i64} {
  func.func @_matmul_bias_act_kernel(%arg0: i32, %arg1: i32, %arg2: i32, %arg3: memref<8x128xbf16, #tpu.memory_space<vmem>>, %arg4: memref<128x256xbf16, #tpu.memory_space<vmem>>, %arg5: memref<1x256xf32, #tpu.memory_space<vmem>>, %arg6: memref<8x256xbf16, #tpu.memory_space<vmem>>, %arg7: memref<8x256xf32, #tpu.memory_space<vmem>>) attributes {dimension_semantics = [#tpu.dimension_semantics<parallel>, #tpu.dimension_semantics<parallel>, #tpu.dimension_semantics<arbitrary>], iteration_bounds = array<i64: 1, 1, 9>, scalar_prefetch = 0 : i64, scratch_operands = 1 : i64, tpu.core_type = #tpu.core_type<tc>, window_params = [{transform_indices = @transform_0, window_bounds = array<i64: 8, 128>}, {transform_indices = @transform_1, window_bounds = array<i64: 128, 256>}, {transform_indices = @transform_2, window_bounds = array<i64: 1, 256>}, {transform_indices = @transform_3, window_bounds = array<i64: 8, 256>}]} {
    %c0_i32 = arith.constant 0 : i32
    %0 = arith.cmpi eq, %arg2, %c0_i32 : i32
    %1 = arith.extui %0 : i1 to i32
    %c0_i32_0 = arith.constant 0 : i32
    %2 = arith.cmpi ne, %1, %c0_i32_0 : i32
    scf.if %2 {
      %cst_9 = arith.constant 0.000000e+00 : f32
      %12 = vector.broadcast %cst_9 : f32 to vector<8x256xf32>
      %c0_10 = arith.constant 0 : index
      %c0_11 = arith.constant 0 : index
      %13 = vector.load %arg7[%c0_10, %c0_11] : memref<8x256xf32, #tpu.memory_space<vmem>>, vector<8x256xf32>
      tpu.vector_store %arg7[%c0_10, %c0_11], %12 {strides = array<i32>} : memref<8x256xf32, #tpu.memory_space<vmem>>, vector<8x256xf32>,
    } else {
    }
    %c0 = arith.constant 0 : index
    %c0_1 = arith.constant 0 : index
    %3 = vector.load %arg7[%c0, %c0_1] : memref<8x256xf32, #tpu.memory_space<vmem>>, vector<8x256xf32>
    %c0_2 = arith.constant 0 : index
    %c0_3 = arith.constant 0 : index
    %4 = vector.load %arg3[%c0_2, %c0_3] : memref<8x128xbf16, #tpu.memory_space<vmem>>, vector<8x128xbf16>
    %c0_4 = arith.constant 0 : index
    %c0_5 = arith.constant 0 : index
    %5 = vector.load %arg4[%c0_4, %c0_5] : memref<128x256xbf16, #tpu.memory_space<vmem>>, vector<128x256xbf16>
    %cst = arith.constant dense<0.000000e+00> : vector<8x256xf32>
    %6 = tpu.matmul %4, %5, %cst {dimension_numbers = #tpu.dot_dimension_numbers<[1], [0], [0], [1], [0, 0, 1, 1], [], []>} : vector<8x128xbf16>, vector<128x256xbf16>, vector<8x256xf32> -> vector<8x256xf32>
    %7 = arith.addf %3, %6 : vector<8x256xf32>
    %c0_6 = arith.constant 0 : index
    %c0_7 = arith.constant 0 : index
    %8 = vector.load %arg7[%c0_6, %c0_7] : memref<8x256xf32, #tpu.memory_space<vmem>>, vector<8x256xf32>
    tpu.vector_store %arg7[%c0_6, %c0_7], %7 {strides = array<i32>} : memref<8x256xf32, #tpu.memory_space<vmem>>, vector<8x256xf32>,
    %c8_i32 = arith.constant 8 : i32
    %9 = arith.cmpi eq, %arg2, %c8_i32 : i32
    %10 = arith.extui %9 : i1 to i32
    %c0_i32_8 = arith.constant 0 : i32
    %11 = arith.cmpi ne, %10, %c0_i32_8 : i32
    scf.if %11 {
      %c0_9 = arith.constant 0 : index
      %c0_10 = arith.constant 0 : index
      %12 = vector.load %arg7[%c0_9, %c0_10] : memref<8x256xf32, #tpu.memory_space<vmem>>, vector<8x256xf32>
      %c0_11 = arith.constant 0 : index
      %c0_12 = arith.constant 0 : index
      %13 = vector.load %arg5[%c0_11, %c0_12] : memref<1x256xf32, #tpu.memory_space<vmem>>, vector<1x256xf32>
      %14 = vector.broadcast %13 : vector<1x256xf32> to vector<8x256xf32>
      %15 = arith.addf %12, %14 : vector<8x256xf32>
      %cst_13 = arith.constant 0.000000e+00 : f32
      %16 = vector.broadcast %cst_13 : f32 to vector<8x256xf32>
      %17 = arith.maximumf %15, %16 : vector<8x256xf32>
      %18 = arith.truncf %17 : vector<8x256xf32> to vector<8x256xbf16>
      %c0_14 = arith.constant 0 : index
      %c0_15 = arith.constant 0 : index
      %19 = vector.load %arg6[%c0_14, %c0_15] : memref<8x256xbf16, #tpu.memory_space<vmem>>, vector<8x256xbf16>
      tpu.vector_store %arg6[%c0_14, %c0_15], %18 {strides = array<i32>} : memref<8x256xbf16, #tpu.memory_space<vmem>>, vector<8x256xbf16>,
    } else {
    }
    return
  }
  func.func @transform_0(%arg0: i32, %arg1: i32, %arg2: i32) -> (i32, i32) {
    %c0_i32 = arith.constant 0 : i32
    return %arg0, %arg2 : i32, i32
  }
  func.func @transform_1(%arg0: i32, %arg1: i32, %arg2: i32) -> (i32, i32) {
    %c0_i32 = arith.constant 0 : i32
    return %arg2, %arg1 : i32, i32
  }
  func.func @transform_2(%arg0: i32, %arg1: i32, %arg2: i32) -> (i32, i32) {
    %c0_i32 = arith.constant 0 : i32
    %c0_i32_0 = arith.constant 0 : i32
    return %c0_i32, %arg1 : i32, i32
  }
  func.func @transform_3(%arg0: i32, %arg1: i32, %arg2: i32) -> (i32, i32) {
    %c0_i32 = arith.constant 0 : i32
    return %arg0, %arg1 : i32, i32
  }
}

module attributes {stable_mosaic.version = 11 : i64} {
  func.func @_matmul_bias_act_kernel(%arg0: i32, %arg1: i32, %arg2: i32, %arg3: memref<8x128xbf16, #tpu.memory_space<vmem>>, %arg4: memref<128x256xbf16, #tpu.memory_space<vmem>>, %arg5: memref<1x256xf32, #tpu.memory_space<vmem>>, %arg6: memref<8x256xbf16, #tpu.memory_space<vmem>>, %arg7: memref<8x256xf32, #tpu.memory_space<vmem>>) attributes {dimension_semantics = [#tpu.dimension_semantics<parallel>, #tpu.dimension_semantics<parallel>, #tpu.dimension_semantics<arbitrary>], iteration_bounds = array<i64: 1, 1, 1>, scalar_prefetch = 0 : i64, scratch_operands = 1 : i64, tpu.core_type = #tpu.core_type<tc>, window_params = [{transform_indices = @transform_0, window_bounds = array<i64: 8, 128>}, {transform_indices = @transform_1, window_bounds = array<i64: 128, 256>}, {transform_indices = @transform_2, window_bounds = array<i64: 1, 256>}, {transform_indices = @transform_3, window_bounds = array<i64: 8, 256>}]} {
    %c0_i32 = arith.constant 0 : i32
    %0 = arith.cmpi eq, %arg2, %c0_i32 : i32
    %1 = arith.extui %0 : i1 to i32
    %c0_i32_0 = arith.constant 0 : i32
    %2 = arith.cmpi ne, %1, %c0_i32_0 : i32
    scf.if %2 {
      %cst_10 = arith.constant 0.000000e+00 : f32
      %12 = vector.broadcast %cst_10 : f32 to vector<8x256xf32>
      %c0_11 = arith.constant 0 : index
      %c0_12 = arith.constant 0 : index
      %13 = vector.load %arg7[%c0_11, %c0_12] : memref<8x256xf32, #tpu.memory_space<vmem>>, vector<8x256xf32>
      tpu.vector_store %arg7[%c0_11, %c0_12], %12 {strides = array<i32>} : memref<8x256xf32, #tpu.memory_space<vmem>>, vector<8x256xf32>,
    } else {
    }
    %c0 = arith.constant 0 : index
    %c0_1 = arith.constant 0 : index
    %3 = vector.load %arg7[%c0, %c0_1] : memref<8x256xf32, #tpu.memory_space<vmem>>, vector<8x256xf32>
    %c0_2 = arith.constant 0 : index
    %c0_3 = arith.constant 0 : index
    %4 = vector.load %arg3[%c0_2, %c0_3] : memref<8x128xbf16, #tpu.memory_space<vmem>>, vector<8x128xbf16>
    %c0_4 = arith.constant 0 : index
    %c0_5 = arith.constant 0 : index
    %5 = vector.load %arg4[%c0_4, %c0_5] : memref<128x256xbf16, #tpu.memory_space<vmem>>, vector<128x256xbf16>
    %cst = arith.constant dense<0.000000e+00> : vector<8x256xf32>
    %6 = tpu.matmul %4, %5, %cst {dimension_numbers = #tpu.dot_dimension_numbers<[1], [0], [0], [1], [0, 0, 1, 1], [], []>} : vector<8x128xbf16>, vector<128x256xbf16>, vector<8x256xf32> -> vector<8x256xf32>
    %7 = arith.addf %3, %6 : vector<8x256xf32>
    %c0_6 = arith.constant 0 : index
    %c0_7 = arith.constant 0 : index
    %8 = vector.load %arg7[%c0_6, %c0_7] : memref<8x256xf32, #tpu.memory_space<vmem>>, vector<8x256xf32>
    tpu.vector_store %arg7[%c0_6, %c0_7], %7 {strides = array<i32>} : memref<8x256xf32, #tpu.memory_space<vmem>>, vector<8x256xf32>,
    %c0_i32_8 = arith.constant 0 : i32
    %9 = arith.cmpi eq, %arg2, %c0_i32_8 : i32
    %10 = arith.extui %9 : i1 to i32
    %c0_i32_9 = arith.constant 0 : i32
    %11 = arith.cmpi ne, %10, %c0_i32_9 : i32
    scf.if %11 {
      %c0_10 = arith.constant 0 : index
      %c0_11 = arith.constant 0 : index
      %12 = vector.load %arg7[%c0_10, %c0_11] : memref<8x256xf32, #tpu.memory_space<vmem>>, vector<8x256xf32>
      %c0_12 = arith.constant 0 : index
      %c0_13 = arith.constant 0 : index
      %13 = vector.load %arg5[%c0_12, %c0_13] : memref<1x256xf32, #tpu.memory_space<vmem>>, vector<1x256xf32>
      %14 = vector.broadcast %13 : vector<1x256xf32> to vector<8x256xf32>
      %15 = arith.addf %12, %14 : vector<8x256xf32>
      %16 = arith.truncf %15 : vector<8x256xf32> to vector<8x256xbf16>
      %c0_14 = arith.constant 0 : index
      %c0_15 = arith.constant 0 : index
      %17 = vector.load %arg6[%c0_14, %c0_15] : memref<8x256xbf16, #tpu.memory_space<vmem>>, vector<8x256xbf16>
      tpu.vector_store %arg6[%c0_14, %c0_15], %16 {strides = array<i32>} : memref<8x256xbf16, #tpu.memory_space<vmem>>, vector<8x256xbf16>,
    } else {
    }
    return
  }
  func.func @transform_0(%arg0: i32, %arg1: i32, %arg2: i32) -> (i32, i32) {
    %c0_i32 = arith.constant 0 : i32
    return %arg0, %arg2 : i32, i32
  }
  func.func @transform_1(%arg0: i32, %arg1: i32, %arg2: i32) -> (i32, i32) {
    %c0_i32 = arith.constant 0 : i32
    return %arg2, %arg1 : i32, i32
  }
  func.func @transform_2(%arg0: i32, %arg1: i32, %arg2: i32) -> (i32, i32) {
    %c0_i32 = arith.constant 0 : i32
    %c0_i32_0 = arith.constant 0 : i32
    return %c0_i32, %arg1 : i32, i32
  }
  func.func @transform_3(%arg0: i32, %arg1: i32, %arg2: i32) -> (i32, i32) {
    %c0_i32 = arith.constant 0 : i32
    return %arg0, %arg1 : i32, i32
  }
}

module attributes {stable_mosaic.version = 11 : i64} {
  func.func @_matmul_bias_add_relu_kernel(%arg0: i32, %arg1: i32, %arg2: i32, %arg3: memref<8x256xbf16, #tpu.memory_space<vmem>>, %arg4: memref<256x256xbf16, #tpu.memory_space<vmem>>, %arg5: memref<1x256xf32, #tpu.memory_space<vmem>>, %arg6: memref<8x256xbf16, #tpu.memory_space<vmem>>, %arg7: memref<8x256xbf16, #tpu.memory_space<vmem>>, %arg8: memref<8x256xf32, #tpu.memory_space<vmem>>) attributes {dimension_semantics = [#tpu.dimension_semantics<parallel>, #tpu.dimension_semantics<parallel>, #tpu.dimension_semantics<arbitrary>], iteration_bounds = array<i64: 1, 1, 9>, scalar_prefetch = 0 : i64, scratch_operands = 1 : i64, tpu.core_type = #tpu.core_type<tc>, window_params = [{transform_indices = @transform_0, window_bounds = array<i64: 8, 256>}, {transform_indices = @transform_1, window_bounds = array<i64: 256, 256>}, {transform_indices = @transform_2, window_bounds = array<i64: 1, 256>}, {transform_indices = @transform_3, window_bounds = array<i64: 8, 256>}, {transform_indices = @transform_4, window_bounds = array<i64: 8, 256>}]} {
    %c0_i32 = arith.constant 0 : i32
    %0 = arith.cmpi eq, %arg2, %c0_i32 : i32
    %1 = arith.extui %0 : i1 to i32
    %c0_i32_0 = arith.constant 0 : i32
    %2 = arith.cmpi ne, %1, %c0_i32_0 : i32
    scf.if %2 {
      %cst_9 = arith.constant 0.000000e+00 : f32
      %12 = vector.broadcast %cst_9 : f32 to vector<8x256xf32>
      %c0_10 = arith.constant 0 : index
      %c0_11 = arith.constant 0 : index
      %13 = vector.load %arg8[%c0_10, %c0_11] : memref<8x256xf32, #tpu.memory_space<vmem>>, vector<8x256xf32>
      tpu.vector_store %arg8[%c0_10, %c0_11], %12 {strides = array<i32>} : memref<8x256xf32, #tpu.memory_space<vmem>>, vector<8x256xf32>,
    } else {
    }
    %c0 = arith.constant 0 : index
    %c0_1 = arith.constant 0 : index
    %3 = vector.load %arg8[%c0, %c0_1] : memref<8x256xf32, #tpu.memory_space<vmem>>, vector<8x256xf32>
    %c0_2 = arith.constant 0 : index
    %c0_3 = arith.constant 0 : index
    %4 = vector.load %arg3[%c0_2, %c0_3] : memref<8x256xbf16, #tpu.memory_space<vmem>>, vector<8x256xbf16>
    %c0_4 = arith.constant 0 : index
    %c0_5 = arith.constant 0 : index
    %5 = vector.load %arg4[%c0_4, %c0_5] : memref<256x256xbf16, #tpu.memory_space<vmem>>, vector<256x256xbf16>
    %cst = arith.constant dense<0.000000e+00> : vector<8x256xf32>
    %6 = tpu.matmul %4, %5, %cst {dimension_numbers = #tpu.dot_dimension_numbers<[1], [0], [0], [1], [0, 0, 1, 1], [], []>} : vector<8x256xbf16>, vector<256x256xbf16>, vector<8x256xf32> -> vector<8x256xf32>
    %7 = arith.addf %3, %6 : vector<8x256xf32>
    %c0_6 = arith.constant 0 : index
    %c0_7 = arith.constant 0 : index
    %8 = vector.load %arg8[%c0_6, %c0_7] : memref<8x256xf32, #tpu.memory_space<vmem>>, vector<8x256xf32>
    tpu.vector_store %arg8[%c0_6, %c0_7], %7 {strides = array<i32>} : memref<8x256xf32, #tpu.memory_space<vmem>>, vector<8x256xf32>,
    %c8_i32 = arith.constant 8 : i32
    %9 = arith.cmpi eq, %arg2, %c8_i32 : i32
    %10 = arith.extui %9 : i1 to i32
    %c0_i32_8 = arith.constant 0 : i32
    %11 = arith.cmpi ne, %10, %c0_i32_8 : i32
    scf.if %11 {
      %c0_9 = arith.constant 0 : index
      %c0_10 = arith.constant 0 : index
      %12 = vector.load %arg8[%c0_9, %c0_10] : memref<8x256xf32, #tpu.memory_space<vmem>>, vector<8x256xf32>
      %c0_11 = arith.constant 0 : index
      %c0_12 = arith.constant 0 : index
      %13 = vector.load %arg5[%c0_11, %c0_12] : memref<1x256xf32, #tpu.memory_space<vmem>>, vector<1x256xf32>
      %14 = vector.broadcast %13 : vector<1x256xf32> to vector<8x256xf32>
      %15 = arith.addf %12, %14 : vector<8x256xf32>
      %c0_13 = arith.constant 0 : index
      %c0_14 = arith.constant 0 : index
      %16 = vector.load %arg6[%c0_13, %c0_14] : memref<8x256xbf16, #tpu.memory_space<vmem>>, vector<8x256xbf16>
      %17 = arith.extf %16 : vector<8x256xbf16> to vector<8x256xf32>
      %18 = arith.addf %15, %17 : vector<8x256xf32>
      %cst_15 = arith.constant 0.000000e+00 : f32
      %19 = vector.broadcast %cst_15 : f32 to vector<8x256xf32>
      %20 = arith.maximumf %18, %19 : vector<8x256xf32>
      %21 = arith.truncf %20 : vector<8x256xf32> to vector<8x256xbf16>
      %c0_16 = arith.constant 0 : index
      %c0_17 = arith.constant 0 : index
      %22 = vector.load %arg7[%c0_16, %c0_17] : memref<8x256xbf16, #tpu.memory_space<vmem>>, vector<8x256xbf16>
      tpu.vector_store %arg7[%c0_16, %c0_17], %21 {strides = array<i32>} : memref<8x256xbf16, #tpu.memory_space<vmem>>, vector<8x256xbf16>,
    } else {
    }
    return
  }
  func.func @transform_0(%arg0: i32, %arg1: i32, %arg2: i32) -> (i32, i32) {
    %c0_i32 = arith.constant 0 : i32
    return %arg0, %arg2 : i32, i32
  }
  func.func @transform_1(%arg0: i32, %arg1: i32, %arg2: i32) -> (i32, i32) {
    %c0_i32 = arith.constant 0 : i32
    return %arg2, %arg1 : i32, i32
  }
  func.func @transform_2(%arg0: i32, %arg1: i32, %arg2: i32) -> (i32, i32) {
    %c0_i32 = arith.constant 0 : i32
    %c0_i32_0 = arith.constant 0 : i32
    return %c0_i32, %arg1 : i32, i32
  }
  func.func @transform_3(%arg0: i32, %arg1: i32, %arg2: i32) -> (i32, i32) {
    %c0_i32 = arith.constant 0 : i32
    return %arg0, %arg1 : i32, i32
  }
  func.func @transform_4(%arg0: i32, %arg1: i32, %arg2: i32) -> (i32, i32) {
    %c0_i32 = arith.constant 0 : i32
    return %arg0, %arg1 : i32, i32
  }
}

module attributes {stable_mosaic.version = 11 : i64} {
  func.func @_matmul_bias_act_kernel(%arg0: i32, %arg1: i32, %arg2: i32, %arg3: memref<8x256xbf16, #tpu.memory_space<vmem>>, %arg4: memref<256x256xbf16, #tpu.memory_space<vmem>>, %arg5: memref<1x256xf32, #tpu.memory_space<vmem>>, %arg6: memref<8x256xbf16, #tpu.memory_space<vmem>>, %arg7: memref<8x256xf32, #tpu.memory_space<vmem>>) attributes {dimension_semantics = [#tpu.dimension_semantics<parallel>, #tpu.dimension_semantics<parallel>, #tpu.dimension_semantics<arbitrary>], iteration_bounds = array<i64: 1, 1, 9>, scalar_prefetch = 0 : i64, scratch_operands = 1 : i64, tpu.core_type = #tpu.core_type<tc>, window_params = [{transform_indices = @transform_0, window_bounds = array<i64: 8, 256>}, {transform_indices = @transform_1, window_bounds = array<i64: 256, 256>}, {transform_indices = @transform_2, window_bounds = array<i64: 1, 256>}, {transform_indices = @transform_3, window_bounds = array<i64: 8, 256>}]} {
    %c0_i32 = arith.constant 0 : i32
    %0 = arith.cmpi eq, %arg2, %c0_i32 : i32
    %1 = arith.extui %0 : i1 to i32
    %c0_i32_0 = arith.constant 0 : i32
    %2 = arith.cmpi ne, %1, %c0_i32_0 : i32
    scf.if %2 {
      %cst_9 = arith.constant 0.000000e+00 : f32
      %12 = vector.broadcast %cst_9 : f32 to vector<8x256xf32>
      %c0_10 = arith.constant 0 : index
      %c0_11 = arith.constant 0 : index
      %13 = vector.load %arg7[%c0_10, %c0_11] : memref<8x256xf32, #tpu.memory_space<vmem>>, vector<8x256xf32>
      tpu.vector_store %arg7[%c0_10, %c0_11], %12 {strides = array<i32>} : memref<8x256xf32, #tpu.memory_space<vmem>>, vector<8x256xf32>,
    } else {
    }
    %c0 = arith.constant 0 : index
    %c0_1 = arith.constant 0 : index
    %3 = vector.load %arg7[%c0, %c0_1] : memref<8x256xf32, #tpu.memory_space<vmem>>, vector<8x256xf32>
    %c0_2 = arith.constant 0 : index
    %c0_3 = arith.constant 0 : index
    %4 = vector.load %arg3[%c0_2, %c0_3] : memref<8x256xbf16, #tpu.memory_space<vmem>>, vector<8x256xbf16>
    %c0_4 = arith.constant 0 : index
    %c0_5 = arith.constant 0 : index
    %5 = vector.load %arg4[%c0_4, %c0_5] : memref<256x256xbf16, #tpu.memory_space<vmem>>, vector<256x256xbf16>
    %cst = arith.constant dense<0.000000e+00> : vector<8x256xf32>
    %6 = tpu.matmul %4, %5, %cst {dimension_numbers = #tpu.dot_dimension_numbers<[1], [0], [0], [1], [0, 0, 1, 1], [], []>} : vector<8x256xbf16>, vector<256x256xbf16>, vector<8x256xf32> -> vector<8x256xf32>
    %7 = arith.addf %3, %6 : vector<8x256xf32>
    %c0_6 = arith.constant 0 : index
    %c0_7 = arith.constant 0 : index
    %8 = vector.load %arg7[%c0_6, %c0_7] : memref<8x256xf32, #tpu.memory_space<vmem>>, vector<8x256xf32>
    tpu.vector_store %arg7[%c0_6, %c0_7], %7 {strides = array<i32>} : memref<8x256xf32, #tpu.memory_space<vmem>>, vector<8x256xf32>,
    %c8_i32 = arith.constant 8 : i32
    %9 = arith.cmpi eq, %arg2, %c8_i32 : i32
    %10 = arith.extui %9 : i1 to i32
    %c0_i32_8 = arith.constant 0 : i32
    %11 = arith.cmpi ne, %10, %c0_i32_8 : i32
    scf.if %11 {
      %c0_9 = arith.constant 0 : index
      %c0_10 = arith.constant 0 : index
      %12 = vector.load %arg7[%c0_9, %c0_10] : memref<8x256xf32, #tpu.memory_space<vmem>>, vector<8x256xf32>
      %c0_11 = arith.constant 0 : index
      %c0_12 = arith.constant 0 : index
      %13 = vector.load %arg5[%c0_11, %c0_12] : memref<1x256xf32, #tpu.memory_space<vmem>>, vector<1x256xf32>
      %14 = vector.broadcast %13 : vector<1x256xf32> to vector<8x256xf32>
      %15 = arith.addf %12, %14 : vector<8x256xf32>
      %cst_13 = arith.constant 0.000000e+00 : f32
      %16 = vector.broadcast %cst_13 : f32 to vector<8x256xf32>
      %17 = arith.maximumf %15, %16 : vector<8x256xf32>
      %18 = arith.truncf %17 : vector<8x256xf32> to vector<8x256xbf16>
      %c0_14 = arith.constant 0 : index
      %c0_15 = arith.constant 0 : index
      %19 = vector.load %arg6[%c0_14, %c0_15] : memref<8x256xbf16, #tpu.memory_space<vmem>>, vector<8x256xbf16>
      tpu.vector_store %arg6[%c0_14, %c0_15], %18 {strides = array<i32>} : memref<8x256xbf16, #tpu.memory_space<vmem>>, vector<8x256xbf16>,
    } else {
    }
    return
  }
  func.func @transform_0(%arg0: i32, %arg1: i32, %arg2: i32) -> (i32, i32) {
    %c0_i32 = arith.constant 0 : i32
    return %arg0, %arg2 : i32, i32
  }
  func.func @transform_1(%arg0: i32, %arg1: i32, %arg2: i32) -> (i32, i32) {
    %c0_i32 = arith.constant 0 : i32
    return %arg2, %arg1 : i32, i32
  }
  func.func @transform_2(%arg0: i32, %arg1: i32, %arg2: i32) -> (i32, i32) {
    %c0_i32 = arith.constant 0 : i32
    %c0_i32_0 = arith.constant 0 : i32
    return %c0_i32, %arg1 : i32, i32
  }
  func.func @transform_3(%arg0: i32, %arg1: i32, %arg2: i32) -> (i32, i32) {
    %c0_i32 = arith.constant 0 : i32
    return %arg0, %arg1 : i32, i32
  }
}

module attributes {stable_mosaic.version = 11 : i64} {
  func.func @_matmul_bias_act_kernel(%arg0: i32, %arg1: i32, %arg2: i32, %arg3: memref<8x256xbf16, #tpu.memory_space<vmem>>, %arg4: memref<256x256xbf16, #tpu.memory_space<vmem>>, %arg5: memref<1x256xf32, #tpu.memory_space<vmem>>, %arg6: memref<8x256xbf16, #tpu.memory_space<vmem>>, %arg7: memref<8x256xf32, #tpu.memory_space<vmem>>) attributes {dimension_semantics = [#tpu.dimension_semantics<parallel>, #tpu.dimension_semantics<parallel>, #tpu.dimension_semantics<arbitrary>], iteration_bounds = array<i64: 1, 2, 9>, scalar_prefetch = 0 : i64, scratch_operands = 1 : i64, tpu.core_type = #tpu.core_type<tc>, window_params = [{transform_indices = @transform_0, window_bounds = array<i64: 8, 256>}, {transform_indices = @transform_1, window_bounds = array<i64: 256, 256>}, {transform_indices = @transform_2, window_bounds = array<i64: 1, 256>}, {transform_indices = @transform_3, window_bounds = array<i64: 8, 256>}]} {
    %c0_i32 = arith.constant 0 : i32
    %0 = arith.cmpi eq, %arg2, %c0_i32 : i32
    %1 = arith.extui %0 : i1 to i32
    %c0_i32_0 = arith.constant 0 : i32
    %2 = arith.cmpi ne, %1, %c0_i32_0 : i32
    scf.if %2 {
      %cst_9 = arith.constant 0.000000e+00 : f32
      %12 = vector.broadcast %cst_9 : f32 to vector<8x256xf32>
      %c0_10 = arith.constant 0 : index
      %c0_11 = arith.constant 0 : index
      %13 = vector.load %arg7[%c0_10, %c0_11] : memref<8x256xf32, #tpu.memory_space<vmem>>, vector<8x256xf32>
      tpu.vector_store %arg7[%c0_10, %c0_11], %12 {strides = array<i32>} : memref<8x256xf32, #tpu.memory_space<vmem>>, vector<8x256xf32>,
    } else {
    }
    %c0 = arith.constant 0 : index
    %c0_1 = arith.constant 0 : index
    %3 = vector.load %arg7[%c0, %c0_1] : memref<8x256xf32, #tpu.memory_space<vmem>>, vector<8x256xf32>
    %c0_2 = arith.constant 0 : index
    %c0_3 = arith.constant 0 : index
    %4 = vector.load %arg3[%c0_2, %c0_3] : memref<8x256xbf16, #tpu.memory_space<vmem>>, vector<8x256xbf16>
    %c0_4 = arith.constant 0 : index
    %c0_5 = arith.constant 0 : index
    %5 = vector.load %arg4[%c0_4, %c0_5] : memref<256x256xbf16, #tpu.memory_space<vmem>>, vector<256x256xbf16>
    %cst = arith.constant dense<0.000000e+00> : vector<8x256xf32>
    %6 = tpu.matmul %4, %5, %cst {dimension_numbers = #tpu.dot_dimension_numbers<[1], [0], [0], [1], [0, 0, 1, 1], [], []>} : vector<8x256xbf16>, vector<256x256xbf16>, vector<8x256xf32> -> vector<8x256xf32>
    %7 = arith.addf %3, %6 : vector<8x256xf32>
    %c0_6 = arith.constant 0 : index
    %c0_7 = arith.constant 0 : index
    %8 = vector.load %arg7[%c0_6, %c0_7] : memref<8x256xf32, #tpu.memory_space<vmem>>, vector<8x256xf32>
    tpu.vector_store %arg7[%c0_6, %c0_7], %7 {strides = array<i32>} : memref<8x256xf32, #tpu.memory_space<vmem>>, vector<8x256xf32>,
    %c8_i32 = arith.constant 8 : i32
    %9 = arith.cmpi eq, %arg2, %c8_i32 : i32
    %10 = arith.extui %9 : i1 to i32
    %c0_i32_8 = arith.constant 0 : i32
    %11 = arith.cmpi ne, %10, %c0_i32_8 : i32
    scf.if %11 {
      %c0_9 = arith.constant 0 : index
      %c0_10 = arith.constant 0 : index
      %12 = vector.load %arg7[%c0_9, %c0_10] : memref<8x256xf32, #tpu.memory_space<vmem>>, vector<8x256xf32>
      %c0_11 = arith.constant 0 : index
      %c0_12 = arith.constant 0 : index
      %13 = vector.load %arg5[%c0_11, %c0_12] : memref<1x256xf32, #tpu.memory_space<vmem>>, vector<1x256xf32>
      %14 = vector.broadcast %13 : vector<1x256xf32> to vector<8x256xf32>
      %15 = arith.addf %12, %14 : vector<8x256xf32>
      %cst_13 = arith.constant 0.000000e+00 : f32
      %16 = vector.broadcast %cst_13 : f32 to vector<8x256xf32>
      %17 = arith.maximumf %15, %16 : vector<8x256xf32>
      %18 = arith.truncf %17 : vector<8x256xf32> to vector<8x256xbf16>
      %c0_14 = arith.constant 0 : index
      %c0_15 = arith.constant 0 : index
      %19 = vector.load %arg6[%c0_14, %c0_15] : memref<8x256xbf16, #tpu.memory_space<vmem>>, vector<8x256xbf16>
      tpu.vector_store %arg6[%c0_14, %c0_15], %18 {strides = array<i32>} : memref<8x256xbf16, #tpu.memory_space<vmem>>, vector<8x256xbf16>,
    } else {
    }
    return
  }
  func.func @transform_0(%arg0: i32, %arg1: i32, %arg2: i32) -> (i32, i32) {
    %c0_i32 = arith.constant 0 : i32
    return %arg0, %arg2 : i32, i32
  }
  func.func @transform_1(%arg0: i32, %arg1: i32, %arg2: i32) -> (i32, i32) {
    %c0_i32 = arith.constant 0 : i32
    return %arg2, %arg1 : i32, i32
  }
  func.func @transform_2(%arg0: i32, %arg1: i32, %arg2: i32) -> (i32, i32) {
    %c0_i32 = arith.constant 0 : i32
    %c0_i32_0 = arith.constant 0 : i32
    return %c0_i32, %arg1 : i32, i32
  }
  func.func @transform_3(%arg0: i32, %arg1: i32, %arg2: i32) -> (i32, i32) {
    %c0_i32 = arith.constant 0 : i32
    return %arg0, %arg1 : i32, i32
  }
}

module attributes {stable_mosaic.version = 11 : i64} {
  func.func @_matmul_bias_act_kernel(%arg0: i32, %arg1: i32, %arg2: i32, %arg3: memref<8x256xbf16, #tpu.memory_space<vmem>>, %arg4: memref<256x256xbf16, #tpu.memory_space<vmem>>, %arg5: memref<1x256xf32, #tpu.memory_space<vmem>>, %arg6: memref<8x256xbf16, #tpu.memory_space<vmem>>, %arg7: memref<8x256xf32, #tpu.memory_space<vmem>>) attributes {dimension_semantics = [#tpu.dimension_semantics<parallel>, #tpu.dimension_semantics<parallel>, #tpu.dimension_semantics<arbitrary>], iteration_bounds = array<i64: 1, 2, 1>, scalar_prefetch = 0 : i64, scratch_operands = 1 : i64, tpu.core_type = #tpu.core_type<tc>, window_params = [{transform_indices = @transform_0, window_bounds = array<i64: 8, 256>}, {transform_indices = @transform_1, window_bounds = array<i64: 256, 256>}, {transform_indices = @transform_2, window_bounds = array<i64: 1, 256>}, {transform_indices = @transform_3, window_bounds = array<i64: 8, 256>}]} {
    %c0_i32 = arith.constant 0 : i32
    %0 = arith.cmpi eq, %arg2, %c0_i32 : i32
    %1 = arith.extui %0 : i1 to i32
    %c0_i32_0 = arith.constant 0 : i32
    %2 = arith.cmpi ne, %1, %c0_i32_0 : i32
    scf.if %2 {
      %cst_10 = arith.constant 0.000000e+00 : f32
      %12 = vector.broadcast %cst_10 : f32 to vector<8x256xf32>
      %c0_11 = arith.constant 0 : index
      %c0_12 = arith.constant 0 : index
      %13 = vector.load %arg7[%c0_11, %c0_12] : memref<8x256xf32, #tpu.memory_space<vmem>>, vector<8x256xf32>
      tpu.vector_store %arg7[%c0_11, %c0_12], %12 {strides = array<i32>} : memref<8x256xf32, #tpu.memory_space<vmem>>, vector<8x256xf32>,
    } else {
    }
    %c0 = arith.constant 0 : index
    %c0_1 = arith.constant 0 : index
    %3 = vector.load %arg7[%c0, %c0_1] : memref<8x256xf32, #tpu.memory_space<vmem>>, vector<8x256xf32>
    %c0_2 = arith.constant 0 : index
    %c0_3 = arith.constant 0 : index
    %4 = vector.load %arg3[%c0_2, %c0_3] : memref<8x256xbf16, #tpu.memory_space<vmem>>, vector<8x256xbf16>
    %c0_4 = arith.constant 0 : index
    %c0_5 = arith.constant 0 : index
    %5 = vector.load %arg4[%c0_4, %c0_5] : memref<256x256xbf16, #tpu.memory_space<vmem>>, vector<256x256xbf16>
    %cst = arith.constant dense<0.000000e+00> : vector<8x256xf32>
    %6 = tpu.matmul %4, %5, %cst {dimension_numbers = #tpu.dot_dimension_numbers<[1], [0], [0], [1], [0, 0, 1, 1], [], []>} : vector<8x256xbf16>, vector<256x256xbf16>, vector<8x256xf32> -> vector<8x256xf32>
    %7 = arith.addf %3, %6 : vector<8x256xf32>
    %c0_6 = arith.constant 0 : index
    %c0_7 = arith.constant 0 : index
    %8 = vector.load %arg7[%c0_6, %c0_7] : memref<8x256xf32, #tpu.memory_space<vmem>>, vector<8x256xf32>
    tpu.vector_store %arg7[%c0_6, %c0_7], %7 {strides = array<i32>} : memref<8x256xf32, #tpu.memory_space<vmem>>, vector<8x256xf32>,
    %c0_i32_8 = arith.constant 0 : i32
    %9 = arith.cmpi eq, %arg2, %c0_i32_8 : i32
    %10 = arith.extui %9 : i1 to i32
    %c0_i32_9 = arith.constant 0 : i32
    %11 = arith.cmpi ne, %10, %c0_i32_9 : i32
    scf.if %11 {
      %c0_10 = arith.constant 0 : index
      %c0_11 = arith.constant 0 : index
      %12 = vector.load %arg7[%c0_10, %c0_11] : memref<8x256xf32, #tpu.memory_space<vmem>>, vector<8x256xf32>
      %c0_12 = arith.constant 0 : index
      %c0_13 = arith.constant 0 : index
      %13 = vector.load %arg5[%c0_12, %c0_13] : memref<1x256xf32, #tpu.memory_space<vmem>>, vector<1x256xf32>
      %14 = vector.broadcast %13 : vector<1x256xf32> to vector<8x256xf32>
      %15 = arith.addf %12, %14 : vector<8x256xf32>
      %16 = arith.truncf %15 : vector<8x256xf32> to vector<8x256xbf16>
      %c0_14 = arith.constant 0 : index
      %c0_15 = arith.constant 0 : index
      %17 = vector.load %arg6[%c0_14, %c0_15] : memref<8x256xbf16, #tpu.memory_space<vmem>>, vector<8x256xbf16>
      tpu.vector_store %arg6[%c0_14, %c0_15], %16 {strides = array<i32>} : memref<8x256xbf16, #tpu.memory_space<vmem>>, vector<8x256xbf16>,
    } else {
    }
    return
  }
  func.func @transform_0(%arg0: i32, %arg1: i32, %arg2: i32) -> (i32, i32) {
    %c0_i32 = arith.constant 0 : i32
    return %arg0, %arg2 : i32, i32
  }
  func.func @transform_1(%arg0: i32, %arg1: i32, %arg2: i32) -> (i32, i32) {
    %c0_i32 = arith.constant 0 : i32
    return %arg2, %arg1 : i32, i32
  }
  func.func @transform_2(%arg0: i32, %arg1: i32, %arg2: i32) -> (i32, i32) {
    %c0_i32 = arith.constant 0 : i32
    %c0_i32_0 = arith.constant 0 : i32
    return %c0_i32, %arg1 : i32, i32
  }
  func.func @transform_3(%arg0: i32, %arg1: i32, %arg2: i32) -> (i32, i32) {
    %c0_i32 = arith.constant 0 : i32
    return %arg0, %arg1 : i32, i32
  }
}

module attributes {stable_mosaic.version = 11 : i64} {
  func.func @_matmul_bias_add_relu_kernel(%arg0: i32, %arg1: i32, %arg2: i32, %arg3: memref<8x256xbf16, #tpu.memory_space<vmem>>, %arg4: memref<256x256xbf16, #tpu.memory_space<vmem>>, %arg5: memref<1x256xf32, #tpu.memory_space<vmem>>, %arg6: memref<8x256xbf16, #tpu.memory_space<vmem>>, %arg7: memref<8x256xbf16, #tpu.memory_space<vmem>>, %arg8: memref<8x256xf32, #tpu.memory_space<vmem>>) attributes {dimension_semantics = [#tpu.dimension_semantics<parallel>, #tpu.dimension_semantics<parallel>, #tpu.dimension_semantics<arbitrary>], iteration_bounds = array<i64: 1, 2, 18>, scalar_prefetch = 0 : i64, scratch_operands = 1 : i64, tpu.core_type = #tpu.core_type<tc>, window_params = [{transform_indices = @transform_0, window_bounds = array<i64: 8, 256>}, {transform_indices = @transform_1, window_bounds = array<i64: 256, 256>}, {transform_indices = @transform_2, window_bounds = array<i64: 1, 256>}, {transform_indices = @transform_3, window_bounds = array<i64: 8, 256>}, {transform_indices = @transform_4, window_bounds = array<i64: 8, 256>}]} {
    %c0_i32 = arith.constant 0 : i32
    %0 = arith.cmpi eq, %arg2, %c0_i32 : i32
    %1 = arith.extui %0 : i1 to i32
    %c0_i32_0 = arith.constant 0 : i32
    %2 = arith.cmpi ne, %1, %c0_i32_0 : i32
    scf.if %2 {
      %cst_9 = arith.constant 0.000000e+00 : f32
      %12 = vector.broadcast %cst_9 : f32 to vector<8x256xf32>
      %c0_10 = arith.constant 0 : index
      %c0_11 = arith.constant 0 : index
      %13 = vector.load %arg8[%c0_10, %c0_11] : memref<8x256xf32, #tpu.memory_space<vmem>>, vector<8x256xf32>
      tpu.vector_store %arg8[%c0_10, %c0_11], %12 {strides = array<i32>} : memref<8x256xf32, #tpu.memory_space<vmem>>, vector<8x256xf32>,
    } else {
    }
    %c0 = arith.constant 0 : index
    %c0_1 = arith.constant 0 : index
    %3 = vector.load %arg8[%c0, %c0_1] : memref<8x256xf32, #tpu.memory_space<vmem>>, vector<8x256xf32>
    %c0_2 = arith.constant 0 : index
    %c0_3 = arith.constant 0 : index
    %4 = vector.load %arg3[%c0_2, %c0_3] : memref<8x256xbf16, #tpu.memory_space<vmem>>, vector<8x256xbf16>
    %c0_4 = arith.constant 0 : index
    %c0_5 = arith.constant 0 : index
    %5 = vector.load %arg4[%c0_4, %c0_5] : memref<256x256xbf16, #tpu.memory_space<vmem>>, vector<256x256xbf16>
    %cst = arith.constant dense<0.000000e+00> : vector<8x256xf32>
    %6 = tpu.matmul %4, %5, %cst {dimension_numbers = #tpu.dot_dimension_numbers<[1], [0], [0], [1], [0, 0, 1, 1], [], []>} : vector<8x256xbf16>, vector<256x256xbf16>, vector<8x256xf32> -> vector<8x256xf32>
    %7 = arith.addf %3, %6 : vector<8x256xf32>
    %c0_6 = arith.constant 0 : index
    %c0_7 = arith.constant 0 : index
    %8 = vector.load %arg8[%c0_6, %c0_7] : memref<8x256xf32, #tpu.memory_space<vmem>>, vector<8x256xf32>
    tpu.vector_store %arg8[%c0_6, %c0_7], %7 {strides = array<i32>} : memref<8x256xf32, #tpu.memory_space<vmem>>, vector<8x256xf32>,
    %c17_i32 = arith.constant 17 : i32
    %9 = arith.cmpi eq, %arg2, %c17_i32 : i32
    %10 = arith.extui %9 : i1 to i32
    %c0_i32_8 = arith.constant 0 : i32
    %11 = arith.cmpi ne, %10, %c0_i32_8 : i32
    scf.if %11 {
      %c0_9 = arith.constant 0 : index
      %c0_10 = arith.constant 0 : index
      %12 = vector.load %arg8[%c0_9, %c0_10] : memref<8x256xf32, #tpu.memory_space<vmem>>, vector<8x256xf32>
      %c0_11 = arith.constant 0 : index
      %c0_12 = arith.constant 0 : index
      %13 = vector.load %arg5[%c0_11, %c0_12] : memref<1x256xf32, #tpu.memory_space<vmem>>, vector<1x256xf32>
      %14 = vector.broadcast %13 : vector<1x256xf32> to vector<8x256xf32>
      %15 = arith.addf %12, %14 : vector<8x256xf32>
      %c0_13 = arith.constant 0 : index
      %c0_14 = arith.constant 0 : index
      %16 = vector.load %arg6[%c0_13, %c0_14] : memref<8x256xbf16, #tpu.memory_space<vmem>>, vector<8x256xbf16>
      %17 = arith.extf %16 : vector<8x256xbf16> to vector<8x256xf32>
      %18 = arith.addf %15, %17 : vector<8x256xf32>
      %cst_15 = arith.constant 0.000000e+00 : f32
      %19 = vector.broadcast %cst_15 : f32 to vector<8x256xf32>
      %20 = arith.maximumf %18, %19 : vector<8x256xf32>
      %21 = arith.truncf %20 : vector<8x256xf32> to vector<8x256xbf16>
      %c0_16 = arith.constant 0 : index
      %c0_17 = arith.constant 0 : index
      %22 = vector.load %arg7[%c0_16, %c0_17] : memref<8x256xbf16, #tpu.memory_space<vmem>>, vector<8x256xbf16>
      tpu.vector_store %arg7[%c0_16, %c0_17], %21 {strides = array<i32>} : memref<8x256xbf16, #tpu.memory_space<vmem>>, vector<8x256xbf16>,
    } else {
    }
    return
  }
  func.func @transform_0(%arg0: i32, %arg1: i32, %arg2: i32) -> (i32, i32) {
    %c0_i32 = arith.constant 0 : i32
    return %arg0, %arg2 : i32, i32
  }
  func.func @transform_1(%arg0: i32, %arg1: i32, %arg2: i32) -> (i32, i32) {
    %c0_i32 = arith.constant 0 : i32
    return %arg2, %arg1 : i32, i32
  }
  func.func @transform_2(%arg0: i32, %arg1: i32, %arg2: i32) -> (i32, i32) {
    %c0_i32 = arith.constant 0 : i32
    %c0_i32_0 = arith.constant 0 : i32
    return %c0_i32, %arg1 : i32, i32
  }
  func.func @transform_3(%arg0: i32, %arg1: i32, %arg2: i32) -> (i32, i32) {
    %c0_i32 = arith.constant 0 : i32
    return %arg0, %arg1 : i32, i32
  }
  func.func @transform_4(%arg0: i32, %arg1: i32, %arg2: i32) -> (i32, i32) {
    %c0_i32 = arith.constant 0 : i32
    return %arg0, %arg1 : i32, i32
  }
}

module attributes {stable_mosaic.version = 11 : i64} {
  func.func @_matmul_bias_act_kernel(%arg0: i32, %arg1: i32, %arg2: i32, %arg3: memref<8x256xbf16, #tpu.memory_space<vmem>>, %arg4: memref<256x256xbf16, #tpu.memory_space<vmem>>, %arg5: memref<1x256xf32, #tpu.memory_space<vmem>>, %arg6: memref<8x256xbf16, #tpu.memory_space<vmem>>, %arg7: memref<8x256xf32, #tpu.memory_space<vmem>>) attributes {dimension_semantics = [#tpu.dimension_semantics<parallel>, #tpu.dimension_semantics<parallel>, #tpu.dimension_semantics<arbitrary>], iteration_bounds = array<i64: 1, 2, 18>, scalar_prefetch = 0 : i64, scratch_operands = 1 : i64, tpu.core_type = #tpu.core_type<tc>, window_params = [{transform_indices = @transform_0, window_bounds = array<i64: 8, 256>}, {transform_indices = @transform_1, window_bounds = array<i64: 256, 256>}, {transform_indices = @transform_2, window_bounds = array<i64: 1, 256>}, {transform_indices = @transform_3, window_bounds = array<i64: 8, 256>}]} {
    %c0_i32 = arith.constant 0 : i32
    %0 = arith.cmpi eq, %arg2, %c0_i32 : i32
    %1 = arith.extui %0 : i1 to i32
    %c0_i32_0 = arith.constant 0 : i32
    %2 = arith.cmpi ne, %1, %c0_i32_0 : i32
    scf.if %2 {
      %cst_9 = arith.constant 0.000000e+00 : f32
      %12 = vector.broadcast %cst_9 : f32 to vector<8x256xf32>
      %c0_10 = arith.constant 0 : index
      %c0_11 = arith.constant 0 : index
      %13 = vector.load %arg7[%c0_10, %c0_11] : memref<8x256xf32, #tpu.memory_space<vmem>>, vector<8x256xf32>
      tpu.vector_store %arg7[%c0_10, %c0_11], %12 {strides = array<i32>} : memref<8x256xf32, #tpu.memory_space<vmem>>, vector<8x256xf32>,
    } else {
    }
    %c0 = arith.constant 0 : index
    %c0_1 = arith.constant 0 : index
    %3 = vector.load %arg7[%c0, %c0_1] : memref<8x256xf32, #tpu.memory_space<vmem>>, vector<8x256xf32>
    %c0_2 = arith.constant 0 : index
    %c0_3 = arith.constant 0 : index
    %4 = vector.load %arg3[%c0_2, %c0_3] : memref<8x256xbf16, #tpu.memory_space<vmem>>, vector<8x256xbf16>
    %c0_4 = arith.constant 0 : index
    %c0_5 = arith.constant 0 : index
    %5 = vector.load %arg4[%c0_4, %c0_5] : memref<256x256xbf16, #tpu.memory_space<vmem>>, vector<256x256xbf16>
    %cst = arith.constant dense<0.000000e+00> : vector<8x256xf32>
    %6 = tpu.matmul %4, %5, %cst {dimension_numbers = #tpu.dot_dimension_numbers<[1], [0], [0], [1], [0, 0, 1, 1], [], []>} : vector<8x256xbf16>, vector<256x256xbf16>, vector<8x256xf32> -> vector<8x256xf32>
    %7 = arith.addf %3, %6 : vector<8x256xf32>
    %c0_6 = arith.constant 0 : index
    %c0_7 = arith.constant 0 : index
    %8 = vector.load %arg7[%c0_6, %c0_7] : memref<8x256xf32, #tpu.memory_space<vmem>>, vector<8x256xf32>
    tpu.vector_store %arg7[%c0_6, %c0_7], %7 {strides = array<i32>} : memref<8x256xf32, #tpu.memory_space<vmem>>, vector<8x256xf32>,
    %c17_i32 = arith.constant 17 : i32
    %9 = arith.cmpi eq, %arg2, %c17_i32 : i32
    %10 = arith.extui %9 : i1 to i32
    %c0_i32_8 = arith.constant 0 : i32
    %11 = arith.cmpi ne, %10, %c0_i32_8 : i32
    scf.if %11 {
      %c0_9 = arith.constant 0 : index
      %c0_10 = arith.constant 0 : index
      %12 = vector.load %arg7[%c0_9, %c0_10] : memref<8x256xf32, #tpu.memory_space<vmem>>, vector<8x256xf32>
      %c0_11 = arith.constant 0 : index
      %c0_12 = arith.constant 0 : index
      %13 = vector.load %arg5[%c0_11, %c0_12] : memref<1x256xf32, #tpu.memory_space<vmem>>, vector<1x256xf32>
      %14 = vector.broadcast %13 : vector<1x256xf32> to vector<8x256xf32>
      %15 = arith.addf %12, %14 : vector<8x256xf32>
      %cst_13 = arith.constant 0.000000e+00 : f32
      %16 = vector.broadcast %cst_13 : f32 to vector<8x256xf32>
      %17 = arith.maximumf %15, %16 : vector<8x256xf32>
      %18 = arith.truncf %17 : vector<8x256xf32> to vector<8x256xbf16>
      %c0_14 = arith.constant 0 : index
      %c0_15 = arith.constant 0 : index
      %19 = vector.load %arg6[%c0_14, %c0_15] : memref<8x256xbf16, #tpu.memory_space<vmem>>, vector<8x256xbf16>
      tpu.vector_store %arg6[%c0_14, %c0_15], %18 {strides = array<i32>} : memref<8x256xbf16, #tpu.memory_space<vmem>>, vector<8x256xbf16>,
    } else {
    }
    return
  }
  func.func @transform_0(%arg0: i32, %arg1: i32, %arg2: i32) -> (i32, i32) {
    %c0_i32 = arith.constant 0 : i32
    return %arg0, %arg2 : i32, i32
  }
  func.func @transform_1(%arg0: i32, %arg1: i32, %arg2: i32) -> (i32, i32) {
    %c0_i32 = arith.constant 0 : i32
    return %arg2, %arg1 : i32, i32
  }
  func.func @transform_2(%arg0: i32, %arg1: i32, %arg2: i32) -> (i32, i32) {
    %c0_i32 = arith.constant 0 : i32
    %c0_i32_0 = arith.constant 0 : i32
    return %c0_i32, %arg1 : i32, i32
  }
  func.func @transform_3(%arg0: i32, %arg1: i32, %arg2: i32) -> (i32, i32) {
    %c0_i32 = arith.constant 0 : i32
    return %arg0, %arg1 : i32, i32
  }
}

module attributes {stable_mosaic.version = 11 : i64} {
  func.func @_matmul_bias_act_kernel(%arg0: i32, %arg1: i32, %arg2: i32, %arg3: memref<8x256xbf16, #tpu.memory_space<vmem>>, %arg4: memref<256x10xbf16, #tpu.memory_space<vmem>>, %arg5: memref<1x10xf32, #tpu.memory_space<vmem>>, %arg6: memref<8x10xf32, #tpu.memory_space<vmem>>, %arg7: memref<8x10xf32, #tpu.memory_space<vmem>>) attributes {dimension_semantics = [#tpu.dimension_semantics<parallel>, #tpu.dimension_semantics<parallel>, #tpu.dimension_semantics<arbitrary>], iteration_bounds = array<i64: 1, 1, 2>, scalar_prefetch = 0 : i64, scratch_operands = 1 : i64, tpu.core_type = #tpu.core_type<tc>, window_params = [{transform_indices = @transform_0, window_bounds = array<i64: 8, 256>}, {transform_indices = @transform_1, window_bounds = array<i64: 256, 10>}, {transform_indices = @transform_2, window_bounds = array<i64: 1, 10>}, {transform_indices = @transform_3, window_bounds = array<i64: 8, 10>}]} {
    %c0_i32 = arith.constant 0 : i32
    %0 = arith.cmpi eq, %arg2, %c0_i32 : i32
    %1 = arith.extui %0 : i1 to i32
    %c0_i32_0 = arith.constant 0 : i32
    %2 = arith.cmpi ne, %1, %c0_i32_0 : i32
    scf.if %2 {
      %cst_9 = arith.constant 0.000000e+00 : f32
      %12 = vector.broadcast %cst_9 : f32 to vector<8x10xf32>
      %c0_10 = arith.constant 0 : index
      %c0_11 = arith.constant 0 : index
      %13 = vector.load %arg7[%c0_10, %c0_11] : memref<8x10xf32, #tpu.memory_space<vmem>>, vector<8x10xf32>
      tpu.vector_store %arg7[%c0_10, %c0_11], %12 {strides = array<i32>} : memref<8x10xf32, #tpu.memory_space<vmem>>, vector<8x10xf32>,
    } else {
    }
    %c0 = arith.constant 0 : index
    %c0_1 = arith.constant 0 : index
    %3 = vector.load %arg7[%c0, %c0_1] : memref<8x10xf32, #tpu.memory_space<vmem>>, vector<8x10xf32>
    %c0_2 = arith.constant 0 : index
    %c0_3 = arith.constant 0 : index
    %4 = vector.load %arg3[%c0_2, %c0_3] : memref<8x256xbf16, #tpu.memory_space<vmem>>, vector<8x256xbf16>
    %c0_4 = arith.constant 0 : index
    %c0_5 = arith.constant 0 : index
    %5 = vector.load %arg4[%c0_4, %c0_5] : memref<256x10xbf16, #tpu.memory_space<vmem>>, vector<256x10xbf16>
    %cst = arith.constant dense<0.000000e+00> : vector<8x10xf32>
    %6 = tpu.matmul %4, %5, %cst {dimension_numbers = #tpu.dot_dimension_numbers<[1], [0], [0], [1], [0, 0, 1, 1], [], []>} : vector<8x256xbf16>, vector<256x10xbf16>, vector<8x10xf32> -> vector<8x10xf32>
    %7 = arith.addf %3, %6 : vector<8x10xf32>
    %c0_6 = arith.constant 0 : index
    %c0_7 = arith.constant 0 : index
    %8 = vector.load %arg7[%c0_6, %c0_7] : memref<8x10xf32, #tpu.memory_space<vmem>>, vector<8x10xf32>
    tpu.vector_store %arg7[%c0_6, %c0_7], %7 {strides = array<i32>} : memref<8x10xf32, #tpu.memory_space<vmem>>, vector<8x10xf32>,
    %c1_i32 = arith.constant 1 : i32
    %9 = arith.cmpi eq, %arg2, %c1_i32 : i32
    %10 = arith.extui %9 : i1 to i32
    %c0_i32_8 = arith.constant 0 : i32
    %11 = arith.cmpi ne, %10, %c0_i32_8 : i32
    scf.if %11 {
      %c0_9 = arith.constant 0 : index
      %c0_10 = arith.constant 0 : index
      %12 = vector.load %arg7[%c0_9, %c0_10] : memref<8x10xf32, #tpu.memory_space<vmem>>, vector<8x10xf32>
      %c0_11 = arith.constant 0 : index
      %c0_12 = arith.constant 0 : index
      %13 = vector.load %arg5[%c0_11, %c0_12] : memref<1x10xf32, #tpu.memory_space<vmem>>, vector<1x10xf32>
      %14 = vector.broadcast %13 : vector<1x10xf32> to vector<8x10xf32>
      %15 = arith.addf %12, %14 : vector<8x10xf32>
      %c0_13 = arith.constant 0 : index
      %c0_14 = arith.constant 0 : index
      %16 = vector.load %arg6[%c0_13, %c0_14] : memref<8x10xf32, #tpu.memory_space<vmem>>, vector<8x10xf32>
      tpu.vector_store %arg6[%c0_13, %c0_14], %15 {strides = array<i32>} : memref<8x10xf32, #tpu.memory_space<vmem>>, vector<8x10xf32>,
    } else {
    }
    return
  }
  func.func @transform_0(%arg0: i32, %arg1: i32, %arg2: i32) -> (i32, i32) {
    %c0_i32 = arith.constant 0 : i32
    return %arg0, %arg2 : i32, i32
  }
  func.func @transform_1(%arg0: i32, %arg1: i32, %arg2: i32) -> (i32, i32) {
    %c0_i32 = arith.constant 0 : i32
    return %arg2, %arg1 : i32, i32
  }
  func.func @transform_2(%arg0: i32, %arg1: i32, %arg2: i32) -> (i32, i32) {
    %c0_i32 = arith.constant 0 : i32
    %c0_i32_0 = arith.constant 0 : i32
    return %c0_i32, %arg1 : i32, i32
  }
  func.func @transform_3(%arg0: i32, %arg1: i32, %arg2: i32) -> (i32, i32) {
    %c0_i32 = arith.constant 0 : i32
    return %arg0, %arg1 : i32, i32
  }
}

</mosaic_0001>

<bundles_post_ra>
// kernel: resnet34_forward.37
= control target key start
LH: loop header
LB: loop body
LE: loop exit
PB: predicated region body
PF: predicated region fallthrough
CT: control target
= control target key end

     0   :  { %s1654_s12 = smov 0   ;;  %s1656_s13 = smov 0   ;;  %s1940_s0 = inlined_call_operand.vmem [shape: bf16[512,256], index: 0, kind: input, shape index: {}]   ;;  %s1941_s1 = inlined_call_operand.vmem [shape: bf16[256,64], index: 1, kind: input, shape index: {}]   ;;  %s1942_s2 = inlined_call_operand.vmem [shape: f32[1,64], index: 2, kind: input, shape index: {}]   ;;  %s1943_s3 = inlined_call_operand.vmem [shape: bf16[512,64], index: 3, kind: output, shape index: {}]  }
   0x1   :  { %s1658_s14 = smov 0  }
   0x2 LB: > { %s32_s15 = sadd.s32 1, %s1627_s13  ;;  %p1270_p0 = scmp.ge.s32.totalorder %s1631_s14, 1  ;;  %s1631_s14 = sphi %s1658_s14, %s13_s14   ;;  %s1627_s13 = sphi %s1656_s13, %s1945_s13   ;;  %s1623_s12 = sphi %s1654_s12, %s1944_s12  }
   0x3   : > { %p34_p1 = scmp.ge.s32.totalorder %s32_s15, 2  ;;  %p191_p2 = scmp.lt.s32.totalorder %s1631_s14, 3 }
   0x5   : > { %s1947_s15 = smov (%p34_p1, %s32_s15), 0  ;;  %p192_p3 = pnand %p1270_p0, %p191_p2 }
   0x6   : > { %s1271_s18 = sshll.u32 (!%p192_p3), %s1623_s12, 5 }
   0x7   : > { %195 = sbr.rel (%p192_p3) target bundleno = 320 (0x140), region = 32  ;;  %p236_p4 = scmp.lt.s32.totalorder (!%p192_p3), %s1271_s18, 63 }
   0xc   : > { %v1545_v0 = vld [vmem:[%s1941_s1 + $0x78] sm:$0xff]   ;;  %v1547_v2 = vld [vmem:[%s1941_s1 + $0x70] sm:$0xff]   ;;  %v1549_v4 = vld [vmem:[%s1941_s1 + $0x68] sm:$0xff]   ;;  %s1949_s18 = smov (!%p236_p4, %s1271_s18), 63  ;;  %vm272_vm0 = vcmask 523264   ;;  %v1633_v48 = vmov 0.0  }
   0xd   : > { %v1546_v1 = vld [vmem:[%s1941_s1 + $0x38] sm:$0xff]   ;;  %1392 = vmatprep.subr.bf16.mxu0 %v1545_v0  ;;  %1504 = vmatprep.subr.bf16.mxu1 %v1545_v0  ;;  %v1548_v3 = vld [vmem:[%s1941_s1 + $0x30] sm:$0xff]   ;;  %v1550_v5 = vld [vmem:[%s1941_s1 + $0x28] sm:$0xff]   ;;  %s1359_s6 = sshll.u32 %s1949_s18, 3  ;;  %273 = vst.msk [vmem:[#allocation2] sm:$0xff] %vm272_vm0, %v1633_v48  ;;  %s1275_s5 = sshll.u32 %s1949_s18, 2 }
   0xe   : > { %1393 = vmatpush3.bf16.msra.mxu0 %v1546_v1  ;;  %1512 = vmatpush3.bf16.msra.mxu1 %v1546_v1  ;;  %v1551_v6 = vld [vmem:[%s1941_s1 + $0x60] sm:$0xff]   ;;  %v1553_v8 = vld [vmem:[%s1941_s1 + $0x58] sm:$0xff]   ;;  %s1705_s11 = scalar_lea.vmem %s1940_s0, %s1359_s6  ;;  %v1555_v10 = vld [vmem:[%s1941_s1 + $0x50] sm:$0xff]   ;;  %274 = vst.msk [vmem:[#allocation2 + $0x8] sm:$0xff] %vm272_vm0, %v1633_v48  ;;  %s1809_s18 = scalar_lea.vmem %s1943_s3, %s1275_s5  ;;  %vm1117_vm1 = vcmask 519168  }
   0xf   : > { %1394 = vmatprep.subr.bf16.mxu0 %v1547_v2  ;;  %1505 = vmatprep.subr.bf16.mxu1 %v1547_v2  ;;  %v1552_v7 = vld [vmem:[%s1941_s1 + $0x20] sm:$0xff]   ;;  %v1554_v9 = vld [vmem:[%s1941_s1 + $0x18] sm:$0xff]   ;;  %v1556_v13 = vld [vmem:[%s1941_s1 + $0x10] sm:$0xff]   ;;  %275 = vst.msk [vmem:[#allocation2 + $0x10] sm:$0xff] %vm272_vm0, %v1633_v48 }
  0x10   : > { %v1563_v11 = vld [vmem:[%s1705_s11 + $0x4] ss:$8 sps:$4 sm:$0xff]   ;;  %v1561_v18 = vld [vmem:[%s1705_s11] ss:$8 sps:$4 sm:$0xff]   ;;  %v1567_v20 = vld [vmem:[%s1705_s11 + $0x14] ss:$8 sps:$4 sm:$0xff]  }
  0x11   : > { %v1566_v12 = vld [vmem:[%s1705_s11 + $0x84] ss:$8 sps:$4 sm:$0xff]   ;;  %689 = vmatprep.mubr.bf16.mxu0 %v1563_v11  ;;  %v1564_v19 = vld [vmem:[%s1705_s11 + $0x80] ss:$8 sps:$4 sm:$0xff]   ;;  %v1569_v21 = vld [vmem:[%s1705_s11 + $0x94] ss:$8 sps:$4 sm:$0xff]  }
  0x12   : > { %1395 = vmatpush3.bf16.msra.mxu0 %v1548_v3  ;;  %1513 = vmatpush3.bf16.msra.mxu1 %v1548_v3  ;;  %v1557_v14 = vld [vmem:[%s1941_s1 + $0x48] sm:$0xff]   ;;  %v1559_v16 = vld [vmem:[%s1941_s1 + $0x40] sm:$0xff]   ;;  %v1571_v22 = vld [vmem:[%s1705_s11 + $0x10] ss:$8 sps:$4 sm:$0xff]   ;;  %276 = vst.msk [vmem:[#allocation2 + $0x18] sm:$0xff] %vm272_vm0, %v1633_v48 }
  0x13   : > { %1396 = vmatprep.subr.bf16.mxu0 %v1549_v4  ;;  %1506 = vmatprep.subr.bf16.mxu1 %v1549_v4  ;;  %v1558_v15 = vld [vmem:[%s1941_s1 + $0x8] sm:$0xff]   ;;  %v1560_v17 = vld [vmem:[%s1941_s1] sm:$0xff]   ;;  %v1572_v23 = vld [vmem:[%s1705_s11 + $0x90] ss:$8 sps:$4 sm:$0xff]   ;;  %277 = vst.msk [vmem:[#allocation2 + $0x20] sm:$0xff] %vm272_vm0, %v1633_v48 }
  0x14   : > { %753 = vmatprep.mubr.bf16.mxu1 %v1566_v12  ;;  %v1573_v24 = vld [vmem:[%s1705_s11 + $0x24] ss:$8 sps:$4 sm:$0xff]   ;;  %v1577_v26 = vld [vmem:[%s1705_s11 + $0x20] ss:$8 sps:$4 sm:$0xff]   ;;  %v1579_v28 = vld [vmem:[%s1705_s11 + $0x34] ss:$8 sps:$4 sm:$0xff]  }
  0x15   : > { %v1575_v25 = vld [vmem:[%s1705_s11 + $0xa4] ss:$8 sps:$4 sm:$0xff]   ;;  %v1578_v27 = vld [vmem:[%s1705_s11 + $0xa0] ss:$8 sps:$4 sm:$0xff]   ;;  %v1581_v29 = vld [vmem:[%s1705_s11 + $0xb4] ss:$8 sps:$4 sm:$0xff]  }
  0x16   : > { %1397 = vmatpush3.bf16.msra.mxu0 %v1550_v5  ;;  %1514 = vmatpush3.bf16.msra.mxu1 %v1550_v5  ;;  %v1583_v30 = vld [vmem:[%s1705_s11 + $0x30] ss:$8 sps:$4 sm:$0xff]   ;;  %v1585_v32 = vld [vmem:[%s1705_s11 + $0x44] ss:$8 sps:$4 sm:$0xff]   ;;  %v1589_v34 = vld [vmem:[%s1705_s11 + $0x40] ss:$8 sps:$4 sm:$0xff]  }
  0x17   : > { %1398 = vmatprep.subr.bf16.mxu0 %v1551_v6  ;;  %1507 = vmatprep.subr.bf16.mxu1 %v1551_v6  ;;  %v1584_v31 = vld [vmem:[%s1705_s11 + $0xb0] ss:$8 sps:$4 sm:$0xff]   ;;  %v1587_v33 = vld [vmem:[%s1705_s11 + $0xc4] ss:$8 sps:$4 sm:$0xff]   ;;  %v1590_v35 = vld [vmem:[%s1705_s11 + $0xc0] ss:$8 sps:$4 sm:$0xff]  }
  0x18   : > { %v1591_v36 = vld [vmem:[%s1705_s11 + $0x54] ss:$8 sps:$4 sm:$0xff]   ;;  %v1595_v38 = vld [vmem:[%s1705_s11 + $0x50] ss:$8 sps:$4 sm:$0xff]   ;;  %v1597_v40 = vld [vmem:[%s1705_s11 + $0x64] ss:$8 sps:$4 sm:$0xff]  }
  0x19   : > { %v1593_v37 = vld [vmem:[%s1705_s11 + $0xd4] ss:$8 sps:$4 sm:$0xff]   ;;  %v1596_v39 = vld [vmem:[%s1705_s11 + $0xd0] ss:$8 sps:$4 sm:$0xff]   ;;  %v1599_v41 = vld [vmem:[%s1705_s11 + $0xe4] ss:$8 sps:$4 sm:$0xff]  }
  0x1a   : > { %1399 = vmatpush3.bf16.msra.mxu0 %v1552_v7  ;;  %1515 = vmatpush3.bf16.msra.mxu1 %v1552_v7  ;;  %v1601_v42 = vld [vmem:[%s1705_s11 + $0x60] ss:$8 sps:$4 sm:$0xff]   ;;  %v1603_v44 = vld [vmem:[%s1705_s11 + $0x74] ss:$8 sps:$4 sm:$0xff]   ;;  %v1607_v46 = vld [vmem:[%s1705_s11 + $0x70] ss:$8 sps:$4 sm:$0xff]  }
  0x1b   : > { %1400 = vmatprep.subr.bf16.mxu0 %v1553_v8  ;;  %1508 = vmatprep.subr.bf16.mxu1 %v1553_v8  ;;  %v1602_v43 = vld [vmem:[%s1705_s11 + $0xe0] ss:$8 sps:$4 sm:$0xff]   ;;  %v1605_v45 = vld [vmem:[%s1705_s11 + $0xf4] ss:$8 sps:$4 sm:$0xff]   ;;  %v1608_v47 = vld [vmem:[%s1705_s11 + $0xf0] ss:$8 sps:$4 sm:$0xff]  }
  0x1c   : > { %278 = vst.msk [vmem:[#allocation2 + $0x28] sm:$0xff] %vm272_vm0, %v1633_v48  ;;  %279 = vst.msk [vmem:[#allocation2 + $0x30] sm:$0xff] %vm272_vm0, %v1633_v48  ;;  %v305_v51 = vld [vmem:[#allocation2] sm:$0xff]  ;;  %v306_v61 = vld [vmem:[#allocation2 + $0x8] sm:$0xff] }
  0x1d   : > { %280 = vst.msk [vmem:[#allocation2 + $0x38] sm:$0xff] %vm272_vm0, %v1633_v48  ;;  %281 = vst.msk [vmem:[#allocation2 + $0x40] sm:$0xff] %vm272_vm0, %v1633_v48  ;;  %v307_v7 = vld [vmem:[#allocation2 + $0x10] sm:$0xff] }
  0x1e   : > { %1401 = vmatpush3.bf16.msra.mxu0 %v1554_v9  ;;  %1516 = vmatpush3.bf16.msra.mxu1 %v1554_v9  ;;  %282 = vst.msk [vmem:[#allocation2 + $0x48] sm:$0xff] %vm272_vm0, %v1633_v48  ;;  %283 = vst.msk [vmem:[#allocation2 + $0x50] sm:$0xff] %vm272_vm0, %v1633_v48 }
  0x1f   : > { %1402 = vmatprep.subr.bf16.mxu0 %v1555_v10  ;;  %1509 = vmatprep.subr.bf16.mxu1 %v1555_v10  ;;  %284 = vst.msk [vmem:[#allocation2 + $0x58] sm:$0xff] %vm272_vm0, %v1633_v48  ;;  %285 = vst.msk [vmem:[#allocation2 + $0x60] sm:$0xff] %vm272_vm0, %v1633_v48 }
  0x20   : > { %286 = vst.msk [vmem:[#allocation2 + $0x68] sm:$0xff] %vm272_vm0, %v1633_v48  ;;  %287 = vst.msk [vmem:[#allocation2 + $0x70] sm:$0xff] %vm272_vm0, %v1633_v48 }
  0x21   : > { %288 = vst.msk [vmem:[#allocation2 + $0x78] sm:$0xff] %vm272_vm0, %v1633_v48  ;;  %289 = vst.msk [vmem:[#allocation2 + $0x80] sm:$0xff] %vm272_vm0, %v1633_v48 }
  0x22   : > { %1403 = vmatpush3.bf16.msra.mxu0 %v1556_v13  ;;  %1517 = vmatpush3.bf16.msra.mxu1 %v1556_v13  ;;  %290 = vst.msk [vmem:[#allocation2 + $0x88] sm:$0xff] %vm272_vm0, %v1633_v48  ;;  %291 = vst.msk [vmem:[#allocation2 + $0x90] sm:$0xff] %vm272_vm0, %v1633_v48  ;;  %v1799_v13 = vld [vmem:[%s1942_s2] ss:$0 sm:$0xff] }
  0x23   : > { %1404 = vmatprep.subr.bf16.mxu0 %v1557_v14  ;;  %1510 = vmatprep.subr.bf16.mxu1 %v1557_v14  ;;  %292 = vst.msk [vmem:[#allocation2 + $0x98] sm:$0xff] %vm272_vm0, %v1633_v48  ;;  %293 = vst.msk [vmem:[#allocation2 + $0xa0] sm:$0xff] %vm272_vm0, %v1633_v48 }
  0x24   : > { %294 = vst.msk [vmem:[#allocation2 + $0xa8] sm:$0xff] %vm272_vm0, %v1633_v48  ;;  %295 = vst.msk [vmem:[#allocation2 + $0xb0] sm:$0xff] %vm272_vm0, %v1633_v48 }
  0x25   : > { %296 = vst.msk [vmem:[#allocation2 + $0xb8] sm:$0xff] %vm272_vm0, %v1633_v48  ;;  %297 = vst.msk [vmem:[#allocation2 + $0xc0] sm:$0xff] %vm272_vm0, %v1633_v48 }
  0x26   : > { %1405 = vmatpush3.bf16.msra.mxu0 %v1558_v15  ;;  %1518 = vmatpush3.bf16.msra.mxu1 %v1558_v15  ;;  %298 = vst.msk [vmem:[#allocation2 + $0xc8] sm:$0xff] %vm272_vm0, %v1633_v48  ;;  %299 = vst.msk [vmem:[#allocation2 + $0xd0] sm:$0xff] %vm272_vm0, %v1633_v48 }
  0x27   : > { %1406 = vmatprep.subr.bf16.mxu0 %v1559_v16  ;;  %1511 = vmatprep.subr.bf16.mxu1 %v1559_v16  ;;  %300 = vst.msk [vmem:[#allocation2 + $0xd8] sm:$0xff] %vm272_vm0, %v1633_v48  ;;  %301 = vst.msk [vmem:[#allocation2 + $0xe0] sm:$0xff] %vm272_vm0, %v1633_v48 }
  0x28   : > { %302 = vst.msk [vmem:[#allocation2 + $0xe8] sm:$0xff] %vm272_vm0, %v1633_v48  ;;  %303 = vst.msk [vmem:[#allocation2 + $0xf0] sm:$0xff] %vm272_vm0, %v1633_v48  ;;  %v321_v53 = vld [vmem:[#allocation2 + $0x80] sm:$0xff] }
  0x29   : > { %304 = vst.msk [vmem:[#allocation2 + $0xf8] sm:$0xff] %vm272_vm0, %v1633_v48  ;;  %v322_v63 = vld [vmem:[#allocation2 + $0x88] sm:$0xff]  ;;  %v323_v9 = vld [vmem:[#allocation2 + $0x90] sm:$0xff] }
  0x2a   : > { %1407 = vmatpush3.bf16.msra.mxu0 %v1560_v17  ;;  %1519 = vmatpush3.bf16.msra.mxu1 %v1560_v17 }
  0x2d   : > { %690 = vmatmul.mubr.bf16.vlgmr.msra.gmra.mxu0 %v1561_v18  ;;  %754 = vmatmul.mubr.bf16.vlgmr.msra.gmra.mxu1 %v1564_v19  ;;  %v308_v18 = vld [vmem:[#allocation2 + $0x18] sm:$0xff] }
  0x2e   : > { %697 = vmatprep.mubr.bf16.mxu0 %v1567_v20  ;;  %761 = vmatprep.mubr.bf16.mxu1 %v1569_v21 }
  0x35   : > { %698 = vmatmul.mubr.bf16.gmra.mxu0 %v1571_v22  ;;  %762 = vmatmul.mubr.bf16.gmra.mxu1 %v1572_v23  ;;  %v324_v22 = vld [vmem:[#allocation2 + $0x98] sm:$0xff] }
  0x36   : > { %705 = vmatprep.mubr.bf16.mxu0 %v1573_v24  ;;  %769 = vmatprep.mubr.bf16.mxu1 %v1575_v25 }
  0x3d   : > { %706 = vmatmul.mubr.bf16.gmra.mxu0 %v1577_v26  ;;  %770 = vmatmul.mubr.bf16.gmra.mxu1 %v1578_v27 }
  0x3e   : > { %713 = vmatprep.mubr.bf16.mxu0 %v1579_v28  ;;  %777 = vmatprep.mubr.bf16.mxu1 %v1581_v29 }
  0x45   : > { %714 = vmatmul.mubr.bf16.gmra.mxu0 %v1583_v30  ;;  %778 = vmatmul.mubr.bf16.gmra.mxu1 %v1584_v31 }
  0x46   : > { %721 = vmatprep.mubr.bf16.mxu0 %v1585_v32  ;;  %785 = vmatprep.mubr.bf16.mxu1 %v1587_v33 }
  0x4d   : > { %722 = vmatmul.mubr.bf16.gmra.mxu0 %v1589_v34  ;;  %786 = vmatmul.mubr.bf16.gmra.mxu1 %v1590_v35 }
  0x4e   : > { %729 = vmatprep.mubr.bf16.mxu0 %v1591_v36  ;;  %793 = vmatprep.mubr.bf16.mxu1 %v1593_v37 }
  0x55   : > { %730 = vmatmul.mubr.bf16.gmra.mxu0 %v1595_v38  ;;  %794 = vmatmul.mubr.bf16.gmra.mxu1 %v1596_v39 }
  0x56   : > { %737 = vmatprep.mubr.bf16.mxu0 %v1597_v40  ;;  %801 = vmatprep.mubr.bf16.mxu1 %v1599_v41 }
  0x5d   : > { %738 = vmatmul.mubr.bf16.gmra.mxu0 %v1601_v42  ;;  %802 = vmatmul.mubr.bf16.gmra.mxu1 %v1602_v43  ;;  %v309_v42 = vld [vmem:[#allocation2 + $0x20] sm:$0xff] }
  0x5e   : > { %745 = vmatprep.mubr.bf16.mxu0 %v1603_v44  ;;  %809 = vmatprep.mubr.bf16.mxu1 %v1605_v45  ;;  %v325_v43 = vld [vmem:[#allocation2 + $0xa0] sm:$0xff] }
  0x65   : > { %746 = vmatmul.mubr.bf16.gmra.mxu0 %v1607_v46  ;;  %810 = vmatmul.mubr.bf16.gmra.mxu1 %v1608_v47 }
  0xed   : > { %v1408_v49 = vpop.f32.mrf.mxu0  ;;  %v1456_v50 = vpop.f32.mrf.mxu1 }
  0xef   : > { %v1409_v52 = vpop.f32.mrf.mxu0  ;;  %v1457_v54 = vpop.f32.mrf.mxu1 }
  0xf0   : > { %v1410_v55 = vadd.f32 %v1409_v52, %v1408_v49  ;;  %v1458_v56 = vadd.f32 %v1457_v54, %v1456_v50 }
  0xf1   : > { %v1411_v57 = vpop.f32.mrf.mxu0  ;;  %v1459_v58 = vpop.f32.mrf.mxu1 }
  0xf2   : > { %v818_v59 = vadd.f32 %v1410_v55, %v305_v51  ;;  %v834_v60 = vadd.f32 %v1458_v56, %v321_v53 }
  0xf3   : > { %v1412_v62 = vpop.f32.mrf.mxu0  ;;  %v1460_v0 = vpop.f32.mrf.mxu1 }
  0xf4   : > { %851 = vst.msk [vmem:[#allocation2] sm:$0xff] %vm272_vm0, %v818_v59  ;;  %867 = vst.msk [vmem:[#allocation2 + $0x80] sm:$0xff] %vm272_vm0, %v834_v60  ;;  %v1413_v1 = vadd.f32 %v1412_v62, %v1411_v57  ;;  %v1461_v2 = vadd.f32 %v1460_v0, %v1459_v58  ;;  %v310_v60 = vld [vmem:[#allocation2 + $0x28] sm:$0xff] }
  0xf5   : > { %v1414_v3 = vpop.f32.mrf.mxu0  ;;  %v1462_v4 = vpop.f32.mrf.mxu1 }
  0xf6   : > { %v819_v5 = vadd.f32 %v1413_v1, %v306_v61  ;;  %v835_v6 = vadd.f32 %v1461_v2, %v322_v63  ;;  %v326_v61 = vld [vmem:[#allocation2 + $0xa8] sm:$0xff] }
  0xf7   : > { %v1415_v8 = vpop.f32.mrf.mxu0  ;;  %v1463_v10 = vpop.f32.mrf.mxu1 }
  0xf8   : > { %852 = vst.msk [vmem:[#allocation2 + $0x8] sm:$0xff] %vm272_vm0, %v819_v5  ;;  %868 = vst.msk [vmem:[#allocation2 + $0x88] sm:$0xff] %vm272_vm0, %v835_v6  ;;  %v1416_v11 = vadd.f32 %v1415_v8, %v1414_v3  ;;  %v1464_v12 = vadd.f32 %v1463_v10, %v1462_v4 }
  0xf9   : > { %v1417_v14 = vpop.f32.mrf.mxu0  ;;  %v1465_v15 = vpop.f32.mrf.mxu1 }
  0xfa   : > { %v820_v16 = vadd.f32 %v1416_v11, %v307_v7  ;;  %v836_v17 = vadd.f32 %v1464_v12, %v323_v9 }
  0xfb   : > { %v886_v19 = vld [vmem:[#allocation2] sm:$0xff]  ;;  %v1418_v21 = vpop.f32.mrf.mxu0  ;;  %v1466_v23 = vpop.f32.mrf.mxu1 }
  0xfc   : > { %v902_v20 = vld [vmem:[#allocation2 + $0x80] sm:$0xff]  ;;  %v925_v24 = vadd.f32 %v1799_v13, %v886_v19  ;;  %853 = vst.msk [vmem:[#allocation2 + $0x10] sm:$0xff] %vm272_vm0, %v820_v16  ;;  %869 = vst.msk [vmem:[#allocation2 + $0x90] sm:$0xff] %vm272_vm0, %v836_v17  ;;  %v1419_v26 = vadd.f32 %v1418_v21, %v1417_v14  ;;  %v1467_v27 = vadd.f32 %v1466_v23, %v1465_v15  ;;  %v311_v15 = vld [vmem:[#allocation2 + $0x30] sm:$0xff] }
  0xfd   : > { %v941_v25 = vadd.f32 %v1799_v13, %v902_v20  ;;  %v1420_v28 = vpop.f32.mrf.mxu0  ;;  %v1468_v29 = vpop.f32.mrf.mxu1  ;;  %v327_v16 = vld [vmem:[#allocation2 + $0xb0] sm:$0xff] }
  0xfe   : > { %v957_v30 = vmax.f32 %v925_v24, 0.0  ;;  %v821_v32 = vadd.f32 %v1419_v26, %v308_v18  ;;  %v837_v33 = vadd.f32 %v1467_v27, %v324_v22  ;;  %v328_v27 = vld [vmem:[#allocation2 + $0xb8] sm:$0xff] }
  0xff   : > { %v973_v31 = vmax.f32 %v941_v25, 0.0  ;;  %v887_v34 = vld [vmem:[#allocation2 + $0x8] sm:$0xff]  ;;  %v1421_v36 = vpop.f32.mrf.mxu0  ;;  %v1469_v37 = vpop.f32.mrf.mxu1  ;;  %v312_v25 = vld [vmem:[#allocation2 + $0x38] sm:$0xff] }
 0x100   : > { %v903_v35 = vld [vmem:[#allocation2 + $0x88] sm:$0xff]  ;;  %v1360_v38 = vpack.c.bf16 %v957_v30, %v957_v30  ;;  %v926_v40 = vadd.f32 %v1799_v13, %v887_v34  ;;  %854 = vst.msk [vmem:[#allocation2 + $0x18] sm:$0xff] %vm272_vm0, %v821_v32  ;;  %870 = vst.msk [vmem:[#allocation2 + $0x98] sm:$0xff] %vm272_vm0, %v837_v33  ;;  %v1422_v44 = vadd.f32 %v1421_v36, %v1420_v28 }
 0x101   : > { %v1376_v39 = vpack.c.bf16 %v973_v31, %v973_v31  ;;  %v942_v41 = vadd.f32 %v1799_v13, %v903_v35  ;;  %v1470_v45 = vadd.f32 %v1469_v37, %v1468_v29  ;;  %v1423_v46 = vpop.f32.mrf.mxu0  ;;  %v1471_v47 = vpop.f32.mrf.mxu1 }
 0x102   : > { %1118 = vst.msk [vmem:[%s1809_s18] sm:$0xf] %vm1117_vm1, %v1360_v38  ;;  %v958_v48 = vmax.f32 %v926_v40, 0.0  ;;  %v822_v52 = vadd.f32 %v1422_v44, %v309_v42 }
 0x103   : > { %1134 = vst.msk [vmem:[%s1809_s18 + $0x40] sm:$0xf] %vm1117_vm1, %v1376_v39  ;;  %v974_v49 = vmax.f32 %v942_v41, 0.0  ;;  %v888_v50 = vld [vmem:[#allocation2 + $0x10] sm:$0xff]  ;;  %v838_v53 = vadd.f32 %v1470_v45, %v325_v43  ;;  %v1424_v54 = vpop.f32.mrf.mxu0  ;;  %v1472_v55 = vpop.f32.mrf.mxu1  ;;  %v313_v43 = vld [vmem:[#allocation2 + $0x40] sm:$0xff] }
 0x104   : > { %v904_v51 = vld [vmem:[#allocation2 + $0x90] sm:$0xff]  ;;  %v1361_v56 = vpack.c.bf16 %v958_v48, %v958_v48  ;;  %v927_v58 = vadd.f32 %v1799_v13, %v888_v50  ;;  %855 = vst.msk [vmem:[#allocation2 + $0x20] sm:$0xff] %vm272_vm0, %v822_v52  ;;  %v1425_v62 = vadd.f32 %v1424_v54, %v1423_v46  ;;  %v1473_v63 = vadd.f32 %v1472_v55, %v1471_v47  ;;  %v329_v45 = vld [vmem:[#allocation2 + $0xc0] sm:$0xff] }
 0x105   : > { %v1377_v57 = vpack.c.bf16 %v974_v49, %v974_v49  ;;  %v943_v59 = vadd.f32 %v1799_v13, %v904_v51  ;;  %871 = vst.msk [vmem:[#allocation2 + $0xa0] sm:$0xff] %vm272_vm0, %v838_v53  ;;  %v1426_v0 = vpop.f32.mrf.mxu0  ;;  %v1474_v1 = vpop.f32.mrf.mxu1 }
 0x106   : > { %1119 = vst.msk [vmem:[%s1809_s18 + $0x4] sm:$0xf] %vm1117_vm1, %v1361_v56  ;;  %v959_v2 = vmax.f32 %v927_v58, 0.0  ;;  %v823_v6 = vadd.f32 %v1425_v62, %v310_v60  ;;  %v839_v7 = vadd.f32 %v1473_v63, %v326_v61  ;;  %v314_v61 = vld [vmem:[#allocation2 + $0x48] sm:$0xff] }
 0x107   : > { %1135 = vst.msk [vmem:[%s1809_s18 + $0x44] sm:$0xf] %vm1117_vm1, %v1377_v57  ;;  %v975_v3 = vmax.f32 %v943_v59, 0.0  ;;  %v889_v4 = vld [vmem:[#allocation2 + $0x18] sm:$0xff]  ;;  %v1427_v8 = vpop.f32.mrf.mxu0  ;;  %v1475_v9 = vpop.f32.mrf.mxu1  ;;  %v330_v63 = vld [vmem:[#allocation2 + $0xc8] sm:$0xff] }
 0x108   : > { %v905_v5 = vld [vmem:[#allocation2 + $0x98] sm:$0xff]  ;;  %v1362_v10 = vpack.c.bf16 %v959_v2, %v959_v2  ;;  %v928_v12 = vadd.f32 %v1799_v13, %v889_v4  ;;  %856 = vst.msk [vmem:[#allocation2 + $0x28] sm:$0xff] %vm272_vm0, %v823_v6  ;;  %872 = vst.msk [vmem:[#allocation2 + $0xa8] sm:$0xff] %vm272_vm0, %v839_v7  ;;  %v1428_v17 = vadd.f32 %v1427_v8, %v1426_v0 }
 0x109   : > { %v1378_v11 = vpack.c.bf16 %v975_v3, %v975_v3  ;;  %v944_v14 = vadd.f32 %v1799_v13, %v905_v5  ;;  %v1476_v18 = vadd.f32 %v1475_v9, %v1474_v1  ;;  %v1429_v19 = vpop.f32.mrf.mxu0  ;;  %v1477_v20 = vpop.f32.mrf.mxu1 }
 0x10a   : > { %1120 = vst.msk [vmem:[%s1809_s18 + $0x8] sm:$0xf] %vm1117_vm1, %v1362_v10  ;;  %v960_v21 = vmax.f32 %v928_v12, 0.0  ;;  %v824_v23 = vadd.f32 %v1428_v17, %v311_v15 }
 0x10b   : > { %1136 = vst.msk [vmem:[%s1809_s18 + $0x48] sm:$0xf] %vm1117_vm1, %v1378_v11  ;;  %v976_v22 = vmax.f32 %v944_v14, 0.0  ;;  %v840_v24 = vadd.f32 %v1476_v18, %v327_v16  ;;  %v1430_v26 = vpop.f32.mrf.mxu0  ;;  %v1478_v28 = vpop.f32.mrf.mxu1  ;;  %v890_v31 = vld [vmem:[#allocation2 + $0x20] sm:$0xff]  ;;  %v315_v14 = vld [vmem:[#allocation2 + $0x50] sm:$0xff] }
 0x10c   : > { %v1363_v29 = vpack.c.bf16 %v960_v21, %v960_v21  ;;  %v906_v32 = vld [vmem:[#allocation2 + $0xa0] sm:$0xff]  ;;  %v1431_v33 = vadd.f32 %v1430_v26, %v1429_v19  ;;  %v1479_v34 = vadd.f32 %v1478_v28, %v1477_v20  ;;  %v929_v35 = vadd.f32 %v1799_v13, %v890_v31  ;;  %857 = vst.msk [vmem:[#allocation2 + $0x30] sm:$0xff] %vm272_vm0, %v824_v23  ;;  %v331_v20 = vld [vmem:[#allocation2 + $0xd0] sm:$0xff] }
 0x10d   : > { %v1379_v30 = vpack.c.bf16 %v976_v22, %v976_v22  ;;  %v945_v36 = vadd.f32 %v1799_v13, %v906_v32  ;;  %873 = vst.msk [vmem:[#allocation2 + $0xb0] sm:$0xff] %vm272_vm0, %v840_v24  ;;  %v1432_v37 = vpop.f32.mrf.mxu0  ;;  %v1480_v38 = vpop.f32.mrf.mxu1 }
 0x10e   : > { %1121 = vst.msk [vmem:[%s1809_s18 + $0xc] sm:$0xf] %vm1117_vm1, %v1363_v29  ;;  %v825_v39 = vadd.f32 %v1431_v33, %v312_v25  ;;  %v841_v40 = vadd.f32 %v1479_v34, %v328_v27  ;;  %v961_v41 = vmax.f32 %v929_v35, 0.0 }
 0x10f   : > { %1137 = vst.msk [vmem:[%s1809_s18 + $0x4c] sm:$0xf] %vm1117_vm1, %v1379_v30  ;;  %v977_v42 = vmax.f32 %v945_v36, 0.0  ;;  %v1433_v44 = vpop.f32.mrf.mxu0  ;;  %v1481_v46 = vpop.f32.mrf.mxu1  ;;  %v891_v47 = vld [vmem:[#allocation2 + $0x28] sm:$0xff] }
 0x110   : > { %v907_v48 = vld [vmem:[#allocation2 + $0xa8] sm:$0xff]  ;;  %858 = vst.msk [vmem:[#allocation2 + $0x38] sm:$0xff] %vm272_vm0, %v825_v39  ;;  %874 = vst.msk [vmem:[#allocation2 + $0xb8] sm:$0xff] %vm272_vm0, %v841_v40  ;;  %v1434_v49 = vadd.f32 %v1433_v44, %v1432_v37  ;;  %v1482_v50 = vadd.f32 %v1481_v46, %v1480_v38  ;;  %v1364_v51 = vpack.c.bf16 %v961_v41, %v961_v41 }
 0x111   : > { %v1380_v52 = vpack.c.bf16 %v977_v42, %v977_v42  ;;  %v930_v53 = vadd.f32 %v1799_v13, %v891_v47  ;;  %v946_v54 = vadd.f32 %v1799_v13, %v907_v48  ;;  %v1435_v55 = vpop.f32.mrf.mxu0  ;;  %v1483_v56 = vpop.f32.mrf.mxu1  ;;  %v316_v42 = vld [vmem:[#allocation2 + $0x58] sm:$0xff] }
 0x112   : > { %v826_v57 = vadd.f32 %v1434_v49, %v313_v43  ;;  %v842_v58 = vadd.f32 %v1482_v50, %v329_v45  ;;  %1122 = vst.msk [vmem:[%s1809_s18 + $0x10] sm:$0xf] %vm1117_vm1, %v1364_v51  ;;  %v332_v43 = vld [vmem:[#allocation2 + $0xd8] sm:$0xff] }
 0x113   : > { %1138 = vst.msk [vmem:[%s1809_s18 + $0x50] sm:$0xf] %vm1117_vm1, %v1380_v52  ;;  %v962_v59 = vmax.f32 %v930_v53, 0.0  ;;  %v978_v60 = vmax.f32 %v946_v54, 0.0  ;;  %v1436_v62 = vpop.f32.mrf.mxu0  ;;  %v1484_v0 = vpop.f32.mrf.mxu1  ;;  %v892_v1 = vld [vmem:[#allocation2 + $0x30] sm:$0xff] }
 0x114   : > { %v908_v2 = vld [vmem:[#allocation2 + $0xb0] sm:$0xff]  ;;  %859 = vst.msk [vmem:[#allocation2 + $0x40] sm:$0xff] %vm272_vm0, %v826_v57  ;;  %875 = vst.msk [vmem:[#allocation2 + $0xc0] sm:$0xff] %vm272_vm0, %v842_v58  ;;  %v1437_v3 = vadd.f32 %v1436_v62, %v1435_v55  ;;  %v1485_v4 = vadd.f32 %v1484_v0, %v1483_v56  ;;  %v931_v7 = vadd.f32 %v1799_v13, %v892_v1 }
 0x115   : > { %v1365_v5 = vpack.c.bf16 %v962_v59, %v962_v59  ;;  %v1381_v6 = vpack.c.bf16 %v978_v60, %v978_v60  ;;  %v947_v8 = vadd.f32 %v1799_v13, %v908_v2  ;;  %v1438_v9 = vpop.f32.mrf.mxu0  ;;  %v1486_v10 = vpop.f32.mrf.mxu1  ;;  %v317_v60 = vld [vmem:[#allocation2 + $0x60] sm:$0xff] }
 0x116   : > { %v827_v11 = vadd.f32 %v1437_v3, %v314_v61  ;;  %v843_v12 = vadd.f32 %v1485_v4, %v330_v63  ;;  %v963_v15 = vmax.f32 %v931_v7, 0.0  ;;  %v333_v61 = vld [vmem:[#allocation2 + $0xe0] sm:$0xff] }
 0x117   : > { %1123 = vst.msk [vmem:[%s1809_s18 + $0x14] sm:$0xf] %vm1117_vm1, %v1365_v5  ;;  %1139 = vst.msk [vmem:[%s1809_s18 + $0x54] sm:$0xf] %vm1117_vm1, %v1381_v6  ;;  %v979_v16 = vmax.f32 %v947_v8, 0.0  ;;  %v893_v17 = vld [vmem:[#allocation2 + $0x38] sm:$0xff]  ;;  %v1439_v19 = vpop.f32.mrf.mxu0  ;;  %v1487_v21 = vpop.f32.mrf.mxu1 }
 0x118   : > { %v909_v18 = vld [vmem:[#allocation2 + $0xb8] sm:$0xff]  ;;  %v932_v22 = vadd.f32 %v1799_v13, %v893_v17  ;;  %860 = vst.msk [vmem:[#allocation2 + $0x48] sm:$0xff] %vm272_vm0, %v827_v11  ;;  %876 = vst.msk [vmem:[#allocation2 + $0xc8] sm:$0xff] %vm272_vm0, %v843_v12  ;;  %v1440_v24 = vadd.f32 %v1439_v19, %v1438_v9  ;;  %v1488_v25 = vadd.f32 %v1487_v21, %v1486_v10 }
 0x119   : > { %v948_v23 = vadd.f32 %v1799_v13, %v909_v18  ;;  %v1366_v26 = vpack.c.bf16 %v963_v15, %v963_v15  ;;  %v1382_v27 = vpack.c.bf16 %v979_v16, %v979_v16  ;;  %v1441_v28 = vpop.f32.mrf.mxu0  ;;  %v1489_v29 = vpop.f32.mrf.mxu1  ;;  %v318_v15 = vld [vmem:[#allocation2 + $0x68] sm:$0xff] }
 0x11a   : > { %v964_v30 = vmax.f32 %v932_v22, 0.0  ;;  %v828_v32 = vadd.f32 %v1440_v24, %v315_v14  ;;  %v844_v33 = vadd.f32 %v1488_v25, %v331_v20  ;;  %v334_v16 = vld [vmem:[#allocation2 + $0xe8] sm:$0xff]  ;;  %v319_v25 = vld [vmem:[#allocation2 + $0x70] sm:$0xff] }
 0x11b   : > { %v980_v31 = vmax.f32 %v948_v23, 0.0  ;;  %1124 = vst.msk [vmem:[%s1809_s18 + $0x18] sm:$0xf] %vm1117_vm1, %v1366_v26  ;;  %1140 = vst.msk [vmem:[%s1809_s18 + $0x58] sm:$0xf] %vm1117_vm1, %v1382_v27  ;;  %v894_v34 = vld [vmem:[#allocation2 + $0x40] sm:$0xff]  ;;  %v1442_v36 = vpop.f32.mrf.mxu0  ;;  %v1490_v37 = vpop.f32.mrf.mxu1 }
 0x11c   : > { %v910_v35 = vld [vmem:[#allocation2 + $0xc0] sm:$0xff]  ;;  %v1367_v38 = vpack.c.bf16 %v964_v30, %v964_v30  ;;  %v933_v40 = vadd.f32 %v1799_v13, %v894_v34  ;;  %861 = vst.msk [vmem:[#allocation2 + $0x50] sm:$0xff] %vm272_vm0, %v828_v32  ;;  %877 = vst.msk [vmem:[#allocation2 + $0xd0] sm:$0xff] %vm272_vm0, %v844_v33  ;;  %v1443_v44 = vadd.f32 %v1442_v36, %v1441_v28  ;;  %v335_v27 = vld [vmem:[#allocation2 + $0xf0] sm:$0xff] }
 0x11d   : > { %v1383_v39 = vpack.c.bf16 %v980_v31, %v980_v31  ;;  %v949_v41 = vadd.f32 %v1799_v13, %v910_v35  ;;  %v1491_v45 = vadd.f32 %v1490_v37, %v1489_v29  ;;  %v1444_v46 = vpop.f32.mrf.mxu0  ;;  %v1492_v47 = vpop.f32.mrf.mxu1 }
 0x11e   : > { %1125 = vst.msk [vmem:[%s1809_s18 + $0x1c] sm:$0xf] %vm1117_vm1, %v1367_v38  ;;  %v965_v48 = vmax.f32 %v933_v40, 0.0  ;;  %v829_v52 = vadd.f32 %v1443_v44, %v316_v42 }
 0x11f   : > { %1141 = vst.msk [vmem:[%s1809_s18 + $0x5c] sm:$0xf] %vm1117_vm1, %v1383_v39  ;;  %v981_v49 = vmax.f32 %v949_v41, 0.0  ;;  %v895_v50 = vld [vmem:[#allocation2 + $0x48] sm:$0xff]  ;;  %v845_v53 = vadd.f32 %v1491_v45, %v332_v43  ;;  %v1445_v54 = vpop.f32.mrf.mxu0  ;;  %v1493_v55 = vpop.f32.mrf.mxu1  ;;  %v320_v43 = vld [vmem:[#allocation2 + $0x78] sm:$0xff] }
 0x120   : > { %v911_v51 = vld [vmem:[#allocation2 + $0xc8] sm:$0xff]  ;;  %v1368_v56 = vpack.c.bf16 %v965_v48, %v965_v48  ;;  %v934_v58 = vadd.f32 %v1799_v13, %v895_v50  ;;  %862 = vst.msk [vmem:[#allocation2 + $0x58] sm:$0xff] %vm272_vm0, %v829_v52  ;;  %v1446_v62 = vadd.f32 %v1445_v54, %v1444_v46  ;;  %v1494_v63 = vadd.f32 %v1493_v55, %v1492_v47  ;;  %v336_v45 = vld [vmem:[#allocation2 + $0xf8] sm:$0xff] }
 0x121   : > { %v1384_v57 = vpack.c.bf16 %v981_v49, %v981_v49  ;;  %v950_v59 = vadd.f32 %v1799_v13, %v911_v51  ;;  %878 = vst.msk [vmem:[#allocation2 + $0xd8] sm:$0xff] %vm272_vm0, %v845_v53  ;;  %v1447_v0 = vpop.f32.mrf.mxu0  ;;  %v1495_v1 = vpop.f32.mrf.mxu1 }
 0x122   : > { %1126 = vst.msk [vmem:[%s1809_s18 + $0x20] sm:$0xf] %vm1117_vm1, %v1368_v56  ;;  %v966_v2 = vmax.f32 %v934_v58, 0.0  ;;  %v830_v6 = vadd.f32 %v1446_v62, %v317_v60  ;;  %v846_v7 = vadd.f32 %v1494_v63, %v333_v61 }
 0x123   : > { %1142 = vst.msk [vmem:[%s1809_s18 + $0x60] sm:$0xf] %vm1117_vm1, %v1384_v57  ;;  %v982_v3 = vmax.f32 %v950_v59, 0.0  ;;  %v896_v4 = vld [vmem:[#allocation2 + $0x50] sm:$0xff]  ;;  %v1448_v8 = vpop.f32.mrf.mxu0  ;;  %v1496_v9 = vpop.f32.mrf.mxu1 }
 0x124   : > { %v912_v5 = vld [vmem:[#allocation2 + $0xd0] sm:$0xff]  ;;  %v1369_v10 = vpack.c.bf16 %v966_v2, %v966_v2  ;;  %v935_v12 = vadd.f32 %v1799_v13, %v896_v4  ;;  %863 = vst.msk [vmem:[#allocation2 + $0x60] sm:$0xff] %vm272_vm0, %v830_v6  ;;  %879 = vst.msk [vmem:[#allocation2 + $0xe0] sm:$0xff] %vm272_vm0, %v846_v7  ;;  %v1449_v17 = vadd.f32 %v1448_v8, %v1447_v0 }
 0x125   : > { %v1385_v11 = vpack.c.bf16 %v982_v3, %v982_v3  ;;  %v951_v14 = vadd.f32 %v1799_v13, %v912_v5  ;;  %v1497_v18 = vadd.f32 %v1496_v9, %v1495_v1  ;;  %v1450_v19 = vpop.f32.mrf.mxu0  ;;  %v1498_v20 = vpop.f32.mrf.mxu1 }
 0x126   : > { %1127 = vst.msk [vmem:[%s1809_s18 + $0x24] sm:$0xf] %vm1117_vm1, %v1369_v10  ;;  %v967_v21 = vmax.f32 %v935_v12, 0.0  ;;  %v831_v23 = vadd.f32 %v1449_v17, %v318_v15 }
 0x127   : > { %1143 = vst.msk [vmem:[%s1809_s18 + $0x64] sm:$0xf] %vm1117_vm1, %v1385_v11  ;;  %v983_v22 = vmax.f32 %v951_v14, 0.0  ;;  %v847_v24 = vadd.f32 %v1497_v18, %v334_v16  ;;  %v1451_v26 = vpop.f32.mrf.mxu0  ;;  %v1499_v28 = vpop.f32.mrf.mxu1  ;;  %v897_v31 = vld [vmem:[#allocation2 + $0x58] sm:$0xff] }
 0x128   : > { %v1370_v29 = vpack.c.bf16 %v967_v21, %v967_v21  ;;  %v913_v32 = vld [vmem:[#allocation2 + $0xd8] sm:$0xff]  ;;  %v1452_v33 = vadd.f32 %v1451_v26, %v1450_v19  ;;  %v1500_v34 = vadd.f32 %v1499_v28, %v1498_v20  ;;  %v936_v35 = vadd.f32 %v1799_v13, %v897_v31  ;;  %864 = vst.msk [vmem:[#allocation2 + $0x68] sm:$0xff] %vm272_vm0, %v831_v23 }
 0x129   : > { %v1386_v30 = vpack.c.bf16 %v983_v22, %v983_v22  ;;  %v952_v36 = vadd.f32 %v1799_v13, %v913_v32  ;;  %880 = vst.msk [vmem:[#allocation2 + $0xe8] sm:$0xff] %vm272_vm0, %v847_v24  ;;  %v1453_v37 = vpop.f32.mrf.mxu0  ;;  %v1501_v38 = vpop.f32.mrf.mxu1 }
 0x12a   : > { %1128 = vst.msk [vmem:[%s1809_s18 + $0x28] sm:$0xf] %vm1117_vm1, %v1370_v29  ;;  %v832_v39 = vadd.f32 %v1452_v33, %v319_v25  ;;  %v848_v40 = vadd.f32 %v1500_v34, %v335_v27  ;;  %v968_v41 = vmax.f32 %v936_v35, 0.0 }
 0x12b   : > { %1144 = vst.msk [vmem:[%s1809_s18 + $0x68] sm:$0xf] %vm1117_vm1, %v1386_v30  ;;  %v984_v42 = vmax.f32 %v952_v36, 0.0  ;;  %v1454_v44 = vpop.f32.mrf.mxu0  ;;  %v1502_v46 = vpop.f32.mrf.mxu1  ;;  %v898_v47 = vld [vmem:[#allocation2 + $0x60] sm:$0xff] }
 0x12c   : > { %v914_v48 = vld [vmem:[#allocation2 + $0xe0] sm:$0xff]  ;;  %865 = vst.msk [vmem:[#allocation2 + $0x70] sm:$0xff] %vm272_vm0, %v832_v39  ;;  %881 = vst.msk [vmem:[#allocation2 + $0xf0] sm:$0xff] %vm272_vm0, %v848_v40  ;;  %v1455_v49 = vadd.f32 %v1454_v44, %v1453_v37  ;;  %v1503_v50 = vadd.f32 %v1502_v46, %v1501_v38  ;;  %v1371_v51 = vpack.c.bf16 %v968_v41, %v968_v41 }
 0x12d   : > { %v1387_v52 = vpack.c.bf16 %v984_v42, %v984_v42  ;;  %v937_v53 = vadd.f32 %v1799_v13, %v898_v47  ;;  %v953_v54 = vadd.f32 %v1799_v13, %v914_v48 }
 0x12e   : > { %v833_v55 = vadd.f32 %v1455_v49, %v320_v43  ;;  %v849_v56 = vadd.f32 %v1503_v50, %v336_v45  ;;  %1129 = vst.msk [vmem:[%s1809_s18 + $0x2c] sm:$0xf] %vm1117_vm1, %v1371_v51 }
 0x12f   : > { %1145 = vst.msk [vmem:[%s1809_s18 + $0x6c] sm:$0xf] %vm1117_vm1, %v1387_v52  ;;  %v969_v57 = vmax.f32 %v937_v53, 0.0  ;;  %v985_v58 = vmax.f32 %v953_v54, 0.0  ;;  %v899_v59 = vld [vmem:[#allocation2 + $0x68] sm:$0xff] }
 0x130   : > { %v915_v60 = vld [vmem:[#allocation2 + $0xe8] sm:$0xff]  ;;  %866 = vst.msk [vmem:[#allocation2 + $0x78] sm:$0xff] %vm272_vm0, %v833_v55  ;;  %882 = vst.msk [vmem:[#allocation2 + $0xf8] sm:$0xff] %vm272_vm0, %v849_v56  ;;  %v938_v63 = vadd.f32 %v1799_v13, %v899_v59 }
 0x131   : > { %v1372_v61 = vpack.c.bf16 %v969_v57, %v969_v57  ;;  %v1388_v62 = vpack.c.bf16 %v985_v58, %v985_v58  ;;  %v954_v0 = vadd.f32 %v1799_v13, %v915_v60 }
 0x132   : > { %v970_v1 = vmax.f32 %v938_v63, 0.0 }
 0x133   : > { %1130 = vst.msk [vmem:[%s1809_s18 + $0x30] sm:$0xf] %vm1117_vm1, %v1372_v61  ;;  %1146 = vst.msk [vmem:[%s1809_s18 + $0x70] sm:$0xf] %vm1117_vm1, %v1388_v62  ;;  %v986_v2 = vmax.f32 %v954_v0, 0.0  ;;  %v900_v3 = vld [vmem:[#allocation2 + $0x70] sm:$0xff] }
 0x134   : > { %v916_v4 = vld [vmem:[#allocation2 + $0xf0] sm:$0xff]  ;;  %v939_v5 = vadd.f32 %v1799_v13, %v900_v3  ;;  %v1373_v7 = vpack.c.bf16 %v970_v1, %v970_v1 }
 0x135   : > { %v955_v6 = vadd.f32 %v1799_v13, %v916_v4  ;;  %v1389_v8 = vpack.c.bf16 %v986_v2, %v986_v2 }
 0x136   : > { %v971_v9 = vmax.f32 %v939_v5, 0.0  ;;  %1131 = vst.msk [vmem:[%s1809_s18 + $0x34] sm:$0xf] %vm1117_vm1, %v1373_v7 }
 0x137   : > { %v987_v10 = vmax.f32 %v955_v6, 0.0  ;;  %1147 = vst.msk [vmem:[%s1809_s18 + $0x74] sm:$0xf] %vm1117_vm1, %v1389_v8  ;;  %v901_v11 = vld [vmem:[#allocation2 + $0x78] sm:$0xff] }
 0x138   : > { %v917_v12 = vld [vmem:[#allocation2 + $0xf8] sm:$0xff]  ;;  %v1374_v14 = vpack.c.bf16 %v971_v9, %v971_v9  ;;  %v940_v16 = vadd.f32 %v1799_v13, %v901_v11 }
 0x139   : > { %v1390_v15 = vpack.c.bf16 %v987_v10, %v987_v10  ;;  %v956_v17 = vadd.f32 %v1799_v13, %v917_v12 }
 0x13a   : > { %1132 = vst.msk [vmem:[%s1809_s18 + $0x38] sm:$0xf] %vm1117_vm1, %v1374_v14  ;;  %v972_v18 = vmax.f32 %v940_v16, 0.0 }
 0x13b   : > { %1148 = vst.msk [vmem:[%s1809_s18 + $0x78] sm:$0xf] %vm1117_vm1, %v1390_v15  ;;  %v988_v19 = vmax.f32 %v956_v17, 0.0 }
 0x13c   : > { %v1375_v20 = vpack.c.bf16 %v972_v18, %v972_v18 }
 0x13d   : > { %v1391_v21 = vpack.c.bf16 %v988_v19, %v988_v19 }
 0x13e   : > { %1133 = vst.msk [vmem:[%s1809_s18 + $0x3c] sm:$0xf] %vm1117_vm1, %v1375_v20 }
 0x13f   : > { %1149 = vst.msk [vmem:[%s1809_s18 + $0x7c] sm:$0xf] %vm1117_vm1, %v1391_v21 }
 0x140 PF: > { %s13_s14 = sadd.s32 1, %s1631_s14   ;;  %s1944_s12 = smov %s1627_s13 }
 0x141   : > { %p10_p5 = scmp.ge.s32.totalorder %s13_s14, 4   ;;  %s1945_s13 = smov %s1947_s15 }
 0x143   :  { %12 = sbr.rel (!%p10_p5) target bundleno = 2 (0x2), region = 76 }

// kernel: resnet34_forward.38
= control target key start
LH: loop header
LB: loop body
LE: loop exit
PB: predicated region body
PF: predicated region fallthrough
CT: control target
= control target key end

     0   :  { %s1148_s12 = smov 0   ;;  %s1150_s13 = smov 0   ;;  %s1352_s0 = inlined_call_operand.vmem [shape: bf16[128,640], index: 0, kind: input, shape index: {}]   ;;  %s1353_s1 = inlined_call_operand.vmem [shape: bf16[640,64], index: 1, kind: input, shape index: {}]   ;;  %s1354_s2 = inlined_call_operand.vmem [shape: f32[1,64], index: 2, kind: input, shape index: {}]   ;;  %s1355_s3 = inlined_call_operand.vmem [shape: bf16[128,64], index: 3, kind: output, shape index: {}]  }
   0x1   :  { %s1152_s14 = smov 0   ;;  %s1154_s15 = smov 0  }
   0x2   :  { %s1156_s16 = smov 0  }
   0x3 LB: > { %s25_s17 = sadd.s32 1, %s1121_s15  ;;  %p48_p1 = scmp.ne.s32.totalorder %s1113_s13, %s1109_s12  ;;  %s1125_s16 = sphi %s1156_s16, %s13_s16   ;;  %s1121_s15 = sphi %s1154_s15, %s1359_s15   ;;  %s1117_s14 = sphi %s1152_s14, %s1358_s14   ;;  %s1113_s13 = sphi %s1150_s13, %s1357_s13   ;;  %s1109_s12 = sphi %s1148_s12, %s1356_s12  }
   0x4   : > { %p26_p0 = scmp.ge.s32.totalorder %s25_s17, 5  ;;  %p49_p2 = scmp.eq.s32.totalorder %s1125_s16, 0 }
   0x5   : > { %s41_s19 = sadd.s32 1, %s1113_s13  ;;  %p904_p5 = scmp.ge.s32.totalorder %s1125_s16, 5 }
   0x6   : > { %s1361_s17 = smov (%p26_p0, %s25_s17), 0  ;;  %p50_p3 = por %p49_p2, %p48_p1 }
   0x7   : > { %s37_s18 = ssub.s32 %s1121_s15, %s1361_s17  ;;  %162 = sbr.rel (%p904_p5) target bundleno = 26 (0x1a), region = 20 }
   0x8   : > { %p39_p4 = scmp.eq.s32.totalorder %s37_s18, 0 }
   0xa   : > { %s1183_s20 = scalar_select %p39_p4, %s1113_s13, %s41_s19  }
   0xc   : > { %165 = sbr.rel (!%p50_p3) target bundleno = 26 (0x1a), region = 24  ;;  %s167_s21 = sand.u32 (%p50_p3), 1, %s1113_s13  }
   0xd   : > { %s906_s22 = sshll.u32 (%p50_p3), %s1121_s15, 2  ;;  %s905_s23 = sshll.u32 (%p50_p3), %s167_s21, 6 }
   0xe   : > { %s1191_s26 = scalar_lea.vmem (%p50_p3), %s1352_s0, %s906_s22  ;;  %s169_s27 = scalar_lea.vmem (%p50_p3), [#allocation3], %s905_s23 }
   0xf   : > { %v191_v0 = vld [vmem:[%s1191_s26] sm:$0xf] (%p50_p3)  ;;  %v193_v1 = vld [vmem:[%s1191_s26 + $0x14] sm:$0xf] (%p50_p3)  ;;  %v195_v2 = vld [vmem:[%s1191_s26 + $0x28] sm:$0xf] (%p50_p3) }
  0x10   : > { %192 = vst [vmem:[%s169_s27] sm:$0xf] (%p50_p3), %v191_v0  ;;  %194 = vst [vmem:[%s169_s27 + $0x4] sm:$0xf] (%p50_p3), %v193_v1  ;;  %v197_v3 = vld [vmem:[%s1191_s26 + $0x3c] sm:$0xf] (%p50_p3) }
  0x11   : > { %v199_v4 = vld [vmem:[%s1191_s26 + $0x50] sm:$0xf]  ;;  %196 = vst [vmem:[%s169_s27 + $0x8] sm:$0xf] %v195_v2  ;;  %198 = vst [vmem:[%s169_s27 + $0xc] sm:$0xf] %v197_v3 }
  0x12   : > { %200 = vst [vmem:[%s169_s27 + $0x10] sm:$0xf] %v199_v4  ;;  %v201_v5 = vld [vmem:[%s1191_s26 + $0x64] sm:$0xf]  ;;  %v203_v6 = vld [vmem:[%s1191_s26 + $0x78] sm:$0xf] }
  0x13   : > { %v205_v7 = vld [vmem:[%s1191_s26 + $0x8c] sm:$0xf]  ;;  %202 = vst [vmem:[%s169_s27 + $0x14] sm:$0xf] %v201_v5  ;;  %204 = vst [vmem:[%s169_s27 + $0x18] sm:$0xf] %v203_v6 }
  0x14   : > { %206 = vst [vmem:[%s169_s27 + $0x1c] sm:$0xf] %v205_v7  ;;  %v207_v8 = vld [vmem:[%s1191_s26 + $0xa0] sm:$0xf]  ;;  %v209_v9 = vld [vmem:[%s1191_s26 + $0xb4] sm:$0xf] }
  0x15   : > { %v211_v10 = vld [vmem:[%s1191_s26 + $0xc8] sm:$0xf]  ;;  %208 = vst [vmem:[%s169_s27 + $0x20] sm:$0xf] %v207_v8  ;;  %210 = vst [vmem:[%s169_s27 + $0x24] sm:$0xf] %v209_v9 }
  0x16   : > { %212 = vst [vmem:[%s169_s27 + $0x28] sm:$0xf] %v211_v10  ;;  %v213_v11 = vld [vmem:[%s1191_s26 + $0xdc] sm:$0xf]  ;;  %v215_v12 = vld [vmem:[%s1191_s26 + $0xf0] sm:$0xf] }
  0x17   : > { %v217_v13 = vld [vmem:[%s1191_s26 + $0x104] sm:$0xf]  ;;  %214 = vst [vmem:[%s169_s27 + $0x2c] sm:$0xf] %v213_v11  ;;  %216 = vst [vmem:[%s169_s27 + $0x30] sm:$0xf] %v215_v12 }
  0x18   : > { %218 = vst [vmem:[%s169_s27 + $0x34] sm:$0xf] %v217_v13  ;;  %v219_v14 = vld [vmem:[%s1191_s26 + $0x118] sm:$0xf]  ;;  %v221_v15 = vld [vmem:[%s1191_s26 + $0x12c] sm:$0xf] }
  0x19   : > { %220 = vst [vmem:[%s169_s27 + $0x38] sm:$0xf] %v219_v14  ;;  %222 = vst [vmem:[%s169_s27 + $0x3c] sm:$0xf] %v221_v15 }
  0x1a PF: > { %p907_p6 = scmp.ge.s32.totalorder %s1125_s16, 1  ;;  %p289_p7 = scmp.lt.s32.totalorder %s1125_s16, 6 }
  0x1c   : > { %p290_p8 = pnand %p907_p6, %p289_p7 }
  0x1d   : > { %s296_s28 = sand.u32 (!%p290_p8), 1, %s1109_s12   ;;  %s909_s29 = sshll.u32 (!%p290_p8), %s1117_s14, 4 }
  0x1e   : > { %293 = sbr.rel (%p290_p8) target bundleno = 309 (0x135), region = 69  ;;  %s908_s30 = sshll.u32 (!%p290_p8), %s296_s28, 6 }
  0x1f   : > { %p335_p9 = scmp.lt.s32.totalorder (!%p290_p8), %s909_s29, 79  ;;  %s1218_s8 = scalar_lea.vmem (!%p290_p8), [#allocation3], %s908_s30 }
  0x20   : > { %p911_p10 = scmp.ne.s32.totalorder (!%p290_p8), %s1117_s14, 0 }
  0x23   : > { %s1363_s29 = smov (!%p335_p9, %s909_s29), 79  ;;  %359 = sbr.rel (%p911_p10) target bundleno = 49 (0x31), region = 77 }
  0x24   : > { %s910_s4 = sshll.u32 %s1363_s29, 2 }
  0x25   : > { %s1216_s7 = scalar_lea.vmem %s1353_s1, %s910_s4 }
  0x28   : > { %vm360_vm0 = vcmask 523264   ;;  %v1127_v16 = vmov 0.0  }
  0x29   : > { %361 = vst.msk [vmem:[#allocation2] sm:$0xff] %vm360_vm0, %v1127_v16  ;;  %362 = vst.msk [vmem:[#allocation2 + $0x8] sm:$0xff] %vm360_vm0, %v1127_v16 }
  0x2a   : > { %363 = vst.msk [vmem:[#allocation2 + $0x10] sm:$0xff] %vm360_vm0, %v1127_v16  ;;  %364 = vst.msk [vmem:[#allocation2 + $0x18] sm:$0xff] %vm360_vm0, %v1127_v16 }
  0x2b   : > { %365 = vst.msk [vmem:[#allocation2 + $0x20] sm:$0xff] %vm360_vm0, %v1127_v16  ;;  %366 = vst.msk [vmem:[#allocation2 + $0x28] sm:$0xff] %vm360_vm0, %v1127_v16 }
  0x2c   : > { %367 = vst.msk [vmem:[#allocation2 + $0x30] sm:$0xff] %vm360_vm0, %v1127_v16  ;;  %368 = vst.msk [vmem:[#allocation2 + $0x38] sm:$0xff] %vm360_vm0, %v1127_v16 }
  0x2d   : > { %369 = vst.msk [vmem:[#allocation2 + $0x40] sm:$0xff] %vm360_vm0, %v1127_v16  ;;  %370 = vst.msk [vmem:[#allocation2 + $0x48] sm:$0xff] %vm360_vm0, %v1127_v16 }
  0x2e   : > { %371 = vst.msk [vmem:[#allocation2 + $0x50] sm:$0xff] %vm360_vm0, %v1127_v16  ;;  %372 = vst.msk [vmem:[#allocation2 + $0x58] sm:$0xff] %vm360_vm0, %v1127_v16 }
  0x2f   : > { %373 = vst.msk [vmem:[#allocation2 + $0x60] sm:$0xff] %vm360_vm0, %v1127_v16  ;;  %374 = vst.msk [vmem:[#allocation2 + $0x68] sm:$0xff] %vm360_vm0, %v1127_v16 }
  0x30   : > { %375 = vst.msk [vmem:[#allocation2 + $0x70] sm:$0xff] %vm360_vm0, %v1127_v16  ;;  %376 = vst.msk [vmem:[#allocation2 + $0x78] sm:$0xff] %vm360_vm0, %v1127_v16 }
  0x31 PF: > { %v1071_v17 = vld [vmem:[%s1216_s7 + $0x38] sm:$0xff]   ;;  %v1072_v18 = vld [vmem:[%s1216_s7 + $0x30] sm:$0xff]   ;;  %v1073_v19 = vld [vmem:[%s1216_s7 + $0x28] sm:$0xff]   ;;  %vm634_vm1 = vcmask 523264   ;;  %p928_p11 = scmp.ne.s32.totalorder %s1117_s14, 4 }
  0x32   : > { %982 = vmatprep.subr.bf16.mxu0 %v1071_v17  ;;  %1014 = vmatprep.subr.bf16.mxu1 %v1071_v17  ;;  %v1074_v20 = vld [vmem:[%s1216_s7 + $0x20] sm:$0xff]   ;;  %v1075_v23 = vld [vmem:[%s1216_s7 + $0x18] sm:$0xff]   ;;  %v1076_v24 = vld [vmem:[%s1216_s7 + $0x10] sm:$0xff]  }
  0x33   : > { %983 = vmatpush3.bf16.msra.mxu0 %v1071_v17  ;;  %1022 = vmatpush3.bf16.msra.mxu1 %v1071_v17  ;;  %v1079_v21 = vld [vmem:[%s1218_s8] sm:$0xff]   ;;  %v1077_v25 = vld [vmem:[%s1216_s7 + $0x8] sm:$0xff]   ;;  %v1083_v29 = vld [vmem:[%s1218_s8 + $0x10] sm:$0xff]  }
  0x34   : > { %984 = vmatprep.subr.bf16.mxu0 %v1072_v18  ;;  %1015 = vmatprep.subr.bf16.mxu1 %v1072_v18  ;;  %v1080_v22 = vld [vmem:[%s1218_s8 + $0x20] sm:$0xff]   ;;  %v1081_v27 = vld [vmem:[%s1218_s8 + $0x8] sm:$0xff]   ;;  %v1084_v30 = vld [vmem:[%s1218_s8 + $0x30] sm:$0xff]  }
  0x35   : > { %998 = vmatprep.mubr.bf16.mxu0 %v1079_v21  ;;  %1006 = vmatprep.mubr.bf16.mxu1 %v1080_v22  ;;  %v1078_v26 = vld [vmem:[%s1216_s7] sm:$0xff]   ;;  %v1082_v28 = vld [vmem:[%s1218_s8 + $0x28] sm:$0xff]   ;;  %v1085_v31 = vld [vmem:[%s1218_s8 + $0x18] sm:$0xff]  }
  0x36   : > { %v1086_v32 = vld [vmem:[%s1218_s8 + $0x38] sm:$0xff]   ;;  %v379_v33 = vld [vmem:[#allocation2 + $0x10] sm:$0xff]  ;;  %v377_v37 = vld [vmem:[#allocation2] sm:$0xff] }
  0x37   : > { %985 = vmatpush3.bf16.msra.mxu0 %v1072_v18  ;;  %1023 = vmatpush3.bf16.msra.mxu1 %v1072_v18  ;;  %v387_v34 = vld [vmem:[#allocation2 + $0x50] sm:$0xff]  ;;  %v385_v38 = vld [vmem:[#allocation2 + $0x40] sm:$0xff]  ;;  %v380_v43 = vld [vmem:[#allocation2 + $0x18] sm:$0xff] }
  0x38   : > { %986 = vmatprep.subr.bf16.mxu0 %v1073_v19  ;;  %1016 = vmatprep.subr.bf16.mxu1 %v1073_v19  ;;  %v388_v44 = vld [vmem:[#allocation2 + $0x58] sm:$0xff]  ;;  %v378_v49 = vld [vmem:[#allocation2 + $0x8] sm:$0xff]  ;;  %v383_v55 = vld [vmem:[#allocation2 + $0x30] sm:$0xff] }
  0x39   : > { %v386_v50 = vld [vmem:[#allocation2 + $0x48] sm:$0xff]  ;;  %v391_v56 = vld [vmem:[#allocation2 + $0x70] sm:$0xff]  ;;  %v381_v61 = vld [vmem:[#allocation2 + $0x20] sm:$0xff] }
  0x3a   : > { %v389_v62 = vld [vmem:[#allocation2 + $0x60] sm:$0xff]  ;;  %v384_v3 = vld [vmem:[#allocation2 + $0x38] sm:$0xff]  ;;  %v382_v9 = vld [vmem:[#allocation2 + $0x28] sm:$0xff] }
  0x3b   : > { %987 = vmatpush3.bf16.msra.mxu0 %v1073_v19  ;;  %1024 = vmatpush3.bf16.msra.mxu1 %v1073_v19  ;;  %v392_v4 = vld [vmem:[#allocation2 + $0x78] sm:$0xff]  ;;  %v390_v10 = vld [vmem:[#allocation2 + $0x68] sm:$0xff] }
  0x3c   : > { %988 = vmatprep.subr.bf16.mxu0 %v1074_v20  ;;  %1017 = vmatprep.subr.bf16.mxu1 %v1074_v20 }
  0x3f   : > { %989 = vmatpush3.bf16.msra.mxu0 %v1074_v20  ;;  %1025 = vmatpush3.bf16.msra.mxu1 %v1074_v20 }
  0x40   : > { %990 = vmatprep.subr.bf16.mxu0 %v1075_v23  ;;  %1018 = vmatprep.subr.bf16.mxu1 %v1075_v23 }
  0x43   : > { %991 = vmatpush3.bf16.msra.mxu0 %v1075_v23  ;;  %1026 = vmatpush3.bf16.msra.mxu1 %v1075_v23 }
  0x44   : > { %992 = vmatprep.subr.bf16.mxu0 %v1076_v24  ;;  %1019 = vmatprep.subr.bf16.mxu1 %v1076_v24 }
  0x47   : > { %993 = vmatpush3.bf16.msra.mxu0 %v1076_v24  ;;  %1027 = vmatpush3.bf16.msra.mxu1 %v1076_v24 }
  0x48   : > { %994 = vmatprep.subr.bf16.mxu0 %v1077_v25  ;;  %1020 = vmatprep.subr.bf16.mxu1 %v1077_v25 }
  0x4b   : > { %995 = vmatpush3.bf16.msra.mxu0 %v1077_v25  ;;  %1028 = vmatpush3.bf16.msra.mxu1 %v1077_v25 }
  0x4c   : > { %996 = vmatprep.subr.bf16.mxu0 %v1078_v26  ;;  %1021 = vmatprep.subr.bf16.mxu1 %v1078_v26 }
  0x4f   : > { %997 = vmatpush3.bf16.msra.mxu0 %v1078_v26  ;;  %1029 = vmatpush3.bf16.msra.mxu1 %v1078_v26 }
  0x52   : > { %999 = vmatmul.mubr.bf16.vlgmr.msra.gmra.mxu0 %v1081_v27  ;;  %1007 = vmatmul.mubr.bf16.vlgmr.msra.gmra.mxu1 %v1082_v28 }
  0x53   : > { %1002 = vmatprep.mubr.bf16.mxu0 %v1083_v29  ;;  %1010 = vmatprep.mubr.bf16.mxu1 %v1084_v30 }
  0x5a   : > { %1003 = vmatmul.mubr.bf16.gmra.mxu0 %v1085_v31  ;;  %1011 = vmatmul.mubr.bf16.gmra.mxu1 %v1086_v32 }
 0x112   : > { %v1000_v35 = vpop.f32.mrf.mxu0  ;;  %v1008_v36 = vpop.f32.mrf.mxu1 }
 0x113   : > { %v620_v39 = vadd.f32 %v1000_v35, %v379_v33  ;;  %v628_v40 = vadd.f32 %v1008_v36, %v387_v34 }
 0x114   : > { %v555_v41 = vpop.f32.mrf.mxu0  ;;  %v587_v42 = vpop.f32.mrf.mxu1 }
 0x115   : > { %637 = vst.msk [vmem:[#allocation2 + $0x10] sm:$0xff] %vm634_vm1, %v620_v39  ;;  %645 = vst.msk [vmem:[#allocation2 + $0x50] sm:$0xff] %vm634_vm1, %v628_v40  ;;  %v618_v45 = vadd.f32 %v555_v41, %v377_v37  ;;  %v626_v46 = vadd.f32 %v587_v42, %v385_v38 }
 0x116   : > { %v1001_v47 = vpop.f32.mrf.mxu0  ;;  %v1009_v48 = vpop.f32.mrf.mxu1 }
 0x117   : > { %635 = vst.msk [vmem:[#allocation2] sm:$0xff] %vm634_vm1, %v618_v45  ;;  %643 = vst.msk [vmem:[#allocation2 + $0x40] sm:$0xff] %vm634_vm1, %v626_v46  ;;  %v621_v51 = vadd.f32 %v1001_v47, %v380_v43  ;;  %v629_v52 = vadd.f32 %v1009_v48, %v388_v44 }
 0x118   : > { %v558_v53 = vpop.f32.mrf.mxu0  ;;  %v590_v54 = vpop.f32.mrf.mxu1 }
 0x119   : > { %638 = vst.msk [vmem:[#allocation2 + $0x18] sm:$0xff] %vm634_vm1, %v621_v51  ;;  %646 = vst.msk [vmem:[#allocation2 + $0x58] sm:$0xff] %vm634_vm1, %v629_v52  ;;  %v619_v57 = vadd.f32 %v558_v53, %v378_v49  ;;  %v627_v58 = vadd.f32 %v590_v54, %v386_v50 }
 0x11a   : > { %v1004_v59 = vpop.f32.mrf.mxu0  ;;  %v1012_v60 = vpop.f32.mrf.mxu1 }
 0x11b   : > { %636 = vst.msk [vmem:[#allocation2 + $0x8] sm:$0xff] %vm634_vm1, %v619_v57  ;;  %644 = vst.msk [vmem:[#allocation2 + $0x48] sm:$0xff] %vm634_vm1, %v627_v58  ;;  %v624_v63 = vadd.f32 %v1004_v59, %v383_v55  ;;  %v632_v0 = vadd.f32 %v1012_v60, %v391_v56 }
 0x11c   : > { %v571_v1 = vpop.f32.mrf.mxu0  ;;  %v603_v2 = vpop.f32.mrf.mxu1 }
 0x11d   : > { %641 = vst.msk [vmem:[#allocation2 + $0x30] sm:$0xff] %vm634_vm1, %v624_v63  ;;  %649 = vst.msk [vmem:[#allocation2 + $0x70] sm:$0xff] %vm634_vm1, %v632_v0  ;;  %v622_v5 = vadd.f32 %v571_v1, %v381_v61  ;;  %v630_v6 = vadd.f32 %v603_v2, %v389_v62 }
 0x11e   : > { %v1005_v7 = vpop.f32.mrf.mxu0  ;;  %v1013_v8 = vpop.f32.mrf.mxu1 }
 0x11f   : > { %639 = vst.msk [vmem:[#allocation2 + $0x20] sm:$0xff] %vm634_vm1, %v622_v5  ;;  %647 = vst.msk [vmem:[#allocation2 + $0x60] sm:$0xff] %vm634_vm1, %v630_v6  ;;  %v625_v11 = vadd.f32 %v1005_v7, %v384_v3  ;;  %v633_v12 = vadd.f32 %v1013_v8, %v392_v4  ;;  %654 = sbr.rel (%p928_p11) target bundleno = 309 (0x135), region = 81 }
 0x120   : > { %v574_v13 = vpop.f32.mrf.mxu0  ;;  %v606_v14 = vpop.f32.mrf.mxu1 }
 0x121   : > { %642 = vst.msk [vmem:[#allocation2 + $0x38] sm:$0xff] %vm634_vm1, %v625_v11  ;;  %650 = vst.msk [vmem:[#allocation2 + $0x78] sm:$0xff] %vm634_vm1, %v633_v12  ;;  %v623_v15 = vadd.f32 %v574_v13, %v382_v9  ;;  %v631_v16 = vadd.f32 %v606_v14, %v390_v10 }
 0x123   : > { %640 = vst.msk [vmem:[#allocation2 + $0x28] sm:$0xff] %vm634_vm1, %v623_v15  ;;  %648 = vst.msk [vmem:[#allocation2 + $0x68] sm:$0xff] %vm634_vm1, %v631_v16 }
 0x124   : > { %v655_v17 = vld [vmem:[#allocation2] sm:$0xff]  ;;  %v656_v19 = vld [vmem:[#allocation2 + $0x8] sm:$0xff]  ;;  %v657_v22 = vld [vmem:[#allocation2 + $0x10] sm:$0xff]  ;;  %vm774_vm2 = vcmask 519168  }
 0x125   : > { %v929_v18 = vld [vmem:[%s1354_s2] ss:$0 sm:$0xff]  ;;  %v658_v23 = vld [vmem:[#allocation2 + $0x18] sm:$0xff]  ;;  %v661_v29 = vld [vmem:[#allocation2 + $0x30] sm:$0xff] }
 0x126   : > { %v678_v20 = vadd.f32 %v929_v18, %v655_v17  ;;  %v679_v21 = vadd.f32 %v929_v18, %v656_v19  ;;  %v659_v24 = vld [vmem:[#allocation2 + $0x20] sm:$0xff]  ;;  %v680_v25 = vadd.f32 %v929_v18, %v657_v22  ;;  %v681_v26 = vadd.f32 %v929_v18, %v658_v23  ;;  %v664_v40 = vld [vmem:[#allocation2 + $0x48] sm:$0xff]  ;;  %v665_v45 = vld [vmem:[#allocation2 + $0x50] sm:$0xff] }
 0x127   : > { %v682_v27 = vadd.f32 %v929_v18, %v659_v24  ;;  %v684_v34 = vadd.f32 %v929_v18, %v661_v29  ;;  %v663_v39 = vld [vmem:[#allocation2 + $0x40] sm:$0xff]  ;;  %v666_v46 = vld [vmem:[#allocation2 + $0x58] sm:$0xff]  ;;  %v669_v53 = vld [vmem:[#allocation2 + $0x70] sm:$0xff]  ;;  %v687_v57 = vadd.f32 %v929_v18, %v664_v40  ;;  %v688_v60 = vadd.f32 %v929_v18, %v665_v45 }
 0x128   : > { %v662_v30 = vld [vmem:[#allocation2 + $0x38] sm:$0xff]  ;;  %v694_v31 = vmax.f32 %v678_v20, 0.0  ;;  %v695_v32 = vmax.f32 %v679_v21, 0.0  ;;  %v696_v35 = vmax.f32 %v680_v25, 0.0  ;;  %v697_v36 = vmax.f32 %v681_v26, 0.0  ;;  %v667_v47 = vld [vmem:[#allocation2 + $0x60] sm:$0xff] }
 0x129   : > { %v698_v37 = vmax.f32 %v682_v27, 0.0  ;;  %v685_v38 = vadd.f32 %v929_v18, %v662_v30  ;;  %v700_v44 = vmax.f32 %v684_v34, 0.0  ;;  %v686_v56 = vadd.f32 %v929_v18, %v663_v39  ;;  %v670_v58 = vld [vmem:[#allocation2 + $0x78] sm:$0xff] }
 0x12a   : > { %v660_v28 = vld [vmem:[#allocation2 + $0x28] sm:$0xff]  ;;  %v950_v41 = vpack.c.bf16 %v694_v31, %v694_v31  ;;  %v951_v42 = vpack.c.bf16 %v695_v32, %v695_v32  ;;  %v952_v48 = vpack.c.bf16 %v696_v35, %v696_v35  ;;  %v953_v49 = vpack.c.bf16 %v697_v36, %v697_v36 }
 0x12b   : > { %v683_v33 = vadd.f32 %v929_v18, %v660_v28  ;;  %v954_v50 = vpack.c.bf16 %v698_v37, %v698_v37  ;;  %v701_v51 = vmax.f32 %v685_v38, 0.0  ;;  %v668_v52 = vld [vmem:[#allocation2 + $0x68] sm:$0xff]  ;;  %v956_v55 = vpack.c.bf16 %v700_v44, %v700_v44 }
 0x12c   : > { %775 = vst.msk [vmem:[%s1355_s3] sm:$0xf] %vm774_vm2, %v950_v41  ;;  %776 = vst.msk [vmem:[%s1355_s3 + $0x4] sm:$0xf] %vm774_vm2, %v951_v42  ;;  %v689_v61 = vadd.f32 %v929_v18, %v666_v46  ;;  %v690_v62 = vadd.f32 %v929_v18, %v667_v47  ;;  %v702_v63 = vmax.f32 %v686_v56, 0.0  ;;  %v703_v0 = vmax.f32 %v687_v57, 0.0 }
 0x12d   : > { %v699_v43 = vmax.f32 %v683_v33, 0.0  ;;  %777 = vst.msk [vmem:[%s1355_s3 + $0x8] sm:$0xf] %vm774_vm2, %v952_v48  ;;  %778 = vst.msk [vmem:[%s1355_s3 + $0xc] sm:$0xf] %vm774_vm2, %v953_v49  ;;  %v957_v59 = vpack.c.bf16 %v701_v51, %v701_v51  ;;  %v691_v1 = vadd.f32 %v929_v18, %v668_v52  ;;  %v692_v2 = vadd.f32 %v929_v18, %v669_v53 }
 0x12e   : > { %779 = vst.msk [vmem:[%s1355_s3 + $0x10] sm:$0xf] %vm774_vm2, %v954_v50  ;;  %781 = vst.msk [vmem:[%s1355_s3 + $0x18] sm:$0xf] %vm774_vm2, %v956_v55  ;;  %v704_v3 = vmax.f32 %v688_v60, 0.0  ;;  %v705_v4 = vmax.f32 %v689_v61, 0.0  ;;  %v693_v6 = vadd.f32 %v929_v18, %v670_v58  ;;  %v958_v7 = vpack.c.bf16 %v702_v63, %v702_v63 }
 0x12f   : > { %v955_v54 = vpack.c.bf16 %v699_v43, %v699_v43  ;;  %782 = vst.msk [vmem:[%s1355_s3 + $0x1c] sm:$0xf] %vm774_vm2, %v957_v59  ;;  %v706_v5 = vmax.f32 %v690_v62, 0.0  ;;  %v959_v8 = vpack.c.bf16 %v703_v0, %v703_v0  ;;  %v707_v9 = vmax.f32 %v691_v1, 0.0 }
 0x130   : > { %v708_v10 = vmax.f32 %v692_v2, 0.0  ;;  %v960_v11 = vpack.c.bf16 %v704_v3, %v704_v3  ;;  %v961_v12 = vpack.c.bf16 %v705_v4, %v705_v4  ;;  %v709_v14 = vmax.f32 %v693_v6, 0.0  ;;  %783 = vst.msk [vmem:[%s1355_s3 + $0x20] sm:$0xf] %vm774_vm2, %v958_v7 }
 0x131   : > { %780 = vst.msk [vmem:[%s1355_s3 + $0x14] sm:$0xf] %vm774_vm2, %v955_v54  ;;  %v962_v13 = vpack.c.bf16 %v706_v5, %v706_v5  ;;  %784 = vst.msk [vmem:[%s1355_s3 + $0x24] sm:$0xf] %vm774_vm2, %v959_v8  ;;  %v963_v15 = vpack.c.bf16 %v707_v9, %v707_v9 }
 0x132   : > { %v964_v16 = vpack.c.bf16 %v708_v10, %v708_v10  ;;  %785 = vst.msk [vmem:[%s1355_s3 + $0x28] sm:$0xf] %vm774_vm2, %v960_v11  ;;  %786 = vst.msk [vmem:[%s1355_s3 + $0x2c] sm:$0xf] %vm774_vm2, %v961_v12  ;;  %v965_v17 = vpack.c.bf16 %v709_v14, %v709_v14 }
 0x133   : > { %787 = vst.msk [vmem:[%s1355_s3 + $0x30] sm:$0xf] %vm774_vm2, %v962_v13  ;;  %788 = vst.msk [vmem:[%s1355_s3 + $0x34] sm:$0xf] %vm774_vm2, %v963_v15 }
 0x134   : > { %789 = vst.msk [vmem:[%s1355_s3 + $0x38] sm:$0xf] %vm774_vm2, %v964_v16  ;;  %790 = vst.msk [vmem:[%s1355_s3 + $0x3c] sm:$0xf] %vm774_vm2, %v965_v17 }
 0x135 PF: > { %s13_s16 = sadd.s32 1, %s1125_s16   ;;  %s1356_s12 = smov %s1113_s13 }
 0x136   : > { %p10_p12 = scmp.ge.s32.totalorder %s13_s16, 7   ;;  %s1357_s13 = smov %s1183_s20 }
 0x137   : > { %s1358_s14 = smov %s1121_s15  ;;  %s1359_s15 = smov %s1361_s17 }
 0x138   :  { %12 = sbr.rel (!%p10_p12) target bundleno = 3 (0x3), region = 122 }

// kernel: resnet34_forward.39
= control target key start
LH: loop header
LB: loop body
LE: loop exit
PB: predicated region body
PF: predicated region fallthrough
CT: control target
= control target key end

     0   :  { %s1319_s15 = smov 0   ;;  %s1321_s16 = smov 0   ;;  %s1565_s0 = inlined_call_operand.vmem [shape: bf16[128,640], index: 0, kind: input, shape index: {}]   ;;  %s1566_s1 = inlined_call_operand.vmem [shape: bf16[640,64], index: 1, kind: input, shape index: {}]   ;;  %s1567_s2 = inlined_call_operand.vmem [shape: f32[1,64], index: 2, kind: input, shape index: {}]   ;;  %s1568_s3 = inlined_call_operand.vmem [shape: bf16[128,64], index: 3, kind: input, shape index: {}]   ;;  %s1569_s4 = inlined_call_operand.vmem [shape: bf16[128,64], index: 4, kind: output, shape index: {}]  }
   0x1   :  { %s1323_s17 = smov 0   ;;  %s1325_s18 = smov 0  }
   0x2   :  { %s1327_s19 = smov 0  }
   0x3 LB: > { %s26_s20 = sadd.s32 1, %s1287_s18  ;;  %p49_p1 = scmp.ne.s32.totalorder %s1279_s16, %s1275_s15  ;;  %s1291_s19 = sphi %s1327_s19, %s14_s19   ;;  %s1287_s18 = sphi %s1325_s18, %s1573_s18   ;;  %s1283_s17 = sphi %s1323_s17, %s1572_s17   ;;  %s1279_s16 = sphi %s1321_s16, %s1571_s16   ;;  %s1275_s15 = sphi %s1319_s15, %s1570_s15  }
   0x4   : > { %p27_p0 = scmp.ge.s32.totalorder %s26_s20, 5  ;;  %p50_p2 = scmp.eq.s32.totalorder %s1291_s19, 0 }
   0x5   : > { %s42_s22 = sadd.s32 1, %s1279_s16  ;;  %p1031_p5 = scmp.ge.s32.totalorder %s1291_s19, 5 }
   0x6   : > { %s1575_s20 = smov (%p27_p0, %s26_s20), 0  ;;  %p51_p3 = por %p50_p2, %p49_p1 }
   0x7   : > { %s38_s21 = ssub.s32 %s1287_s18, %s1575_s20  ;;  %203 = sbr.rel (%p1031_p5) target bundleno = 26 (0x1a), region = 24 }
   0x8   : > { %p40_p4 = scmp.eq.s32.totalorder %s38_s21, 0 }
   0xa   : > { %s1354_s23 = scalar_select %p40_p4, %s1279_s16, %s42_s22  }
   0xc   : > { %206 = sbr.rel (!%p51_p3) target bundleno = 26 (0x1a), region = 28  ;;  %s208_s24 = sand.u32 (%p51_p3), 1, %s1279_s16  }
   0xd   : > { %s1033_s25 = sshll.u32 (%p51_p3), %s1287_s18, 2  ;;  %s1032_s26 = sshll.u32 (%p51_p3), %s208_s24, 6 }
   0xe   : > { %s1362_s29 = scalar_lea.vmem (%p51_p3), %s1565_s0, %s1033_s25  ;;  %s210_s30 = scalar_lea.vmem (%p51_p3), [#allocation3], %s1032_s26 }
   0xf   : > { %v232_v0 = vld [vmem:[%s1362_s29] sm:$0xf] (%p51_p3)  ;;  %v234_v1 = vld [vmem:[%s1362_s29 + $0x14] sm:$0xf] (%p51_p3)  ;;  %v236_v2 = vld [vmem:[%s1362_s29 + $0x28] sm:$0xf] (%p51_p3) }
  0x10   : > { %233 = vst [vmem:[%s210_s30] sm:$0xf] (%p51_p3), %v232_v0  ;;  %235 = vst [vmem:[%s210_s30 + $0x4] sm:$0xf] (%p51_p3), %v234_v1  ;;  %v238_v3 = vld [vmem:[%s1362_s29 + $0x3c] sm:$0xf] (%p51_p3) }
  0x11   : > { %v240_v4 = vld [vmem:[%s1362_s29 + $0x50] sm:$0xf]  ;;  %237 = vst [vmem:[%s210_s30 + $0x8] sm:$0xf] %v236_v2  ;;  %239 = vst [vmem:[%s210_s30 + $0xc] sm:$0xf] %v238_v3 }
  0x12   : > { %241 = vst [vmem:[%s210_s30 + $0x10] sm:$0xf] %v240_v4  ;;  %v242_v5 = vld [vmem:[%s1362_s29 + $0x64] sm:$0xf]  ;;  %v244_v6 = vld [vmem:[%s1362_s29 + $0x78] sm:$0xf] }
  0x13   : > { %v246_v7 = vld [vmem:[%s1362_s29 + $0x8c] sm:$0xf]  ;;  %243 = vst [vmem:[%s210_s30 + $0x14] sm:$0xf] %v242_v5  ;;  %245 = vst [vmem:[%s210_s30 + $0x18] sm:$0xf] %v244_v6 }
  0x14   : > { %247 = vst [vmem:[%s210_s30 + $0x1c] sm:$0xf] %v246_v7  ;;  %v248_v8 = vld [vmem:[%s1362_s29 + $0xa0] sm:$0xf]  ;;  %v250_v9 = vld [vmem:[%s1362_s29 + $0xb4] sm:$0xf] }
  0x15   : > { %v252_v10 = vld [vmem:[%s1362_s29 + $0xc8] sm:$0xf]  ;;  %249 = vst [vmem:[%s210_s30 + $0x20] sm:$0xf] %v248_v8  ;;  %251 = vst [vmem:[%s210_s30 + $0x24] sm:$0xf] %v250_v9 }
  0x16   : > { %253 = vst [vmem:[%s210_s30 + $0x28] sm:$0xf] %v252_v10  ;;  %v254_v11 = vld [vmem:[%s1362_s29 + $0xdc] sm:$0xf]  ;;  %v256_v12 = vld [vmem:[%s1362_s29 + $0xf0] sm:$0xf] }
  0x17   : > { %v258_v13 = vld [vmem:[%s1362_s29 + $0x104] sm:$0xf]  ;;  %255 = vst [vmem:[%s210_s30 + $0x2c] sm:$0xf] %v254_v11  ;;  %257 = vst [vmem:[%s210_s30 + $0x30] sm:$0xf] %v256_v12 }
  0x18   : > { %259 = vst [vmem:[%s210_s30 + $0x34] sm:$0xf] %v258_v13  ;;  %v260_v14 = vld [vmem:[%s1362_s29 + $0x118] sm:$0xf]  ;;  %v262_v15 = vld [vmem:[%s1362_s29 + $0x12c] sm:$0xf] }
  0x19   : > { %261 = vst [vmem:[%s210_s30 + $0x38] sm:$0xf] %v260_v14  ;;  %263 = vst [vmem:[%s210_s30 + $0x3c] sm:$0xf] %v262_v15 }
  0x1a PF: > { %p1034_p6 = scmp.ge.s32.totalorder %s1291_s19, 1  ;;  %p330_p7 = scmp.lt.s32.totalorder %s1291_s19, 6 }
  0x1c   : > { %p331_p8 = pnand %p1034_p6, %p330_p7 }
  0x1d   : > { %s337_s5 = sand.u32 (!%p331_p8), 1, %s1275_s15   ;;  %s1036_s6 = sshll.u32 (!%p331_p8), %s1283_s17, 4 }
  0x1e   : > { %334 = sbr.rel (%p331_p8) target bundleno = 320 (0x140), region = 73  ;;  %s1035_s7 = sshll.u32 (!%p331_p8), %s337_s5, 6 }
  0x1f   : > { %p386_p9 = scmp.lt.s32.totalorder (!%p331_p8), %s1036_s6, 79  ;;  %s1389_s12 = scalar_lea.vmem (!%p331_p8), [#allocation3], %s1035_s7 }
  0x20   : > { %p1038_p10 = scmp.ne.s32.totalorder (!%p331_p8), %s1283_s17, 0 }
  0x23   : > { %s1577_s6 = smov (!%p386_p9, %s1036_s6), 79  ;;  %419 = sbr.rel (%p1038_p10) target bundleno = 49 (0x31), region = 81 }
  0x24   : > { %s1037_s8 = sshll.u32 %s1577_s6, 2 }
  0x25   : > { %s1387_s11 = scalar_lea.vmem %s1566_s1, %s1037_s8 }
  0x28   : > { %vm420_vm0 = vcmask 523264   ;;  %v1293_v16 = vmov 0.0  }
  0x29   : > { %421 = vst.msk [vmem:[#allocation2] sm:$0xff] %vm420_vm0, %v1293_v16  ;;  %422 = vst.msk [vmem:[#allocation2 + $0x8] sm:$0xff] %vm420_vm0, %v1293_v16 }
  0x2a   : > { %423 = vst.msk [vmem:[#allocation2 + $0x10] sm:$0xff] %vm420_vm0, %v1293_v16  ;;  %424 = vst.msk [vmem:[#allocation2 + $0x18] sm:$0xff] %vm420_vm0, %v1293_v16 }
  0x2b   : > { %425 = vst.msk [vmem:[#allocation2 + $0x20] sm:$0xff] %vm420_vm0, %v1293_v16  ;;  %426 = vst.msk [vmem:[#allocation2 + $0x28] sm:$0xff] %vm420_vm0, %v1293_v16 }
  0x2c   : > { %427 = vst.msk [vmem:[#allocation2 + $0x30] sm:$0xff] %vm420_vm0, %v1293_v16  ;;  %428 = vst.msk [vmem:[#allocation2 + $0x38] sm:$0xff] %vm420_vm0, %v1293_v16 }
  0x2d   : > { %429 = vst.msk [vmem:[#allocation2 + $0x40] sm:$0xff] %vm420_vm0, %v1293_v16  ;;  %430 = vst.msk [vmem:[#allocation2 + $0x48] sm:$0xff] %vm420_vm0, %v1293_v16 }
  0x2e   : > { %431 = vst.msk [vmem:[#allocation2 + $0x50] sm:$0xff] %vm420_vm0, %v1293_v16  ;;  %432 = vst.msk [vmem:[#allocation2 + $0x58] sm:$0xff] %vm420_vm0, %v1293_v16 }
  0x2f   : > { %433 = vst.msk [vmem:[#allocation2 + $0x60] sm:$0xff] %vm420_vm0, %v1293_v16  ;;  %434 = vst.msk [vmem:[#allocation2 + $0x68] sm:$0xff] %vm420_vm0, %v1293_v16 }
  0x30   : > { %435 = vst.msk [vmem:[#allocation2 + $0x70] sm:$0xff] %vm420_vm0, %v1293_v16  ;;  %436 = vst.msk [vmem:[#allocation2 + $0x78] sm:$0xff] %vm420_vm0, %v1293_v16 }
  0x31 PF: > { %v1237_v17 = vld [vmem:[%s1387_s11 + $0x38] sm:$0xff]   ;;  %v1238_v18 = vld [vmem:[%s1387_s11 + $0x30] sm:$0xff]   ;;  %v1239_v19 = vld [vmem:[%s1387_s11 + $0x28] sm:$0xff]   ;;  %vm694_vm1 = vcmask 523264   ;;  %p1055_p11 = scmp.ne.s32.totalorder %s1283_s17, 4 }
  0x32   : > { %1148 = vmatprep.subr.bf16.mxu0 %v1237_v17  ;;  %1180 = vmatprep.subr.bf16.mxu1 %v1237_v17  ;;  %v1240_v20 = vld [vmem:[%s1387_s11 + $0x20] sm:$0xff]   ;;  %v1241_v23 = vld [vmem:[%s1387_s11 + $0x18] sm:$0xff]   ;;  %v1242_v24 = vld [vmem:[%s1387_s11 + $0x10] sm:$0xff]  }
  0x33   : > { %1149 = vmatpush3.bf16.msra.mxu0 %v1237_v17  ;;  %1188 = vmatpush3.bf16.msra.mxu1 %v1237_v17  ;;  %v1245_v21 = vld [vmem:[%s1389_s12] sm:$0xff]   ;;  %v1243_v25 = vld [vmem:[%s1387_s11 + $0x8] sm:$0xff]   ;;  %v1249_v29 = vld [vmem:[%s1389_s12 + $0x10] sm:$0xff]  }
  0x34   : > { %1150 = vmatprep.subr.bf16.mxu0 %v1238_v18  ;;  %1181 = vmatprep.subr.bf16.mxu1 %v1238_v18  ;;  %v1246_v22 = vld [vmem:[%s1389_s12 + $0x20] sm:$0xff]   ;;  %v1247_v27 = vld [vmem:[%s1389_s12 + $0x8] sm:$0xff]   ;;  %v1250_v30 = vld [vmem:[%s1389_s12 + $0x30] sm:$0xff]  }
  0x35   : > { %1164 = vmatprep.mubr.bf16.mxu0 %v1245_v21  ;;  %1172 = vmatprep.mubr.bf16.mxu1 %v1246_v22  ;;  %v1244_v26 = vld [vmem:[%s1387_s11] sm:$0xff]   ;;  %v1248_v28 = vld [vmem:[%s1389_s12 + $0x28] sm:$0xff]   ;;  %v1251_v31 = vld [vmem:[%s1389_s12 + $0x18] sm:$0xff]  }
  0x36   : > { %v1252_v32 = vld [vmem:[%s1389_s12 + $0x38] sm:$0xff]   ;;  %v439_v33 = vld [vmem:[#allocation2 + $0x10] sm:$0xff]  ;;  %v437_v37 = vld [vmem:[#allocation2] sm:$0xff] }
  0x37   : > { %1151 = vmatpush3.bf16.msra.mxu0 %v1238_v18  ;;  %1189 = vmatpush3.bf16.msra.mxu1 %v1238_v18  ;;  %v447_v34 = vld [vmem:[#allocation2 + $0x50] sm:$0xff]  ;;  %v445_v38 = vld [vmem:[#allocation2 + $0x40] sm:$0xff]  ;;  %v440_v43 = vld [vmem:[#allocation2 + $0x18] sm:$0xff] }
  0x38   : > { %1152 = vmatprep.subr.bf16.mxu0 %v1239_v19  ;;  %1182 = vmatprep.subr.bf16.mxu1 %v1239_v19  ;;  %v448_v44 = vld [vmem:[#allocation2 + $0x58] sm:$0xff]  ;;  %v438_v49 = vld [vmem:[#allocation2 + $0x8] sm:$0xff]  ;;  %v443_v55 = vld [vmem:[#allocation2 + $0x30] sm:$0xff] }
  0x39   : > { %v446_v50 = vld [vmem:[#allocation2 + $0x48] sm:$0xff]  ;;  %v451_v56 = vld [vmem:[#allocation2 + $0x70] sm:$0xff]  ;;  %v441_v61 = vld [vmem:[#allocation2 + $0x20] sm:$0xff] }
  0x3a   : > { %v449_v62 = vld [vmem:[#allocation2 + $0x60] sm:$0xff]  ;;  %v444_v3 = vld [vmem:[#allocation2 + $0x38] sm:$0xff]  ;;  %v442_v9 = vld [vmem:[#allocation2 + $0x28] sm:$0xff] }
  0x3b   : > { %1153 = vmatpush3.bf16.msra.mxu0 %v1239_v19  ;;  %1190 = vmatpush3.bf16.msra.mxu1 %v1239_v19  ;;  %v452_v4 = vld [vmem:[#allocation2 + $0x78] sm:$0xff]  ;;  %v450_v10 = vld [vmem:[#allocation2 + $0x68] sm:$0xff] }
  0x3c   : > { %1154 = vmatprep.subr.bf16.mxu0 %v1240_v20  ;;  %1183 = vmatprep.subr.bf16.mxu1 %v1240_v20 }
  0x3f   : > { %1155 = vmatpush3.bf16.msra.mxu0 %v1240_v20  ;;  %1191 = vmatpush3.bf16.msra.mxu1 %v1240_v20 }
  0x40   : > { %1156 = vmatprep.subr.bf16.mxu0 %v1241_v23  ;;  %1184 = vmatprep.subr.bf16.mxu1 %v1241_v23 }
  0x43   : > { %1157 = vmatpush3.bf16.msra.mxu0 %v1241_v23  ;;  %1192 = vmatpush3.bf16.msra.mxu1 %v1241_v23 }
  0x44   : > { %1158 = vmatprep.subr.bf16.mxu0 %v1242_v24  ;;  %1185 = vmatprep.subr.bf16.mxu1 %v1242_v24 }
  0x47   : > { %1159 = vmatpush3.bf16.msra.mxu0 %v1242_v24  ;;  %1193 = vmatpush3.bf16.msra.mxu1 %v1242_v24 }
  0x48   : > { %1160 = vmatprep.subr.bf16.mxu0 %v1243_v25  ;;  %1186 = vmatprep.subr.bf16.mxu1 %v1243_v25 }
  0x4b   : > { %1161 = vmatpush3.bf16.msra.mxu0 %v1243_v25  ;;  %1194 = vmatpush3.bf16.msra.mxu1 %v1243_v25 }
  0x4c   : > { %1162 = vmatprep.subr.bf16.mxu0 %v1244_v26  ;;  %1187 = vmatprep.subr.bf16.mxu1 %v1244_v26 }
  0x4f   : > { %1163 = vmatpush3.bf16.msra.mxu0 %v1244_v26  ;;  %1195 = vmatpush3.bf16.msra.mxu1 %v1244_v26 }
  0x52   : > { %1165 = vmatmul.mubr.bf16.vlgmr.msra.gmra.mxu0 %v1247_v27  ;;  %1173 = vmatmul.mubr.bf16.vlgmr.msra.gmra.mxu1 %v1248_v28 }
  0x53   : > { %1168 = vmatprep.mubr.bf16.mxu0 %v1249_v29  ;;  %1176 = vmatprep.mubr.bf16.mxu1 %v1250_v30 }
  0x5a   : > { %1169 = vmatmul.mubr.bf16.gmra.mxu0 %v1251_v31  ;;  %1177 = vmatmul.mubr.bf16.gmra.mxu1 %v1252_v32 }
 0x112   : > { %v1166_v35 = vpop.f32.mrf.mxu0  ;;  %v1174_v36 = vpop.f32.mrf.mxu1 }
 0x113   : > { %v680_v39 = vadd.f32 %v1166_v35, %v439_v33  ;;  %v688_v40 = vadd.f32 %v1174_v36, %v447_v34 }
 0x114   : > { %v615_v41 = vpop.f32.mrf.mxu0  ;;  %v647_v42 = vpop.f32.mrf.mxu1 }
 0x115   : > { %697 = vst.msk [vmem:[#allocation2 + $0x10] sm:$0xff] %vm694_vm1, %v680_v39  ;;  %705 = vst.msk [vmem:[#allocation2 + $0x50] sm:$0xff] %vm694_vm1, %v688_v40  ;;  %v678_v45 = vadd.f32 %v615_v41, %v437_v37  ;;  %v686_v46 = vadd.f32 %v647_v42, %v445_v38 }
 0x116   : > { %v1167_v47 = vpop.f32.mrf.mxu0  ;;  %v1175_v48 = vpop.f32.mrf.mxu1 }
 0x117   : > { %695 = vst.msk [vmem:[#allocation2] sm:$0xff] %vm694_vm1, %v678_v45  ;;  %703 = vst.msk [vmem:[#allocation2 + $0x40] sm:$0xff] %vm694_vm1, %v686_v46  ;;  %v681_v51 = vadd.f32 %v1167_v47, %v440_v43  ;;  %v689_v52 = vadd.f32 %v1175_v48, %v448_v44 }
 0x118   : > { %v618_v53 = vpop.f32.mrf.mxu0  ;;  %v650_v54 = vpop.f32.mrf.mxu1 }
 0x119   : > { %698 = vst.msk [vmem:[#allocation2 + $0x18] sm:$0xff] %vm694_vm1, %v681_v51  ;;  %706 = vst.msk [vmem:[#allocation2 + $0x58] sm:$0xff] %vm694_vm1, %v689_v52  ;;  %v679_v57 = vadd.f32 %v618_v53, %v438_v49  ;;  %v687_v58 = vadd.f32 %v650_v54, %v446_v50 }
 0x11a   : > { %v1170_v59 = vpop.f32.mrf.mxu0  ;;  %v1178_v60 = vpop.f32.mrf.mxu1 }
 0x11b   : > { %696 = vst.msk [vmem:[#allocation2 + $0x8] sm:$0xff] %vm694_vm1, %v679_v57  ;;  %704 = vst.msk [vmem:[#allocation2 + $0x48] sm:$0xff] %vm694_vm1, %v687_v58  ;;  %v684_v63 = vadd.f32 %v1170_v59, %v443_v55  ;;  %v692_v0 = vadd.f32 %v1178_v60, %v451_v56 }
 0x11c   : > { %v631_v1 = vpop.f32.mrf.mxu0  ;;  %v663_v2 = vpop.f32.mrf.mxu1 }
 0x11d   : > { %701 = vst.msk [vmem:[#allocation2 + $0x30] sm:$0xff] %vm694_vm1, %v684_v63  ;;  %709 = vst.msk [vmem:[#allocation2 + $0x70] sm:$0xff] %vm694_vm1, %v692_v0  ;;  %v682_v5 = vadd.f32 %v631_v1, %v441_v61  ;;  %v690_v6 = vadd.f32 %v663_v2, %v449_v62 }
 0x11e   : > { %v1171_v7 = vpop.f32.mrf.mxu0  ;;  %v1179_v8 = vpop.f32.mrf.mxu1 }
 0x11f   : > { %699 = vst.msk [vmem:[#allocation2 + $0x20] sm:$0xff] %vm694_vm1, %v682_v5  ;;  %707 = vst.msk [vmem:[#allocation2 + $0x60] sm:$0xff] %vm694_vm1, %v690_v6  ;;  %v685_v11 = vadd.f32 %v1171_v7, %v444_v3  ;;  %v693_v12 = vadd.f32 %v1179_v8, %v452_v4  ;;  %714 = sbr.rel (%p1055_p11) target bundleno = 320 (0x140), region = 85 }
 0x120   : > { %v634_v13 = vpop.f32.mrf.mxu0  ;;  %v666_v14 = vpop.f32.mrf.mxu1 }
 0x121   : > { %702 = vst.msk [vmem:[#allocation2 + $0x38] sm:$0xff] %vm694_vm1, %v685_v11  ;;  %710 = vst.msk [vmem:[#allocation2 + $0x78] sm:$0xff] %vm694_vm1, %v693_v12  ;;  %v683_v15 = vadd.f32 %v634_v13, %v442_v9  ;;  %v691_v16 = vadd.f32 %v666_v14, %v450_v10 }
 0x123   : > { %700 = vst.msk [vmem:[#allocation2 + $0x28] sm:$0xff] %vm694_vm1, %v683_v15  ;;  %708 = vst.msk [vmem:[#allocation2 + $0x68] sm:$0xff] %vm694_vm1, %v691_v16 }
 0x124   : > { %v715_v17 = vld [vmem:[#allocation2] sm:$0xff]  ;;  %vm882_vm2 = vcmask 519168   ;;  %v716_v22 = vld [vmem:[#allocation2 + $0x8] sm:$0xff]  ;;  %v717_v24 = vld [vmem:[#allocation2 + $0x10] sm:$0xff] }
 0x125   : > { %v1444_v18 = vld [vmem:[%s1567_s2] ss:$0 sm:$0xff]  ;;  %v1125_v25 = vld [vmem:[%s1568_s3 + $0x8] sm:$0xff]   ;;  %v718_v29 = vld [vmem:[#allocation2 + $0x18] sm:$0xff] }
 0x126   : > { %v1094_v19 = vld [vmem:[%s1568_s3] sm:$0xff]   ;;  %v738_v20 = vadd.f32 %v1444_v18, %v715_v17  ;;  %v739_v26 = vadd.f32 %v1444_v18, %v716_v22  ;;  %v740_v27 = vadd.f32 %v1444_v18, %v717_v24  ;;  %v1099_v28 = vunpack.c.l.bf16 %v1125_v25  ;;  %v1126_v32 = vld [vmem:[%s1568_s3 + $0x10] sm:$0xff]   ;;  %v1127_v39 = vld [vmem:[%s1568_s3 + $0x18] sm:$0xff]  }
 0x127   : > { %v1095_v21 = vunpack.c.l.bf16 %v1094_v19  ;;  %v1096_v23 = vunpack.c.h.bf16 %v1094_v19  ;;  %v1100_v30 = vunpack.c.h.bf16 %v1125_v25  ;;  %v719_v31 = vld [vmem:[#allocation2 + $0x20] sm:$0xff]  ;;  %v741_v34 = vadd.f32 %v1444_v18, %v718_v29  ;;  %v721_v38 = vld [vmem:[#allocation2 + $0x30] sm:$0xff]  ;;  %v724_v59 = vld [vmem:[#allocation2 + $0x48] sm:$0xff] }
 0x128   : > { %v742_v35 = vadd.f32 %v1444_v18, %v719_v31  ;;  %v1103_v36 = vunpack.c.l.bf16 %v1126_v32  ;;  %v788_v41 = vadd.f32 %v1099_v28, %v740_v27  ;;  %v1104_v43 = vunpack.c.h.bf16 %v1126_v32  ;;  %v722_v44 = vld [vmem:[#allocation2 + $0x38] sm:$0xff]  ;;  %v723_v53 = vld [vmem:[#allocation2 + $0x40] sm:$0xff]  ;;  %v725_v0 = vld [vmem:[#allocation2 + $0x50] sm:$0xff] }
 0x129   : > { %v786_v33 = vadd.f32 %v1095_v21, %v738_v20  ;;  %v787_v40 = vadd.f32 %v1096_v23, %v739_v26  ;;  %v789_v46 = vadd.f32 %v1100_v30, %v741_v34  ;;  %v744_v48 = vadd.f32 %v1444_v18, %v721_v38  ;;  %v1128_v58 = vld [vmem:[%s1568_s3 + $0x20] sm:$0xff]   ;;  %v1129_v1 = vld [vmem:[%s1568_s3 + $0x28] sm:$0xff]   ;;  %v726_v6 = vld [vmem:[#allocation2 + $0x58] sm:$0xff] }
 0x12a   : > { %v720_v37 = vld [vmem:[#allocation2 + $0x28] sm:$0xff]  ;;  %v790_v47 = vadd.f32 %v1103_v36, %v742_v35  ;;  %v804_v50 = vmax.f32 %v788_v41, 0.0  ;;  %v1107_v52 = vunpack.c.l.bf16 %v1127_v39  ;;  %v745_v57 = vadd.f32 %v1444_v18, %v722_v44  ;;  %v727_v11 = vld [vmem:[#allocation2 + $0x60] sm:$0xff]  ;;  %v1130_v16 = vld [vmem:[%s1568_s3 + $0x30] sm:$0xff]  }
 0x12b   : > { %v743_v42 = vadd.f32 %v1444_v18, %v720_v37  ;;  %v802_v45 = vmax.f32 %v786_v33, 0.0  ;;  %v803_v49 = vmax.f32 %v787_v40, 0.0  ;;  %v805_v55 = vmax.f32 %v789_v46, 0.0  ;;  %v728_v17 = vld [vmem:[#allocation2 + $0x68] sm:$0xff]  ;;  %v729_v27 = vld [vmem:[#allocation2 + $0x70] sm:$0xff]  ;;  %v1131_v32 = vld [vmem:[%s1568_s3 + $0x38] sm:$0xff]  }
 0x12c   : > { %v806_v56 = vmax.f32 %v790_v47, 0.0  ;;  %v1079_v61 = vpack.c.bf16 %v804_v50, %v804_v50  ;;  %v792_v63 = vadd.f32 %v1107_v52, %v744_v48  ;;  %v1108_v4 = vunpack.c.h.bf16 %v1127_v39  ;;  %v730_v37 = vld [vmem:[#allocation2 + $0x78] sm:$0xff] }
 0x12d   : > { %v791_v51 = vadd.f32 %v1104_v43, %v743_v42  ;;  %v1077_v54 = vpack.c.bf16 %v802_v45, %v802_v45  ;;  %v1078_v60 = vpack.c.bf16 %v803_v49, %v803_v49  ;;  %v1080_v2 = vpack.c.bf16 %v805_v55, %v805_v55 }
 0x12e   : > { %v1081_v3 = vpack.c.bf16 %v806_v56, %v806_v56  ;;  %v746_v5 = vadd.f32 %v1444_v18, %v723_v53  ;;  %885 = vst.msk [vmem:[%s1569_s4 + $0x8] sm:$0xf] %vm882_vm2, %v1079_v61  ;;  %v808_v8 = vmax.f32 %v792_v63, 0.0  ;;  %v1111_v9 = vunpack.c.l.bf16 %v1128_v58 }
 0x12f   : > { %v807_v62 = vmax.f32 %v791_v51, 0.0  ;;  %883 = vst.msk [vmem:[%s1569_s4] sm:$0xf] %vm882_vm2, %v1077_v54  ;;  %884 = vst.msk [vmem:[%s1569_s4 + $0x4] sm:$0xf] %vm882_vm2, %v1078_v60  ;;  %v747_v10 = vadd.f32 %v1444_v18, %v724_v59  ;;  %v793_v12 = vadd.f32 %v1108_v4, %v745_v57  ;;  %v1112_v13 = vunpack.c.h.bf16 %v1128_v58 }
 0x130   : > { %886 = vst.msk [vmem:[%s1569_s4 + $0xc] sm:$0xf] %vm882_vm2, %v1080_v2  ;;  %887 = vst.msk [vmem:[%s1569_s4 + $0x10] sm:$0xf] %vm882_vm2, %v1081_v3  ;;  %v748_v14 = vadd.f32 %v1444_v18, %v725_v0  ;;  %v1115_v15 = vunpack.c.l.bf16 %v1129_v1  ;;  %v1083_v19 = vpack.c.bf16 %v808_v8, %v808_v8  ;;  %v794_v20 = vadd.f32 %v1111_v9, %v746_v5 }
 0x131   : > { %v1082_v7 = vpack.c.bf16 %v807_v62, %v807_v62  ;;  %v749_v21 = vadd.f32 %v1444_v18, %v726_v6  ;;  %v1116_v22 = vunpack.c.h.bf16 %v1129_v1  ;;  %v809_v23 = vmax.f32 %v793_v12, 0.0 }
 0x132   : > { %v795_v24 = vadd.f32 %v1112_v13, %v747_v10  ;;  %v796_v25 = vadd.f32 %v1115_v15, %v748_v14  ;;  %v750_v26 = vadd.f32 %v1444_v18, %v727_v11  ;;  %889 = vst.msk [vmem:[%s1569_s4 + $0x18] sm:$0xf] %vm882_vm2, %v1083_v19  ;;  %v810_v28 = vmax.f32 %v794_v20, 0.0 }
 0x133   : > { %888 = vst.msk [vmem:[%s1569_s4 + $0x14] sm:$0xf] %vm882_vm2, %v1082_v7  ;;  %v797_v29 = vadd.f32 %v1116_v22, %v749_v21  ;;  %v1119_v30 = vunpack.c.l.bf16 %v1130_v16  ;;  %v751_v31 = vadd.f32 %v1444_v18, %v728_v17  ;;  %v1084_v33 = vpack.c.bf16 %v809_v23, %v809_v23 }
 0x134   : > { %v811_v34 = vmax.f32 %v795_v24, 0.0  ;;  %v812_v35 = vmax.f32 %v796_v25, 0.0  ;;  %v1120_v36 = vunpack.c.h.bf16 %v1130_v16  ;;  %v1085_v38 = vpack.c.bf16 %v810_v28, %v810_v28 }
 0x135   : > { %v813_v39 = vmax.f32 %v797_v29, 0.0  ;;  %v798_v40 = vadd.f32 %v1119_v30, %v750_v26  ;;  %v752_v41 = vadd.f32 %v1444_v18, %v729_v27  ;;  %890 = vst.msk [vmem:[%s1569_s4 + $0x1c] sm:$0xf] %vm882_vm2, %v1084_v33  ;;  %v1123_v45 = vunpack.c.l.bf16 %v1131_v32 }
 0x136   : > { %v1086_v42 = vpack.c.bf16 %v811_v34, %v811_v34  ;;  %v1087_v43 = vpack.c.bf16 %v812_v35, %v812_v35  ;;  %v799_v44 = vadd.f32 %v1120_v36, %v751_v31  ;;  %891 = vst.msk [vmem:[%s1569_s4 + $0x20] sm:$0xf] %vm882_vm2, %v1085_v38  ;;  %v753_v48 = vadd.f32 %v1444_v18, %v730_v37 }
 0x137   : > { %v1088_v46 = vpack.c.bf16 %v813_v39, %v813_v39  ;;  %v814_v47 = vmax.f32 %v798_v40, 0.0  ;;  %v1124_v49 = vunpack.c.h.bf16 %v1131_v32  ;;  %v800_v51 = vadd.f32 %v1123_v45, %v752_v41 }
 0x138   : > { %892 = vst.msk [vmem:[%s1569_s4 + $0x24] sm:$0xf] %vm882_vm2, %v1086_v42  ;;  %893 = vst.msk [vmem:[%s1569_s4 + $0x28] sm:$0xf] %vm882_vm2, %v1087_v43  ;;  %v815_v50 = vmax.f32 %v799_v44, 0.0 }
 0x139   : > { %894 = vst.msk [vmem:[%s1569_s4 + $0x2c] sm:$0xf] %vm882_vm2, %v1088_v46  ;;  %v1089_v52 = vpack.c.bf16 %v814_v47, %v814_v47  ;;  %v801_v18 = vadd.f32 %v1124_v49, %v753_v48  ;;  %v816_v54 = vmax.f32 %v800_v51, 0.0 }
 0x13a   : > { %v1090_v53 = vpack.c.bf16 %v815_v50, %v815_v50 }
 0x13b   : > { %895 = vst.msk [vmem:[%s1569_s4 + $0x30] sm:$0xf] %vm882_vm2, %v1089_v52  ;;  %v817_v55 = vmax.f32 %v801_v18, 0.0  ;;  %v1091_v56 = vpack.c.bf16 %v816_v54, %v816_v54 }
 0x13c   : > { %896 = vst.msk [vmem:[%s1569_s4 + $0x34] sm:$0xf] %vm882_vm2, %v1090_v53 }
 0x13d   : > { %v1092_v57 = vpack.c.bf16 %v817_v55, %v817_v55  ;;  %897 = vst.msk [vmem:[%s1569_s4 + $0x38] sm:$0xf] %vm882_vm2, %v1091_v56 }
 0x13f   : > { %898 = vst.msk [vmem:[%s1569_s4 + $0x3c] sm:$0xf] %vm882_vm2, %v1092_v57 }
 0x140 PF: > { %s14_s19 = sadd.s32 1, %s1291_s19   ;;  %s1570_s15 = smov %s1279_s16 }
 0x141   : > { %p11_p12 = scmp.ge.s32.totalorder %s14_s19, 7   ;;  %s1571_s16 = smov %s1354_s23 }
 0x142   : > { %s1572_s17 = smov %s1287_s18  ;;  %s1573_s18 = smov %s1575_s20 }
 0x143   :  { %13 = sbr.rel (!%p11_p12) target bundleno = 3 (0x3), region = 129 }

// kernel: resnet34_forward.44
= control target key start
LH: loop header
LB: loop body
LE: loop exit
PB: predicated region body
PF: predicated region fallthrough
CT: control target
= control target key end

     0   :  { %s798_s12 = smov 0   ;;  %s800_s13 = smov 0   ;;  %s891_s0 = inlined_call_operand.vmem [shape: bf16[32,640], index: 0, kind: input, shape index: {}]   ;;  %s892_s1 = inlined_call_operand.vmem [shape: bf16[640,128], index: 1, kind: input, shape index: {}]   ;;  %s893_s2 = inlined_call_operand.vmem [shape: f32[1,128], index: 2, kind: input, shape index: {}]   ;;  %s894_s3 = inlined_call_operand.vmem [shape: bf16[32,128], index: 3, kind: output, shape index: {}]  }
   0x1   :  { %s802_s14 = smov 0   ;;  %s804_s15 = smov 0  }
   0x2   :  { %s806_s16 = smov 0  }
   0x3 LB: > { %s25_s17 = sadd.s32 1, %s771_s15  ;;  %p48_p1 = scmp.ne.s32.totalorder %s763_s13, %s759_s12  ;;  %s775_s16 = sphi %s806_s16, %s13_s16   ;;  %s771_s15 = sphi %s804_s15, %s898_s15   ;;  %s767_s14 = sphi %s802_s14, %s897_s14   ;;  %s763_s13 = sphi %s800_s13, %s896_s13   ;;  %s759_s12 = sphi %s798_s12, %s895_s12  }
   0x4   : > { %p26_p0 = scmp.ge.s32.totalorder %s25_s17, 5  ;;  %p49_p2 = scmp.eq.s32.totalorder %s775_s16, 0 }
   0x5   : > { %s41_s19 = sadd.s32 1, %s763_s13  ;;  %p613_p5 = scmp.ge.s32.totalorder %s775_s16, 5 }
   0x6   : > { %s900_s17 = smov (%p26_p0, %s25_s17), 0  ;;  %p50_p3 = por %p49_p2, %p48_p1 }
   0x7   : > { %s37_s18 = ssub.s32 %s771_s15, %s900_s17  ;;  %162 = sbr.rel (%p613_p5) target bundleno = 18 (0x12), region = 20 }
   0x8   : > { %p39_p4 = scmp.eq.s32.totalorder %s37_s18, 0 }
   0xa   : > { %s833_s20 = scalar_select %p39_p4, %s763_s13, %s41_s19  }
   0xc   : > { %165 = sbr.rel (!%p50_p3) target bundleno = 18 (0x12), region = 24  ;;  %s167_s21 = sand.u32 (%p50_p3), 1, %s763_s13  }
   0xd   : > { %s615_s22 = sshll.u32 (%p50_p3), %s771_s15, 2  ;;  %s614_s23 = sshll.u32 (%p50_p3), %s167_s21, 4 }
   0xe   : > { %s174_s26 = scalar_lea.vmem (%p50_p3), %s891_s0, %s615_s22  ;;  %s169_s27 = scalar_lea.vmem (%p50_p3), [#allocation3], %s614_s23 }
   0xf   : > { %v191_v0 = vld [vmem:[%s174_s26] sm:$0xf] (%p50_p3)  ;;  %v193_v1 = vld [vmem:[%s174_s26 + $0x14] sm:$0xf] (%p50_p3)  ;;  %v195_v2 = vld [vmem:[%s174_s26 + $0x28] sm:$0xf] (%p50_p3) }
  0x10   : > { %192 = vst [vmem:[%s169_s27] sm:$0xf] (%p50_p3), %v191_v0  ;;  %194 = vst [vmem:[%s169_s27 + $0x4] sm:$0xf] (%p50_p3), %v193_v1  ;;  %v197_v3 = vld [vmem:[%s174_s26 + $0x3c] sm:$0xf] (%p50_p3) }
  0x11   : > { %196 = vst [vmem:[%s169_s27 + $0x8] sm:$0xf] %v195_v2  ;;  %198 = vst [vmem:[%s169_s27 + $0xc] sm:$0xf] %v197_v3 }
  0x12 PF: > { %p616_p6 = scmp.ge.s32.totalorder %s775_s16, 1  ;;  %p241_p7 = scmp.lt.s32.totalorder %s775_s16, 6 }
  0x14   : > { %p242_p8 = pnand %p616_p6, %p241_p7 }
  0x15   : > { %s248_s28 = sand.u32 (!%p242_p8), 1, %s759_s12   ;;  %s618_s29 = sshll.u32 (!%p242_p8), %s767_s14, 4 }
  0x16   : > { %245 = sbr.rel (%p242_p8) target bundleno = 284 (0x11c), region = 69  ;;  %s845_s30 = sshll.u32 (!%p242_p8), %s248_s28, 4 }
  0x17   : > { %p287_p9 = scmp.lt.s32.totalorder (!%p242_p8), %s618_s29, 79  ;;  %s250_s8 = scalar_lea.vmem (!%p242_p8), [#allocation3], %s845_s30 }
  0x18   : > { %p620_p10 = scmp.ne.s32.totalorder (!%p242_p8), %s767_s14, 0 }
  0x1b   : > { %s902_s29 = smov (!%p287_p9, %s618_s29), 79  ;;  %311 = sbr.rel (%p620_p10) target bundleno = 35 (0x23), region = 77 }
  0x1c   : > { %s619_s4 = sshll.u32 %s902_s29, 2 }
  0x1d   : > { %s850_s7 = scalar_lea.vmem %s892_s1, %s619_s4 }
  0x20   : > { %v777_v4 = vmov 0.0  }
  0x21   : > { %312 = vst [vmem:[#allocation2 + $0x10] sm:$0xff] %v777_v4  ;;  %313 = vst [vmem:[#allocation2] sm:$0xff] %v777_v4 }
  0x22   : > { %314 = vst [vmem:[#allocation2 + $0x18] sm:$0xff] %v777_v4  ;;  %315 = vst [vmem:[#allocation2 + $0x8] sm:$0xff] %v777_v4 }
  0x23 PF: > { %v727_v5 = vld [vmem:[%s850_s7 + $0x38] sm:$0xff]   ;;  %v728_v6 = vld [vmem:[%s850_s7 + $0x30] sm:$0xff]   ;;  %v729_v7 = vld [vmem:[%s850_s7 + $0x28] sm:$0xff]   ;;  %p631_p11 = scmp.ne.s32.totalorder %s767_s14, 4 }
  0x24   : > { %666 = vmatprep.subr.bf16.mxu0 %v727_v5  ;;  %v730_v8 = vld [vmem:[%s850_s7 + $0x20] sm:$0xff]   ;;  %v731_v10 = vld [vmem:[%s850_s7 + $0x18] sm:$0xff]   ;;  %v732_v11 = vld [vmem:[%s850_s7 + $0x10] sm:$0xff]  }
  0x25   : > { %667 = vmatpush3.bf16.msra.mxu0 %v727_v5  ;;  %v735_v9 = vld [vmem:[%s250_s8] sm:$0xff]   ;;  %v733_v12 = vld [vmem:[%s850_s7 + $0x8] sm:$0xff]  }
  0x26   : > { %668 = vmatprep.subr.bf16.mxu0 %v728_v6  ;;  %682 = vmatprep.mubr.bf16.mxu0 %v735_v9  ;;  %v734_v13 = vld [vmem:[%s850_s7] sm:$0xff]   ;;  %v736_v14 = vld [vmem:[%s250_s8 + $0x8] sm:$0xff]  }
  0x28   : > { %v316_v17 = vld [vmem:[#allocation2 + $0x10] sm:$0xff]  ;;  %v317_v23 = vld [vmem:[#allocation2] sm:$0xff] }
  0x29   : > { %669 = vmatpush3.bf16.msra.mxu0 %v728_v6  ;;  %v318_v15 = vld [vmem:[#allocation2 + $0x18] sm:$0xff]  ;;  %v319_v20 = vld [vmem:[#allocation2 + $0x8] sm:$0xff] }
  0x2a   : > { %670 = vmatprep.subr.bf16.mxu0 %v729_v7 }
  0x2d   : > { %671 = vmatpush3.bf16.msra.mxu0 %v729_v7 }
  0x2e   : > { %672 = vmatprep.subr.bf16.mxu0 %v730_v8 }
  0x31   : > { %673 = vmatpush3.bf16.msra.mxu0 %v730_v8 }
  0x32   : > { %674 = vmatprep.subr.bf16.mxu0 %v731_v10 }
  0x35   : > { %675 = vmatpush3.bf16.msra.mxu0 %v731_v10 }
  0x36   : > { %676 = vmatprep.subr.bf16.mxu0 %v732_v11 }
  0x39   : > { %677 = vmatpush3.bf16.msra.mxu0 %v732_v11 }
  0x3a   : > { %678 = vmatprep.subr.bf16.mxu0 %v733_v12 }
  0x3d   : > { %679 = vmatpush3.bf16.msra.mxu0 %v733_v12 }
  0x3e   : > { %680 = vmatprep.subr.bf16.mxu0 %v734_v13 }
  0x41   : > { %681 = vmatpush3.bf16.msra.mxu0 %v734_v13 }
  0x44   : > { %683 = vmatmul.mubr.bf16.vlgmr.msra.gmra.mxu0 %v736_v14 }
 0x104   : > { %v684_v16 = vpop.f32.mrf.mxu0 }
 0x105   : > { %v451_v18 = vadd.f32 %v684_v16, %v318_v15 }
 0x106   : > { %v434_v19 = vpop.f32.mrf.mxu0 }
 0x107   : > { %455 = vst [vmem:[#allocation2 + $0x18] sm:$0xff] %v451_v18  ;;  %v449_v21 = vadd.f32 %v434_v19, %v316_v17 }
 0x108   : > { %v685_v22 = vpop.f32.mrf.mxu0 }
 0x109   : > { %453 = vst [vmem:[#allocation2 + $0x10] sm:$0xff] %v449_v21  ;;  %v452_v24 = vadd.f32 %v685_v22, %v319_v20  ;;  %460 = sbr.rel (%p631_p11) target bundleno = 284 (0x11c), region = 81 }
 0x10a   : > { %v437_v25 = vpop.f32.mrf.mxu0 }
 0x10b   : > { %456 = vst [vmem:[#allocation2 + $0x8] sm:$0xff] %v452_v24  ;;  %v450_v26 = vadd.f32 %v437_v25, %v317_v23 }
 0x10d   : > { %454 = vst [vmem:[#allocation2] sm:$0xff] %v450_v26 }
 0x10e   : > { %v632_v29 = vld [vmem:[%s893_s2] ss:$0 sm:$0xff]  ;;  %v463_v32 = vld [vmem:[#allocation2 + $0x18] sm:$0xff] }
 0x10f   : > { %v474_v34 = vadd.f32 %v632_v29, %v463_v32 }
 0x110   : > { %v461_v27 = vld [vmem:[#allocation2 + $0x10] sm:$0xff] }
 0x111   : > { %v472_v30 = vadd.f32 %v632_v29, %v461_v27  ;;  %v478_v38 = vmax.f32 %v474_v34, 0.0 }
 0x112   : > { %v464_v33 = vld [vmem:[#allocation2 + $0x8] sm:$0xff] }
 0x113   : > { %v475_v35 = vadd.f32 %v632_v29, %v464_v33  ;;  %v476_v36 = vmax.f32 %v472_v30, 0.0 }
 0x114   : > { %v462_v28 = vld [vmem:[#allocation2] sm:$0xff] }
 0x115   : > { %v473_v31 = vadd.f32 %v632_v29, %v462_v28  ;;  %v479_v39 = vmax.f32 %v475_v35, 0.0 }
 0x117   : > { %v477_v37 = vmax.f32 %v473_v31, 0.0  ;;  %v653_v41 = vpack.c.bf16 %v479_v39, %v478_v38 }
 0x119   : > { %v648_v40 = vpack.c.bf16 %v477_v37, %v476_v36  ;;  %655 = vst [vmem:[%s894_s3 + $0x8] sm:$0xff] %v653_v41  }
 0x11b   : > { %649 = vst [vmem:[%s894_s3] sm:$0xff] %v648_v40  }
 0x11c PF: > { %s13_s16 = sadd.s32 1, %s775_s16   ;;  %s895_s12 = smov %s763_s13 }
 0x11d   : > { %p10_p12 = scmp.ge.s32.totalorder %s13_s16, 7   ;;  %s896_s13 = smov %s833_s20 }
 0x11e   : > { %s897_s14 = smov %s771_s15  ;;  %s898_s15 = smov %s900_s17 }
 0x11f   :  { %12 = sbr.rel (!%p10_p12) target bundleno = 3 (0x3), region = 122 }

// kernel: resnet34_forward.45
= control target key start
LH: loop header
LB: loop body
LE: loop exit
PB: predicated region body
PF: predicated region fallthrough
CT: control target
= control target key end

     0   :  { %s335_s1 = inlined_call_operand.vmem [shape: bf16[128,128], index: 1, kind: input, shape index: {}]   ;;  %s336_s0 = inlined_call_operand.vmem [shape: bf16[32,128], index: 0, kind: input, shape index: {}]   ;;  %s337_s2 = inlined_call_operand.vmem [shape: f32[1,128], index: 2, kind: input, shape index: {}]   ;;  %s338_s3 = inlined_call_operand.vmem [shape: bf16[32,128], index: 3, kind: output, shape index: {}]  }
   0x1   :  { %v266_v0 = vld [vmem:[%s335_s1 + $0x38] sm:$0xff]   ;;  %v267_v1 = vld [vmem:[%s335_s1 + $0x30] sm:$0xff]   ;;  %v268_v2 = vld [vmem:[%s335_s1 + $0x28] sm:$0xff]  }
   0x2   :  { %246 = vmatprep.subr.bf16.mxu0 %v266_v0  ;;  %v269_v3 = vld [vmem:[%s335_s1 + $0x20] sm:$0xff]   ;;  %v270_v5 = vld [vmem:[%s335_s1 + $0x18] sm:$0xff]   ;;  %v271_v6 = vld [vmem:[%s335_s1 + $0x10] sm:$0xff]  }
   0x3   :  { %247 = vmatpush3.bf16.msra.mxu0 %v266_v0  ;;  %v274_v4 = vld [vmem:[%s336_s0] sm:$0xff]   ;;  %v272_v7 = vld [vmem:[%s335_s1 + $0x8] sm:$0xff]  }
   0x4   :  { %248 = vmatprep.subr.bf16.mxu0 %v267_v1  ;;  %262 = vmatprep.mubr.bf16.mxu0 %v274_v4  ;;  %v273_v8 = vld [vmem:[%s335_s1] sm:$0xff]   ;;  %v275_v9 = vld [vmem:[%s336_s0 + $0x8] sm:$0xff]  }
   0x5   :  { %v216_v11 = vld [vmem:[%s337_s2] ss:$0 sm:$0xff] }
   0x7   :  { %249 = vmatpush3.bf16.msra.mxu0 %v267_v1 }
   0x8   :  { %250 = vmatprep.subr.bf16.mxu0 %v268_v2 }
   0xb   :  { %251 = vmatpush3.bf16.msra.mxu0 %v268_v2 }
   0xc   :  { %252 = vmatprep.subr.bf16.mxu0 %v269_v3 }
   0xf   :  { %253 = vmatpush3.bf16.msra.mxu0 %v269_v3 }
  0x10   :  { %254 = vmatprep.subr.bf16.mxu0 %v270_v5 }
  0x13   :  { %255 = vmatpush3.bf16.msra.mxu0 %v270_v5 }
  0x14   :  { %256 = vmatprep.subr.bf16.mxu0 %v271_v6 }
  0x17   :  { %257 = vmatpush3.bf16.msra.mxu0 %v271_v6 }
  0x18   :  { %258 = vmatprep.subr.bf16.mxu0 %v272_v7 }
  0x1b   :  { %259 = vmatpush3.bf16.msra.mxu0 %v272_v7 }
  0x1c   :  { %260 = vmatprep.subr.bf16.mxu0 %v273_v8 }
  0x1f   :  { %261 = vmatpush3.bf16.msra.mxu0 %v273_v8 }
  0x22   :  { %263 = vmatmul.mubr.bf16.vlgmr.msra.gmra.mxu0 %v275_v9 }
  0xe2   :  { %v264_v10 = vpop.f32.mrf.mxu0 }
  0xe3   :  { %v180_v14 = vadd.f32 %v264_v10, %v216_v11 }
  0xe4   :  { %v141_v12 = vpop.f32.mrf.mxu0 }
  0xe5   :  { %v178_v17 = vadd.f32 %v216_v11, %v141_v12 }
  0xe6   :  { %v265_v13 = vpop.f32.mrf.mxu0 }
  0xe7   :  { %v181_v15 = vadd.f32 %v265_v13, %v216_v11 }
  0xe8   :  { %v144_v16 = vpop.f32.mrf.mxu0 }
  0xe9   :  { %v233_v18 = vpack.c.bf16 %v181_v15, %v180_v14  ;;  %v179_v19 = vadd.f32 %v216_v11, %v144_v16 }
  0xeb   :  { %235 = vst [vmem:[%s338_s3 + $0x8] sm:$0xff] %v233_v18   ;;  %v228_v20 = vpack.c.bf16 %v179_v19, %v178_v17 }
  0xed   :  { %229 = vst [vmem:[%s338_s3] sm:$0xff] %v228_v20  }

// kernel: resnet34_forward.46
= control target key start
LH: loop header
LB: loop body
LE: loop exit
PB: predicated region body
PF: predicated region fallthrough
CT: control target
= control target key end

     0   :  { %s903_s15 = smov 0   ;;  %s905_s16 = smov 0   ;;  %s1002_s0 = inlined_call_operand.vmem [shape: bf16[32,1152], index: 0, kind: input, shape index: {}]   ;;  %s1003_s1 = inlined_call_operand.vmem [shape: bf16[1152,128], index: 1, kind: input, shape index: {}]   ;;  %s1004_s2 = inlined_call_operand.vmem [shape: f32[1,128], index: 2, kind: input, shape index: {}]   ;;  %s1005_s3 = inlined_call_operand.vmem [shape: bf16[32,128], index: 3, kind: input, shape index: {}]   ;;  %s1006_s4 = inlined_call_operand.vmem [shape: bf16[32,128], index: 4, kind: output, shape index: {}]  }
   0x1   :  { %s907_s17 = smov 0   ;;  %s909_s18 = smov 0  }
   0x2   :  { %s911_s19 = smov 0  }
   0x3 LB: > { %s26_s20 = sadd.s32 1, %s871_s18  ;;  %p49_p1 = scmp.ne.s32.totalorder %s863_s16, %s859_s15  ;;  %s875_s19 = sphi %s911_s19, %s14_s19   ;;  %s871_s18 = sphi %s909_s18, %s1010_s18   ;;  %s867_s17 = sphi %s907_s17, %s1009_s17   ;;  %s863_s16 = sphi %s905_s16, %s1008_s16   ;;  %s859_s15 = sphi %s903_s15, %s1007_s15  }
   0x4   : > { %p27_p0 = scmp.ge.s32.totalorder %s26_s20, 9  ;;  %p50_p2 = scmp.eq.s32.totalorder %s875_s19, 0 }
   0x5   : > { %s42_s22 = sadd.s32 1, %s863_s16  ;;  %p704_p5 = scmp.ge.s32.totalorder %s875_s19, 9 }
   0x6   : > { %s1012_s20 = smov (%p27_p0, %s26_s20), 0  ;;  %p51_p3 = por %p50_p2, %p49_p1 }
   0x7   : > { %s38_s21 = ssub.s32 %s871_s18, %s1012_s20  ;;  %203 = sbr.rel (%p704_p5) target bundleno = 18 (0x12), region = 24 }
   0x8   : > { %p40_p4 = scmp.eq.s32.totalorder %s38_s21, 0 }
   0xa   : > { %s938_s23 = scalar_select %p40_p4, %s863_s16, %s42_s22  }
   0xc   : > { %206 = sbr.rel (!%p51_p3) target bundleno = 18 (0x12), region = 28  ;;  %s208_s24 = sand.u32 (%p51_p3), 1, %s863_s16  }
   0xd   : > { %s706_s25 = sshll.u32 (%p51_p3), %s871_s18, 2  ;;  %s705_s26 = sshll.u32 (%p51_p3), %s208_s24, 4 }
   0xe   : > { %s215_s29 = scalar_lea.vmem (%p51_p3), %s1002_s0, %s706_s25  ;;  %s210_s30 = scalar_lea.vmem (%p51_p3), [#allocation3], %s705_s26 }
   0xf   : > { %v232_v0 = vld [vmem:[%s215_s29] sm:$0xf] (%p51_p3)  ;;  %v234_v1 = vld [vmem:[%s215_s29 + $0x24] sm:$0xf] (%p51_p3)  ;;  %v236_v2 = vld [vmem:[%s215_s29 + $0x48] sm:$0xf] (%p51_p3) }
  0x10   : > { %233 = vst [vmem:[%s210_s30] sm:$0xf] (%p51_p3), %v232_v0  ;;  %235 = vst [vmem:[%s210_s30 + $0x4] sm:$0xf] (%p51_p3), %v234_v1  ;;  %v238_v3 = vld [vmem:[%s215_s29 + $0x6c] sm:$0xf] (%p51_p3) }
  0x11   : > { %237 = vst [vmem:[%s210_s30 + $0x8] sm:$0xf] %v236_v2  ;;  %239 = vst [vmem:[%s210_s30 + $0xc] sm:$0xf] %v238_v3 }
  0x12 PF: > { %p707_p6 = scmp.ge.s32.totalorder %s875_s19, 1  ;;  %p282_p7 = scmp.lt.s32.totalorder %s875_s19, 10 }
  0x14   : > { %p283_p8 = pnand %p707_p6, %p282_p7 }
  0x15   : > { %s289_s5 = sand.u32 (!%p283_p8), 1, %s859_s15   ;;  %s709_s6 = sshll.u32 (!%p283_p8), %s867_s17, 4 }
  0x16   : > { %286 = sbr.rel (%p283_p8) target bundleno = 286 (0x11e), region = 73  ;;  %s950_s7 = sshll.u32 (!%p283_p8), %s289_s5, 4 }
  0x17   : > { %p338_p9 = scmp.lt.s32.totalorder (!%p283_p8), %s709_s6, 143  ;;  %s291_s12 = scalar_lea.vmem (!%p283_p8), [#allocation3], %s950_s7 }
  0x18   : > { %p711_p10 = scmp.ne.s32.totalorder (!%p283_p8), %s867_s17, 0 }
  0x1b   : > { %s1014_s6 = smov (!%p338_p9, %s709_s6), 143  ;;  %371 = sbr.rel (%p711_p10) target bundleno = 35 (0x23), region = 81 }
  0x1c   : > { %s710_s8 = sshll.u32 %s1014_s6, 2 }
  0x1d   : > { %s955_s11 = scalar_lea.vmem %s1003_s1, %s710_s8 }
  0x20   : > { %v877_v4 = vmov 0.0  }
  0x21   : > { %372 = vst [vmem:[#allocation2 + $0x10] sm:$0xff] %v877_v4  ;;  %373 = vst [vmem:[#allocation2] sm:$0xff] %v877_v4 }
  0x22   : > { %374 = vst [vmem:[#allocation2 + $0x18] sm:$0xff] %v877_v4  ;;  %375 = vst [vmem:[#allocation2 + $0x8] sm:$0xff] %v877_v4 }
  0x23 PF: > { %v827_v5 = vld [vmem:[%s955_s11 + $0x38] sm:$0xff]   ;;  %v828_v6 = vld [vmem:[%s955_s11 + $0x30] sm:$0xff]   ;;  %v829_v7 = vld [vmem:[%s955_s11 + $0x28] sm:$0xff]   ;;  %p722_p11 = scmp.ne.s32.totalorder %s867_s17, 8 }
  0x24   : > { %766 = vmatprep.subr.bf16.mxu0 %v827_v5  ;;  %v830_v8 = vld [vmem:[%s955_s11 + $0x20] sm:$0xff]   ;;  %v831_v10 = vld [vmem:[%s955_s11 + $0x18] sm:$0xff]   ;;  %v832_v11 = vld [vmem:[%s955_s11 + $0x10] sm:$0xff]  }
  0x25   : > { %767 = vmatpush3.bf16.msra.mxu0 %v827_v5  ;;  %v835_v9 = vld [vmem:[%s291_s12] sm:$0xff]   ;;  %v833_v12 = vld [vmem:[%s955_s11 + $0x8] sm:$0xff]  }
  0x26   : > { %768 = vmatprep.subr.bf16.mxu0 %v828_v6  ;;  %782 = vmatprep.mubr.bf16.mxu0 %v835_v9  ;;  %v834_v13 = vld [vmem:[%s955_s11] sm:$0xff]   ;;  %v836_v14 = vld [vmem:[%s291_s12 + $0x8] sm:$0xff]  }
  0x28   : > { %v376_v17 = vld [vmem:[#allocation2 + $0x10] sm:$0xff]  ;;  %v377_v23 = vld [vmem:[#allocation2] sm:$0xff] }
  0x29   : > { %769 = vmatpush3.bf16.msra.mxu0 %v828_v6  ;;  %v378_v15 = vld [vmem:[#allocation2 + $0x18] sm:$0xff]  ;;  %v379_v20 = vld [vmem:[#allocation2 + $0x8] sm:$0xff] }
  0x2a   : > { %770 = vmatprep.subr.bf16.mxu0 %v829_v7 }
  0x2d   : > { %771 = vmatpush3.bf16.msra.mxu0 %v829_v7 }
  0x2e   : > { %772 = vmatprep.subr.bf16.mxu0 %v830_v8 }
  0x31   : > { %773 = vmatpush3.bf16.msra.mxu0 %v830_v8 }
  0x32   : > { %774 = vmatprep.subr.bf16.mxu0 %v831_v10 }
  0x35   : > { %775 = vmatpush3.bf16.msra.mxu0 %v831_v10 }
  0x36   : > { %776 = vmatprep.subr.bf16.mxu0 %v832_v11 }
  0x39   : > { %777 = vmatpush3.bf16.msra.mxu0 %v832_v11 }
  0x3a   : > { %778 = vmatprep.subr.bf16.mxu0 %v833_v12 }
  0x3d   : > { %779 = vmatpush3.bf16.msra.mxu0 %v833_v12 }
  0x3e   : > { %780 = vmatprep.subr.bf16.mxu0 %v834_v13 }
  0x41   : > { %781 = vmatpush3.bf16.msra.mxu0 %v834_v13 }
  0x44   : > { %783 = vmatmul.mubr.bf16.vlgmr.msra.gmra.mxu0 %v836_v14 }
 0x104   : > { %v784_v16 = vpop.f32.mrf.mxu0 }
 0x105   : > { %v511_v18 = vadd.f32 %v784_v16, %v378_v15 }
 0x106   : > { %v494_v19 = vpop.f32.mrf.mxu0 }
 0x107   : > { %515 = vst [vmem:[#allocation2 + $0x18] sm:$0xff] %v511_v18  ;;  %v509_v21 = vadd.f32 %v494_v19, %v376_v17 }
 0x108   : > { %v785_v22 = vpop.f32.mrf.mxu0 }
 0x109   : > { %513 = vst [vmem:[#allocation2 + $0x10] sm:$0xff] %v509_v21  ;;  %v512_v24 = vadd.f32 %v785_v22, %v379_v20  ;;  %520 = sbr.rel (%p722_p11) target bundleno = 286 (0x11e), region = 85 }
 0x10a   : > { %v497_v25 = vpop.f32.mrf.mxu0 }
 0x10b   : > { %516 = vst [vmem:[#allocation2 + $0x8] sm:$0xff] %v512_v24  ;;  %v510_v26 = vadd.f32 %v497_v25, %v377_v23 }
 0x10d   : > { %514 = vst [vmem:[#allocation2] sm:$0xff] %v510_v26 }
 0x10e   : > { %v723_v29 = vld [vmem:[%s1004_s2] ss:$0 sm:$0xff]  ;;  %v523_v33 = vld [vmem:[#allocation2 + $0x18] sm:$0xff]  ;;  %v754_v39 = vld [vmem:[%s1005_s3 + $0x8] sm:$0xff]  }
 0x10f   : > { %v737_v32 = vld [vmem:[%s1005_s3] sm:$0xff]   ;;  %v534_v37 = vadd.f32 %v723_v29, %v523_v33  ;;  %v742_v40 = vunpack.c.l.bf16 %v754_v39  ;;  %v743_v41 = vunpack.c.h.bf16 %v754_v39 }
 0x110   : > { %v521_v27 = vld [vmem:[#allocation2 + $0x10] sm:$0xff]  ;;  %v738_v35 = vunpack.c.l.bf16 %v737_v32  ;;  %v739_v36 = vunpack.c.h.bf16 %v737_v32 }
 0x111   : > { %v532_v30 = vadd.f32 %v723_v29, %v521_v27  ;;  %v546_v44 = vadd.f32 %v742_v40, %v534_v37 }
 0x112   : > { %v524_v34 = vld [vmem:[#allocation2 + $0x8] sm:$0xff] }
 0x113   : > { %v535_v38 = vadd.f32 %v723_v29, %v524_v34  ;;  %v544_v42 = vadd.f32 %v738_v35, %v532_v30  ;;  %v550_v48 = vmax.f32 %v546_v44, 0.0 }
 0x114   : > { %v522_v28 = vld [vmem:[#allocation2] sm:$0xff] }
 0x115   : > { %v533_v31 = vadd.f32 %v723_v29, %v522_v28  ;;  %v547_v45 = vadd.f32 %v743_v41, %v535_v38  ;;  %v548_v46 = vmax.f32 %v544_v42, 0.0 }
 0x117   : > { %v545_v43 = vadd.f32 %v739_v36, %v533_v31  ;;  %v551_v49 = vmax.f32 %v547_v45, 0.0 }
 0x119   : > { %v549_v47 = vmax.f32 %v545_v43, 0.0  ;;  %v752_v51 = vpack.c.bf16 %v551_v49, %v550_v48 }
 0x11b   : > { %v747_v50 = vpack.c.bf16 %v549_v47, %v548_v46  ;;  %755 = vst [vmem:[%s1006_s4 + $0x8] sm:$0xff] %v752_v51  }
 0x11d   : > { %748 = vst [vmem:[%s1006_s4] sm:$0xff] %v747_v50  }
 0x11e PF: > { %s14_s19 = sadd.s32 1, %s875_s19   ;;  %s1007_s15 = smov %s863_s16 }
 0x11f   : > { %p11_p12 = scmp.ge.s32.totalorder %s14_s19, 11   ;;  %s1008_s16 = smov %s938_s23 }
 0x120   : > { %s1009_s17 = smov %s871_s18  ;;  %s1010_s18 = smov %s1012_s20 }
 0x121   :  { %13 = sbr.rel (!%p11_p12) target bundleno = 3 (0x3), region = 129 }

// kernel: resnet34_forward.47
= control target key start
LH: loop header
LB: loop body
LE: loop exit
PB: predicated region body
PF: predicated region fallthrough
CT: control target
= control target key end

     0   :  { %s798_s12 = smov 0   ;;  %s800_s13 = smov 0   ;;  %s891_s0 = inlined_call_operand.vmem [shape: bf16[32,1152], index: 0, kind: input, shape index: {}]   ;;  %s892_s1 = inlined_call_operand.vmem [shape: bf16[1152,128], index: 1, kind: input, shape index: {}]   ;;  %s893_s2 = inlined_call_operand.vmem [shape: f32[1,128], index: 2, kind: input, shape index: {}]   ;;  %s894_s3 = inlined_call_operand.vmem [shape: bf16[32,128], index: 3, kind: output, shape index: {}]  }
   0x1   :  { %s802_s14 = smov 0   ;;  %s804_s15 = smov 0  }
   0x2   :  { %s806_s16 = smov 0  }
   0x3 LB: > { %s25_s17 = sadd.s32 1, %s771_s15  ;;  %p48_p1 = scmp.ne.s32.totalorder %s763_s13, %s759_s12  ;;  %s775_s16 = sphi %s806_s16, %s13_s16   ;;  %s771_s15 = sphi %s804_s15, %s898_s15   ;;  %s767_s14 = sphi %s802_s14, %s897_s14   ;;  %s763_s13 = sphi %s800_s13, %s896_s13   ;;  %s759_s12 = sphi %s798_s12, %s895_s12  }
   0x4   : > { %p26_p0 = scmp.ge.s32.totalorder %s25_s17, 9  ;;  %p49_p2 = scmp.eq.s32.totalorder %s775_s16, 0 }
   0x5   : > { %s41_s19 = sadd.s32 1, %s763_s13  ;;  %p613_p5 = scmp.ge.s32.totalorder %s775_s16, 9 }
   0x6   : > { %s900_s17 = smov (%p26_p0, %s25_s17), 0  ;;  %p50_p3 = por %p49_p2, %p48_p1 }
   0x7   : > { %s37_s18 = ssub.s32 %s771_s15, %s900_s17  ;;  %162 = sbr.rel (%p613_p5) target bundleno = 18 (0x12), region = 20 }
   0x8   : > { %p39_p4 = scmp.eq.s32.totalorder %s37_s18, 0 }
   0xa   : > { %s833_s20 = scalar_select %p39_p4, %s763_s13, %s41_s19  }
   0xc   : > { %165 = sbr.rel (!%p50_p3) target bundleno = 18 (0x12), region = 24  ;;  %s167_s21 = sand.u32 (%p50_p3), 1, %s763_s13  }
   0xd   : > { %s615_s22 = sshll.u32 (%p50_p3), %s771_s15, 2  ;;  %s614_s23 = sshll.u32 (%p50_p3), %s167_s21, 4 }
   0xe   : > { %s174_s26 = scalar_lea.vmem (%p50_p3), %s891_s0, %s615_s22  ;;  %s169_s27 = scalar_lea.vmem (%p50_p3), [#allocation3], %s614_s23 }
   0xf   : > { %v191_v0 = vld [vmem:[%s174_s26] sm:$0xf] (%p50_p3)  ;;  %v193_v1 = vld [vmem:[%s174_s26 + $0x24] sm:$0xf] (%p50_p3)  ;;  %v195_v2 = vld [vmem:[%s174_s26 + $0x48] sm:$0xf] (%p50_p3) }
  0x10   : > { %192 = vst [vmem:[%s169_s27] sm:$0xf] (%p50_p3), %v191_v0  ;;  %194 = vst [vmem:[%s169_s27 + $0x4] sm:$0xf] (%p50_p3), %v193_v1  ;;  %v197_v3 = vld [vmem:[%s174_s26 + $0x6c] sm:$0xf] (%p50_p3) }
  0x11   : > { %196 = vst [vmem:[%s169_s27 + $0x8] sm:$0xf] %v195_v2  ;;  %198 = vst [vmem:[%s169_s27 + $0xc] sm:$0xf] %v197_v3 }
  0x12 PF: > { %p616_p6 = scmp.ge.s32.totalorder %s775_s16, 1  ;;  %p241_p7 = scmp.lt.s32.totalorder %s775_s16, 10 }
  0x14   : > { %p242_p8 = pnand %p616_p6, %p241_p7 }
  0x15   : > { %s248_s28 = sand.u32 (!%p242_p8), 1, %s759_s12   ;;  %s618_s29 = sshll.u32 (!%p242_p8), %s767_s14, 4 }
  0x16   : > { %245 = sbr.rel (%p242_p8) target bundleno = 284 (0x11c), region = 69  ;;  %s845_s30 = sshll.u32 (!%p242_p8), %s248_s28, 4 }
  0x17   : > { %p287_p9 = scmp.lt.s32.totalorder (!%p242_p8), %s618_s29, 143  ;;  %s250_s8 = scalar_lea.vmem (!%p242_p8), [#allocation3], %s845_s30 }
  0x18   : > { %p620_p10 = scmp.ne.s32.totalorder (!%p242_p8), %s767_s14, 0 }
  0x1b   : > { %s902_s29 = smov (!%p287_p9, %s618_s29), 143  ;;  %311 = sbr.rel (%p620_p10) target bundleno = 35 (0x23), region = 77 }
  0x1c   : > { %s619_s4 = sshll.u32 %s902_s29, 2 }
  0x1d   : > { %s850_s7 = scalar_lea.vmem %s892_s1, %s619_s4 }
  0x20   : > { %v777_v4 = vmov 0.0  }
  0x21   : > { %312 = vst [vmem:[#allocation2 + $0x10] sm:$0xff] %v777_v4  ;;  %313 = vst [vmem:[#allocation2] sm:$0xff] %v777_v4 }
  0x22   : > { %314 = vst [vmem:[#allocation2 + $0x18] sm:$0xff] %v777_v4  ;;  %315 = vst [vmem:[#allocation2 + $0x8] sm:$0xff] %v777_v4 }
  0x23 PF: > { %v727_v5 = vld [vmem:[%s850_s7 + $0x38] sm:$0xff]   ;;  %v728_v6 = vld [vmem:[%s850_s7 + $0x30] sm:$0xff]   ;;  %v729_v7 = vld [vmem:[%s850_s7 + $0x28] sm:$0xff]   ;;  %p631_p11 = scmp.ne.s32.totalorder %s767_s14, 8 }
  0x24   : > { %666 = vmatprep.subr.bf16.mxu0 %v727_v5  ;;  %v730_v8 = vld [vmem:[%s850_s7 + $0x20] sm:$0xff]   ;;  %v731_v10 = vld [vmem:[%s850_s7 + $0x18] sm:$0xff]   ;;  %v732_v11 = vld [vmem:[%s850_s7 + $0x10] sm:$0xff]  }
  0x25   : > { %667 = vmatpush3.bf16.msra.mxu0 %v727_v5  ;;  %v735_v9 = vld [vmem:[%s250_s8] sm:$0xff]   ;;  %v733_v12 = vld [vmem:[%s850_s7 + $0x8] sm:$0xff]  }
  0x26   : > { %668 = vmatprep.subr.bf16.mxu0 %v728_v6  ;;  %682 = vmatprep.mubr.bf16.mxu0 %v735_v9  ;;  %v734_v13 = vld [vmem:[%s850_s7] sm:$0xff]   ;;  %v736_v14 = vld [vmem:[%s250_s8 + $0x8] sm:$0xff]  }
  0x28   : > { %v316_v17 = vld [vmem:[#allocation2 + $0x10] sm:$0xff]  ;;  %v317_v23 = vld [vmem:[#allocation2] sm:$0xff] }
  0x29   : > { %669 = vmatpush3.bf16.msra.mxu0 %v728_v6  ;;  %v318_v15 = vld [vmem:[#allocation2 + $0x18] sm:$0xff]  ;;  %v319_v20 = vld [vmem:[#allocation2 + $0x8] sm:$0xff] }
  0x2a   : > { %670 = vmatprep.subr.bf16.mxu0 %v729_v7 }
  0x2d   : > { %671 = vmatpush3.bf16.msra.mxu0 %v729_v7 }
  0x2e   : > { %672 = vmatprep.subr.bf16.mxu0 %v730_v8 }
  0x31   : > { %673 = vmatpush3.bf16.msra.mxu0 %v730_v8 }
  0x32   : > { %674 = vmatprep.subr.bf16.mxu0 %v731_v10 }
  0x35   : > { %675 = vmatpush3.bf16.msra.mxu0 %v731_v10 }
  0x36   : > { %676 = vmatprep.subr.bf16.mxu0 %v732_v11 }
  0x39   : > { %677 = vmatpush3.bf16.msra.mxu0 %v732_v11 }
  0x3a   : > { %678 = vmatprep.subr.bf16.mxu0 %v733_v12 }
  0x3d   : > { %679 = vmatpush3.bf16.msra.mxu0 %v733_v12 }
  0x3e   : > { %680 = vmatprep.subr.bf16.mxu0 %v734_v13 }
  0x41   : > { %681 = vmatpush3.bf16.msra.mxu0 %v734_v13 }
  0x44   : > { %683 = vmatmul.mubr.bf16.vlgmr.msra.gmra.mxu0 %v736_v14 }
 0x104   : > { %v684_v16 = vpop.f32.mrf.mxu0 }
 0x105   : > { %v451_v18 = vadd.f32 %v684_v16, %v318_v15 }
 0x106   : > { %v434_v19 = vpop.f32.mrf.mxu0 }
 0x107   : > { %455 = vst [vmem:[#allocation2 + $0x18] sm:$0xff] %v451_v18  ;;  %v449_v21 = vadd.f32 %v434_v19, %v316_v17 }
 0x108   : > { %v685_v22 = vpop.f32.mrf.mxu0 }
 0x109   : > { %453 = vst [vmem:[#allocation2 + $0x10] sm:$0xff] %v449_v21  ;;  %v452_v24 = vadd.f32 %v685_v22, %v319_v20  ;;  %460 = sbr.rel (%p631_p11) target bundleno = 284 (0x11c), region = 81 }
 0x10a   : > { %v437_v25 = vpop.f32.mrf.mxu0 }
 0x10b   : > { %456 = vst [vmem:[#allocation2 + $0x8] sm:$0xff] %v452_v24  ;;  %v450_v26 = vadd.f32 %v437_v25, %v317_v23 }
 0x10d   : > { %454 = vst [vmem:[#allocation2] sm:$0xff] %v450_v26 }
 0x10e   : > { %v632_v29 = vld [vmem:[%s893_s2] ss:$0 sm:$0xff]  ;;  %v463_v32 = vld [vmem:[#allocation2 + $0x18] sm:$0xff] }
 0x10f   : > { %v474_v34 = vadd.f32 %v632_v29, %v463_v32 }
 0x110   : > { %v461_v27 = vld [vmem:[#allocation2 + $0x10] sm:$0xff] }
 0x111   : > { %v472_v30 = vadd.f32 %v632_v29, %v461_v27  ;;  %v478_v38 = vmax.f32 %v474_v34, 0.0 }
 0x112   : > { %v464_v33 = vld [vmem:[#allocation2 + $0x8] sm:$0xff] }
 0x113   : > { %v475_v35 = vadd.f32 %v632_v29, %v464_v33  ;;  %v476_v36 = vmax.f32 %v472_v30, 0.0 }
 0x114   : > { %v462_v28 = vld [vmem:[#allocation2] sm:$0xff] }
 0x115   : > { %v473_v31 = vadd.f32 %v632_v29, %v462_v28  ;;  %v479_v39 = vmax.f32 %v475_v35, 0.0 }
 0x117   : > { %v477_v37 = vmax.f32 %v473_v31, 0.0  ;;  %v653_v41 = vpack.c.bf16 %v479_v39, %v478_v38 }
 0x119   : > { %v648_v40 = vpack.c.bf16 %v477_v37, %v476_v36  ;;  %655 = vst [vmem:[%s894_s3 + $0x8] sm:$0xff] %v653_v41  }
 0x11b   : > { %649 = vst [vmem:[%s894_s3] sm:$0xff] %v648_v40  }
 0x11c PF: > { %s13_s16 = sadd.s32 1, %s775_s16   ;;  %s895_s12 = smov %s763_s13 }
 0x11d   : > { %p10_p12 = scmp.ge.s32.totalorder %s13_s16, 11   ;;  %s896_s13 = smov %s833_s20 }
 0x11e   : > { %s897_s14 = smov %s771_s15  ;;  %s898_s15 = smov %s900_s17 }
 0x11f   :  { %12 = sbr.rel (!%p10_p12) target bundleno = 3 (0x3), region = 122 }

// kernel: resnet34_forward.53
= control target key start
LH: loop header
LB: loop body
LE: loop exit
PB: predicated region body
PF: predicated region fallthrough
CT: control target
= control target key end

     0   :  { %s701_s12 = smov 0   ;;  %s703_s13 = smov 0   ;;  %s768_s0 = inlined_call_operand.vmem [shape: bf16[8,1152], index: 0, kind: input, shape index: {}]   ;;  %s769_s1 = inlined_call_operand.vmem [shape: bf16[1152,256], index: 1, kind: input, shape index: {}]   ;;  %s770_s2 = inlined_call_operand.vmem [shape: f32[1,256], index: 2, kind: input, shape index: {}]   ;;  %s771_s3 = inlined_call_operand.vmem [shape: bf16[8,256], index: 3, kind: output, shape index: {}]  }
   0x1   :  { %s705_s14 = smov 0  }
   0x2 LB: > { %s25_s15 = sadd.s32 1, %s673_s13  ;;  %p575_p0 = scmp.ge.s32.totalorder %s677_s14, 1  ;;  %s677_s14 = sphi %s705_s14, %s13_s14   ;;  %s673_s13 = sphi %s703_s13, %s773_s13   ;;  %s669_s12 = sphi %s701_s12, %s772_s12  }
   0x3   : > { %p26_p1 = scmp.ge.s32.totalorder %s25_s15, 9  ;;  %p192_p2 = scmp.lt.s32.totalorder %s677_s14, 10 }
   0x5   : > { %s775_s15 = smov (%p26_p1, %s25_s15), 0  ;;  %p193_p3 = pnand %p575_p0, %p192_p2 }
   0x6   : > { %p239_p4 = scmp.lt.s32.totalorder (!%p193_p3), %s669_s12, 8  ;;  %s577_s16 = sshll.u32 (!%p193_p3), %s669_s12, 4 }
   0x7   : > { %196 = sbr.rel (%p193_p3) target bundleno = 267 (0x10b), region = 32  ;;  %p247_p5 = scmp.lt.s32.totalorder (!%p193_p3), %s577_s16, 143 }
   0x8   : > { %p580_p6 = scmp.ne.s32.totalorder (!%p193_p3), %s669_s12, 0 }
   0xc   : > { %s240_s17 = scalar_select %p239_p4, %s669_s12, 8 }
   0xd   : > { %s777_s16 = smov (!%p247_p5, %s577_s16), 143  ;;  %276 = sbr.rel (%p580_p6) target bundleno = 20 (0x14), region = 36 }
   0xe   : > { %s576_s18 = sshll.u32 %s240_s17, 2  ;;  %s603_s22 = sshll.u32 %s777_s16, 3 }
   0xf   : > { %s727_s21 = scalar_lea.vmem %s768_s0, %s576_s18  ;;  %s732_s25 = scalar_lea.vmem %s769_s1, %s603_s22 }
  0x12   : > { %v679_v0 = vmov 0.0  }
  0x13   : > { %277 = vst [vmem:[#allocation2] sm:$0xff] %v679_v0  ;;  %278 = vst [vmem:[#allocation2 + $0x8] sm:$0xff] %v679_v0 }
  0x14 PF: > { %v631_v1 = vld [vmem:[%s732_s25 + $0x74] ss:$8 sps:$4 sm:$0xff]   ;;  %v633_v2 = vld [vmem:[%s732_s25 + $0x70] ss:$8 sps:$4 sm:$0xff]   ;;  %v680_v3 = vmov 0   ;;  %p597_p7 = scmp.ne.s32.totalorder %s669_s12, 8 }
  0x15   : > { %410 = vmatprep.mubr.bf16.mxu0 %v680_v3  ;;  %378 = vmatprep.subr.bf16.mxu0 %v631_v1  ;;  %v634_v4 = vld [vmem:[%s732_s25 + $0x64] ss:$8 sps:$4 sm:$0xff]   ;;  %v636_v5 = vld [vmem:[%s732_s25 + $0x60] ss:$8 sps:$4 sm:$0xff]   ;;  %v637_v6 = vld [vmem:[%s732_s25 + $0x54] ss:$8 sps:$4 sm:$0xff]  }
  0x16   : > { %379 = vmatpush1.bf16.msra.mxu0 %v633_v2  ;;  %v639_v7 = vld [vmem:[%s732_s25 + $0x50] ss:$8 sps:$4 sm:$0xff]   ;;  %v640_v8 = vld [vmem:[%s732_s25 + $0x44] ss:$8 sps:$4 sm:$0xff]   ;;  %v642_v9 = vld [vmem:[%s732_s25 + $0x40] ss:$8 sps:$4 sm:$0xff]  }
  0x17   : > { %380 = vmatprep.subr.bf16.mxu0 %v634_v4  ;;  %v643_v10 = vld [vmem:[%s732_s25 + $0x34] ss:$8 sps:$4 sm:$0xff]   ;;  %v645_v11 = vld [vmem:[%s732_s25 + $0x30] ss:$8 sps:$4 sm:$0xff]   ;;  %v646_v12 = vld [vmem:[%s732_s25 + $0x24] ss:$8 sps:$4 sm:$0xff]  }
  0x18   : > { %v648_v13 = vld [vmem:[%s732_s25 + $0x20] ss:$8 sps:$4 sm:$0xff]   ;;  %v649_v14 = vld [vmem:[%s732_s25 + $0x14] ss:$8 sps:$4 sm:$0xff]   ;;  %v651_v15 = vld [vmem:[%s732_s25 + $0x10] ss:$8 sps:$4 sm:$0xff]  }
  0x19   : > { %v652_v16 = vld [vmem:[%s732_s25 + $0x4] ss:$8 sps:$4 sm:$0xff]   ;;  %v654_v17 = vld [vmem:[%s732_s25] ss:$8 sps:$4 sm:$0xff]  }
  0x1a   : > { %381 = vmatpush1.bf16.msra.mxu0 %v636_v5  ;;  %v281_v18 = vld [vmem:[%s727_s21] sm:$0xf]  ;;  %v280_v21 = vld [vmem:[#allocation2 + $0x8] sm:$0xff] }
  0x1b   : > { %382 = vmatprep.subr.bf16.mxu0 %v637_v6  ;;  %v279_v19 = vld [vmem:[#allocation2] sm:$0xff] }
  0x1e   : > { %383 = vmatpush1.bf16.msra.mxu0 %v639_v7 }
  0x1f   : > { %384 = vmatprep.subr.bf16.mxu0 %v640_v8 }
  0x22   : > { %385 = vmatpush1.bf16.msra.mxu0 %v642_v9 }
  0x23   : > { %386 = vmatprep.subr.bf16.mxu0 %v643_v10 }
  0x26   : > { %387 = vmatpush1.bf16.msra.mxu0 %v645_v11 }
  0x27   : > { %388 = vmatprep.subr.bf16.mxu0 %v646_v12 }
  0x2a   : > { %389 = vmatpush1.bf16.msra.mxu0 %v648_v13 }
  0x2b   : > { %390 = vmatprep.subr.bf16.mxu0 %v649_v14 }
  0x2e   : > { %391 = vmatpush1.bf16.msra.mxu0 %v651_v15 }
  0x2f   : > { %392 = vmatprep.subr.bf16.mxu0 %v652_v16 }
  0x32   : > { %393 = vmatpush1.bf16.msra.mxu0 %v654_v17 }
  0x35   : > { %411 = vmatmul.mubr.bf16.vlgmr.msra.gmra.mxu0 %v281_v18 }
  0xf5   : > { %v412_v20 = vpop.f32.mrf.mxu0 }
  0xf6   : > { %v419_v22 = vadd.f32 %v412_v20, %v279_v19 }
  0xf7   : > { %v414_v23 = vpop.f32.mrf.mxu0  ;;  %426 = sbr.rel (%p597_p7) target bundleno = 267 (0x10b), region = 40 }
  0xf8   : > { %421 = vst [vmem:[#allocation2] sm:$0xff] %v419_v22  ;;  %v420_v24 = vadd.f32 %v414_v23, %v280_v21 }
  0xf9   : > { %v416_v25 = vpop.f32.mrf.mxu0 }
  0xfa   : > { %422 = vst [vmem:[#allocation2 + $0x8] sm:$0xff] %v420_v24 }
  0xfb   : > { %v417_v26 = vpop.f32.mrf.mxu0 }
  0xfc   : > { %v431_v27 = vlaneseq  ;;  %v429_v29 = vld [vmem:[%s770_s2] sm:$0x3] }
  0xfe   : > { %v432_v28 = vshrl.u32 %v431_v27, 7 }
  0xff   : > { %v427_v32 = vld [vmem:[#allocation2] sm:$0xff] }
 0x100   : > { %v433_v30 = vsub.s32 0, %v432_v28  ;;  %v437_v31 = vsub.s32 1, %v432_v28 }
 0x101   : > { %v428_v33 = vld [vmem:[#allocation2 + $0x8] sm:$0xff] }
 0x102   : > { %v434_v34 = vrot.slane %v429_v29, %v433_v30  ;;  %v438_v35 = vrot.slane %v429_v29, %v437_v31 }
 0x104   : > { %v441_v36 = vadd.f32 %v434_v34, %v427_v32  ;;  %v442_v37 = vadd.f32 %v438_v35, %v428_v33 }
 0x106   : > { %v443_v38 = vmax.f32 %v441_v36, 0.0  ;;  %v444_v39 = vmax.f32 %v442_v37, 0.0 }
 0x108   : > { %v604_v40 = vpack.c.bf16 %v444_v39, %v443_v38 }
 0x10a   : > { %453 = vst [vmem:[%s771_s3] sm:$0xff] %v604_v40 }
 0x10b PF: > { %s13_s14 = sadd.s32 1, %s677_s14   ;;  %s772_s12 = smov %s673_s13 }
 0x10c   : > { %p10_p8 = scmp.ge.s32.totalorder %s13_s14, 11   ;;  %s773_s13 = smov %s775_s15 }
 0x10e   :  { %12 = sbr.rel (!%p10_p8) target bundleno = 2 (0x2), region = 76 }

// kernel: resnet34_forward.54
= control target key start
LH: loop header
LB: loop body
LE: loop exit
PB: predicated region body
PF: predicated region fallthrough
CT: control target
= control target key end

     0   :  { %v240_v1 = vmov 0   ;;  %v172_v18 = vlaneseq  ;;  %s318_s1 = inlined_call_operand.vmem [shape: bf16[128,256], index: 1, kind: input, shape index: {}]   ;;  %s319_s0 = inlined_call_operand.vmem [shape: bf16[8,128], index: 0, kind: input, shape index: {}]   ;;  %s320_s2 = inlined_call_operand.vmem [shape: f32[1,256], index: 2, kind: input, shape index: {}]   ;;  %s321_s3 = inlined_call_operand.vmem [shape: bf16[8,256], index: 3, kind: output, shape index: {}]  }
   0x1   :  { %v216_v0 = vld [vmem:[%s318_s1 + $0x74] ss:$8 sps:$4 sm:$0xff]   ;;  %152 = vmatprep.mubr.bf16.mxu0 %v240_v1  ;;  %v218_v2 = vld [vmem:[%s318_s1 + $0x70] ss:$8 sps:$4 sm:$0xff]   ;;  %v219_v3 = vld [vmem:[%s318_s1 + $0x64] ss:$8 sps:$4 sm:$0xff]  }
   0x2   :  { %120 = vmatprep.subr.bf16.mxu0 %v216_v0  ;;  %v221_v4 = vld [vmem:[%s318_s1 + $0x60] ss:$8 sps:$4 sm:$0xff]   ;;  %v222_v5 = vld [vmem:[%s318_s1 + $0x54] ss:$8 sps:$4 sm:$0xff]   ;;  %v224_v6 = vld [vmem:[%s318_s1 + $0x50] ss:$8 sps:$4 sm:$0xff]  }
   0x3   :  { %121 = vmatpush1.bf16.msra.mxu0 %v218_v2  ;;  %v225_v7 = vld [vmem:[%s318_s1 + $0x44] ss:$8 sps:$4 sm:$0xff]   ;;  %v227_v8 = vld [vmem:[%s318_s1 + $0x40] ss:$8 sps:$4 sm:$0xff]   ;;  %v228_v9 = vld [vmem:[%s318_s1 + $0x34] ss:$8 sps:$4 sm:$0xff]  }
   0x4   :  { %122 = vmatprep.subr.bf16.mxu0 %v219_v3  ;;  %v230_v10 = vld [vmem:[%s318_s1 + $0x30] ss:$8 sps:$4 sm:$0xff]   ;;  %v231_v11 = vld [vmem:[%s318_s1 + $0x24] ss:$8 sps:$4 sm:$0xff]   ;;  %v233_v12 = vld [vmem:[%s318_s1 + $0x20] ss:$8 sps:$4 sm:$0xff]  }
   0x5   :  { %v234_v13 = vld [vmem:[%s318_s1 + $0x14] ss:$8 sps:$4 sm:$0xff]   ;;  %v236_v14 = vld [vmem:[%s318_s1 + $0x10] ss:$8 sps:$4 sm:$0xff]   ;;  %v237_v15 = vld [vmem:[%s318_s1 + $0x4] ss:$8 sps:$4 sm:$0xff]  }
   0x6   :  { %v239_v16 = vld [vmem:[%s318_s1] ss:$8 sps:$4 sm:$0xff]   ;;  %v173_v19 = vshrl.u32 %v172_v18, 7 }
   0x7   :  { %123 = vmatpush1.bf16.msra.mxu0 %v221_v4  ;;  %v23_v17 = vld [vmem:[%s319_s0] sm:$0xf] }
   0x8   :  { %124 = vmatprep.subr.bf16.mxu0 %v222_v5  ;;  %v174_v20 = vsub.s32 0, %v173_v19  ;;  %v178_v21 = vsub.s32 1, %v173_v19  ;;  %v170_v22 = vld [vmem:[%s320_s2] sm:$0x3] }
   0xa   :  { %v175_v23 = vrot.slane %v170_v22, %v174_v20  ;;  %v179_v24 = vrot.slane %v170_v22, %v178_v21 }
   0xb   :  { %125 = vmatpush1.bf16.msra.mxu0 %v224_v6 }
   0xc   :  { %126 = vmatprep.subr.bf16.mxu0 %v225_v7 }
   0xf   :  { %127 = vmatpush1.bf16.msra.mxu0 %v227_v8 }
  0x10   :  { %128 = vmatprep.subr.bf16.mxu0 %v228_v9 }
  0x13   :  { %129 = vmatpush1.bf16.msra.mxu0 %v230_v10 }
  0x14   :  { %130 = vmatprep.subr.bf16.mxu0 %v231_v11 }
  0x17   :  { %131 = vmatpush1.bf16.msra.mxu0 %v233_v12 }
  0x18   :  { %132 = vmatprep.subr.bf16.mxu0 %v234_v13 }
  0x1b   :  { %133 = vmatpush1.bf16.msra.mxu0 %v236_v14 }
  0x1c   :  { %134 = vmatprep.subr.bf16.mxu0 %v237_v15 }
  0x1f   :  { %135 = vmatpush1.bf16.msra.mxu0 %v239_v16 }
  0x22   :  { %153 = vmatmul.mubr.bf16.vlgmr.msra.gmra.mxu0 %v23_v17 }
  0xe2   :  { %v154_v25 = vpop.f32.mrf.mxu0 }
  0xe3   :  { %v182_v27 = vadd.f32 %v175_v23, %v154_v25 }
  0xe4   :  { %v156_v26 = vpop.f32.mrf.mxu0 }
  0xe5   :  { %v183_v28 = vadd.f32 %v179_v24, %v156_v26 }
  0xe6   :  { %v158_v29 = vpop.f32.mrf.mxu0 }
  0xe7   :  { %v214_v30 = vpack.c.bf16 %v183_v28, %v182_v27 }
  0xe8   :  { %v159_v31 = vpop.f32.mrf.mxu0 }
  0xe9   :  { %192 = vst [vmem:[%s321_s3] sm:$0xff] %v214_v30 }

// kernel: resnet34_forward.55
= control target key start
LH: loop header
LB: loop body
LE: loop exit
PB: predicated region body
PF: predicated region fallthrough
CT: control target
= control target key end

     0   :  { %s946_s15 = smov 0   ;;  %s948_s16 = smov 0   ;;  %s1031_s0 = inlined_call_operand.vmem [shape: bf16[8,2304], index: 0, kind: input, shape index: {}]   ;;  %s1032_s1 = inlined_call_operand.vmem [shape: bf16[2304,256], index: 1, kind: input, shape index: {}]   ;;  %s1033_s2 = inlined_call_operand.vmem [shape: f32[1,256], index: 2, kind: input, shape index: {}]   ;;  %s1034_s3 = inlined_call_operand.vmem [shape: bf16[8,256], index: 3, kind: input, shape index: {}]   ;;  %s1035_s4 = inlined_call_operand.vmem [shape: bf16[8,256], index: 4, kind: output, shape index: {}]  }
   0x1   :  { %s950_s17 = smov 0  }
   0x2 LB: > { %s26_s18 = sadd.s32 1, %s914_s16  ;;  %p772_p0 = scmp.ge.s32.totalorder %s918_s17, 1  ;;  %s918_s17 = sphi %s950_s17, %s14_s17   ;;  %s914_s16 = sphi %s948_s16, %s1037_s16   ;;  %s910_s15 = sphi %s946_s15, %s1036_s15  }
   0x3   : > { %p27_p1 = scmp.ge.s32.totalorder %s26_s18, 9  ;;  %p236_p2 = scmp.lt.s32.totalorder %s918_s17, 10 }
   0x5   : > { %s1039_s18 = smov (%p27_p1, %s26_s18), 0  ;;  %p237_p3 = pnand %p772_p0, %p236_p2 }
   0x6   : > { %s773_s19 = sshll.u32 (!%p237_p3), %s910_s15, 1  ;;  %s775_s20 = sshll.u32 (!%p237_p3), %s910_s15, 5 }
   0x7   : > { %240 = sbr.rel (%p237_p3) target bundleno = 303 (0x12f), region = 36  ;;  %p296_p4 = scmp.lt.s32.totalorder (!%p237_p3), %s773_s19, 17 }
   0x8   : > { %p305_p5 = scmp.lt.s32.totalorder (!%p237_p3), %s775_s20, 287  ;;  %p778_p6 = scmp.ne.s32.totalorder (!%p237_p3), %s910_s15, 0 }
   0xc   : > { %s1041_s19 = smov (!%p296_p4, %s773_s19), 17  ;;  %s1043_s20 = smov (!%p305_p5, %s775_s20), 287 }
   0xd   : > { %s774_s21 = sshll.u32 %s1041_s19, 2  ;;  %s819_s25 = sshll.u32 %s1043_s20, 3 }
   0xe   : > { %s971_s24 = scalar_lea.vmem %s1031_s0, %s774_s21  ;;  %s976_s28 = scalar_lea.vmem %s1032_s1, %s819_s25 }
   0xf   : > { %343 = sbr.rel (%p778_p6) target bundleno = 22 (0x16), region = 40 }
  0x14   : > { %v920_v0 = vmov 0.0  }
  0x15   : > { %344 = vst [vmem:[#allocation2] sm:$0xff] %v920_v0  ;;  %345 = vst [vmem:[#allocation2 + $0x8] sm:$0xff] %v920_v0 }
  0x16 PF: > { %v846_v1 = vld [vmem:[%s976_s28 + $0x74] ss:$8 sps:$4 sm:$0xff]   ;;  %v848_v2 = vld [vmem:[%s976_s28 + $0x70] ss:$8 sps:$4 sm:$0xff]   ;;  %v849_v3 = vld [vmem:[%s976_s28 + $0x64] ss:$8 sps:$4 sm:$0xff]  }
  0x17   : > { %548 = vmatprep.subr.bf16.mxu0 %v846_v1  ;;  %v851_v4 = vld [vmem:[%s976_s28 + $0x60] ss:$8 sps:$4 sm:$0xff]   ;;  %v852_v5 = vld [vmem:[%s976_s28 + $0x54] ss:$8 sps:$4 sm:$0xff]   ;;  %v854_v6 = vld [vmem:[%s976_s28 + $0x50] ss:$8 sps:$4 sm:$0xff]  }
  0x18   : > { %549 = vmatpush1.bf16.msra.mxu0 %v848_v2  ;;  %v855_v7 = vld [vmem:[%s976_s28 + $0x44] ss:$8 sps:$4 sm:$0xff]   ;;  %v857_v8 = vld [vmem:[%s976_s28 + $0x40] ss:$8 sps:$4 sm:$0xff]   ;;  %v858_v9 = vld [vmem:[%s976_s28 + $0x34] ss:$8 sps:$4 sm:$0xff]  }
  0x19   : > { %550 = vmatprep.subr.bf16.mxu0 %v849_v3  ;;  %v860_v10 = vld [vmem:[%s976_s28 + $0x30] ss:$8 sps:$4 sm:$0xff]   ;;  %v861_v11 = vld [vmem:[%s976_s28 + $0x24] ss:$8 sps:$4 sm:$0xff]   ;;  %v863_v12 = vld [vmem:[%s976_s28 + $0x20] ss:$8 sps:$4 sm:$0xff]  }
  0x1a   : > { %v864_v13 = vld [vmem:[%s976_s28 + $0x14] ss:$8 sps:$4 sm:$0xff]   ;;  %v348_v14 = vld [vmem:[%s971_s24] sm:$0xff]  ;;  %v866_v16 = vld [vmem:[%s976_s28 + $0x10] ss:$8 sps:$4 sm:$0xff]   ;;  %p813_p7 = scmp.ne.s32.totalorder %s910_s15, 8 }
  0x1b   : > { %v780_v15 = vcombine.high %v348_v14, %v348_v14  ;;  %v867_v17 = vld [vmem:[%s976_s28 + $0x4] ss:$8 sps:$4 sm:$0xff]   ;;  %v869_v18 = vld [vmem:[%s976_s28] ss:$8 sps:$4 sm:$0xff]   ;;  %v870_v19 = vld [vmem:[%s976_s28 + $0xf4] ss:$8 sps:$4 sm:$0xff]   ;;  %v779_v35 = vcombine.low %v348_v14, %v348_v14 }
  0x1c   : > { %551 = vmatpush1.bf16.msra.mxu0 %v851_v4  ;;  %v872_v20 = vld [vmem:[%s976_s28 + $0xf0] ss:$8 sps:$4 sm:$0xff]   ;;  %v873_v21 = vld [vmem:[%s976_s28 + $0xe4] ss:$8 sps:$4 sm:$0xff]   ;;  %v875_v22 = vld [vmem:[%s976_s28 + $0xe0] ss:$8 sps:$4 sm:$0xff]  }
  0x1d   : > { %552 = vmatprep.subr.bf16.mxu0 %v852_v5  ;;  %580 = vmatprep.mubr.bf16.mxu0 %v780_v15  ;;  %v876_v23 = vld [vmem:[%s976_s28 + $0xd4] ss:$8 sps:$4 sm:$0xff]   ;;  %v878_v24 = vld [vmem:[%s976_s28 + $0xd0] ss:$8 sps:$4 sm:$0xff]   ;;  %v879_v25 = vld [vmem:[%s976_s28 + $0xc4] ss:$8 sps:$4 sm:$0xff]  }
  0x1e   : > { %v881_v26 = vld [vmem:[%s976_s28 + $0xc0] ss:$8 sps:$4 sm:$0xff]   ;;  %v882_v27 = vld [vmem:[%s976_s28 + $0xb4] ss:$8 sps:$4 sm:$0xff]   ;;  %v884_v28 = vld [vmem:[%s976_s28 + $0xb0] ss:$8 sps:$4 sm:$0xff]  }
  0x1f   : > { %v885_v29 = vld [vmem:[%s976_s28 + $0xa4] ss:$8 sps:$4 sm:$0xff]   ;;  %v887_v30 = vld [vmem:[%s976_s28 + $0xa0] ss:$8 sps:$4 sm:$0xff]   ;;  %v888_v31 = vld [vmem:[%s976_s28 + $0x94] ss:$8 sps:$4 sm:$0xff]  }
  0x20   : > { %553 = vmatpush1.bf16.msra.mxu0 %v854_v6  ;;  %v890_v32 = vld [vmem:[%s976_s28 + $0x90] ss:$8 sps:$4 sm:$0xff]   ;;  %v891_v33 = vld [vmem:[%s976_s28 + $0x84] ss:$8 sps:$4 sm:$0xff]   ;;  %v893_v34 = vld [vmem:[%s976_s28 + $0x80] ss:$8 sps:$4 sm:$0xff]  }
  0x21   : > { %554 = vmatprep.subr.bf16.mxu0 %v855_v7  ;;  %v346_v36 = vld [vmem:[#allocation2] sm:$0xff]  ;;  %v347_v38 = vld [vmem:[#allocation2 + $0x8] sm:$0xff] }
  0x24   : > { %555 = vmatpush1.bf16.msra.mxu0 %v857_v8 }
  0x25   : > { %556 = vmatprep.subr.bf16.mxu0 %v858_v9 }
  0x28   : > { %557 = vmatpush1.bf16.msra.mxu0 %v860_v10 }
  0x29   : > { %558 = vmatprep.subr.bf16.mxu0 %v861_v11 }
  0x2c   : > { %559 = vmatpush1.bf16.msra.mxu0 %v863_v12 }
  0x2d   : > { %560 = vmatprep.subr.bf16.mxu0 %v864_v13 }
  0x30   : > { %561 = vmatpush1.bf16.msra.mxu0 %v866_v16 }
  0x31   : > { %562 = vmatprep.subr.bf16.mxu0 %v867_v17 }
  0x34   : > { %563 = vmatpush1.bf16.msra.mxu0 %v869_v18 }
  0x35   : > { %564 = vmatprep.subr.bf16.mxu0 %v870_v19 }
  0x38   : > { %565 = vmatpush2.bf16.msra.mxu0 %v872_v20 }
  0x39   : > { %566 = vmatprep.subr.bf16.mxu0 %v873_v21 }
  0x3c   : > { %567 = vmatpush2.bf16.msra.mxu0 %v875_v22 }
  0x3d   : > { %568 = vmatprep.subr.bf16.mxu0 %v876_v23 }
  0x40   : > { %569 = vmatpush2.bf16.msra.mxu0 %v878_v24 }
  0x41   : > { %570 = vmatprep.subr.bf16.mxu0 %v879_v25 }
  0x44   : > { %571 = vmatpush2.bf16.msra.mxu0 %v881_v26 }
  0x45   : > { %572 = vmatprep.subr.bf16.mxu0 %v882_v27 }
  0x48   : > { %573 = vmatpush2.bf16.msra.mxu0 %v884_v28 }
  0x49   : > { %574 = vmatprep.subr.bf16.mxu0 %v885_v29 }
  0x4c   : > { %575 = vmatpush2.bf16.msra.mxu0 %v887_v30 }
  0x4d   : > { %576 = vmatprep.subr.bf16.mxu0 %v888_v31 }
  0x50   : > { %577 = vmatpush2.bf16.msra.mxu0 %v890_v32 }
  0x51   : > { %578 = vmatprep.subr.bf16.mxu0 %v891_v33 }
  0x54   : > { %579 = vmatpush2.bf16.msra.mxu0 %v893_v34 }
  0x57   : > { %581 = vmatmul.mubr.bf16.vlgmr.msra.gmra.mxu0 %v779_v35 }
 0x117   : > { %v582_v37 = vpop.f32.mrf.mxu0 }
 0x118   : > { %v589_v39 = vadd.f32 %v582_v37, %v346_v36 }
 0x119   : > { %v584_v40 = vpop.f32.mrf.mxu0  ;;  %596 = sbr.rel (%p813_p7) target bundleno = 303 (0x12f), region = 44 }
 0x11a   : > { %591 = vst [vmem:[#allocation2] sm:$0xff] %v589_v39  ;;  %v590_v41 = vadd.f32 %v584_v40, %v347_v38 }
 0x11b   : > { %v586_v42 = vpop.f32.mrf.mxu0 }
 0x11c   : > { %592 = vst [vmem:[#allocation2 + $0x8] sm:$0xff] %v590_v41 }
 0x11d   : > { %v587_v43 = vpop.f32.mrf.mxu0 }
 0x11e   : > { %v601_v44 = vlaneseq  ;;  %v599_v46 = vld [vmem:[%s1033_s2] sm:$0x3] }
 0x11f   : > { %v613_v47 = vld [vmem:[%s1034_s3] sm:$0xff] }
 0x120   : > { %v602_v45 = vshrl.u32 %v601_v44, 7  ;;  %v614_v54 = vunpack.c.l.bf16 %v613_v47  ;;  %v615_v55 = vunpack.c.h.bf16 %v613_v47 }
 0x121   : > { %v597_v50 = vld [vmem:[#allocation2] sm:$0xff] }
 0x122   : > { %v603_v48 = vsub.s32 0, %v602_v45  ;;  %v607_v49 = vsub.s32 1, %v602_v45 }
 0x123   : > { %v598_v51 = vld [vmem:[#allocation2 + $0x8] sm:$0xff] }
 0x124   : > { %v604_v52 = vrot.slane %v599_v46, %v603_v48  ;;  %v608_v53 = vrot.slane %v599_v46, %v607_v49 }
 0x126   : > { %v611_v56 = vadd.f32 %v604_v52, %v597_v50  ;;  %v612_v57 = vadd.f32 %v608_v53, %v598_v51 }
 0x128   : > { %v616_v58 = vadd.f32 %v614_v54, %v611_v56  ;;  %v617_v59 = vadd.f32 %v615_v55, %v612_v57 }
 0x12a   : > { %v618_v60 = vmax.f32 %v616_v58, 0.0  ;;  %v619_v61 = vmax.f32 %v617_v59, 0.0 }
 0x12c   : > { %v820_v62 = vpack.c.bf16 %v619_v61, %v618_v60 }
 0x12e   : > { %628 = vst [vmem:[%s1035_s4] sm:$0xff] %v820_v62 }
 0x12f PF: > { %s14_s17 = sadd.s32 1, %s918_s17   ;;  %s1036_s15 = smov %s914_s16 }
 0x130   : > { %p11_p8 = scmp.ge.s32.totalorder %s14_s17, 11   ;;  %s1037_s16 = smov %s1039_s18 }
 0x132   :  { %13 = sbr.rel (!%p11_p8) target bundleno = 2 (0x2), region = 83 }

// kernel: resnet34_forward.56
= control target key start
LH: loop header
LB: loop body
LE: loop exit
PB: predicated region body
PF: predicated region fallthrough
CT: control target
= control target key end

     0   :  { %s851_s12 = smov 0   ;;  %s853_s13 = smov 0   ;;  %s933_s0 = inlined_call_operand.vmem [shape: bf16[8,2304], index: 0, kind: input, shape index: {}]   ;;  %s934_s1 = inlined_call_operand.vmem [shape: bf16[2304,256], index: 1, kind: input, shape index: {}]   ;;  %s935_s2 = inlined_call_operand.vmem [shape: f32[1,256], index: 2, kind: input, shape index: {}]   ;;  %s936_s3 = inlined_call_operand.vmem [shape: bf16[8,256], index: 3, kind: output, shape index: {}]  }
   0x1   :  { %s855_s14 = smov 0  }
   0x2 LB: > { %s25_s15 = sadd.s32 1, %s824_s13  ;;  %p682_p0 = scmp.ge.s32.totalorder %s828_s14, 1  ;;  %s828_s14 = sphi %s855_s14, %s13_s14   ;;  %s824_s13 = sphi %s853_s13, %s938_s13   ;;  %s820_s12 = sphi %s851_s12, %s937_s12  }
   0x3   : > { %p26_p1 = scmp.ge.s32.totalorder %s25_s15, 9  ;;  %p194_p2 = scmp.lt.s32.totalorder %s828_s14, 10 }
   0x5   : > { %s940_s15 = smov (%p26_p1, %s25_s15), 0  ;;  %p195_p3 = pnand %p682_p0, %p194_p2 }
   0x6   : > { %s683_s16 = sshll.u32 (!%p195_p3), %s820_s12, 1  ;;  %s685_s17 = sshll.u32 (!%p195_p3), %s820_s12, 5 }
   0x7   : > { %198 = sbr.rel (%p195_p3) target bundleno = 301 (0x12d), region = 32  ;;  %p243_p4 = scmp.lt.s32.totalorder (!%p195_p3), %s683_s16, 17 }
   0x8   : > { %p252_p5 = scmp.lt.s32.totalorder (!%p195_p3), %s685_s17, 287  ;;  %p688_p6 = scmp.ne.s32.totalorder (!%p195_p3), %s820_s12, 0 }
   0xc   : > { %s942_s16 = smov (!%p243_p4, %s683_s16), 17  ;;  %s944_s17 = smov (!%p252_p5, %s685_s17), 287 }
   0xd   : > { %s684_s18 = sshll.u32 %s942_s16, 2  ;;  %s729_s22 = sshll.u32 %s944_s17, 3 }
   0xe   : > { %s876_s21 = scalar_lea.vmem %s933_s0, %s684_s18  ;;  %s881_s25 = scalar_lea.vmem %s934_s1, %s729_s22 }
   0xf   : > { %280 = sbr.rel (%p688_p6) target bundleno = 22 (0x16), region = 36 }
  0x14   : > { %v830_v0 = vmov 0.0  }
  0x15   : > { %281 = vst [vmem:[#allocation2] sm:$0xff] %v830_v0  ;;  %282 = vst [vmem:[#allocation2 + $0x8] sm:$0xff] %v830_v0 }
  0x16 PF: > { %v756_v1 = vld [vmem:[%s881_s25 + $0x74] ss:$8 sps:$4 sm:$0xff]   ;;  %v758_v2 = vld [vmem:[%s881_s25 + $0x70] ss:$8 sps:$4 sm:$0xff]   ;;  %v759_v3 = vld [vmem:[%s881_s25 + $0x64] ss:$8 sps:$4 sm:$0xff]  }
  0x17   : > { %485 = vmatprep.subr.bf16.mxu0 %v756_v1  ;;  %v761_v4 = vld [vmem:[%s881_s25 + $0x60] ss:$8 sps:$4 sm:$0xff]   ;;  %v762_v5 = vld [vmem:[%s881_s25 + $0x54] ss:$8 sps:$4 sm:$0xff]   ;;  %v764_v6 = vld [vmem:[%s881_s25 + $0x50] ss:$8 sps:$4 sm:$0xff]  }
  0x18   : > { %486 = vmatpush1.bf16.msra.mxu0 %v758_v2  ;;  %v765_v7 = vld [vmem:[%s881_s25 + $0x44] ss:$8 sps:$4 sm:$0xff]   ;;  %v767_v8 = vld [vmem:[%s881_s25 + $0x40] ss:$8 sps:$4 sm:$0xff]   ;;  %v768_v9 = vld [vmem:[%s881_s25 + $0x34] ss:$8 sps:$4 sm:$0xff]  }
  0x19   : > { %487 = vmatprep.subr.bf16.mxu0 %v759_v3  ;;  %v770_v10 = vld [vmem:[%s881_s25 + $0x30] ss:$8 sps:$4 sm:$0xff]   ;;  %v771_v11 = vld [vmem:[%s881_s25 + $0x24] ss:$8 sps:$4 sm:$0xff]   ;;  %v773_v12 = vld [vmem:[%s881_s25 + $0x20] ss:$8 sps:$4 sm:$0xff]  }
  0x1a   : > { %v774_v13 = vld [vmem:[%s881_s25 + $0x14] ss:$8 sps:$4 sm:$0xff]   ;;  %v285_v14 = vld [vmem:[%s876_s21] sm:$0xff]  ;;  %v776_v16 = vld [vmem:[%s881_s25 + $0x10] ss:$8 sps:$4 sm:$0xff]   ;;  %p723_p7 = scmp.ne.s32.totalorder %s820_s12, 8 }
  0x1b   : > { %v690_v15 = vcombine.high %v285_v14, %v285_v14  ;;  %v777_v17 = vld [vmem:[%s881_s25 + $0x4] ss:$8 sps:$4 sm:$0xff]   ;;  %v779_v18 = vld [vmem:[%s881_s25] ss:$8 sps:$4 sm:$0xff]   ;;  %v780_v19 = vld [vmem:[%s881_s25 + $0xf4] ss:$8 sps:$4 sm:$0xff]   ;;  %v689_v35 = vcombine.low %v285_v14, %v285_v14 }
  0x1c   : > { %488 = vmatpush1.bf16.msra.mxu0 %v761_v4  ;;  %v782_v20 = vld [vmem:[%s881_s25 + $0xf0] ss:$8 sps:$4 sm:$0xff]   ;;  %v783_v21 = vld [vmem:[%s881_s25 + $0xe4] ss:$8 sps:$4 sm:$0xff]   ;;  %v785_v22 = vld [vmem:[%s881_s25 + $0xe0] ss:$8 sps:$4 sm:$0xff]  }
  0x1d   : > { %489 = vmatprep.subr.bf16.mxu0 %v762_v5  ;;  %517 = vmatprep.mubr.bf16.mxu0 %v690_v15  ;;  %v786_v23 = vld [vmem:[%s881_s25 + $0xd4] ss:$8 sps:$4 sm:$0xff]   ;;  %v788_v24 = vld [vmem:[%s881_s25 + $0xd0] ss:$8 sps:$4 sm:$0xff]   ;;  %v789_v25 = vld [vmem:[%s881_s25 + $0xc4] ss:$8 sps:$4 sm:$0xff]  }
  0x1e   : > { %v791_v26 = vld [vmem:[%s881_s25 + $0xc0] ss:$8 sps:$4 sm:$0xff]   ;;  %v792_v27 = vld [vmem:[%s881_s25 + $0xb4] ss:$8 sps:$4 sm:$0xff]   ;;  %v794_v28 = vld [vmem:[%s881_s25 + $0xb0] ss:$8 sps:$4 sm:$0xff]  }
  0x1f   : > { %v795_v29 = vld [vmem:[%s881_s25 + $0xa4] ss:$8 sps:$4 sm:$0xff]   ;;  %v797_v30 = vld [vmem:[%s881_s25 + $0xa0] ss:$8 sps:$4 sm:$0xff]   ;;  %v798_v31 = vld [vmem:[%s881_s25 + $0x94] ss:$8 sps:$4 sm:$0xff]  }
  0x20   : > { %490 = vmatpush1.bf16.msra.mxu0 %v764_v6  ;;  %v800_v32 = vld [vmem:[%s881_s25 + $0x90] ss:$8 sps:$4 sm:$0xff]   ;;  %v801_v33 = vld [vmem:[%s881_s25 + $0x84] ss:$8 sps:$4 sm:$0xff]   ;;  %v803_v34 = vld [vmem:[%s881_s25 + $0x80] ss:$8 sps:$4 sm:$0xff]  }
  0x21   : > { %491 = vmatprep.subr.bf16.mxu0 %v765_v7  ;;  %v283_v36 = vld [vmem:[#allocation2] sm:$0xff]  ;;  %v284_v38 = vld [vmem:[#allocation2 + $0x8] sm:$0xff] }
  0x24   : > { %492 = vmatpush1.bf16.msra.mxu0 %v767_v8 }
  0x25   : > { %493 = vmatprep.subr.bf16.mxu0 %v768_v9 }
  0x28   : > { %494 = vmatpush1.bf16.msra.mxu0 %v770_v10 }
  0x29   : > { %495 = vmatprep.subr.bf16.mxu0 %v771_v11 }
  0x2c   : > { %496 = vmatpush1.bf16.msra.mxu0 %v773_v12 }
  0x2d   : > { %497 = vmatprep.subr.bf16.mxu0 %v774_v13 }
  0x30   : > { %498 = vmatpush1.bf16.msra.mxu0 %v776_v16 }
  0x31   : > { %499 = vmatprep.subr.bf16.mxu0 %v777_v17 }
  0x34   : > { %500 = vmatpush1.bf16.msra.mxu0 %v779_v18 }
  0x35   : > { %501 = vmatprep.subr.bf16.mxu0 %v780_v19 }
  0x38   : > { %502 = vmatpush2.bf16.msra.mxu0 %v782_v20 }
  0x39   : > { %503 = vmatprep.subr.bf16.mxu0 %v783_v21 }
  0x3c   : > { %504 = vmatpush2.bf16.msra.mxu0 %v785_v22 }
  0x3d   : > { %505 = vmatprep.subr.bf16.mxu0 %v786_v23 }
  0x40   : > { %506 = vmatpush2.bf16.msra.mxu0 %v788_v24 }
  0x41   : > { %507 = vmatprep.subr.bf16.mxu0 %v789_v25 }
  0x44   : > { %508 = vmatpush2.bf16.msra.mxu0 %v791_v26 }
  0x45   : > { %509 = vmatprep.subr.bf16.mxu0 %v792_v27 }
  0x48   : > { %510 = vmatpush2.bf16.msra.mxu0 %v794_v28 }
  0x49   : > { %511 = vmatprep.subr.bf16.mxu0 %v795_v29 }
  0x4c   : > { %512 = vmatpush2.bf16.msra.mxu0 %v797_v30 }
  0x4d   : > { %513 = vmatprep.subr.bf16.mxu0 %v798_v31 }
  0x50   : > { %514 = vmatpush2.bf16.msra.mxu0 %v800_v32 }
  0x51   : > { %515 = vmatprep.subr.bf16.mxu0 %v801_v33 }
  0x54   : > { %516 = vmatpush2.bf16.msra.mxu0 %v803_v34 }
  0x57   : > { %518 = vmatmul.mubr.bf16.vlgmr.msra.gmra.mxu0 %v689_v35 }
 0x117   : > { %v519_v37 = vpop.f32.mrf.mxu0 }
 0x118   : > { %v526_v39 = vadd.f32 %v519_v37, %v283_v36 }
 0x119   : > { %v521_v40 = vpop.f32.mrf.mxu0  ;;  %533 = sbr.rel (%p723_p7) target bundleno = 301 (0x12d), region = 40 }
 0x11a   : > { %528 = vst [vmem:[#allocation2] sm:$0xff] %v526_v39  ;;  %v527_v41 = vadd.f32 %v521_v40, %v284_v38 }
 0x11b   : > { %v523_v42 = vpop.f32.mrf.mxu0 }
 0x11c   : > { %529 = vst [vmem:[#allocation2 + $0x8] sm:$0xff] %v527_v41 }
 0x11d   : > { %v524_v43 = vpop.f32.mrf.mxu0 }
 0x11e   : > { %v538_v44 = vlaneseq  ;;  %v536_v46 = vld [vmem:[%s935_s2] sm:$0x3] }
 0x120   : > { %v539_v45 = vshrl.u32 %v538_v44, 7 }
 0x121   : > { %v534_v49 = vld [vmem:[#allocation2] sm:$0xff] }
 0x122   : > { %v540_v47 = vsub.s32 0, %v539_v45  ;;  %v544_v48 = vsub.s32 1, %v539_v45 }
 0x123   : > { %v535_v50 = vld [vmem:[#allocation2 + $0x8] sm:$0xff] }
 0x124   : > { %v541_v51 = vrot.slane %v536_v46, %v540_v47  ;;  %v545_v52 = vrot.slane %v536_v46, %v544_v48 }
 0x126   : > { %v548_v53 = vadd.f32 %v541_v51, %v534_v49  ;;  %v549_v54 = vadd.f32 %v545_v52, %v535_v50 }
 0x128   : > { %v550_v55 = vmax.f32 %v548_v53, 0.0  ;;  %v551_v56 = vmax.f32 %v549_v54, 0.0 }
 0x12a   : > { %v730_v57 = vpack.c.bf16 %v551_v56, %v550_v55 }
 0x12c   : > { %560 = vst [vmem:[%s936_s3] sm:$0xff] %v730_v57 }
 0x12d PF: > { %s13_s14 = sadd.s32 1, %s828_s14   ;;  %s937_s12 = smov %s824_s13 }
 0x12e   : > { %p10_p8 = scmp.ge.s32.totalorder %s13_s14, 11   ;;  %s938_s13 = smov %s940_s15 }
 0x130   :  { %12 = sbr.rel (!%p10_p8) target bundleno = 2 (0x2), region = 76 }

// kernel: resnet34_forward.66
= control target key start
LH: loop header
LB: loop body
LE: loop exit
PB: predicated region body
PF: predicated region fallthrough
CT: control target
= control target key end

     0   :  { %s1071_s12 = smov 0   ;;  %s1073_s13 = smov 0   ;;  %s1285_s0 = inlined_call_operand.vmem [shape: bf16[8,2304], index: 0, kind: input, shape index: {}]   ;;  %s1286_s1 = inlined_call_operand.vmem [shape: bf16[2304,512], index: 1, kind: input, shape index: {}]   ;;  %s1287_s2 = inlined_call_operand.vmem [shape: f32[1,512], index: 2, kind: input, shape index: {}]   ;;  %s1288_s3 = inlined_call_operand.vmem [shape: bf16[8,512], index: 3, kind: output, shape index: {}]  }
   0x1   :  { %s1075_s14 = smov 0   ;;  %s1077_s15 = smov 0  }
   0x2   :  { %s1079_s16 = smov 0   ;;  %s1081_s17 = smov 0  }
   0x3   :  { %s1083_s18 = smov 0  }
   0x4 LB: > { %s25_s19 = sadd.s32 1, %s1040_s16  ;;  %s28_s20 = sadd.s32 1, %s1044_s17  ;;  %s1048_s18 = sphi %s1083_s18, %s13_s18   ;;  %s1044_s17 = sphi %s1081_s17, %s1294_s17   ;;  %s1040_s16 = sphi %s1079_s16, %s1293_s16   ;;  %s1036_s15 = sphi %s1077_s15, %s1292_s15   ;;  %s1032_s14 = sphi %s1075_s14, %s1291_s14   ;;  %s1028_s13 = sphi %s1073_s13, %s1290_s13   ;;  %s1024_s12 = sphi %s1071_s12, %s1289_s12  }
   0x5   : > { %p26_p0 = scmp.ge.s32.totalorder %s25_s19, 9  ;;  %p76_p1 = scmp.ne.s32.totalorder %s1028_s13, %s1024_s12 }
   0x6   : > { %p77_p2 = scmp.eq.s32.totalorder %s1048_s18, 0  ;;  %s69_s24 = sadd.s32 1, %s1028_s13 }
   0x7   : > { %s1296_s19 = smov (%p26_p0, %s25_s19), 0  ;;  %s1298_s20 = smov (!%p26_p0, %s28_s20), %s1044_s17 }
   0x8   : > { %p78_p3 = por %p77_p2, %p76_p1  ;;  %p30_p4 = scmp.ge.s32.totalorder %s1298_s20, 2 }
   0x9   : > { %s64_s21 = ssub.s32 %s1040_s16, %s1296_s19  ;;  %p833_p6 = scmp.ge.s32.totalorder %s1048_s18, 18 }
   0xa   : > { %s1300_s20 = smov (%p30_p4, %s1298_s20), 0 }
   0xb   : > { %s65_s22 = ssub.s32 %s1044_s17, %s1300_s20  ;;  %156 = sbr.rel (%p833_p6) target bundleno = 39 (0x27), region = 16 }
   0xc   : > { %s66_s23 = sor.u32 %s65_s22, %s64_s21 }
   0xd   : > { %p67_p5 = scmp.eq.s32.totalorder %s66_s23, 0 }
   0xf   : > { %s1122_s25 = scalar_select %p67_p5, %s1028_s13, %s69_s24  }
  0x10   : > { %172 = sbr.rel (!%p78_p3) target bundleno = 39 (0x27), region = 24  ;;  %s174_s26 = sand.u32 (%p78_p3), 1, %s1028_s13  }
  0x11   : > { %s836_s27 = sshll.u32 (%p78_p3), %s1044_s17, 1  ;;  %s834_s28 = sshll.u32 (%p78_p3), %s174_s26, 8 }
  0x12   : > { %s885_s29 = sshll.u32 (%p78_p3), %s1040_s16, 7  ;;  %s1136_s8 = scalar_lea.vmem (%p78_p3), [#allocation3], %s834_s28 }
  0x13   : > { %s180_s30 = sadd.s32 (%p78_p3), %s885_s29, %s836_s27 }
  0x14   : > { %s838_s4 = sshll.u32 (%p78_p3), %s180_s30, 2 }
  0x15   : > { %s1131_s7 = scalar_lea.vmem %s1286_s1, %s838_s4 }
  0x16   : > { %v273_v0 = vld [vmem:[%s1131_s7] sm:$0xff]  ;;  %v275_v1 = vld [vmem:[%s1131_s7 + $0x10] sm:$0xff] }
  0x17   : > { %v277_v2 = vld [vmem:[%s1131_s7 + $0x20] sm:$0xff]  ;;  %274 = vst [vmem:[%s1136_s8] sm:$0xff] %v273_v0  ;;  %276 = vst [vmem:[%s1136_s8 + $0x8] sm:$0xff] %v275_v1  ;;  %v279_v3 = vld [vmem:[%s1131_s7 + $0x30] sm:$0xff] }
  0x18   : > { %278 = vst [vmem:[%s1136_s8 + $0x10] sm:$0xff] %v277_v2  ;;  %v281_v4 = vld [vmem:[%s1131_s7 + $0x40] sm:$0xff]  ;;  %v283_v5 = vld [vmem:[%s1131_s7 + $0x50] sm:$0xff]  ;;  %280 = vst [vmem:[%s1136_s8 + $0x18] sm:$0xff] %v279_v3 }
  0x19   : > { %282 = vst [vmem:[%s1136_s8 + $0x20] sm:$0xff] %v281_v4  ;;  %284 = vst [vmem:[%s1136_s8 + $0x28] sm:$0xff] %v283_v5  ;;  %v285_v6 = vld [vmem:[%s1131_s7 + $0x60] sm:$0xff]  ;;  %v287_v7 = vld [vmem:[%s1131_s7 + $0x70] sm:$0xff] }
  0x1a   : > { %v289_v8 = vld [vmem:[%s1131_s7 + $0x80] sm:$0xff]  ;;  %286 = vst [vmem:[%s1136_s8 + $0x30] sm:$0xff] %v285_v6  ;;  %288 = vst [vmem:[%s1136_s8 + $0x38] sm:$0xff] %v287_v7  ;;  %v291_v9 = vld [vmem:[%s1131_s7 + $0x90] sm:$0xff] }
  0x1b   : > { %290 = vst [vmem:[%s1136_s8 + $0x40] sm:$0xff] %v289_v8  ;;  %v293_v10 = vld [vmem:[%s1131_s7 + $0xa0] sm:$0xff]  ;;  %v295_v11 = vld [vmem:[%s1131_s7 + $0xb0] sm:$0xff]  ;;  %292 = vst [vmem:[%s1136_s8 + $0x48] sm:$0xff] %v291_v9 }
  0x1c   : > { %294 = vst [vmem:[%s1136_s8 + $0x50] sm:$0xff] %v293_v10  ;;  %296 = vst [vmem:[%s1136_s8 + $0x58] sm:$0xff] %v295_v11  ;;  %v297_v12 = vld [vmem:[%s1131_s7 + $0xc0] sm:$0xff]  ;;  %v299_v13 = vld [vmem:[%s1131_s7 + $0xd0] sm:$0xff] }
  0x1d   : > { %v301_v14 = vld [vmem:[%s1131_s7 + $0xe0] sm:$0xff]  ;;  %298 = vst [vmem:[%s1136_s8 + $0x60] sm:$0xff] %v297_v12  ;;  %300 = vst [vmem:[%s1136_s8 + $0x68] sm:$0xff] %v299_v13  ;;  %v303_v15 = vld [vmem:[%s1131_s7 + $0xf0] sm:$0xff] }
  0x1e   : > { %302 = vst [vmem:[%s1136_s8 + $0x70] sm:$0xff] %v301_v14  ;;  %v305_v16 = vld [vmem:[%s1131_s7 + $0x100] sm:$0xff]  ;;  %v307_v17 = vld [vmem:[%s1131_s7 + $0x110] sm:$0xff]  ;;  %304 = vst [vmem:[%s1136_s8 + $0x78] sm:$0xff] %v303_v15 }
  0x1f   : > { %306 = vst [vmem:[%s1136_s8 + $0x80] sm:$0xff] %v305_v16  ;;  %308 = vst [vmem:[%s1136_s8 + $0x88] sm:$0xff] %v307_v17  ;;  %v309_v18 = vld [vmem:[%s1131_s7 + $0x120] sm:$0xff]  ;;  %v311_v19 = vld [vmem:[%s1131_s7 + $0x130] sm:$0xff] }
  0x20   : > { %v313_v20 = vld [vmem:[%s1131_s7 + $0x140] sm:$0xff]  ;;  %310 = vst [vmem:[%s1136_s8 + $0x90] sm:$0xff] %v309_v18  ;;  %312 = vst [vmem:[%s1136_s8 + $0x98] sm:$0xff] %v311_v19  ;;  %v315_v21 = vld [vmem:[%s1131_s7 + $0x150] sm:$0xff] }
  0x21   : > { %314 = vst [vmem:[%s1136_s8 + $0xa0] sm:$0xff] %v313_v20  ;;  %v317_v22 = vld [vmem:[%s1131_s7 + $0x160] sm:$0xff]  ;;  %v319_v23 = vld [vmem:[%s1131_s7 + $0x170] sm:$0xff]  ;;  %316 = vst [vmem:[%s1136_s8 + $0xa8] sm:$0xff] %v315_v21 }
  0x22   : > { %318 = vst [vmem:[%s1136_s8 + $0xb0] sm:$0xff] %v317_v22  ;;  %320 = vst [vmem:[%s1136_s8 + $0xb8] sm:$0xff] %v319_v23  ;;  %v321_v24 = vld [vmem:[%s1131_s7 + $0x180] sm:$0xff]  ;;  %v323_v25 = vld [vmem:[%s1131_s7 + $0x190] sm:$0xff] }
  0x23   : > { %v325_v26 = vld [vmem:[%s1131_s7 + $0x1a0] sm:$0xff]  ;;  %322 = vst [vmem:[%s1136_s8 + $0xc0] sm:$0xff] %v321_v24  ;;  %324 = vst [vmem:[%s1136_s8 + $0xc8] sm:$0xff] %v323_v25  ;;  %v327_v27 = vld [vmem:[%s1131_s7 + $0x1b0] sm:$0xff] }
  0x24   : > { %326 = vst [vmem:[%s1136_s8 + $0xd0] sm:$0xff] %v325_v26  ;;  %v329_v28 = vld [vmem:[%s1131_s7 + $0x1c0] sm:$0xff]  ;;  %v331_v29 = vld [vmem:[%s1131_s7 + $0x1d0] sm:$0xff]  ;;  %328 = vst [vmem:[%s1136_s8 + $0xd8] sm:$0xff] %v327_v27 }
  0x25   : > { %330 = vst [vmem:[%s1136_s8 + $0xe0] sm:$0xff] %v329_v28  ;;  %332 = vst [vmem:[%s1136_s8 + $0xe8] sm:$0xff] %v331_v29  ;;  %v333_v30 = vld [vmem:[%s1131_s7 + $0x1e0] sm:$0xff]  ;;  %v335_v31 = vld [vmem:[%s1131_s7 + $0x1f0] sm:$0xff] }
  0x26   : > { %334 = vst [vmem:[%s1136_s8 + $0xf0] sm:$0xff] %v333_v30  ;;  %336 = vst [vmem:[%s1136_s8 + $0xf8] sm:$0xff] %v335_v31 }
  0x27 PF: > { %p839_p7 = scmp.ge.s32.totalorder %s1048_s18, 1  ;;  %p349_p8 = scmp.lt.s32.totalorder %s1048_s18, 19 }
  0x29   : > { %p350_p9 = pnand %p839_p7, %p349_p8 }
  0x2a   : > { %s356_s9 = sand.u32 (!%p350_p9), 1, %s1024_s12   ;;  %s841_s10 = sshll.u32 (!%p350_p9), %s1032_s14, 1 }
  0x2b   : > { %353 = sbr.rel (%p350_p9) target bundleno = 337 (0x151), region = 66  ;;  %s840_s11 = sshll.u32 (!%p350_p9), %s356_s9, 8 }
  0x2c   : > { %p399_p10 = scmp.lt.s32.totalorder (!%p350_p9), %s841_s10, 17  ;;  %s843_s21 = sshll.u32 (!%p350_p9), %s1036_s15, 1 }
  0x2d   : > { %p409_p11 = scmp.lt.s32.totalorder (!%p350_p9), %s843_s21, 3  ;;  %s1221_s5 = scalar_lea.vmem (!%p350_p9), [#allocation3], %s840_s11 }
  0x2e   : > { %p846_p12 = scmp.ne.s32.totalorder (!%p350_p9), %s1032_s14, 0 }
  0x30   : > { %s1302_s10 = smov (!%p399_p10, %s841_s10), 17  ;;  %s1304_s21 = smov (!%p409_p11, %s843_s21), 3 }
  0x31   : > { %s842_s22 = sshll.u32 %s1302_s10, 2  ;;  %s411_s12 = scalar_lea.vmem %s1287_s2, %s1304_s21 }
  0x32   : > { %s1207_s26 = scalar_lea.vmem %s1285_s0, %s842_s22  ;;  %s845_s29 = sshll.u32 %s1304_s21, 2 }
  0x33   : > { %s1219_s15 = scalar_lea.vmem %s1288_s3, %s845_s29  ;;  %426 = sbr.rel (%p846_p12) target bundleno = 58 (0x3a), region = 74 }
  0x38   : > { %v1050_v32 = vmov 0.0  }
  0x39   : > { %427 = vst [vmem:[#allocation2] sm:$0xff] %v1050_v32  ;;  %428 = vst [vmem:[#allocation2 + $0x8] sm:$0xff] %v1050_v32 }
  0x3a PF: > { %v944_v33 = vld [vmem:[%s1221_s5 + $0x74] ss:$8 sps:$4 sm:$0xff]   ;;  %v946_v34 = vld [vmem:[%s1221_s5 + $0x70] ss:$8 sps:$4 sm:$0xff]   ;;  %v947_v35 = vld [vmem:[%s1221_s5 + $0x64] ss:$8 sps:$4 sm:$0xff]  }
  0x3b   : > { %631 = vmatprep.subr.bf16.mxu0 %v944_v33  ;;  %v949_v36 = vld [vmem:[%s1221_s5 + $0x60] ss:$8 sps:$4 sm:$0xff]   ;;  %v950_v37 = vld [vmem:[%s1221_s5 + $0x54] ss:$8 sps:$4 sm:$0xff]   ;;  %v952_v38 = vld [vmem:[%s1221_s5 + $0x50] ss:$8 sps:$4 sm:$0xff]  }
  0x3c   : > { %632 = vmatpush1.bf16.msra.mxu0 %v946_v34  ;;  %v953_v39 = vld [vmem:[%s1221_s5 + $0x44] ss:$8 sps:$4 sm:$0xff]   ;;  %v955_v40 = vld [vmem:[%s1221_s5 + $0x40] ss:$8 sps:$4 sm:$0xff]   ;;  %v956_v41 = vld [vmem:[%s1221_s5 + $0x34] ss:$8 sps:$4 sm:$0xff]  }
  0x3d   : > { %633 = vmatprep.subr.bf16.mxu0 %v947_v35  ;;  %v958_v42 = vld [vmem:[%s1221_s5 + $0x30] ss:$8 sps:$4 sm:$0xff]   ;;  %v959_v43 = vld [vmem:[%s1221_s5 + $0x24] ss:$8 sps:$4 sm:$0xff]   ;;  %v961_v44 = vld [vmem:[%s1221_s5 + $0x20] ss:$8 sps:$4 sm:$0xff]  }
  0x3e   : > { %v962_v45 = vld [vmem:[%s1221_s5 + $0x14] ss:$8 sps:$4 sm:$0xff]   ;;  %v964_v48 = vld [vmem:[%s1221_s5 + $0x10] ss:$8 sps:$4 sm:$0xff]   ;;  %v965_v49 = vld [vmem:[%s1221_s5 + $0x4] ss:$8 sps:$4 sm:$0xff]  }
  0x3f   : > { %v431_v46 = vld [vmem:[%s1207_s26] sm:$0xff]  ;;  %v967_v50 = vld [vmem:[%s1221_s5] ss:$8 sps:$4 sm:$0xff]   ;;  %v971_v53 = vld [vmem:[%s1221_s5 + $0xe4] ss:$8 sps:$4 sm:$0xff]   ;;  %p881_p13 = scmp.ne.s32.totalorder %s1032_s14, 8 }
  0x40   : > { %634 = vmatpush1.bf16.msra.mxu0 %v949_v36  ;;  %v848_v47 = vcombine.high %v431_v46, %v431_v46  ;;  %v968_v51 = vld [vmem:[%s1221_s5 + $0xf4] ss:$8 sps:$4 sm:$0xff]   ;;  %v970_v52 = vld [vmem:[%s1221_s5 + $0xf0] ss:$8 sps:$4 sm:$0xff]   ;;  %v973_v54 = vld [vmem:[%s1221_s5 + $0xe0] ss:$8 sps:$4 sm:$0xff]   ;;  %v847_v3 = vcombine.low %v431_v46, %v431_v46 }
  0x41   : > { %635 = vmatprep.subr.bf16.mxu0 %v950_v37  ;;  %v974_v55 = vld [vmem:[%s1221_s5 + $0xd4] ss:$8 sps:$4 sm:$0xff]   ;;  %v976_v56 = vld [vmem:[%s1221_s5 + $0xd0] ss:$8 sps:$4 sm:$0xff]   ;;  %v977_v57 = vld [vmem:[%s1221_s5 + $0xc4] ss:$8 sps:$4 sm:$0xff]  }
  0x42   : > { %663 = vmatprep.mubr.bf16.mxu0 %v848_v47  ;;  %v979_v58 = vld [vmem:[%s1221_s5 + $0xc0] ss:$8 sps:$4 sm:$0xff]   ;;  %v980_v59 = vld [vmem:[%s1221_s5 + $0xb4] ss:$8 sps:$4 sm:$0xff]   ;;  %v982_v60 = vld [vmem:[%s1221_s5 + $0xb0] ss:$8 sps:$4 sm:$0xff]  }
  0x43   : > { %v983_v61 = vld [vmem:[%s1221_s5 + $0xa4] ss:$8 sps:$4 sm:$0xff]   ;;  %v985_v62 = vld [vmem:[%s1221_s5 + $0xa0] ss:$8 sps:$4 sm:$0xff]   ;;  %v986_v63 = vld [vmem:[%s1221_s5 + $0x94] ss:$8 sps:$4 sm:$0xff]  }
  0x44   : > { %636 = vmatpush1.bf16.msra.mxu0 %v952_v38  ;;  %v988_v0 = vld [vmem:[%s1221_s5 + $0x90] ss:$8 sps:$4 sm:$0xff]   ;;  %v989_v1 = vld [vmem:[%s1221_s5 + $0x84] ss:$8 sps:$4 sm:$0xff]   ;;  %v991_v2 = vld [vmem:[%s1221_s5 + $0x80] ss:$8 sps:$4 sm:$0xff]  }
  0x45   : > { %637 = vmatprep.subr.bf16.mxu0 %v953_v39  ;;  %v429_v4 = vld [vmem:[#allocation2] sm:$0xff]  ;;  %v430_v6 = vld [vmem:[#allocation2 + $0x8] sm:$0xff] }
  0x48   : > { %638 = vmatpush1.bf16.msra.mxu0 %v955_v40 }
  0x49   : > { %639 = vmatprep.subr.bf16.mxu0 %v956_v41 }
  0x4c   : > { %640 = vmatpush1.bf16.msra.mxu0 %v958_v42 }
  0x4d   : > { %641 = vmatprep.subr.bf16.mxu0 %v959_v43 }
  0x50   : > { %642 = vmatpush1.bf16.msra.mxu0 %v961_v44 }
  0x51   : > { %643 = vmatprep.subr.bf16.mxu0 %v962_v45 }
  0x54   : > { %644 = vmatpush1.bf16.msra.mxu0 %v964_v48 }
  0x55   : > { %645 = vmatprep.subr.bf16.mxu0 %v965_v49 }
  0x58   : > { %646 = vmatpush1.bf16.msra.mxu0 %v967_v50 }
  0x59   : > { %647 = vmatprep.subr.bf16.mxu0 %v968_v51 }
  0x5c   : > { %648 = vmatpush2.bf16.msra.mxu0 %v970_v52 }
  0x5d   : > { %649 = vmatprep.subr.bf16.mxu0 %v971_v53 }
  0x60   : > { %650 = vmatpush2.bf16.msra.mxu0 %v973_v54 }
  0x61   : > { %651 = vmatprep.subr.bf16.mxu0 %v974_v55 }
  0x64   : > { %652 = vmatpush2.bf16.msra.mxu0 %v976_v56 }
  0x65   : > { %653 = vmatprep.subr.bf16.mxu0 %v977_v57 }
  0x68   : > { %654 = vmatpush2.bf16.msra.mxu0 %v979_v58 }
  0x69   : > { %655 = vmatprep.subr.bf16.mxu0 %v980_v59 }
  0x6c   : > { %656 = vmatpush2.bf16.msra.mxu0 %v982_v60 }
  0x6d   : > { %657 = vmatprep.subr.bf16.mxu0 %v983_v61 }
  0x70   : > { %658 = vmatpush2.bf16.msra.mxu0 %v985_v62 }
  0x71   : > { %659 = vmatprep.subr.bf16.mxu0 %v986_v63 }
  0x74   : > { %660 = vmatpush2.bf16.msra.mxu0 %v988_v0 }
  0x75   : > { %661 = vmatprep.subr.bf16.mxu0 %v989_v1 }
  0x78   : > { %662 = vmatpush2.bf16.msra.mxu0 %v991_v2 }
  0x7b   : > { %664 = vmatmul.mubr.bf16.vlgmr.msra.gmra.mxu0 %v847_v3 }
 0x13b   : > { %v665_v5 = vpop.f32.mrf.mxu0 }
 0x13c   : > { %v672_v7 = vadd.f32 %v665_v5, %v429_v4 }
 0x13d   : > { %v667_v8 = vpop.f32.mrf.mxu0  ;;  %679 = sbr.rel (%p881_p13) target bundleno = 337 (0x151), region = 78 }
 0x13e   : > { %674 = vst [vmem:[#allocation2] sm:$0xff] %v672_v7  ;;  %v673_v9 = vadd.f32 %v667_v8, %v430_v6 }
 0x13f   : > { %v669_v10 = vpop.f32.mrf.mxu0 }
 0x140   : > { %675 = vst [vmem:[#allocation2 + $0x8] sm:$0xff] %v673_v9 }
 0x141   : > { %v670_v11 = vpop.f32.mrf.mxu0 }
 0x142   : > { %v684_v12 = vlaneseq  ;;  %v682_v14 = vld [vmem:[%s411_s12] sm:$0x3] }
 0x144   : > { %v685_v13 = vshrl.u32 %v684_v12, 7 }
 0x145   : > { %v680_v17 = vld [vmem:[#allocation2] sm:$0xff] }
 0x146   : > { %v686_v15 = vsub.s32 0, %v685_v13  ;;  %v690_v16 = vsub.s32 1, %v685_v13 }
 0x147   : > { %v681_v18 = vld [vmem:[#allocation2 + $0x8] sm:$0xff] }
 0x148   : > { %v687_v19 = vrot.slane %v682_v14, %v686_v15  ;;  %v691_v20 = vrot.slane %v682_v14, %v690_v16 }
 0x14a   : > { %v694_v21 = vadd.f32 %v687_v19, %v680_v17  ;;  %v695_v22 = vadd.f32 %v691_v20, %v681_v18 }
 0x14c   : > { %v696_v23 = vmax.f32 %v694_v21, 0.0  ;;  %v697_v24 = vmax.f32 %v695_v22, 0.0 }
 0x14e   : > { %v886_v25 = vpack.c.bf16 %v697_v24, %v696_v23 }
 0x150   : > { %706 = vst [vmem:[%s1219_s15] sm:$0xff] %v886_v25 }
 0x151 PF: > { %s13_s18 = sadd.s32 1, %s1048_s18   ;;  %s1289_s12 = smov %s1028_s13 }
 0x152   : > { %p10_p0 = scmp.ge.s32.totalorder %s13_s18, 20   ;;  %s1290_s13 = smov %s1122_s25 }
 0x153   : > { %s1291_s14 = smov %s1040_s16  ;;  %s1292_s15 = smov %s1044_s17 }
 0x154   : > { %s1293_s16 = smov %s1296_s19  ;;  %s1294_s17 = smov %s1300_s20 }
 0x155   :  { %12 = sbr.rel (!%p10_p0) target bundleno = 4 (0x4), region = 119 }

// kernel: resnet34_forward.67
= control target key start
LH: loop header
LB: loop body
LE: loop exit
PB: predicated region body
PF: predicated region fallthrough
CT: control target
= control target key end

     0   :  { %s1029_s12 = smov 0   ;;  %s1031_s13 = smov 0   ;;  %s1208_s0 = inlined_call_operand.vmem [shape: bf16[8,256], index: 0, kind: input, shape index: {}]   ;;  %s1209_s1 = inlined_call_operand.vmem [shape: bf16[256,512], index: 1, kind: input, shape index: {}]   ;;  %s1210_s2 = inlined_call_operand.vmem [shape: f32[1,512], index: 2, kind: input, shape index: {}]   ;;  %s1211_s3 = inlined_call_operand.vmem [shape: bf16[8,512], index: 3, kind: output, shape index: {}]  }
   0x1   :  { %s1033_s14 = smov 0   ;;  %s1035_s15 = smov 0  }
   0x2   :  { %s1037_s16 = smov 0  }
   0x3 LB: > { %s28_s17 = sadd.s32 1, %s1003_s15  ;;  %p76_p1 = scmp.ne.s32.totalorder %s995_s13, %s991_s12  ;;  %s1007_s16 = sphi %s1037_s16, %s13_s16   ;;  %s1003_s15 = sphi %s1035_s15, %s1215_s15   ;;  %s999_s14 = sphi %s1033_s14, %s1214_s14   ;;  %s995_s13 = sphi %s1031_s13, %s1213_s13   ;;  %s991_s12 = sphi %s1029_s12, %s1212_s12  }
   0x4   : > { %p30_p0 = scmp.ge.s32.totalorder %s28_s17, 2  ;;  %p77_p2 = scmp.eq.s32.totalorder %s1007_s16, 0 }
   0x5   : > { %s69_s19 = sadd.s32 1, %s995_s13  ;;  %p831_p5 = scmp.ge.s32.totalorder %s1007_s16, 2 }
   0x6   : > { %s1217_s17 = smov (%p30_p0, %s28_s17), 0  ;;  %p78_p3 = por %p77_p2, %p76_p1 }
   0x7   : > { %s65_s18 = ssub.s32 %s1003_s15, %s1217_s17  ;;  %169 = sbr.rel (%p831_p5) target bundleno = 32 (0x20), region = 20 }
   0x8   : > { %p67_p4 = scmp.eq.s32.totalorder %s65_s18, 0 }
   0xa   : > { %s1064_s20 = scalar_select %p67_p4, %s995_s13, %s69_s19  }
   0xc   : > { %172 = sbr.rel (!%p78_p3) target bundleno = 32 (0x20), region = 24  ;;  %s174_s21 = sand.u32 (%p78_p3), 1, %s995_s13  }
   0xd   : > { %s877_s22 = sshll.u32 (%p78_p3), %s1003_s15, 3  ;;  %s832_s23 = sshll.u32 (%p78_p3), %s174_s21, 8 }
   0xe   : > { %s1072_s26 = scalar_lea.vmem (%p78_p3), %s1209_s1, %s877_s22  ;;  %s1077_s27 = scalar_lea.vmem (%p78_p3), [#allocation3], %s832_s23 }
   0xf   : > { %v273_v0 = vld [vmem:[%s1072_s26] sm:$0xff] (%p78_p3)  ;;  %v275_v1 = vld [vmem:[%s1072_s26 + $0x10] sm:$0xff] (%p78_p3) }
  0x10   : > { %v277_v2 = vld [vmem:[%s1072_s26 + $0x20] sm:$0xff] (%p78_p3)  ;;  %274 = vst [vmem:[%s1077_s27] sm:$0xff] (%p78_p3), %v273_v0  ;;  %276 = vst [vmem:[%s1077_s27 + $0x8] sm:$0xff] (%p78_p3), %v275_v1  ;;  %v279_v3 = vld [vmem:[%s1072_s26 + $0x30] sm:$0xff] (%p78_p3) }
  0x11   : > { %278 = vst [vmem:[%s1077_s27 + $0x10] sm:$0xff] %v277_v2  ;;  %v281_v4 = vld [vmem:[%s1072_s26 + $0x40] sm:$0xff]  ;;  %v283_v5 = vld [vmem:[%s1072_s26 + $0x50] sm:$0xff]  ;;  %280 = vst [vmem:[%s1077_s27 + $0x18] sm:$0xff] %v279_v3 }
  0x12   : > { %282 = vst [vmem:[%s1077_s27 + $0x20] sm:$0xff] %v281_v4  ;;  %284 = vst [vmem:[%s1077_s27 + $0x28] sm:$0xff] %v283_v5  ;;  %v285_v6 = vld [vmem:[%s1072_s26 + $0x60] sm:$0xff]  ;;  %v287_v7 = vld [vmem:[%s1072_s26 + $0x70] sm:$0xff] }
  0x13   : > { %v289_v8 = vld [vmem:[%s1072_s26 + $0x80] sm:$0xff]  ;;  %286 = vst [vmem:[%s1077_s27 + $0x30] sm:$0xff] %v285_v6  ;;  %288 = vst [vmem:[%s1077_s27 + $0x38] sm:$0xff] %v287_v7  ;;  %v291_v9 = vld [vmem:[%s1072_s26 + $0x90] sm:$0xff] }
  0x14   : > { %290 = vst [vmem:[%s1077_s27 + $0x40] sm:$0xff] %v289_v8  ;;  %v293_v10 = vld [vmem:[%s1072_s26 + $0xa0] sm:$0xff]  ;;  %v295_v11 = vld [vmem:[%s1072_s26 + $0xb0] sm:$0xff]  ;;  %292 = vst [vmem:[%s1077_s27 + $0x48] sm:$0xff] %v291_v9 }
  0x15   : > { %294 = vst [vmem:[%s1077_s27 + $0x50] sm:$0xff] %v293_v10  ;;  %296 = vst [vmem:[%s1077_s27 + $0x58] sm:$0xff] %v295_v11  ;;  %v297_v12 = vld [vmem:[%s1072_s26 + $0xc0] sm:$0xff]  ;;  %v299_v13 = vld [vmem:[%s1072_s26 + $0xd0] sm:$0xff] }
  0x16   : > { %v301_v14 = vld [vmem:[%s1072_s26 + $0xe0] sm:$0xff]  ;;  %298 = vst [vmem:[%s1077_s27 + $0x60] sm:$0xff] %v297_v12  ;;  %300 = vst [vmem:[%s1077_s27 + $0x68] sm:$0xff] %v299_v13  ;;  %v303_v15 = vld [vmem:[%s1072_s26 + $0xf0] sm:$0xff] }
  0x17   : > { %302 = vst [vmem:[%s1077_s27 + $0x70] sm:$0xff] %v301_v14  ;;  %v305_v16 = vld [vmem:[%s1072_s26 + $0x100] sm:$0xff]  ;;  %v307_v17 = vld [vmem:[%s1072_s26 + $0x110] sm:$0xff]  ;;  %304 = vst [vmem:[%s1077_s27 + $0x78] sm:$0xff] %v303_v15 }
  0x18   : > { %306 = vst [vmem:[%s1077_s27 + $0x80] sm:$0xff] %v305_v16  ;;  %308 = vst [vmem:[%s1077_s27 + $0x88] sm:$0xff] %v307_v17  ;;  %v309_v18 = vld [vmem:[%s1072_s26 + $0x120] sm:$0xff]  ;;  %v311_v19 = vld [vmem:[%s1072_s26 + $0x130] sm:$0xff] }
  0x19   : > { %v313_v20 = vld [vmem:[%s1072_s26 + $0x140] sm:$0xff]  ;;  %310 = vst [vmem:[%s1077_s27 + $0x90] sm:$0xff] %v309_v18  ;;  %312 = vst [vmem:[%s1077_s27 + $0x98] sm:$0xff] %v311_v19  ;;  %v315_v21 = vld [vmem:[%s1072_s26 + $0x150] sm:$0xff] }
  0x1a   : > { %314 = vst [vmem:[%s1077_s27 + $0xa0] sm:$0xff] %v313_v20  ;;  %v317_v22 = vld [vmem:[%s1072_s26 + $0x160] sm:$0xff]  ;;  %v319_v23 = vld [vmem:[%s1072_s26 + $0x170] sm:$0xff]  ;;  %316 = vst [vmem:[%s1077_s27 + $0xa8] sm:$0xff] %v315_v21 }
  0x1b   : > { %318 = vst [vmem:[%s1077_s27 + $0xb0] sm:$0xff] %v317_v22  ;;  %320 = vst [vmem:[%s1077_s27 + $0xb8] sm:$0xff] %v319_v23  ;;  %v321_v24 = vld [vmem:[%s1072_s26 + $0x180] sm:$0xff]  ;;  %v323_v25 = vld [vmem:[%s1072_s26 + $0x190] sm:$0xff] }
  0x1c   : > { %v325_v26 = vld [vmem:[%s1072_s26 + $0x1a0] sm:$0xff]  ;;  %322 = vst [vmem:[%s1077_s27 + $0xc0] sm:$0xff] %v321_v24  ;;  %324 = vst [vmem:[%s1077_s27 + $0xc8] sm:$0xff] %v323_v25  ;;  %v327_v27 = vld [vmem:[%s1072_s26 + $0x1b0] sm:$0xff] }
  0x1d   : > { %326 = vst [vmem:[%s1077_s27 + $0xd0] sm:$0xff] %v325_v26  ;;  %v329_v28 = vld [vmem:[%s1072_s26 + $0x1c0] sm:$0xff]  ;;  %v331_v29 = vld [vmem:[%s1072_s26 + $0x1d0] sm:$0xff]  ;;  %328 = vst [vmem:[%s1077_s27 + $0xd8] sm:$0xff] %v327_v27 }
  0x1e   : > { %330 = vst [vmem:[%s1077_s27 + $0xe0] sm:$0xff] %v329_v28  ;;  %332 = vst [vmem:[%s1077_s27 + $0xe8] sm:$0xff] %v331_v29  ;;  %v333_v30 = vld [vmem:[%s1072_s26 + $0x1e0] sm:$0xff]  ;;  %v335_v31 = vld [vmem:[%s1072_s26 + $0x1f0] sm:$0xff] }
  0x1f   : > { %334 = vst [vmem:[%s1077_s27 + $0xf0] sm:$0xff] %v333_v30  ;;  %336 = vst [vmem:[%s1077_s27 + $0xf8] sm:$0xff] %v335_v31 }
  0x20 PF: > { %p835_p6 = scmp.ge.s32.totalorder %s1007_s16, 1  ;;  %p349_p7 = scmp.lt.s32.totalorder %s1007_s16, 3 }
  0x22   : > { %p350_p8 = pnand %p835_p6, %p349_p7 }
  0x23   : > { %s356_s28 = sand.u32 (!%p350_p8), 1, %s991_s12   ;;  %s837_s6 = sshll.u32 (!%p350_p8), %s999_s14, 1 }
  0x24   : > { %353 = sbr.rel (%p350_p8) target bundleno = 306 (0x132), region = 66  ;;  %s836_s4 = sshll.u32 (!%p350_p8), %s356_s28, 8 }
  0x25   : > { %s1150_s5 = scalar_lea.vmem (!%p350_p8), [#allocation3], %s836_s4  ;;  %p409_p9 = scmp.lt.s32.totalorder (!%p350_p8), %s837_s6, 3 }
  0x29   : > { %v1146_v32 = vld [vmem:[%s1208_s0] sm:$0xff]  ;;  %v919_v34 = vld [vmem:[%s1150_s5 + $0x74] ss:$8 sps:$4 sm:$0xff]   ;;  %v921_v35 = vld [vmem:[%s1150_s5 + $0x70] ss:$8 sps:$4 sm:$0xff]   ;;  %v683_v3 = vlaneseq  ;;  %s1219_s6 = smov (!%p409_p9, %s837_s6), 3 }
  0x2a   : > { %v841_v33 = vcombine.high %v1146_v32, %v1146_v32  ;;  %631 = vmatprep.subr.bf16.mxu0 %v919_v34  ;;  %v922_v36 = vld [vmem:[%s1150_s5 + $0x64] ss:$8 sps:$4 sm:$0xff]   ;;  %v924_v37 = vld [vmem:[%s1150_s5 + $0x60] ss:$8 sps:$4 sm:$0xff]   ;;  %v925_v38 = vld [vmem:[%s1150_s5 + $0x54] ss:$8 sps:$4 sm:$0xff]   ;;  %v840_v2 = vcombine.low %v1146_v32, %v1146_v32  ;;  %s411_s9 = scalar_lea.vmem %s1210_s2, %s1219_s6 }
  0x2b   : > { %632 = vmatpush1.bf16.msra.mxu0 %v921_v35  ;;  %v927_v39 = vld [vmem:[%s1150_s5 + $0x50] ss:$8 sps:$4 sm:$0xff]   ;;  %v928_v40 = vld [vmem:[%s1150_s5 + $0x44] ss:$8 sps:$4 sm:$0xff]   ;;  %v930_v41 = vld [vmem:[%s1150_s5 + $0x40] ss:$8 sps:$4 sm:$0xff]  }
  0x2c   : > { %663 = vmatprep.mubr.bf16.mxu0 %v841_v33  ;;  %633 = vmatprep.subr.bf16.mxu0 %v922_v36  ;;  %v931_v42 = vld [vmem:[%s1150_s5 + $0x34] ss:$8 sps:$4 sm:$0xff]   ;;  %v933_v43 = vld [vmem:[%s1150_s5 + $0x30] ss:$8 sps:$4 sm:$0xff]   ;;  %v934_v44 = vld [vmem:[%s1150_s5 + $0x24] ss:$8 sps:$4 sm:$0xff]  }
  0x2d   : > { %v936_v45 = vld [vmem:[%s1150_s5 + $0x20] ss:$8 sps:$4 sm:$0xff]   ;;  %v937_v46 = vld [vmem:[%s1150_s5 + $0x14] ss:$8 sps:$4 sm:$0xff]   ;;  %v939_v47 = vld [vmem:[%s1150_s5 + $0x10] ss:$8 sps:$4 sm:$0xff]  }
  0x2e   : > { %v940_v48 = vld [vmem:[%s1150_s5 + $0x4] ss:$8 sps:$4 sm:$0xff]   ;;  %v942_v49 = vld [vmem:[%s1150_s5] ss:$8 sps:$4 sm:$0xff]   ;;  %v943_v50 = vld [vmem:[%s1150_s5 + $0xf4] ss:$8 sps:$4 sm:$0xff]  }
  0x2f   : > { %634 = vmatpush1.bf16.msra.mxu0 %v924_v37  ;;  %v945_v51 = vld [vmem:[%s1150_s5 + $0xf0] ss:$8 sps:$4 sm:$0xff]   ;;  %v946_v52 = vld [vmem:[%s1150_s5 + $0xe4] ss:$8 sps:$4 sm:$0xff]   ;;  %v948_v53 = vld [vmem:[%s1150_s5 + $0xe0] ss:$8 sps:$4 sm:$0xff]  }
  0x30   : > { %635 = vmatprep.subr.bf16.mxu0 %v925_v38  ;;  %v949_v54 = vld [vmem:[%s1150_s5 + $0xd4] ss:$8 sps:$4 sm:$0xff]   ;;  %v951_v55 = vld [vmem:[%s1150_s5 + $0xd0] ss:$8 sps:$4 sm:$0xff]   ;;  %v952_v56 = vld [vmem:[%s1150_s5 + $0xc4] ss:$8 sps:$4 sm:$0xff]  }
  0x31   : > { %v954_v57 = vld [vmem:[%s1150_s5 + $0xc0] ss:$8 sps:$4 sm:$0xff]   ;;  %v955_v58 = vld [vmem:[%s1150_s5 + $0xb4] ss:$8 sps:$4 sm:$0xff]   ;;  %v957_v59 = vld [vmem:[%s1150_s5 + $0xb0] ss:$8 sps:$4 sm:$0xff]  }
  0x32   : > { %v958_v60 = vld [vmem:[%s1150_s5 + $0xa4] ss:$8 sps:$4 sm:$0xff]   ;;  %v960_v61 = vld [vmem:[%s1150_s5 + $0xa0] ss:$8 sps:$4 sm:$0xff]   ;;  %v961_v62 = vld [vmem:[%s1150_s5 + $0x94] ss:$8 sps:$4 sm:$0xff]  }
  0x33   : > { %636 = vmatpush1.bf16.msra.mxu0 %v927_v39  ;;  %v963_v63 = vld [vmem:[%s1150_s5 + $0x90] ss:$8 sps:$4 sm:$0xff]   ;;  %v964_v0 = vld [vmem:[%s1150_s5 + $0x84] ss:$8 sps:$4 sm:$0xff]   ;;  %v966_v1 = vld [vmem:[%s1150_s5 + $0x80] ss:$8 sps:$4 sm:$0xff]  }
  0x34   : > { %637 = vmatprep.subr.bf16.mxu0 %v928_v40  ;;  %v684_v4 = vshrl.u32 %v683_v3, 7  ;;  %v681_v7 = vld [vmem:[%s411_s9] sm:$0x3]  ;;  %s839_s10 = sshll.u32 %s1219_s6, 2 }
  0x35   : > { %s421_s14 = scalar_lea.vmem %s1211_s3, %s839_s10 }
  0x36   : > { %v685_v5 = vsub.s32 0, %v684_v4  ;;  %v689_v6 = vsub.s32 1, %v684_v4 }
  0x37   : > { %638 = vmatpush1.bf16.msra.mxu0 %v930_v41 }
  0x38   : > { %639 = vmatprep.subr.bf16.mxu0 %v931_v42  ;;  %v686_v8 = vrot.slane %v681_v7, %v685_v5  ;;  %v690_v9 = vrot.slane %v681_v7, %v689_v6 }
  0x3b   : > { %640 = vmatpush1.bf16.msra.mxu0 %v933_v43 }
  0x3c   : > { %641 = vmatprep.subr.bf16.mxu0 %v934_v44 }
  0x3f   : > { %642 = vmatpush1.bf16.msra.mxu0 %v936_v45 }
  0x40   : > { %643 = vmatprep.subr.bf16.mxu0 %v937_v46 }
  0x43   : > { %644 = vmatpush1.bf16.msra.mxu0 %v939_v47 }
  0x44   : > { %645 = vmatprep.subr.bf16.mxu0 %v940_v48 }
  0x47   : > { %646 = vmatpush1.bf16.msra.mxu0 %v942_v49 }
  0x48   : > { %647 = vmatprep.subr.bf16.mxu0 %v943_v50 }
  0x4b   : > { %648 = vmatpush2.bf16.msra.mxu0 %v945_v51 }
  0x4c   : > { %649 = vmatprep.subr.bf16.mxu0 %v946_v52 }
  0x4f   : > { %650 = vmatpush2.bf16.msra.mxu0 %v948_v53 }
  0x50   : > { %651 = vmatprep.subr.bf16.mxu0 %v949_v54 }
  0x53   : > { %652 = vmatpush2.bf16.msra.mxu0 %v951_v55 }
  0x54   : > { %653 = vmatprep.subr.bf16.mxu0 %v952_v56 }
  0x57   : > { %654 = vmatpush2.bf16.msra.mxu0 %v954_v57 }
  0x58   : > { %655 = vmatprep.subr.bf16.mxu0 %v955_v58 }
  0x5b   : > { %656 = vmatpush2.bf16.msra.mxu0 %v957_v59 }
  0x5c   : > { %657 = vmatprep.subr.bf16.mxu0 %v958_v60 }
  0x5f   : > { %658 = vmatpush2.bf16.msra.mxu0 %v960_v61 }
  0x60   : > { %659 = vmatprep.subr.bf16.mxu0 %v961_v62 }
  0x63   : > { %660 = vmatpush2.bf16.msra.mxu0 %v963_v63 }
  0x64   : > { %661 = vmatprep.subr.bf16.mxu0 %v964_v0 }
  0x67   : > { %662 = vmatpush2.bf16.msra.mxu0 %v966_v1 }
  0x6a   : > { %664 = vmatmul.mubr.bf16.vlgmr.msra.gmra.mxu0 %v840_v2 }
 0x12a   : > { %v665_v10 = vpop.f32.mrf.mxu0 }
 0x12b   : > { %v693_v12 = vadd.f32 %v686_v8, %v665_v10 }
 0x12c   : > { %v667_v11 = vpop.f32.mrf.mxu0 }
 0x12d   : > { %v694_v13 = vadd.f32 %v690_v9, %v667_v11 }
 0x12e   : > { %v669_v14 = vpop.f32.mrf.mxu0 }
 0x12f   : > { %v878_v15 = vpack.c.bf16 %v694_v13, %v693_v12 }
 0x130   : > { %v670_v16 = vpop.f32.mrf.mxu0 }
 0x131   : > { %703 = vst [vmem:[%s421_s14] sm:$0xff] %v878_v15 }
 0x132 PF: > { %s13_s16 = sadd.s32 1, %s1007_s16   ;;  %s1212_s12 = smov %s995_s13 }
 0x133   : > { %p10_p10 = scmp.ge.s32.totalorder %s13_s16, 4   ;;  %s1213_s13 = smov %s1064_s20 }
 0x134   : > { %s1214_s14 = smov %s1003_s15  ;;  %s1215_s15 = smov %s1217_s17 }
 0x135   :  { %12 = sbr.rel (!%p10_p10) target bundleno = 3 (0x3), region = 119 }

// kernel: resnet34_forward.68
= control target key start
LH: loop header
LB: loop body
LE: loop exit
PB: predicated region body
PF: predicated region fallthrough
CT: control target
= control target key end

     0   :  { %s1164_s15 = smov 0   ;;  %s1166_s16 = smov 0   ;;  %s1384_s0 = inlined_call_operand.vmem [shape: bf16[8,4608], index: 0, kind: input, shape index: {}]   ;;  %s1385_s1 = inlined_call_operand.vmem [shape: bf16[4608,512], index: 1, kind: input, shape index: {}]   ;;  %s1386_s2 = inlined_call_operand.vmem [shape: f32[1,512], index: 2, kind: input, shape index: {}]   ;;  %s1387_s3 = inlined_call_operand.vmem [shape: bf16[8,512], index: 3, kind: input, shape index: {}]   ;;  %s1388_s4 = inlined_call_operand.vmem [shape: bf16[8,512], index: 4, kind: output, shape index: {}]  }
   0x1   :  { %s1168_s17 = smov 0   ;;  %s1170_s18 = smov 0  }
   0x2   :  { %s1172_s19 = smov 0   ;;  %s1174_s20 = smov 0  }
   0x3   :  { %s1176_s21 = smov 0  }
   0x4 LB: > { %s26_s22 = sadd.s32 1, %s1128_s19  ;;  %s29_s23 = sadd.s32 1, %s1132_s20  ;;  %s1136_s21 = sphi %s1176_s21, %s14_s21   ;;  %s1132_s20 = sphi %s1174_s20, %s1394_s20   ;;  %s1128_s19 = sphi %s1172_s19, %s1393_s19   ;;  %s1124_s18 = sphi %s1170_s18, %s1392_s18   ;;  %s1120_s17 = sphi %s1168_s17, %s1391_s17   ;;  %s1116_s16 = sphi %s1166_s16, %s1390_s16   ;;  %s1112_s15 = sphi %s1164_s15, %s1389_s15  }
   0x5   : > { %p27_p0 = scmp.ge.s32.totalorder %s26_s22, 18  ;;  %p77_p1 = scmp.ne.s32.totalorder %s1116_s16, %s1112_s15 }
   0x6   : > { %p78_p2 = scmp.eq.s32.totalorder %s1136_s21, 0  ;;  %s70_s27 = sadd.s32 1, %s1116_s16 }
   0x7   : > { %s1396_s22 = smov (%p27_p0, %s26_s22), 0  ;;  %s1398_s23 = smov (!%p27_p0, %s29_s23), %s1132_s20 }
   0x8   : > { %p79_p3 = por %p78_p2, %p77_p1  ;;  %p31_p4 = scmp.ge.s32.totalorder %s1398_s23, 2 }
   0x9   : > { %s65_s24 = ssub.s32 %s1128_s19, %s1396_s22  ;;  %p919_p6 = scmp.ge.s32.totalorder %s1136_s21, 36 }
   0xa   : > { %s1400_s23 = smov (%p31_p4, %s1398_s23), 0 }
   0xb   : > { %s66_s25 = ssub.s32 %s1132_s20, %s1400_s23  ;;  %185 = sbr.rel (%p919_p6) target bundleno = 39 (0x27), region = 16 }
   0xc   : > { %s67_s26 = sor.u32 %s66_s25, %s65_s24 }
   0xd   : > { %p68_p5 = scmp.eq.s32.totalorder %s67_s26, 0 }
   0xf   : > { %s1215_s28 = scalar_select %p68_p5, %s1116_s16, %s70_s27  }
  0x10   : > { %201 = sbr.rel (!%p79_p3) target bundleno = 39 (0x27), region = 24  ;;  %s203_s29 = sand.u32 (%p79_p3), 1, %s1116_s16  }
  0x11   : > { %s922_s30 = sshll.u32 (%p79_p3), %s1132_s20, 1  ;;  %s920_s5 = sshll.u32 (%p79_p3), %s203_s29, 8 }
  0x12   : > { %s973_s6 = sshll.u32 (%p79_p3), %s1128_s19, 7  ;;  %s1229_s12 = scalar_lea.vmem (%p79_p3), [#allocation3], %s920_s5 }
  0x13   : > { %s209_s7 = sadd.s32 (%p79_p3), %s973_s6, %s922_s30 }
  0x14   : > { %s924_s8 = sshll.u32 (%p79_p3), %s209_s7, 2 }
  0x15   : > { %s1224_s11 = scalar_lea.vmem %s1385_s1, %s924_s8 }
  0x16   : > { %v302_v0 = vld [vmem:[%s1224_s11] sm:$0xff]  ;;  %v304_v1 = vld [vmem:[%s1224_s11 + $0x10] sm:$0xff] }
  0x17   : > { %v306_v2 = vld [vmem:[%s1224_s11 + $0x20] sm:$0xff]  ;;  %303 = vst [vmem:[%s1229_s12] sm:$0xff] %v302_v0  ;;  %305 = vst [vmem:[%s1229_s12 + $0x8] sm:$0xff] %v304_v1  ;;  %v308_v3 = vld [vmem:[%s1224_s11 + $0x30] sm:$0xff] }
  0x18   : > { %307 = vst [vmem:[%s1229_s12 + $0x10] sm:$0xff] %v306_v2  ;;  %v310_v4 = vld [vmem:[%s1224_s11 + $0x40] sm:$0xff]  ;;  %v312_v5 = vld [vmem:[%s1224_s11 + $0x50] sm:$0xff]  ;;  %309 = vst [vmem:[%s1229_s12 + $0x18] sm:$0xff] %v308_v3 }
  0x19   : > { %311 = vst [vmem:[%s1229_s12 + $0x20] sm:$0xff] %v310_v4  ;;  %313 = vst [vmem:[%s1229_s12 + $0x28] sm:$0xff] %v312_v5  ;;  %v314_v6 = vld [vmem:[%s1224_s11 + $0x60] sm:$0xff]  ;;  %v316_v7 = vld [vmem:[%s1224_s11 + $0x70] sm:$0xff] }
  0x1a   : > { %v318_v8 = vld [vmem:[%s1224_s11 + $0x80] sm:$0xff]  ;;  %315 = vst [vmem:[%s1229_s12 + $0x30] sm:$0xff] %v314_v6  ;;  %317 = vst [vmem:[%s1229_s12 + $0x38] sm:$0xff] %v316_v7  ;;  %v320_v9 = vld [vmem:[%s1224_s11 + $0x90] sm:$0xff] }
  0x1b   : > { %319 = vst [vmem:[%s1229_s12 + $0x40] sm:$0xff] %v318_v8  ;;  %v322_v10 = vld [vmem:[%s1224_s11 + $0xa0] sm:$0xff]  ;;  %v324_v11 = vld [vmem:[%s1224_s11 + $0xb0] sm:$0xff]  ;;  %321 = vst [vmem:[%s1229_s12 + $0x48] sm:$0xff] %v320_v9 }
  0x1c   : > { %323 = vst [vmem:[%s1229_s12 + $0x50] sm:$0xff] %v322_v10  ;;  %325 = vst [vmem:[%s1229_s12 + $0x58] sm:$0xff] %v324_v11  ;;  %v326_v12 = vld [vmem:[%s1224_s11 + $0xc0] sm:$0xff]  ;;  %v328_v13 = vld [vmem:[%s1224_s11 + $0xd0] sm:$0xff] }
  0x1d   : > { %v330_v14 = vld [vmem:[%s1224_s11 + $0xe0] sm:$0xff]  ;;  %327 = vst [vmem:[%s1229_s12 + $0x60] sm:$0xff] %v326_v12  ;;  %329 = vst [vmem:[%s1229_s12 + $0x68] sm:$0xff] %v328_v13  ;;  %v332_v15 = vld [vmem:[%s1224_s11 + $0xf0] sm:$0xff] }
  0x1e   : > { %331 = vst [vmem:[%s1229_s12 + $0x70] sm:$0xff] %v330_v14  ;;  %v334_v16 = vld [vmem:[%s1224_s11 + $0x100] sm:$0xff]  ;;  %v336_v17 = vld [vmem:[%s1224_s11 + $0x110] sm:$0xff]  ;;  %333 = vst [vmem:[%s1229_s12 + $0x78] sm:$0xff] %v332_v15 }
  0x1f   : > { %335 = vst [vmem:[%s1229_s12 + $0x80] sm:$0xff] %v334_v16  ;;  %337 = vst [vmem:[%s1229_s12 + $0x88] sm:$0xff] %v336_v17  ;;  %v338_v18 = vld [vmem:[%s1224_s11 + $0x120] sm:$0xff]  ;;  %v340_v19 = vld [vmem:[%s1224_s11 + $0x130] sm:$0xff] }
  0x20   : > { %v342_v20 = vld [vmem:[%s1224_s11 + $0x140] sm:$0xff]  ;;  %339 = vst [vmem:[%s1229_s12 + $0x90] sm:$0xff] %v338_v18  ;;  %341 = vst [vmem:[%s1229_s12 + $0x98] sm:$0xff] %v340_v19  ;;  %v344_v21 = vld [vmem:[%s1224_s11 + $0x150] sm:$0xff] }
  0x21   : > { %343 = vst [vmem:[%s1229_s12 + $0xa0] sm:$0xff] %v342_v20  ;;  %v346_v22 = vld [vmem:[%s1224_s11 + $0x160] sm:$0xff]  ;;  %v348_v23 = vld [vmem:[%s1224_s11 + $0x170] sm:$0xff]  ;;  %345 = vst [vmem:[%s1229_s12 + $0xa8] sm:$0xff] %v344_v21 }
  0x22   : > { %347 = vst [vmem:[%s1229_s12 + $0xb0] sm:$0xff] %v346_v22  ;;  %349 = vst [vmem:[%s1229_s12 + $0xb8] sm:$0xff] %v348_v23  ;;  %v350_v24 = vld [vmem:[%s1224_s11 + $0x180] sm:$0xff]  ;;  %v352_v25 = vld [vmem:[%s1224_s11 + $0x190] sm:$0xff] }
  0x23   : > { %v354_v26 = vld [vmem:[%s1224_s11 + $0x1a0] sm:$0xff]  ;;  %351 = vst [vmem:[%s1229_s12 + $0xc0] sm:$0xff] %v350_v24  ;;  %353 = vst [vmem:[%s1229_s12 + $0xc8] sm:$0xff] %v352_v25  ;;  %v356_v27 = vld [vmem:[%s1224_s11 + $0x1b0] sm:$0xff] }
  0x24   : > { %355 = vst [vmem:[%s1229_s12 + $0xd0] sm:$0xff] %v354_v26  ;;  %v358_v28 = vld [vmem:[%s1224_s11 + $0x1c0] sm:$0xff]  ;;  %v360_v29 = vld [vmem:[%s1224_s11 + $0x1d0] sm:$0xff]  ;;  %357 = vst [vmem:[%s1229_s12 + $0xd8] sm:$0xff] %v356_v27 }
  0x25   : > { %359 = vst [vmem:[%s1229_s12 + $0xe0] sm:$0xff] %v358_v28  ;;  %361 = vst [vmem:[%s1229_s12 + $0xe8] sm:$0xff] %v360_v29  ;;  %v362_v30 = vld [vmem:[%s1224_s11 + $0x1e0] sm:$0xff]  ;;  %v364_v31 = vld [vmem:[%s1224_s11 + $0x1f0] sm:$0xff] }
  0x26   : > { %363 = vst [vmem:[%s1229_s12 + $0xf0] sm:$0xff] %v362_v30  ;;  %365 = vst [vmem:[%s1229_s12 + $0xf8] sm:$0xff] %v364_v31 }
  0x27 PF: > { %p925_p7 = scmp.ge.s32.totalorder %s1136_s21, 1  ;;  %p391_p8 = scmp.lt.s32.totalorder %s1136_s21, 37 }
  0x29   : > { %p392_p9 = pnand %p925_p7, %p391_p8 }
  0x2a   : > { %s398_s13 = sand.u32 (!%p392_p9), 1, %s1112_s15   ;;  %s927_s14 = sshll.u32 (!%p392_p9), %s1120_s17, 1 }
  0x2b   : > { %395 = sbr.rel (%p392_p9) target bundleno = 340 (0x154), region = 70  ;;  %s926_s24 = sshll.u32 (!%p392_p9), %s398_s13, 8 }
  0x2c   : > { %p452_p10 = scmp.lt.s32.totalorder (!%p392_p9), %s927_s14, 35  ;;  %s929_s25 = sshll.u32 (!%p392_p9), %s1124_s18, 1 }
  0x2d   : > { %p462_p11 = scmp.lt.s32.totalorder (!%p392_p9), %s929_s25, 3  ;;  %s1319_s13 = scalar_lea.vmem (!%p392_p9), [#allocation3], %s926_s24 }
  0x2e   : > { %p934_p12 = scmp.ne.s32.totalorder (!%p392_p9), %s1120_s17, 0 }
  0x30   : > { %s1402_s14 = smov (!%p452_p10, %s927_s14), 35  ;;  %s1404_s25 = smov (!%p462_p11, %s929_s25), 3 }
  0x31   : > { %s928_s26 = sshll.u32 %s1402_s14, 2  ;;  %s464_s15 = scalar_lea.vmem %s1386_s2, %s1404_s25 }
  0x32   : > { %s1300_s30 = scalar_lea.vmem %s1384_s0, %s928_s26  ;;  %s931_s7 = sshll.u32 %s1404_s25, 2 }
  0x33   : > { %s1312_s18 = scalar_lea.vmem %s1387_s3, %s931_s7  ;;  %s1317_s12 = scalar_lea.vmem %s1388_s4, %s931_s7 }
  0x34   : > { %489 = sbr.rel (%p934_p12) target bundleno = 59 (0x3b), region = 78 }
  0x39   : > { %v1138_v32 = vmov 0.0  }
  0x3a   : > { %490 = vst [vmem:[#allocation2] sm:$0xff] %v1138_v32  ;;  %491 = vst [vmem:[#allocation2 + $0x8] sm:$0xff] %v1138_v32 }
  0x3b PF: > { %v1032_v33 = vld [vmem:[%s1319_s13 + $0x74] ss:$8 sps:$4 sm:$0xff]   ;;  %v1034_v34 = vld [vmem:[%s1319_s13 + $0x70] ss:$8 sps:$4 sm:$0xff]   ;;  %v1035_v35 = vld [vmem:[%s1319_s13 + $0x64] ss:$8 sps:$4 sm:$0xff]  }
  0x3c   : > { %694 = vmatprep.subr.bf16.mxu0 %v1032_v33  ;;  %v1037_v36 = vld [vmem:[%s1319_s13 + $0x60] ss:$8 sps:$4 sm:$0xff]   ;;  %v1038_v37 = vld [vmem:[%s1319_s13 + $0x54] ss:$8 sps:$4 sm:$0xff]   ;;  %v1040_v38 = vld [vmem:[%s1319_s13 + $0x50] ss:$8 sps:$4 sm:$0xff]  }
  0x3d   : > { %695 = vmatpush1.bf16.msra.mxu0 %v1034_v34  ;;  %v1041_v39 = vld [vmem:[%s1319_s13 + $0x44] ss:$8 sps:$4 sm:$0xff]   ;;  %v1043_v40 = vld [vmem:[%s1319_s13 + $0x40] ss:$8 sps:$4 sm:$0xff]   ;;  %v1044_v41 = vld [vmem:[%s1319_s13 + $0x34] ss:$8 sps:$4 sm:$0xff]  }
  0x3e   : > { %696 = vmatprep.subr.bf16.mxu0 %v1035_v35  ;;  %v1046_v42 = vld [vmem:[%s1319_s13 + $0x30] ss:$8 sps:$4 sm:$0xff]   ;;  %v1047_v43 = vld [vmem:[%s1319_s13 + $0x24] ss:$8 sps:$4 sm:$0xff]   ;;  %v1049_v44 = vld [vmem:[%s1319_s13 + $0x20] ss:$8 sps:$4 sm:$0xff]  }
  0x3f   : > { %v1050_v45 = vld [vmem:[%s1319_s13 + $0x14] ss:$8 sps:$4 sm:$0xff]   ;;  %v1052_v48 = vld [vmem:[%s1319_s13 + $0x10] ss:$8 sps:$4 sm:$0xff]   ;;  %v1053_v49 = vld [vmem:[%s1319_s13 + $0x4] ss:$8 sps:$4 sm:$0xff]  }
  0x40   : > { %v494_v46 = vld [vmem:[%s1300_s30] sm:$0xff]  ;;  %v1055_v50 = vld [vmem:[%s1319_s13] ss:$8 sps:$4 sm:$0xff]   ;;  %v1059_v53 = vld [vmem:[%s1319_s13 + $0xe4] ss:$8 sps:$4 sm:$0xff]   ;;  %p969_p13 = scmp.ne.s32.totalorder %s1120_s17, 17 }
  0x41   : > { %697 = vmatpush1.bf16.msra.mxu0 %v1037_v36  ;;  %v936_v47 = vcombine.high %v494_v46, %v494_v46  ;;  %v1056_v51 = vld [vmem:[%s1319_s13 + $0xf4] ss:$8 sps:$4 sm:$0xff]   ;;  %v1058_v52 = vld [vmem:[%s1319_s13 + $0xf0] ss:$8 sps:$4 sm:$0xff]   ;;  %v1061_v54 = vld [vmem:[%s1319_s13 + $0xe0] ss:$8 sps:$4 sm:$0xff]   ;;  %v935_v3 = vcombine.low %v494_v46, %v494_v46 }
  0x42   : > { %698 = vmatprep.subr.bf16.mxu0 %v1038_v37  ;;  %v1062_v55 = vld [vmem:[%s1319_s13 + $0xd4] ss:$8 sps:$4 sm:$0xff]   ;;  %v1064_v56 = vld [vmem:[%s1319_s13 + $0xd0] ss:$8 sps:$4 sm:$0xff]   ;;  %v1065_v57 = vld [vmem:[%s1319_s13 + $0xc4] ss:$8 sps:$4 sm:$0xff]  }
  0x43   : > { %726 = vmatprep.mubr.bf16.mxu0 %v936_v47  ;;  %v1067_v58 = vld [vmem:[%s1319_s13 + $0xc0] ss:$8 sps:$4 sm:$0xff]   ;;  %v1068_v59 = vld [vmem:[%s1319_s13 + $0xb4] ss:$8 sps:$4 sm:$0xff]   ;;  %v1070_v60 = vld [vmem:[%s1319_s13 + $0xb0] ss:$8 sps:$4 sm:$0xff]  }
  0x44   : > { %v1071_v61 = vld [vmem:[%s1319_s13 + $0xa4] ss:$8 sps:$4 sm:$0xff]   ;;  %v1073_v62 = vld [vmem:[%s1319_s13 + $0xa0] ss:$8 sps:$4 sm:$0xff]   ;;  %v1074_v63 = vld [vmem:[%s1319_s13 + $0x94] ss:$8 sps:$4 sm:$0xff]  }
  0x45   : > { %699 = vmatpush1.bf16.msra.mxu0 %v1040_v38  ;;  %v1076_v0 = vld [vmem:[%s1319_s13 + $0x90] ss:$8 sps:$4 sm:$0xff]   ;;  %v1077_v1 = vld [vmem:[%s1319_s13 + $0x84] ss:$8 sps:$4 sm:$0xff]   ;;  %v1079_v2 = vld [vmem:[%s1319_s13 + $0x80] ss:$8 sps:$4 sm:$0xff]  }
  0x46   : > { %700 = vmatprep.subr.bf16.mxu0 %v1041_v39  ;;  %v492_v4 = vld [vmem:[#allocation2] sm:$0xff]  ;;  %v493_v6 = vld [vmem:[#allocation2 + $0x8] sm:$0xff] }
  0x49   : > { %701 = vmatpush1.bf16.msra.mxu0 %v1043_v40 }
  0x4a   : > { %702 = vmatprep.subr.bf16.mxu0 %v1044_v41 }
  0x4d   : > { %703 = vmatpush1.bf16.msra.mxu0 %v1046_v42 }
  0x4e   : > { %704 = vmatprep.subr.bf16.mxu0 %v1047_v43 }
  0x51   : > { %705 = vmatpush1.bf16.msra.mxu0 %v1049_v44 }
  0x52   : > { %706 = vmatprep.subr.bf16.mxu0 %v1050_v45 }
  0x55   : > { %707 = vmatpush1.bf16.msra.mxu0 %v1052_v48 }
  0x56   : > { %708 = vmatprep.subr.bf16.mxu0 %v1053_v49 }
  0x59   : > { %709 = vmatpush1.bf16.msra.mxu0 %v1055_v50 }
  0x5a   : > { %710 = vmatprep.subr.bf16.mxu0 %v1056_v51 }
  0x5d   : > { %711 = vmatpush2.bf16.msra.mxu0 %v1058_v52 }
  0x5e   : > { %712 = vmatprep.subr.bf16.mxu0 %v1059_v53 }
  0x61   : > { %713 = vmatpush2.bf16.msra.mxu0 %v1061_v54 }
  0x62   : > { %714 = vmatprep.subr.bf16.mxu0 %v1062_v55 }
  0x65   : > { %715 = vmatpush2.bf16.msra.mxu0 %v1064_v56 }
  0x66   : > { %716 = vmatprep.subr.bf16.mxu0 %v1065_v57 }
  0x69   : > { %717 = vmatpush2.bf16.msra.mxu0 %v1067_v58 }
  0x6a   : > { %718 = vmatprep.subr.bf16.mxu0 %v1068_v59 }
  0x6d   : > { %719 = vmatpush2.bf16.msra.mxu0 %v1070_v60 }
  0x6e   : > { %720 = vmatprep.subr.bf16.mxu0 %v1071_v61 }
  0x71   : > { %721 = vmatpush2.bf16.msra.mxu0 %v1073_v62 }
  0x72   : > { %722 = vmatprep.subr.bf16.mxu0 %v1074_v63 }
  0x75   : > { %723 = vmatpush2.bf16.msra.mxu0 %v1076_v0 }
  0x76   : > { %724 = vmatprep.subr.bf16.mxu0 %v1077_v1 }
  0x79   : > { %725 = vmatpush2.bf16.msra.mxu0 %v1079_v2 }
  0x7c   : > { %727 = vmatmul.mubr.bf16.vlgmr.msra.gmra.mxu0 %v935_v3 }
 0x13c   : > { %v728_v5 = vpop.f32.mrf.mxu0 }
 0x13d   : > { %v735_v7 = vadd.f32 %v728_v5, %v492_v4 }
 0x13e   : > { %v730_v8 = vpop.f32.mrf.mxu0  ;;  %742 = sbr.rel (%p969_p13) target bundleno = 340 (0x154), region = 82 }
 0x13f   : > { %737 = vst [vmem:[#allocation2] sm:$0xff] %v735_v7  ;;  %v736_v9 = vadd.f32 %v730_v8, %v493_v6 }
 0x140   : > { %v732_v10 = vpop.f32.mrf.mxu0 }
 0x141   : > { %738 = vst [vmem:[#allocation2 + $0x8] sm:$0xff] %v736_v9 }
 0x142   : > { %v733_v11 = vpop.f32.mrf.mxu0 }
 0x143   : > { %v747_v12 = vlaneseq  ;;  %v745_v14 = vld [vmem:[%s464_s15] sm:$0x3] }
 0x144   : > { %v759_v15 = vld [vmem:[%s1312_s18] sm:$0xff] }
 0x145   : > { %v748_v13 = vshrl.u32 %v747_v12, 7  ;;  %v760_v22 = vunpack.c.l.bf16 %v759_v15  ;;  %v761_v23 = vunpack.c.h.bf16 %v759_v15 }
 0x146   : > { %v743_v18 = vld [vmem:[#allocation2] sm:$0xff] }
 0x147   : > { %v749_v16 = vsub.s32 0, %v748_v13  ;;  %v753_v17 = vsub.s32 1, %v748_v13 }
 0x148   : > { %v744_v19 = vld [vmem:[#allocation2 + $0x8] sm:$0xff] }
 0x149   : > { %v750_v20 = vrot.slane %v745_v14, %v749_v16  ;;  %v754_v21 = vrot.slane %v745_v14, %v753_v17 }
 0x14b   : > { %v757_v24 = vadd.f32 %v750_v20, %v743_v18  ;;  %v758_v25 = vadd.f32 %v754_v21, %v744_v19 }
 0x14d   : > { %v762_v26 = vadd.f32 %v760_v22, %v757_v24  ;;  %v763_v27 = vadd.f32 %v761_v23, %v758_v25 }
 0x14f   : > { %v764_v28 = vmax.f32 %v762_v26, 0.0  ;;  %v765_v29 = vmax.f32 %v763_v27, 0.0 }
 0x151   : > { %v974_v30 = vpack.c.bf16 %v765_v29, %v764_v28 }
 0x153   : > { %774 = vst [vmem:[%s1317_s12] sm:$0xff] %v974_v30 }
 0x154 PF: > { %s14_s21 = sadd.s32 1, %s1136_s21   ;;  %s1389_s15 = smov %s1116_s16 }
 0x155   : > { %p11_p0 = scmp.ge.s32.totalorder %s14_s21, 38   ;;  %s1390_s16 = smov %s1215_s28 }
 0x156   : > { %s1391_s17 = smov %s1128_s19  ;;  %s1392_s18 = smov %s1132_s20 }
 0x157   : > { %s1393_s19 = smov %s1396_s22  ;;  %s1394_s20 = smov %s1400_s23 }
 0x158   :  { %13 = sbr.rel (!%p11_p0) target bundleno = 4 (0x4), region = 126 }

// kernel: resnet34_forward.69
= control target key start
LH: loop header
LB: loop body
LE: loop exit
PB: predicated region body
PF: predicated region fallthrough
CT: control target
= control target key end

     0   :  { %s1071_s12 = smov 0   ;;  %s1073_s13 = smov 0   ;;  %s1285_s0 = inlined_call_operand.vmem [shape: bf16[8,4608], index: 0, kind: input, shape index: {}]   ;;  %s1286_s1 = inlined_call_operand.vmem [shape: bf16[4608,512], index: 1, kind: input, shape index: {}]   ;;  %s1287_s2 = inlined_call_operand.vmem [shape: f32[1,512], index: 2, kind: input, shape index: {}]   ;;  %s1288_s3 = inlined_call_operand.vmem [shape: bf16[8,512], index: 3, kind: output, shape index: {}]  }
   0x1   :  { %s1075_s14 = smov 0   ;;  %s1077_s15 = smov 0  }
   0x2   :  { %s1079_s16 = smov 0   ;;  %s1081_s17 = smov 0  }
   0x3   :  { %s1083_s18 = smov 0  }
   0x4 LB: > { %s25_s19 = sadd.s32 1, %s1040_s16  ;;  %s28_s20 = sadd.s32 1, %s1044_s17  ;;  %s1048_s18 = sphi %s1083_s18, %s13_s18   ;;  %s1044_s17 = sphi %s1081_s17, %s1294_s17   ;;  %s1040_s16 = sphi %s1079_s16, %s1293_s16   ;;  %s1036_s15 = sphi %s1077_s15, %s1292_s15   ;;  %s1032_s14 = sphi %s1075_s14, %s1291_s14   ;;  %s1028_s13 = sphi %s1073_s13, %s1290_s13   ;;  %s1024_s12 = sphi %s1071_s12, %s1289_s12  }
   0x5   : > { %p26_p0 = scmp.ge.s32.totalorder %s25_s19, 18  ;;  %p76_p1 = scmp.ne.s32.totalorder %s1028_s13, %s1024_s12 }
   0x6   : > { %p77_p2 = scmp.eq.s32.totalorder %s1048_s18, 0  ;;  %s69_s24 = sadd.s32 1, %s1028_s13 }
   0x7   : > { %s1296_s19 = smov (%p26_p0, %s25_s19), 0  ;;  %s1298_s20 = smov (!%p26_p0, %s28_s20), %s1044_s17 }
   0x8   : > { %p78_p3 = por %p77_p2, %p76_p1  ;;  %p30_p4 = scmp.ge.s32.totalorder %s1298_s20, 2 }
   0x9   : > { %s64_s21 = ssub.s32 %s1040_s16, %s1296_s19  ;;  %p833_p6 = scmp.ge.s32.totalorder %s1048_s18, 36 }
   0xa   : > { %s1300_s20 = smov (%p30_p4, %s1298_s20), 0 }
   0xb   : > { %s65_s22 = ssub.s32 %s1044_s17, %s1300_s20  ;;  %156 = sbr.rel (%p833_p6) target bundleno = 39 (0x27), region = 16 }
   0xc   : > { %s66_s23 = sor.u32 %s65_s22, %s64_s21 }
   0xd   : > { %p67_p5 = scmp.eq.s32.totalorder %s66_s23, 0 }
   0xf   : > { %s1122_s25 = scalar_select %p67_p5, %s1028_s13, %s69_s24  }
  0x10   : > { %172 = sbr.rel (!%p78_p3) target bundleno = 39 (0x27), region = 24  ;;  %s174_s26 = sand.u32 (%p78_p3), 1, %s1028_s13  }
  0x11   : > { %s836_s27 = sshll.u32 (%p78_p3), %s1044_s17, 1  ;;  %s834_s28 = sshll.u32 (%p78_p3), %s174_s26, 8 }
  0x12   : > { %s885_s29 = sshll.u32 (%p78_p3), %s1040_s16, 7  ;;  %s1136_s8 = scalar_lea.vmem (%p78_p3), [#allocation3], %s834_s28 }
  0x13   : > { %s180_s30 = sadd.s32 (%p78_p3), %s885_s29, %s836_s27 }
  0x14   : > { %s838_s4 = sshll.u32 (%p78_p3), %s180_s30, 2 }
  0x15   : > { %s1131_s7 = scalar_lea.vmem %s1286_s1, %s838_s4 }
  0x16   : > { %v273_v0 = vld [vmem:[%s1131_s7] sm:$0xff]  ;;  %v275_v1 = vld [vmem:[%s1131_s7 + $0x10] sm:$0xff] }
  0x17   : > { %v277_v2 = vld [vmem:[%s1131_s7 + $0x20] sm:$0xff]  ;;  %274 = vst [vmem:[%s1136_s8] sm:$0xff] %v273_v0  ;;  %276 = vst [vmem:[%s1136_s8 + $0x8] sm:$0xff] %v275_v1  ;;  %v279_v3 = vld [vmem:[%s1131_s7 + $0x30] sm:$0xff] }
  0x18   : > { %278 = vst [vmem:[%s1136_s8 + $0x10] sm:$0xff] %v277_v2  ;;  %v281_v4 = vld [vmem:[%s1131_s7 + $0x40] sm:$0xff]  ;;  %v283_v5 = vld [vmem:[%s1131_s7 + $0x50] sm:$0xff]  ;;  %280 = vst [vmem:[%s1136_s8 + $0x18] sm:$0xff] %v279_v3 }
  0x19   : > { %282 = vst [vmem:[%s1136_s8 + $0x20] sm:$0xff] %v281_v4  ;;  %284 = vst [vmem:[%s1136_s8 + $0x28] sm:$0xff] %v283_v5  ;;  %v285_v6 = vld [vmem:[%s1131_s7 + $0x60] sm:$0xff]  ;;  %v287_v7 = vld [vmem:[%s1131_s7 + $0x70] sm:$0xff] }
  0x1a   : > { %v289_v8 = vld [vmem:[%s1131_s7 + $0x80] sm:$0xff]  ;;  %286 = vst [vmem:[%s1136_s8 + $0x30] sm:$0xff] %v285_v6  ;;  %288 = vst [vmem:[%s1136_s8 + $0x38] sm:$0xff] %v287_v7  ;;  %v291_v9 = vld [vmem:[%s1131_s7 + $0x90] sm:$0xff] }
  0x1b   : > { %290 = vst [vmem:[%s1136_s8 + $0x40] sm:$0xff] %v289_v8  ;;  %v293_v10 = vld [vmem:[%s1131_s7 + $0xa0] sm:$0xff]  ;;  %v295_v11 = vld [vmem:[%s1131_s7 + $0xb0] sm:$0xff]  ;;  %292 = vst [vmem:[%s1136_s8 + $0x48] sm:$0xff] %v291_v9 }
  0x1c   : > { %294 = vst [vmem:[%s1136_s8 + $0x50] sm:$0xff] %v293_v10  ;;  %296 = vst [vmem:[%s1136_s8 + $0x58] sm:$0xff] %v295_v11  ;;  %v297_v12 = vld [vmem:[%s1131_s7 + $0xc0] sm:$0xff]  ;;  %v299_v13 = vld [vmem:[%s1131_s7 + $0xd0] sm:$0xff] }
  0x1d   : > { %v301_v14 = vld [vmem:[%s1131_s7 + $0xe0] sm:$0xff]  ;;  %298 = vst [vmem:[%s1136_s8 + $0x60] sm:$0xff] %v297_v12  ;;  %300 = vst [vmem:[%s1136_s8 + $0x68] sm:$0xff] %v299_v13  ;;  %v303_v15 = vld [vmem:[%s1131_s7 + $0xf0] sm:$0xff] }
  0x1e   : > { %302 = vst [vmem:[%s1136_s8 + $0x70] sm:$0xff] %v301_v14  ;;  %v305_v16 = vld [vmem:[%s1131_s7 + $0x100] sm:$0xff]  ;;  %v307_v17 = vld [vmem:[%s1131_s7 + $0x110] sm:$0xff]  ;;  %304 = vst [vmem:[%s1136_s8 + $0x78] sm:$0xff] %v303_v15 }
  0x1f   : > { %306 = vst [vmem:[%s1136_s8 + $0x80] sm:$0xff] %v305_v16  ;;  %308 = vst [vmem:[%s1136_s8 + $0x88] sm:$0xff] %v307_v17  ;;  %v309_v18 = vld [vmem:[%s1131_s7 + $0x120] sm:$0xff]  ;;  %v311_v19 = vld [vmem:[%s1131_s7 + $0x130] sm:$0xff] }
  0x20   : > { %v313_v20 = vld [vmem:[%s1131_s7 + $0x140] sm:$0xff]  ;;  %310 = vst [vmem:[%s1136_s8 + $0x90] sm:$0xff] %v309_v18  ;;  %312 = vst [vmem:[%s1136_s8 + $0x98] sm:$0xff] %v311_v19  ;;  %v315_v21 = vld [vmem:[%s1131_s7 + $0x150] sm:$0xff] }
  0x21   : > { %314 = vst [vmem:[%s1136_s8 + $0xa0] sm:$0xff] %v313_v20  ;;  %v317_v22 = vld [vmem:[%s1131_s7 + $0x160] sm:$0xff]  ;;  %v319_v23 = vld [vmem:[%s1131_s7 + $0x170] sm:$0xff]  ;;  %316 = vst [vmem:[%s1136_s8 + $0xa8] sm:$0xff] %v315_v21 }
  0x22   : > { %318 = vst [vmem:[%s1136_s8 + $0xb0] sm:$0xff] %v317_v22  ;;  %320 = vst [vmem:[%s1136_s8 + $0xb8] sm:$0xff] %v319_v23  ;;  %v321_v24 = vld [vmem:[%s1131_s7 + $0x180] sm:$0xff]  ;;  %v323_v25 = vld [vmem:[%s1131_s7 + $0x190] sm:$0xff] }
  0x23   : > { %v325_v26 = vld [vmem:[%s1131_s7 + $0x1a0] sm:$0xff]  ;;  %322 = vst [vmem:[%s1136_s8 + $0xc0] sm:$0xff] %v321_v24  ;;  %324 = vst [vmem:[%s1136_s8 + $0xc8] sm:$0xff] %v323_v25  ;;  %v327_v27 = vld [vmem:[%s1131_s7 + $0x1b0] sm:$0xff] }
  0x24   : > { %326 = vst [vmem:[%s1136_s8 + $0xd0] sm:$0xff] %v325_v26  ;;  %v329_v28 = vld [vmem:[%s1131_s7 + $0x1c0] sm:$0xff]  ;;  %v331_v29 = vld [vmem:[%s1131_s7 + $0x1d0] sm:$0xff]  ;;  %328 = vst [vmem:[%s1136_s8 + $0xd8] sm:$0xff] %v327_v27 }
  0x25   : > { %330 = vst [vmem:[%s1136_s8 + $0xe0] sm:$0xff] %v329_v28  ;;  %332 = vst [vmem:[%s1136_s8 + $0xe8] sm:$0xff] %v331_v29  ;;  %v333_v30 = vld [vmem:[%s1131_s7 + $0x1e0] sm:$0xff]  ;;  %v335_v31 = vld [vmem:[%s1131_s7 + $0x1f0] sm:$0xff] }
  0x26   : > { %334 = vst [vmem:[%s1136_s8 + $0xf0] sm:$0xff] %v333_v30  ;;  %336 = vst [vmem:[%s1136_s8 + $0xf8] sm:$0xff] %v335_v31 }
  0x27 PF: > { %p839_p7 = scmp.ge.s32.totalorder %s1048_s18, 1  ;;  %p349_p8 = scmp.lt.s32.totalorder %s1048_s18, 37 }
  0x29   : > { %p350_p9 = pnand %p839_p7, %p349_p8 }
  0x2a   : > { %s356_s9 = sand.u32 (!%p350_p9), 1, %s1024_s12   ;;  %s841_s10 = sshll.u32 (!%p350_p9), %s1032_s14, 1 }
  0x2b   : > { %353 = sbr.rel (%p350_p9) target bundleno = 337 (0x151), region = 66  ;;  %s840_s11 = sshll.u32 (!%p350_p9), %s356_s9, 8 }
  0x2c   : > { %p399_p10 = scmp.lt.s32.totalorder (!%p350_p9), %s841_s10, 35  ;;  %s843_s21 = sshll.u32 (!%p350_p9), %s1036_s15, 1 }
  0x2d   : > { %p409_p11 = scmp.lt.s32.totalorder (!%p350_p9), %s843_s21, 3  ;;  %s1221_s5 = scalar_lea.vmem (!%p350_p9), [#allocation3], %s840_s11 }
  0x2e   : > { %p846_p12 = scmp.ne.s32.totalorder (!%p350_p9), %s1032_s14, 0 }
  0x30   : > { %s1302_s10 = smov (!%p399_p10, %s841_s10), 35  ;;  %s1304_s21 = smov (!%p409_p11, %s843_s21), 3 }
  0x31   : > { %s842_s22 = sshll.u32 %s1302_s10, 2  ;;  %s411_s12 = scalar_lea.vmem %s1287_s2, %s1304_s21 }
  0x32   : > { %s1207_s26 = scalar_lea.vmem %s1285_s0, %s842_s22  ;;  %s845_s29 = sshll.u32 %s1304_s21, 2 }
  0x33   : > { %s1219_s15 = scalar_lea.vmem %s1288_s3, %s845_s29  ;;  %426 = sbr.rel (%p846_p12) target bundleno = 58 (0x3a), region = 74 }
  0x38   : > { %v1050_v32 = vmov 0.0  }
  0x39   : > { %427 = vst [vmem:[#allocation2] sm:$0xff] %v1050_v32  ;;  %428 = vst [vmem:[#allocation2 + $0x8] sm:$0xff] %v1050_v32 }
  0x3a PF: > { %v944_v33 = vld [vmem:[%s1221_s5 + $0x74] ss:$8 sps:$4 sm:$0xff]   ;;  %v946_v34 = vld [vmem:[%s1221_s5 + $0x70] ss:$8 sps:$4 sm:$0xff]   ;;  %v947_v35 = vld [vmem:[%s1221_s5 + $0x64] ss:$8 sps:$4 sm:$0xff]  }
  0x3b   : > { %631 = vmatprep.subr.bf16.mxu0 %v944_v33  ;;  %v949_v36 = vld [vmem:[%s1221_s5 + $0x60] ss:$8 sps:$4 sm:$0xff]   ;;  %v950_v37 = vld [vmem:[%s1221_s5 + $0x54] ss:$8 sps:$4 sm:$0xff]   ;;  %v952_v38 = vld [vmem:[%s1221_s5 + $0x50] ss:$8 sps:$4 sm:$0xff]  }
  0x3c   : > { %632 = vmatpush1.bf16.msra.mxu0 %v946_v34  ;;  %v953_v39 = vld [vmem:[%s1221_s5 + $0x44] ss:$8 sps:$4 sm:$0xff]   ;;  %v955_v40 = vld [vmem:[%s1221_s5 + $0x40] ss:$8 sps:$4 sm:$0xff]   ;;  %v956_v41 = vld [vmem:[%s1221_s5 + $0x34] ss:$8 sps:$4 sm:$0xff]  }
  0x3d   : > { %633 = vmatprep.subr.bf16.mxu0 %v947_v35  ;;  %v958_v42 = vld [vmem:[%s1221_s5 + $0x30] ss:$8 sps:$4 sm:$0xff]   ;;  %v959_v43 = vld [vmem:[%s1221_s5 + $0x24] ss:$8 sps:$4 sm:$0xff]   ;;  %v961_v44 = vld [vmem:[%s1221_s5 + $0x20] ss:$8 sps:$4 sm:$0xff]  }
  0x3e   : > { %v962_v45 = vld [vmem:[%s1221_s5 + $0x14] ss:$8 sps:$4 sm:$0xff]   ;;  %v964_v48 = vld [vmem:[%s1221_s5 + $0x10] ss:$8 sps:$4 sm:$0xff]   ;;  %v965_v49 = vld [vmem:[%s1221_s5 + $0x4] ss:$8 sps:$4 sm:$0xff]  }
  0x3f   : > { %v431_v46 = vld [vmem:[%s1207_s26] sm:$0xff]  ;;  %v967_v50 = vld [vmem:[%s1221_s5] ss:$8 sps:$4 sm:$0xff]   ;;  %v971_v53 = vld [vmem:[%s1221_s5 + $0xe4] ss:$8 sps:$4 sm:$0xff]   ;;  %p881_p13 = scmp.ne.s32.totalorder %s1032_s14, 17 }
  0x40   : > { %634 = vmatpush1.bf16.msra.mxu0 %v949_v36  ;;  %v848_v47 = vcombine.high %v431_v46, %v431_v46  ;;  %v968_v51 = vld [vmem:[%s1221_s5 + $0xf4] ss:$8 sps:$4 sm:$0xff]   ;;  %v970_v52 = vld [vmem:[%s1221_s5 + $0xf0] ss:$8 sps:$4 sm:$0xff]   ;;  %v973_v54 = vld [vmem:[%s1221_s5 + $0xe0] ss:$8 sps:$4 sm:$0xff]   ;;  %v847_v3 = vcombine.low %v431_v46, %v431_v46 }
  0x41   : > { %635 = vmatprep.subr.bf16.mxu0 %v950_v37  ;;  %v974_v55 = vld [vmem:[%s1221_s5 + $0xd4] ss:$8 sps:$4 sm:$0xff]   ;;  %v976_v56 = vld [vmem:[%s1221_s5 + $0xd0] ss:$8 sps:$4 sm:$0xff]   ;;  %v977_v57 = vld [vmem:[%s1221_s5 + $0xc4] ss:$8 sps:$4 sm:$0xff]  }
  0x42   : > { %663 = vmatprep.mubr.bf16.mxu0 %v848_v47  ;;  %v979_v58 = vld [vmem:[%s1221_s5 + $0xc0] ss:$8 sps:$4 sm:$0xff]   ;;  %v980_v59 = vld [vmem:[%s1221_s5 + $0xb4] ss:$8 sps:$4 sm:$0xff]   ;;  %v982_v60 = vld [vmem:[%s1221_s5 + $0xb0] ss:$8 sps:$4 sm:$0xff]  }
  0x43   : > { %v983_v61 = vld [vmem:[%s1221_s5 + $0xa4] ss:$8 sps:$4 sm:$0xff]   ;;  %v985_v62 = vld [vmem:[%s1221_s5 + $0xa0] ss:$8 sps:$4 sm:$0xff]   ;;  %v986_v63 = vld [vmem:[%s1221_s5 + $0x94] ss:$8 sps:$4 sm:$0xff]  }
  0x44   : > { %636 = vmatpush1.bf16.msra.mxu0 %v952_v38  ;;  %v988_v0 = vld [vmem:[%s1221_s5 + $0x90] ss:$8 sps:$4 sm:$0xff]   ;;  %v989_v1 = vld [vmem:[%s1221_s5 + $0x84] ss:$8 sps:$4 sm:$0xff]   ;;  %v991_v2 = vld [vmem:[%s1221_s5 + $0x80] ss:$8 sps:$4 sm:$0xff]  }
  0x45   : > { %637 = vmatprep.subr.bf16.mxu0 %v953_v39  ;;  %v429_v4 = vld [vmem:[#allocation2] sm:$0xff]  ;;  %v430_v6 = vld [vmem:[#allocation2 + $0x8] sm:$0xff] }
  0x48   : > { %638 = vmatpush1.bf16.msra.mxu0 %v955_v40 }
  0x49   : > { %639 = vmatprep.subr.bf16.mxu0 %v956_v41 }
  0x4c   : > { %640 = vmatpush1.bf16.msra.mxu0 %v958_v42 }
  0x4d   : > { %641 = vmatprep.subr.bf16.mxu0 %v959_v43 }
  0x50   : > { %642 = vmatpush1.bf16.msra.mxu0 %v961_v44 }
  0x51   : > { %643 = vmatprep.subr.bf16.mxu0 %v962_v45 }
  0x54   : > { %644 = vmatpush1.bf16.msra.mxu0 %v964_v48 }
  0x55   : > { %645 = vmatprep.subr.bf16.mxu0 %v965_v49 }
  0x58   : > { %646 = vmatpush1.bf16.msra.mxu0 %v967_v50 }
  0x59   : > { %647 = vmatprep.subr.bf16.mxu0 %v968_v51 }
  0x5c   : > { %648 = vmatpush2.bf16.msra.mxu0 %v970_v52 }
  0x5d   : > { %649 = vmatprep.subr.bf16.mxu0 %v971_v53 }
  0x60   : > { %650 = vmatpush2.bf16.msra.mxu0 %v973_v54 }
  0x61   : > { %651 = vmatprep.subr.bf16.mxu0 %v974_v55 }
  0x64   : > { %652 = vmatpush2.bf16.msra.mxu0 %v976_v56 }
  0x65   : > { %653 = vmatprep.subr.bf16.mxu0 %v977_v57 }
  0x68   : > { %654 = vmatpush2.bf16.msra.mxu0 %v979_v58 }
  0x69   : > { %655 = vmatprep.subr.bf16.mxu0 %v980_v59 }
  0x6c   : > { %656 = vmatpush2.bf16.msra.mxu0 %v982_v60 }
  0x6d   : > { %657 = vmatprep.subr.bf16.mxu0 %v983_v61 }
  0x70   : > { %658 = vmatpush2.bf16.msra.mxu0 %v985_v62 }
  0x71   : > { %659 = vmatprep.subr.bf16.mxu0 %v986_v63 }
  0x74   : > { %660 = vmatpush2.bf16.msra.mxu0 %v988_v0 }
  0x75   : > { %661 = vmatprep.subr.bf16.mxu0 %v989_v1 }
  0x78   : > { %662 = vmatpush2.bf16.msra.mxu0 %v991_v2 }
  0x7b   : > { %664 = vmatmul.mubr.bf16.vlgmr.msra.gmra.mxu0 %v847_v3 }
 0x13b   : > { %v665_v5 = vpop.f32.mrf.mxu0 }
 0x13c   : > { %v672_v7 = vadd.f32 %v665_v5, %v429_v4 }
 0x13d   : > { %v667_v8 = vpop.f32.mrf.mxu0  ;;  %679 = sbr.rel (%p881_p13) target bundleno = 337 (0x151), region = 78 }
 0x13e   : > { %674 = vst [vmem:[#allocation2] sm:$0xff] %v672_v7  ;;  %v673_v9 = vadd.f32 %v667_v8, %v430_v6 }
 0x13f   : > { %v669_v10 = vpop.f32.mrf.mxu0 }
 0x140   : > { %675 = vst [vmem:[#allocation2 + $0x8] sm:$0xff] %v673_v9 }
 0x141   : > { %v670_v11 = vpop.f32.mrf.mxu0 }
 0x142   : > { %v684_v12 = vlaneseq  ;;  %v682_v14 = vld [vmem:[%s411_s12] sm:$0x3] }
 0x144   : > { %v685_v13 = vshrl.u32 %v684_v12, 7 }
 0x145   : > { %v680_v17 = vld [vmem:[#allocation2] sm:$0xff] }
 0x146   : > { %v686_v15 = vsub.s32 0, %v685_v13  ;;  %v690_v16 = vsub.s32 1, %v685_v13 }
 0x147   : > { %v681_v18 = vld [vmem:[#allocation2 + $0x8] sm:$0xff] }
 0x148   : > { %v687_v19 = vrot.slane %v682_v14, %v686_v15  ;;  %v691_v20 = vrot.slane %v682_v14, %v690_v16 }
 0x14a   : > { %v694_v21 = vadd.f32 %v687_v19, %v680_v17  ;;  %v695_v22 = vadd.f32 %v691_v20, %v681_v18 }
 0x14c   : > { %v696_v23 = vmax.f32 %v694_v21, 0.0  ;;  %v697_v24 = vmax.f32 %v695_v22, 0.0 }
 0x14e   : > { %v886_v25 = vpack.c.bf16 %v697_v24, %v696_v23 }
 0x150   : > { %706 = vst [vmem:[%s1219_s15] sm:$0xff] %v886_v25 }
 0x151 PF: > { %s13_s18 = sadd.s32 1, %s1048_s18   ;;  %s1289_s12 = smov %s1028_s13 }
 0x152   : > { %p10_p0 = scmp.ge.s32.totalorder %s13_s18, 38   ;;  %s1290_s13 = smov %s1122_s25 }
 0x153   : > { %s1291_s14 = smov %s1040_s16  ;;  %s1292_s15 = smov %s1044_s17 }
 0x154   : > { %s1293_s16 = smov %s1296_s19  ;;  %s1294_s17 = smov %s1300_s20 }
 0x155   :  { %12 = sbr.rel (!%p10_p0) target bundleno = 4 (0x4), region = 119 }

// kernel: resnet34_forward.73
= control target key start
LH: loop header
LB: loop body
LE: loop exit
PB: predicated region body
PF: predicated region fallthrough
CT: control target
= control target key end

     0   :  { %s708_s12 = smov 0   ;;  %s710_s13 = smov 0   ;;  %s771_s0 = inlined_call_operand.vmem [shape: bf16[8,512], index: 0, kind: input, shape index: {}]   ;;  %s772_s1 = inlined_call_operand.vmem [shape: bf16[512,10], index: 1, kind: input, shape index: {}]   ;;  %s773_s2 = inlined_call_operand.vmem [shape: f32[1,10], index: 2, kind: input, shape index: {}]   ;;  %s774_s3 = inlined_call_operand.vmem [shape: f32[8,10], index: 3, kind: output, shape index: {}]  }
   0x1   :  { %s712_s14 = smov 0  }
   0x2 LB: > { %s25_s15 = sadd.s32 1, %s681_s13  ;;  %p569_p0 = scmp.ge.s32.totalorder %s685_s14, 1  ;;  %s685_s14 = sphi %s712_s14, %s13_s14   ;;  %s681_s13 = sphi %s710_s13, %s776_s13   ;;  %s677_s12 = sphi %s708_s12, %s775_s12  }
   0x3   : > { %p26_p1 = scmp.ge.s32.totalorder %s25_s15, 2  ;;  %p189_p2 = scmp.lt.s32.totalorder %s685_s14, 3 }
   0x5   : > { %s778_s15 = smov (%p26_p1, %s25_s15), 0  ;;  %p190_p3 = pnand %p569_p0, %p189_p2 }
   0x6   : > { %s570_s16 = sshll.u32 (!%p190_p3), %s677_s12, 1  ;;  %s572_s17 = sshll.u32 (!%p190_p3), %s677_s12, 5 }
   0x7   : > { %193 = sbr.rel (%p190_p3) target bundleno = 265 (0x109), region = 32  ;;  %p233_p4 = scmp.lt.s32.totalorder (!%p190_p3), %s570_s16, 3 }
   0x8   : > { %p241_p5 = scmp.lt.s32.totalorder (!%p190_p3), %s572_s17, 63  ;;  %p574_p6 = scmp.ne.s32.totalorder (!%p190_p3), %s677_s12, 0 }
   0xc   : > { %s780_s16 = smov (!%p233_p4, %s570_s16), 3  ;;  %s782_s17 = smov (!%p241_p5, %s572_s17), 63 }
   0xd   : > { %s571_s18 = sshll.u32 %s780_s16, 2  ;;  %s573_s22 = sshll.u32 %s782_s17, 2 }
   0xe   : > { %s238_s21 = scalar_lea.vmem %s771_s0, %s571_s18  ;;  %s736_s25 = scalar_lea.vmem %s772_s1, %s573_s22 }
   0xf   : > { %263 = sbr.rel (%p574_p6) target bundleno = 22 (0x16), region = 36 }
  0x14   : > { %vm264_vm0 = vcmask 80896   ;;  %v687_v0 = vmov 0.0  }
  0x15   : > { %265 = vst.msk [vmem:[#allocation2] sm:$0xff] %vm264_vm0, %v687_v0 }
  0x16 PF: > { %v645_v1 = vld [vmem:[%s736_s25 + $0x78] sm:$0xff]   ;;  %v647_v3 = vld [vmem:[%s736_s25 + $0x70] sm:$0xff]   ;;  %v649_v5 = vld [vmem:[%s736_s25 + $0x68] sm:$0xff]   ;;  %vm444_vm1 = vcmask 80896   ;;  %p593_p7 = scmp.ne.s32.totalorder %s677_s12, 1 }
  0x17   : > { %v646_v2 = vld [vmem:[%s736_s25 + $0x38] sm:$0xff]   ;;  %598 = vmatprep.subr.bf16.mxu0 %v645_v1  ;;  %v648_v4 = vld [vmem:[%s736_s25 + $0x30] sm:$0xff]   ;;  %v650_v6 = vld [vmem:[%s736_s25 + $0x28] sm:$0xff]  }
  0x18   : > { %599 = vmatpush3.bf16.msra.mxu0 %v646_v2  ;;  %v651_v7 = vld [vmem:[%s736_s25 + $0x60] sm:$0xff]   ;;  %v653_v9 = vld [vmem:[%s736_s25 + $0x58] sm:$0xff]   ;;  %v655_v11 = vld [vmem:[%s736_s25 + $0x50] sm:$0xff]  }
  0x19   : > { %600 = vmatprep.subr.bf16.mxu0 %v647_v3  ;;  %v652_v8 = vld [vmem:[%s736_s25 + $0x20] sm:$0xff]   ;;  %v654_v10 = vld [vmem:[%s736_s25 + $0x18] sm:$0xff]   ;;  %v656_v14 = vld [vmem:[%s736_s25 + $0x10] sm:$0xff]  }
  0x1a   : > { %v267_v12 = vld [vmem:[%s238_s21] sm:$0xff]  ;;  %v657_v15 = vld [vmem:[%s736_s25 + $0x48] sm:$0xff]  }
  0x1b   : > { %v576_v13 = vcombine.high %v267_v12, %v267_v12  ;;  %v658_v16 = vld [vmem:[%s736_s25 + $0x8] sm:$0xff]   ;;  %v659_v17 = vld [vmem:[%s736_s25 + $0x40] sm:$0xff]   ;;  %v575_v19 = vcombine.low %v267_v12, %v267_v12 }
  0x1c   : > { %601 = vmatpush3.bf16.msra.mxu0 %v648_v4  ;;  %v660_v18 = vld [vmem:[%s736_s25] sm:$0xff]  }
  0x1d   : > { %602 = vmatprep.subr.bf16.mxu0 %v649_v5  ;;  %435 = vmatprep.mubr.bf16.mxu0 %v576_v13  ;;  %v266_v21 = vld [vmem:[#allocation2] sm:$0xff] }
  0x20   : > { %603 = vmatpush3.bf16.msra.mxu0 %v650_v6 }
  0x21   : > { %604 = vmatprep.subr.bf16.mxu0 %v651_v7 }
  0x24   : > { %605 = vmatpush3.bf16.msra.mxu0 %v652_v8 }
  0x25   : > { %606 = vmatprep.subr.bf16.mxu0 %v653_v9 }
  0x28   : > { %607 = vmatpush3.bf16.msra.mxu0 %v654_v10 }
  0x29   : > { %608 = vmatprep.subr.bf16.mxu0 %v655_v11 }
  0x2c   : > { %609 = vmatpush3.bf16.msra.mxu0 %v656_v14 }
  0x2d   : > { %610 = vmatprep.subr.bf16.mxu0 %v657_v15 }
  0x30   : > { %611 = vmatpush3.bf16.msra.mxu0 %v658_v16 }
  0x31   : > { %612 = vmatprep.subr.bf16.mxu0 %v659_v17 }
  0x34   : > { %613 = vmatpush3.bf16.msra.mxu0 %v660_v18 }
  0x37   : > { %436 = vmatmul.mubr.bf16.vlgmr.msra.gmra.mxu0 %v575_v19 }
  0xf7   : > { %v614_v20 = vpop.f32.mrf.mxu0 }
  0xf9   : > { %v615_v22 = vpop.f32.mrf.mxu0 }
  0xfa   : > { %v616_v23 = vadd.f32 %v615_v22, %v614_v20  ;;  %449 = sbr.rel (%p593_p7) target bundleno = 265 (0x109), region = 40 }
  0xfb   : > { %v617_v24 = vpop.f32.mrf.mxu0 }
  0xfc   : > { %v443_v25 = vadd.f32 %v616_v23, %v266_v21 }
  0xfd   : > { %v618_v26 = vpop.f32.mrf.mxu0 }
  0xfe   : > { %445 = vst.msk [vmem:[#allocation2] sm:$0xff] %vm444_vm1, %v443_v25 }
  0xff   : > { %v594_v28 = vld [vmem:[%s773_s2] ss:$0 sm:$0xff] }
 0x105   : > { %v450_v27 = vld [vmem:[#allocation2] sm:$0xff] }
 0x106   : > { %v458_v29 = vadd.f32 %v594_v28, %v450_v27 }
 0x108   : > { %459 = vst.msk [vmem:[%s774_s3] sm:$0xff] %vm444_vm1, %v458_v29 }
 0x109 PF: > { %s13_s14 = sadd.s32 1, %s685_s14   ;;  %s775_s12 = smov %s681_s13 }
 0x10a   : > { %p10_p8 = scmp.ge.s32.totalorder %s13_s14, 4   ;;  %s776_s13 = smov %s778_s15 }
 0x10c   :  { %12 = sbr.rel (!%p10_p8) target bundleno = 2 (0x2), region = 76 }

</bundles_post_ra>
